<compile_context>
chip_gen: v7x
topology: tpu7x:2x2x1
jax: 0.10.0
libtpu: 0.0.40
codegen_flags: <defaults>
</compile_context>

<pallas_src>
import functools

import jax
import jax.numpy as jnp
from jax import lax
from jax.experimental import pallas as pl
from jax.experimental.pallas import tpu as pltpu

BN_EPS = 1e-5
LANE = 128


def _round_up(n, m):
    return (n + m - 1) // m * m


# ---------------------------------------------------------------------------
# Fused kernel
# ---------------------------------------------------------------------------
def _make_postnet_kernel(*, t_tile, kernel_size, t_valid, n_blocks):
    K = kernel_size
    pad = (K - 1) // 2
    H = n_blocks * pad            # total halo consumed by the stacked convs
    rows0 = t_tile + 2 * H        # rows of the per-tile input window

    def kernel(x_ref, *prm_and_out):
        # x_ref : (1, 1, rows0, C0p) bf16  -- per-tile halo window of the input
        # prm   : (w, shift) per block; w is (K*Cin_p, Cout_p) bf16 with the
        #          BN scale folded in, shift is (1, Cout_p) f32
        # o_ref : (1, t_tile, CLp) f32
        o_ref = prm_and_out[-1]
        prm = prm_and_out[:-1]

        j = pl.program_id(1)

        # Hoisted validity mask: global time of window row r is j*t_tile-H+r.
        # Built once per tile; layers only slice it.  (For interior tiles it is
        # all-true and the select is cheap filler.)
        g = j * t_tile - H + lax.broadcasted_iota(jnp.int32, (rows0, 1), 0)
        valid = (g >= 0) & (g < t_valid)

        a = x_ref[0, 0]                       # (rows0, C0p) bf16
        rows = rows0
        for l in range(n_blocks):
            w_ref = prm[2 * l]
            shift = prm[2 * l + 1][...]       # (1, Cout_p) f32
            rows_out = rows - (K - 1)
            last = (l == n_blocks - 1)

            # im2col: fold the K taps into the contraction -> one deep MXU dot
            # (rows_out, K*Cin_p) @ (K*Cin_p, Cout_p), f32 accumulation.
            cat = jnp.concatenate(
                [a[k:k + rows_out, :] for k in range(K)], axis=1)
            y = jnp.dot(cat, w_ref[...],
                        preferred_element_type=jnp.float32) + shift

            if last:
                o_ref[0] = y.astype(o_ref.dtype)
            else:
                # Halo rows whose global time lies outside [0, t_valid) must
                # act as the NEXT layer's zero padding -> zero them so the
                # fused chain matches per-layer zero-padded convolutions.
                off = (l + 1) * pad
                y = jnp.tanh(y)
                y = jnp.where(valid[off:off + rows_out], y, 0.0)
                a = y.astype(jnp.bfloat16)    # bf16 operand for the next dot
            rows = rows_out

    return kernel


# ---------------------------------------------------------------------------
# Parameter preparation (do ONCE, outside the per-step jit)
# ---------------------------------------------------------------------------
def prepare_params(params, *, kernel_size=5, lane=LANE):
    """Fold conv bias + BatchNorm(running stats) into the weights/shift:
         scale = gamma / sqrt(var + eps)          (folded INTO the weights)
         shift = beta + scale * (bias - mean)     (kept as f32 add)
    Transpose weights to (K, Cin, Cout), zero-pad channel dims to the lane
    width, flatten the taps (im2col layout), and cast weights to bf16.
    """
    prep = []
    prev_coutp = None
    for p in params:
        cout, cin, K = p["weight"].shape
        assert K == kernel_size
        cinp = _round_up(cin, lane) if prev_coutp is None else prev_coutp
        coutp = _round_up(cout, lane)

        scale = p["gamma"] / jnp.sqrt(p["var"] + BN_EPS)           # (cout,)
        shift = p["beta"] + scale * (p["bias"] - p["mean"])        # (cout,)

        w = jnp.transpose(p["weight"], (2, 1, 0))                  # (K,Ci,Co)
        w = w * scale[None, None, :]                               # fold BN scale
        w = jnp.pad(w, ((0, 0), (0, cinp - cin), (0, coutp - cout)))
        w = w.reshape(K * cinp, coutp)                             # im2col layout

        prep.append(dict(
            w=w.astype(jnp.bfloat16),
            shift=jnp.pad(shift, (0, coutp - cout))[None, :].astype(jnp.float32),
        ))
        prev_coutp = coutp
    return prep


# ---------------------------------------------------------------------------
# Forward wrapper
# ---------------------------------------------------------------------------
def postnet_forward(x, prep, *, out_channels, kernel_size=5, t_tile=256):
    """x: (B, T, n_mel) f32 -> (B, T, n_mel) f32.  `prep` from prepare_params."""
    assert t_tile % 16 == 0
    B, T, c_mel = x.shape
    K = kernel_size
    nb = len(prep)
    H = nb * ((K - 1) // 2)

    c0p = prep[0]["w"].shape[0] // K        # layer-0 weight is (K*Cin_p, Cout_p)
    clp = prep[-1]["w"].shape[1]

    tt = t_tile
    t_pad = _round_up(max(T, tt), tt)
    nt = t_pad // tt
    rows0 = tt + 2 * H

    # Single host-side pad (halo + tail to a tile multiple + channels to the
    # lane width), cast the matmul operand to bf16, then pre-window into
    # overlapping halo tiles so the kernel's per-step VMEM for x is O(t_tile).
    x_p = jnp.pad(x, ((0, 0), (H, H + t_pad - T), (0, c0p - c_mel)))
    x_p = x_p.astype(jnp.bfloat16)
    x_w = jnp.stack([x_p[:, jt * tt: jt * tt + rows0, :] for jt in range(nt)],
                    axis=1)                                   # (B, nt, rows0, C0p)

    invariant = pl.Buffered(1)   # weights / shifts never change across the grid
    flat = []
    in_specs = [pl.BlockSpec((1, 1, rows0, c0p), lambda b, j: (b, j, 0, 0))]
    for p in prep:
        flat += [p["w"], p["shift"]]
        in_specs += [
            pl.BlockSpec(p["w"].shape, lambda b, j: (0, 0),
                         pipeline_mode=invariant),
            pl.BlockSpec(p["shift"].shape, lambda b, j: (0, 0),
                         pipeline_mode=invariant),
        ]

    kernel = _make_postnet_kernel(
        t_tile=tt, kernel_size=K, t_valid=T, n_blocks=nb)

    out = pl.pallas_call(
        kernel,
        out_shape=jax.ShapeDtypeStruct((B, t_pad, clp), jnp.float32),
        grid=(B, nt),            # keep B outermost: weight blocks never re-DMA'd
        in_specs=in_specs,
        out_specs=pl.BlockSpec((1, tt, clp), lambda b, j: (b, j, 0)),
        compiler_params=pltpu.CompilerParams(
            dimension_semantics=("parallel", "parallel"),
            vmem_limit_bytes=48 * 1024 * 1024),
    )(x_w, *flat)

    # Callers must keep this slice: padded tail rows / lanes are meaningless.
    return out[:, :T, :out_channels]


# ---------------------------------------------------------------------------
# Test scaffolding
# ---------------------------------------------------------------------------
def init_params(key, n_mel, embed_dim, kernel_size, n_blocks):
    params = []
    dims = [n_mel] + [embed_dim] * (n_blocks - 1) + [n_mel]
    for i in range(n_blocks):
        cin, cout = dims[i], dims[i + 1]
        key, k1, k2, k3, k4, k5, k6 = jax.random.split(key, 7)
        params.append(dict(
            weight=0.05 * jax.random.normal(k1, (cout, cin, kernel_size),
                                            jnp.float32),
            bias=0.05 * jax.random.normal(k2, (cout,), jnp.float32),
            gamma=1.0 + 0.1 * jax.random.normal(k3, (cout,), jnp.float32),
            beta=0.05 * jax.random.normal(k4, (cout,), jnp.float32),
            mean=0.05 * jax.random.normal(k5, (cout,), jnp.float32),
            var=jnp.abs(jax.random.normal(k6, (cout,), jnp.float32)) + 0.5,
        ))
    return params


def reference_forward(x, params, kernel_size=5):
    """Pure-JAX f32 reference mirroring the PyTorch module (eval mode)."""
    pad = (kernel_size - 1) // 2
    h = jnp.transpose(x, (0, 2, 1))                  # (B, C, T), NCW like torch
    n_blocks = len(params)
    for i, p in enumerate(params):
        h = lax.conv_general_dilated(
            h, p["weight"], window_strides=(1,), padding=[(pad, pad)],
            dimension_numbers=("NCH", "OIH", "NCH"))
        h = h + p["bias"][None, :, None]
        h = (p["gamma"][None, :, None]
             * (h - p["mean"][None, :, None])
             / jnp.sqrt(p["var"][None, :, None] + BN_EPS)
             + p["beta"][None, :, None])
        if i < n_blocks - 1:
            h = jnp.tanh(h)
    return jnp.transpose(h, (0, 2, 1))


if __name__ == "__main__":
    # Small shapes consistent with the module structure (n_mel=80, 5 blocks);
    # T not a multiple of the tile and embed not a multiple of 128 to exercise
    # the masking / channel-padding paths; t_tile=256 per the perf review.
    B, T = 2, 300
    N_MEL, EMBED, KSIZE, N_BLOCKS = 80, 96, 5, 5
    T_TILE = 256

    key = jax.random.PRNGKey(0)
    kx, kp = jax.random.split(key)
    x = jax.random.normal(kx, (B, T, N_MEL), jnp.float32)
    params = init_params(kp, N_MEL, EMBED, KSIZE, N_BLOCKS)

    # Hoisted parameter prep (fold BN into weights, transpose, pad, cast).
    prep = prepare_params(params, kernel_size=KSIZE)

    fwd = jax.jit(functools.partial(
        postnet_forward, out_channels=N_MEL, kernel_size=KSIZE, t_tile=T_TILE))
    out = fwd(x, prep)
    jax.block_until_ready(out)

    ref = reference_forward(x, params, kernel_size=KSIZE)
    assert out.shape == (B, T, N_MEL)
    # bf16 MXU operands (fp32 accumulation, BN scale folded into bf16 weights)
    # vs. the fp32 reference -> loose tolerance.
    err = float(jnp.max(jnp.abs(out - ref)))
    assert err < 1e-1, err

    print("KERNEL_OK")
</pallas_src>

<mosaic_0001>
module attributes {stable_mosaic.version = 11 : i64} {
  func.func @kernel(%arg0: i32, %arg1: i32, %arg2: memref<1x1x276x128xbf16, #tpu.memory_space<vmem>>, %arg3: memref<640x128xbf16, #tpu.memory_space<vmem>>, %arg4: memref<1x128xf32, #tpu.memory_space<vmem>>, %arg5: memref<640x128xbf16, #tpu.memory_space<vmem>>, %arg6: memref<1x128xf32, #tpu.memory_space<vmem>>, %arg7: memref<640x128xbf16, #tpu.memory_space<vmem>>, %arg8: memref<1x128xf32, #tpu.memory_space<vmem>>, %arg9: memref<640x128xbf16, #tpu.memory_space<vmem>>, %arg10: memref<1x128xf32, #tpu.memory_space<vmem>>, %arg11: memref<640x128xbf16, #tpu.memory_space<vmem>>, %arg12: memref<1x128xf32, #tpu.memory_space<vmem>>, %arg13: memref<1x256x128xf32, #tpu.memory_space<vmem>>) attributes {dimension_semantics = [#tpu.dimension_semantics<parallel>, #tpu.dimension_semantics<parallel>], iteration_bounds = array<i64: 2, 2>, scalar_prefetch = 0 : i64, scratch_operands = 0 : i64, tpu.core_type = #tpu.core_type<tc>, window_params = [{transform_indices = @transform_0, window_bounds = array<i64: 1, 1, 276, 128>}, {pipeline_mode = #tpu.pipeline_mode<synchronous>, transform_indices = @transform_1, window_bounds = array<i64: 640, 128>}, {pipeline_mode = #tpu.pipeline_mode<synchronous>, transform_indices = @transform_2, window_bounds = array<i64: 1, 128>}, {pipeline_mode = #tpu.pipeline_mode<synchronous>, transform_indices = @transform_3, window_bounds = array<i64: 640, 128>}, {pipeline_mode = #tpu.pipeline_mode<synchronous>, transform_indices = @transform_4, window_bounds = array<i64: 1, 128>}, {pipeline_mode = #tpu.pipeline_mode<synchronous>, transform_indices = @transform_5, window_bounds = array<i64: 640, 128>}, {pipeline_mode = #tpu.pipeline_mode<synchronous>, transform_indices = @transform_6, window_bounds = array<i64: 1, 128>}, {pipeline_mode = #tpu.pipeline_mode<synchronous>, transform_indices = @transform_7, window_bounds = array<i64: 640, 128>}, {pipeline_mode = #tpu.pipeline_mode<synchronous>, transform_indices = @transform_8, window_bounds = array<i64: 1, 128>}, {pipeline_mode = #tpu.pipeline_mode<synchronous>, transform_indices = @transform_9, window_bounds = array<i64: 640, 128>}, {pipeline_mode = #tpu.pipeline_mode<synchronous>, transform_indices = @transform_10, window_bounds = array<i64: 1, 128>}, {transform_indices = @transform_11, window_bounds = array<i64: 1, 256, 128>}]} {
    %c256_i32 = arith.constant 256 : i32
    %0 = arith.muli %arg1, %c256_i32 : i32
    %c10_i32 = arith.constant 10 : i32
    %1 = arith.subi %0, %c10_i32 : i32
    %2 = tpu.iota {dimensions = array<i32: 0>} : vector<276x1xi32>
    %3 = vector.broadcast %1 : i32 to vector<276x1xi32>
    %4 = arith.addi %3, %2 : vector<276x1xi32>
    %c0_i32 = arith.constant 0 : i32
    %5 = vector.broadcast %c0_i32 : i32 to vector<276x1xi32>
    %6 = arith.cmpi sge, %4, %5 : vector<276x1xi32>
    %c300_i32 = arith.constant 300 : i32
    %7 = vector.broadcast %c300_i32 : i32 to vector<276x1xi32>
    %8 = arith.cmpi slt, %4, %7 : vector<276x1xi32>
    %9 = arith.andi %6, %8 : vector<276x1xi1>
    %c0 = arith.constant 0 : index
    %c0_0 = arith.constant 0 : index
    %c0_1 = arith.constant 0 : index
    %c0_2 = arith.constant 0 : index
    %10 = vector.load %arg2[%c0, %c0_0, %c0_1, %c0_2] : memref<1x1x276x128xbf16, #tpu.memory_space<vmem>>, vector<1x1x276x128xbf16>
    %11 = vector.shape_cast %10 : vector<1x1x276x128xbf16> to vector<276x128xbf16>
    %c0_3 = arith.constant 0 : index
    %c0_4 = arith.constant 0 : index
    %12 = vector.load %arg4[%c0_3, %c0_4] : memref<1x128xf32, #tpu.memory_space<vmem>>, vector<1x128xf32>
    %13 = vector.extract_strided_slice %11 {offsets = [0, 0], sizes = [272, 128], strides = [1, 1]} : vector<276x128xbf16> to vector<272x128xbf16>
    %14 = vector.extract_strided_slice %11 {offsets = [1, 0], sizes = [272, 128], strides = [1, 1]} : vector<276x128xbf16> to vector<272x128xbf16>
    %15 = vector.extract_strided_slice %11 {offsets = [2, 0], sizes = [272, 128], strides = [1, 1]} : vector<276x128xbf16> to vector<272x128xbf16>
    %16 = vector.extract_strided_slice %11 {offsets = [3, 0], sizes = [272, 128], strides = [1, 1]} : vector<276x128xbf16> to vector<272x128xbf16>
    %17 = vector.extract_strided_slice %11 {offsets = [4, 0], sizes = [272, 128], strides = [1, 1]} : vector<276x128xbf16> to vector<272x128xbf16>
    %18 = tpu.concatenate %13, %14, %15, %16, %17 in 1 : vector<272x128xbf16>, vector<272x128xbf16>, vector<272x128xbf16>, vector<272x128xbf16>, vector<272x128xbf16> -> vector<272x640xbf16>
    %c0_5 = arith.constant 0 : index
    %c0_6 = arith.constant 0 : index
    %19 = vector.load %arg3[%c0_5, %c0_6] : memref<640x128xbf16, #tpu.memory_space<vmem>>, vector<640x128xbf16>
    %cst = arith.constant dense<0.000000e+00> : vector<272x128xf32>
    %20 = tpu.matmul %18, %19, %cst {dimension_numbers = #tpu.dot_dimension_numbers<[1], [0], [0], [1], [0, 0, 1, 1], [], []>} : vector<272x640xbf16>, vector<640x128xbf16>, vector<272x128xf32> -> vector<272x128xf32>
    %21 = vector.broadcast %12 : vector<1x128xf32> to vector<272x128xf32>
    %22 = arith.addf %20, %21 : vector<272x128xf32>
    %23 = math.tanh %22 : vector<272x128xf32>
    %24 = vector.extract_strided_slice %9 {offsets = [2, 0], sizes = [272, 1], strides = [1, 1]} : vector<276x1xi1> to vector<272x1xi1>
    %cst_7 = arith.constant 0.000000e+00 : f32
    %25 = vector.shape_cast %24 : vector<272x1xi1> to vector<272x1xi1>
    %26 = vector.broadcast %25 : vector<272x1xi1> to vector<272x128xi1>
    %27 = vector.broadcast %cst_7 : f32 to vector<272x128xf32>
    %28 = arith.select %26, %23, %27 : vector<272x128xi1>, vector<272x128xf32>
    %29 = arith.truncf %28 : vector<272x128xf32> to vector<272x128xbf16>
    %c0_8 = arith.constant 0 : index
    %c0_9 = arith.constant 0 : index
    %30 = vector.load %arg6[%c0_8, %c0_9] : memref<1x128xf32, #tpu.memory_space<vmem>>, vector<1x128xf32>
    %31 = vector.extract_strided_slice %29 {offsets = [0, 0], sizes = [268, 128], strides = [1, 1]} : vector<272x128xbf16> to vector<268x128xbf16>
    %32 = vector.extract_strided_slice %29 {offsets = [1, 0], sizes = [268, 128], strides = [1, 1]} : vector<272x128xbf16> to vector<268x128xbf16>
    %33 = vector.extract_strided_slice %29 {offsets = [2, 0], sizes = [268, 128], strides = [1, 1]} : vector<272x128xbf16> to vector<268x128xbf16>
    %34 = vector.extract_strided_slice %29 {offsets = [3, 0], sizes = [268, 128], strides = [1, 1]} : vector<272x128xbf16> to vector<268x128xbf16>
    %35 = vector.extract_strided_slice %29 {offsets = [4, 0], sizes = [268, 128], strides = [1, 1]} : vector<272x128xbf16> to vector<268x128xbf16>
    %36 = tpu.concatenate %31, %32, %33, %34, %35 in 1 : vector<268x128xbf16>, vector<268x128xbf16>, vector<268x128xbf16>, vector<268x128xbf16>, vector<268x128xbf16> -> vector<268x640xbf16>
    %c0_10 = arith.constant 0 : index
    %c0_11 = arith.constant 0 : index
    %37 = vector.load %arg5[%c0_10, %c0_11] : memref<640x128xbf16, #tpu.memory_space<vmem>>, vector<640x128xbf16>
    %cst_12 = arith.constant dense<0.000000e+00> : vector<268x128xf32>
    %38 = tpu.matmul %36, %37, %cst_12 {dimension_numbers = #tpu.dot_dimension_numbers<[1], [0], [0], [1], [0, 0, 1, 1], [], []>} : vector<268x640xbf16>, vector<640x128xbf16>, vector<268x128xf32> -> vector<268x128xf32>
    %39 = vector.broadcast %30 : vector<1x128xf32> to vector<268x128xf32>
    %40 = arith.addf %38, %39 : vector<268x128xf32>
    %41 = math.tanh %40 : vector<268x128xf32>
    %42 = vector.extract_strided_slice %9 {offsets = [4, 0], sizes = [268, 1], strides = [1, 1]} : vector<276x1xi1> to vector<268x1xi1>
    %cst_13 = arith.constant 0.000000e+00 : f32
    %43 = vector.shape_cast %42 : vector<268x1xi1> to vector<268x1xi1>
    %44 = vector.broadcast %43 : vector<268x1xi1> to vector<268x128xi1>
    %45 = vector.broadcast %cst_13 : f32 to vector<268x128xf32>
    %46 = arith.select %44, %41, %45 : vector<268x128xi1>, vector<268x128xf32>
    %47 = arith.truncf %46 : vector<268x128xf32> to vector<268x128xbf16>
    %c0_14 = arith.constant 0 : index
    %c0_15 = arith.constant 0 : index
    %48 = vector.load %arg8[%c0_14, %c0_15] : memref<1x128xf32, #tpu.memory_space<vmem>>, vector<1x128xf32>
    %49 = vector.extract_strided_slice %47 {offsets = [0, 0], sizes = [264, 128], strides = [1, 1]} : vector<268x128xbf16> to vector<264x128xbf16>
    %50 = vector.extract_strided_slice %47 {offsets = [1, 0], sizes = [264, 128], strides = [1, 1]} : vector<268x128xbf16> to vector<264x128xbf16>
    %51 = vector.extract_strided_slice %47 {offsets = [2, 0], sizes = [264, 128], strides = [1, 1]} : vector<268x128xbf16> to vector<264x128xbf16>
    %52 = vector.extract_strided_slice %47 {offsets = [3, 0], sizes = [264, 128], strides = [1, 1]} : vector<268x128xbf16> to vector<264x128xbf16>
    %53 = vector.extract_strided_slice %47 {offsets = [4, 0], sizes = [264, 128], strides = [1, 1]} : vector<268x128xbf16> to vector<264x128xbf16>
    %54 = tpu.concatenate %49, %50, %51, %52, %53 in 1 : vector<264x128xbf16>, vector<264x128xbf16>, vector<264x128xbf16>, vector<264x128xbf16>, vector<264x128xbf16> -> vector<264x640xbf16>
    %c0_16 = arith.constant 0 : index
    %c0_17 = arith.constant 0 : index
    %55 = vector.load %arg7[%c0_16, %c0_17] : memref<640x128xbf16, #tpu.memory_space<vmem>>, vector<640x128xbf16>
    %cst_18 = arith.constant dense<0.000000e+00> : vector<264x128xf32>
    %56 = tpu.matmul %54, %55, %cst_18 {dimension_numbers = #tpu.dot_dimension_numbers<[1], [0], [0], [1], [0, 0, 1, 1], [], []>} : vector<264x640xbf16>, vector<640x128xbf16>, vector<264x128xf32> -> vector<264x128xf32>
    %57 = vector.broadcast %48 : vector<1x128xf32> to vector<264x128xf32>
    %58 = arith.addf %56, %57 : vector<264x128xf32>
    %59 = math.tanh %58 : vector<264x128xf32>
    %60 = vector.extract_strided_slice %9 {offsets = [6, 0], sizes = [264, 1], strides = [1, 1]} : vector<276x1xi1> to vector<264x1xi1>
    %cst_19 = arith.constant 0.000000e+00 : f32
    %61 = vector.shape_cast %60 : vector<264x1xi1> to vector<264x1xi1>
    %62 = vector.broadcast %61 : vector<264x1xi1> to vector<264x128xi1>
    %63 = vector.broadcast %cst_19 : f32 to vector<264x128xf32>
    %64 = arith.select %62, %59, %63 : vector<264x128xi1>, vector<264x128xf32>
    %65 = arith.truncf %64 : vector<264x128xf32> to vector<264x128xbf16>
    %c0_20 = arith.constant 0 : index
    %c0_21 = arith.constant 0 : index
    %66 = vector.load %arg10[%c0_20, %c0_21] : memref<1x128xf32, #tpu.memory_space<vmem>>, vector<1x128xf32>
    %67 = vector.extract_strided_slice %65 {offsets = [0, 0], sizes = [260, 128], strides = [1, 1]} : vector<264x128xbf16> to vector<260x128xbf16>
    %68 = vector.extract_strided_slice %65 {offsets = [1, 0], sizes = [260, 128], strides = [1, 1]} : vector<264x128xbf16> to vector<260x128xbf16>
    %69 = vector.extract_strided_slice %65 {offsets = [2, 0], sizes = [260, 128], strides = [1, 1]} : vector<264x128xbf16> to vector<260x128xbf16>
    %70 = vector.extract_strided_slice %65 {offsets = [3, 0], sizes = [260, 128], strides = [1, 1]} : vector<264x128xbf16> to vector<260x128xbf16>
    %71 = vector.extract_strided_slice %65 {offsets = [4, 0], sizes = [260, 128], strides = [1, 1]} : vector<264x128xbf16> to vector<260x128xbf16>
    %72 = tpu.concatenate %67, %68, %69, %70, %71 in 1 : vector<260x128xbf16>, vector<260x128xbf16>, vector<260x128xbf16>, vector<260x128xbf16>, vector<260x128xbf16> -> vector<260x640xbf16>
    %c0_22 = arith.constant 0 : index
    %c0_23 = arith.constant 0 : index
    %73 = vector.load %arg9[%c0_22, %c0_23] : memref<640x128xbf16, #tpu.memory_space<vmem>>, vector<640x128xbf16>
    %cst_24 = arith.constant dense<0.000000e+00> : vector<260x128xf32>
    %74 = tpu.matmul %72, %73, %cst_24 {dimension_numbers = #tpu.dot_dimension_numbers<[1], [0], [0], [1], [0, 0, 1, 1], [], []>} : vector<260x640xbf16>, vector<640x128xbf16>, vector<260x128xf32> -> vector<260x128xf32>
    %75 = vector.broadcast %66 : vector<1x128xf32> to vector<260x128xf32>
    %76 = arith.addf %74, %75 : vector<260x128xf32>
    %77 = math.tanh %76 : vector<260x128xf32>
    %78 = vector.extract_strided_slice %9 {offsets = [8, 0], sizes = [260, 1], strides = [1, 1]} : vector<276x1xi1> to vector<260x1xi1>
    %cst_25 = arith.constant 0.000000e+00 : f32
    %79 = vector.shape_cast %78 : vector<260x1xi1> to vector<260x1xi1>
    %80 = vector.broadcast %79 : vector<260x1xi1> to vector<260x128xi1>
    %81 = vector.broadcast %cst_25 : f32 to vector<260x128xf32>
    %82 = arith.select %80, %77, %81 : vector<260x128xi1>, vector<260x128xf32>
    %83 = arith.truncf %82 : vector<260x128xf32> to vector<260x128xbf16>
    %c0_26 = arith.constant 0 : index
    %c0_27 = arith.constant 0 : index
    %84 = vector.load %arg12[%c0_26, %c0_27] : memref<1x128xf32, #tpu.memory_space<vmem>>, vector<1x128xf32>
    %85 = vector.extract_strided_slice %83 {offsets = [0, 0], sizes = [256, 128], strides = [1, 1]} : vector<260x128xbf16> to vector<256x128xbf16>
    %86 = vector.extract_strided_slice %83 {offsets = [1, 0], sizes = [256, 128], strides = [1, 1]} : vector<260x128xbf16> to vector<256x128xbf16>
    %87 = vector.extract_strided_slice %83 {offsets = [2, 0], sizes = [256, 128], strides = [1, 1]} : vector<260x128xbf16> to vector<256x128xbf16>
    %88 = vector.extract_strided_slice %83 {offsets = [3, 0], sizes = [256, 128], strides = [1, 1]} : vector<260x128xbf16> to vector<256x128xbf16>
    %89 = vector.extract_strided_slice %83 {offsets = [4, 0], sizes = [256, 128], strides = [1, 1]} : vector<260x128xbf16> to vector<256x128xbf16>
    %90 = tpu.concatenate %85, %86, %87, %88, %89 in 1 : vector<256x128xbf16>, vector<256x128xbf16>, vector<256x128xbf16>, vector<256x128xbf16>, vector<256x128xbf16> -> vector<256x640xbf16>
    %c0_28 = arith.constant 0 : index
    %c0_29 = arith.constant 0 : index
    %91 = vector.load %arg11[%c0_28, %c0_29] : memref<640x128xbf16, #tpu.memory_space<vmem>>, vector<640x128xbf16>
    %cst_30 = arith.constant dense<0.000000e+00> : vector<256x128xf32>
    %92 = tpu.matmul %90, %91, %cst_30 {dimension_numbers = #tpu.dot_dimension_numbers<[1], [0], [0], [1], [0, 0, 1, 1], [], []>} : vector<256x640xbf16>, vector<640x128xbf16>, vector<256x128xf32> -> vector<256x128xf32>
    %93 = vector.broadcast %84 : vector<1x128xf32> to vector<256x128xf32>
    %94 = arith.addf %92, %93 : vector<256x128xf32>
    %c0_31 = arith.constant 0 : index
    %c0_32 = arith.constant 0 : index
    %c0_33 = arith.constant 0 : index
    %95 = vector.load %arg13[%c0_31, %c0_32, %c0_33] : memref<1x256x128xf32, #tpu.memory_space<vmem>>, vector<1x256x128xf32>
    %96 = vector.shape_cast %95 : vector<1x256x128xf32> to vector<256x128xf32>
    %97 = vector.shape_cast %94 : vector<256x128xf32> to vector<1x256x128xf32>
    tpu.vector_store %arg13[%c0_31, %c0_32, %c0_33], %97 {strides = array<i32>} : memref<1x256x128xf32, #tpu.memory_space<vmem>>, vector<1x256x128xf32>,
    return
  }
  func.func @transform_0(%arg0: i32, %arg1: i32) -> (i32, i32, i32, i32) {
    %c0_i32 = arith.constant 0 : i32
    %c0_i32_0 = arith.constant 0 : i32
    %c0_i32_1 = arith.constant 0 : i32
    return %arg0, %arg1, %c0_i32, %c0_i32_0 : i32, i32, i32, i32
  }
  func.func @transform_1(%arg0: i32, %arg1: i32) -> (i32, i32) {
    %c0_i32 = arith.constant 0 : i32
    %c0_i32_0 = arith.constant 0 : i32
    %c0_i32_1 = arith.constant 0 : i32
    return %c0_i32, %c0_i32_0 : i32, i32
  }
  func.func @transform_2(%arg0: i32, %arg1: i32) -> (i32, i32) {
    %c0_i32 = arith.constant 0 : i32
    %c0_i32_0 = arith.constant 0 : i32
    %c0_i32_1 = arith.constant 0 : i32
    return %c0_i32, %c0_i32_0 : i32, i32
  }
  func.func @transform_3(%arg0: i32, %arg1: i32) -> (i32, i32) {
    %c0_i32 = arith.constant 0 : i32
    %c0_i32_0 = arith.constant 0 : i32
    %c0_i32_1 = arith.constant 0 : i32
    return %c0_i32, %c0_i32_0 : i32, i32
  }
  func.func @transform_4(%arg0: i32, %arg1: i32) -> (i32, i32) {
    %c0_i32 = arith.constant 0 : i32
    %c0_i32_0 = arith.constant 0 : i32
    %c0_i32_1 = arith.constant 0 : i32
    return %c0_i32, %c0_i32_0 : i32, i32
  }
  func.func @transform_5(%arg0: i32, %arg1: i32) -> (i32, i32) {
    %c0_i32 = arith.constant 0 : i32
    %c0_i32_0 = arith.constant 0 : i32
    %c0_i32_1 = arith.constant 0 : i32
    return %c0_i32, %c0_i32_0 : i32, i32
  }
  func.func @transform_6(%arg0: i32, %arg1: i32) -> (i32, i32) {
    %c0_i32 = arith.constant 0 : i32
    %c0_i32_0 = arith.constant 0 : i32
    %c0_i32_1 = arith.constant 0 : i32
    return %c0_i32, %c0_i32_0 : i32, i32
  }
  func.func @transform_7(%arg0: i32, %arg1: i32) -> (i32, i32) {
    %c0_i32 = arith.constant 0 : i32
    %c0_i32_0 = arith.constant 0 : i32
    %c0_i32_1 = arith.constant 0 : i32
    return %c0_i32, %c0_i32_0 : i32, i32
  }
  func.func @transform_8(%arg0: i32, %arg1: i32) -> (i32, i32) {
    %c0_i32 = arith.constant 0 : i32
    %c0_i32_0 = arith.constant 0 : i32
    %c0_i32_1 = arith.constant 0 : i32
    return %c0_i32, %c0_i32_0 : i32, i32
  }
  func.func @transform_9(%arg0: i32, %arg1: i32) -> (i32, i32) {
    %c0_i32 = arith.constant 0 : i32
    %c0_i32_0 = arith.constant 0 : i32
    %c0_i32_1 = arith.constant 0 : i32
    return %c0_i32, %c0_i32_0 : i32, i32
  }
  func.func @transform_10(%arg0: i32, %arg1: i32) -> (i32, i32) {
    %c0_i32 = arith.constant 0 : i32
    %c0_i32_0 = arith.constant 0 : i32
    %c0_i32_1 = arith.constant 0 : i32
    return %c0_i32, %c0_i32_0 : i32, i32
  }
  func.func @transform_11(%arg0: i32, %arg1: i32) -> (i32, i32, i32) {
    %c0_i32 = arith.constant 0 : i32
    %c0_i32_0 = arith.constant 0 : i32
    return %arg0, %arg1, %c0_i32 : i32, i32, i32
  }
}

</mosaic_0001>

<bundles_post_ra>
// kernel: postnet_forward.1
= control target key start
LH: loop header
LB: loop body
LE: loop exit
PB: predicated region body
PF: predicated region fallthrough
CT: control target
= control target key end

     0   :  { %s10432_s17 = smov 0   ;;  %s10434_s18 = smov 0   ;;  %s15555_s0 = inlined_call_operand.vmem [shape: bf16[2,2,276,128], index: 0, kind: input, shape index: {}]   ;;  %s15556_s1 = inlined_call_operand.vmem [shape: bf16[640,128], index: 1, kind: input, shape index: {}]   ;;  %s15557_s2 = inlined_call_operand.vmem [shape: f32[1,128], index: 2, kind: input, shape index: {}]   ;;  %s15558_s3 = inlined_call_operand.vmem [shape: bf16[640,128], index: 3, kind: input, shape index: {}]   ;;  %s15559_s4 = inlined_call_operand.vmem [shape: f32[1,128], index: 4, kind: input, shape index: {}]   ;;  %s15560_s5 = inlined_call_operand.vmem [shape: bf16[640,128], index: 5, kind: input, shape index: {}]   ;;  %s15561_s6 = inlined_call_operand.vmem [shape: f32[1,128], index: 6, kind: input, shape index: {}]   ;;  %s15562_s7 = inlined_call_operand.vmem [shape: bf16[640,128], index: 7, kind: input, shape index: {}]   ;;  %s15563_s8 = inlined_call_operand.vmem [shape: f32[1,128], index: 8, kind: input, shape index: {}]   ;;  %s15564_s9 = inlined_call_operand.vmem [shape: bf16[640,128], index: 9, kind: input, shape index: {}]   ;;  %s15565_s10 = inlined_call_operand.vmem [shape: f32[1,128], index: 10, kind: input, shape index: {}]   ;;  %s15566_s11 = inlined_call_operand.vmem [shape: f32[2,512,128], index: 11, kind: output, shape index: {}]  }
   0x1   :  { %s10436_s19 = smov 0   ;;  %s10438_s20 = smov 0  }
   0x2   :  { %s10440_s21 = smov 0  }
   0x3 LB: > { %s30_s22 = sadd.s32 1, %s10359_s19  ;;  %s33_s23 = sadd.s32 1, %s10363_s20  ;;  %s10367_s21 = sphi %s10440_s21, %s21_s21   ;;  %s10363_s20 = sphi %s10438_s20, %s16759_s20   ;;  %s10359_s19 = sphi %s10436_s19, %s16758_s19   ;;  %s10355_s18 = sphi %s10434_s18, %s16757_s18   ;;  %s10351_s17 = sphi %s10432_s17, %s16756_s17  }
   0x4   : > { %p31_p0 = scmp.ge.s32.totalorder %s30_s22, 2  ;;  %p8079_p1 = scmp.ge.s32.totalorder %s10367_s21, 1 }
   0x5   : > { %p357_p2 = scmp.lt.s32.totalorder %s10367_s21, 5 }
   0x6   : > { %s16761_s22 = smov (%p31_p0, %s30_s22), 0  ;;  %s16763_s23 = smov (!%p31_p0, %s33_s23), %s10363_s20 }
   0x7   : > { %p358_p3 = pnand %p8079_p1, %p357_p2  ;;  %p35_p4 = scmp.ge.s32.totalorder %s16763_s23, 2 }
   0x9   : > { %s16765_s23 = smov (%p35_p4, %s16763_s23), 0  ;;  %361 = sbr.rel (%p358_p3) target bundleno = 2759 (0xac7), region = 64 }
  0x10   : > { %v9830_v0 = vld [vmem:[%s15556_s1] sm:$0xff]   ;;  %v15572_v1 = vmov 0   ;;  %p405_p5 = scmp.lt.s32.totalorder %s10355_s18, 1  ;;  %v9831_v2 = vld [vmem:[%s15556_s1 + $0x8] sm:$0xff]   ;;  %p407_p6 = scmp.lt.s32.totalorder %s10351_s17, 1  ;;  %v9832_v3 = vld [vmem:[%s15556_s1 + $0x10] sm:$0xff]  }
  0x11   : > { %1426 = vmatprep.subr.bf16.mxu0 %v15572_v1  ;;  %3064 = vmatprep.subr.bf16.mxu1 %v15572_v1  ;;  %v9833_v4 = vld [vmem:[%s15556_s1 + $0x18] sm:$0xff]   ;;  %v9834_v5 = vld [vmem:[%s15556_s1 + $0x20] sm:$0xff]   ;;  %v9835_v8 = vld [vmem:[%s15556_s1 + $0x28] sm:$0xff]   ;;  %vm15590_vm0 = vsmask.f32 7424  ;;  %vm15591_vm2 = vcmask 1046528  }
  0x12   : > { %1427 = vmatpush1.bf16.msra.mxu0 %v9830_v0  ;;  %s16767_s18 = smov (!%p405_p5, %s10355_s18), 1  ;;  %v9836_v12 = vld [vmem:[%s15556_s1 + $0x30] sm:$0xff]   ;;  %v9837_v17 = vld [vmem:[%s15556_s1 + $0x38] sm:$0xff]   ;;  %v9838_v18 = vld [vmem:[%s15556_s1 + $0x40] sm:$0xff]   ;;  %vm15569_vm1 = vsmask.f32 6400 }
  0x13   : > { %1428 = vmatprep.subr.bf16.mxu0 %v15572_v1  ;;  %s408_s28 = scalar_select %p407_p6, %s10351_s17, 1  ;;  %v9839_v19 = vld [vmem:[%s15556_s1 + $0x48] sm:$0xff]   ;;  %v9840_v20 = vld [vmem:[%s15556_s1 + $0x50] sm:$0xff]   ;;  %v9841_v21 = vld [vmem:[%s15556_s1 + $0x58] sm:$0xff]   ;;  %vm15567_vm3 = vmmov 0   ;;  %vm15579_vm4 = vcmask 1045504  }
  0x14   : > { %s9786_s29 = smul.u32 70, %s16767_s18  ;;  %v9842_v22 = vld [vmem:[%s15556_s1 + $0x60] sm:$0xff]   ;;  %v9843_v24 = vld [vmem:[%s15556_s1 + $0x68] sm:$0xff]   ;;  %v9844_v26 = vld [vmem:[%s15556_s1 + $0x70] sm:$0xff]   ;;  %vm15597_vm9 = vcmask 1041408   ;;  %s8081_s15 = sshll.u32 %s10351_s17, 5 }
  0x15   : > { %s9785_s13 = smul.u32 35, %s408_s28  ;;  %v9845_v29 = vld [vmem:[%s15556_s1 + $0x78] sm:$0xff]   ;;  %v9848_v36 = vld [vmem:[%s15556_s1 + $0x80] sm:$0xff]   ;;  %v9850_v40 = vld [vmem:[%s15556_s1 + $0x88] sm:$0xff]   ;;  %p417_p7 = scmp.lt.s32.totalorder %s8081_s15, 63 }
  0x16   : > { %1429 = vmatpush1.bf16.msra.mxu0 %v9831_v2  ;;  %v9852_v49 = vld [vmem:[%s15556_s1 + $0x90] sm:$0xff]   ;;  %v9854_v53 = vld [vmem:[%s15556_s1 + $0x98] sm:$0xff]   ;;  %v9856_v61 = vld [vmem:[%s15556_s1 + $0xa0] sm:$0xff]   ;;  %s8082_s16 = sshll.u32 %s16767_s18, 6 }
  0x17   : > { %1430 = vmatprep.subr.bf16.mxu0 %v15572_v1  ;;  %s411_s14 = sadd.s32 %s9786_s29, %s9785_s13  ;;  %s16769_s15 = smov (!%p417_p7, %s8081_s15), 63 }
  0x18   : > { %s8080_s24 = sshll.u32 %s411_s14, 2  ;;  %s420_s25 = sadd.s32 %s8082_s16, %s16769_s15 }
  0x19   : > { %s10492_s28 = scalar_lea.vmem %s15555_s0, %s8080_s24  ;;  %s8083_s26 = sshll.u32 %s420_s25, 3 }
  0x1a   : > { %1431 = vmatpush1.bf16.msra.mxu0 %v9832_v3  ;;  %v10496_v6 = vld [vmem:[%s10492_s28] sm:$0xff]   ;;  %v10499_v7 = vld [vmem:[%s10492_s28 + $0x8] sm:$0xff]   ;;  %v10538_v23 = vld [vmem:[%s10492_s28 + $0x10] sm:$0xff]   ;;  %s15392_s30 = scalar_lea.vmem %s15566_s11, %s8083_s26 }
  0x1b   : > { %1432 = vmatprep.subr.bf16.mxu0 %v15572_v1  ;;  %v747_v9 = vshrl.u32 %v10496_v6, 16  ;;  %v749_v10 = vshll.u32 %v10496_v6, 16  ;;  %v754_v11 = vshll.u32 %v10499_v7, 16  ;;  %v758_v25 = vshrl.u32 %v10499_v7, 16  ;;  %v10550_v28 = vld [vmem:[%s10492_s28 + $0x18] sm:$0xff]   ;;  %v10560_v34 = vld [vmem:[%s10492_s28 + $0x20] sm:$0xff]  }
  0x1c   : > { %v762_v27 = vshll.u32 %v10538_v23, 16  ;;  %v766_v31 = vshrl.u32 %v10538_v23, 16  ;;  %v770_v32 = vshll.u32 %v10550_v28, 16  ;;  %v774_v35 = vshrl.u32 %v10550_v28, 16  ;;  %v10567_v38 = vld [vmem:[%s10492_s28 + $0x28] sm:$0xff]   ;;  %v10599_v62 = vld [vmem:[%s10492_s28 + $0x30] sm:$0xff]  }
  0x1d   : > { %v751_v13 = vrot.slane %v749_v10, 1  ;;  %v756_v14 = vrot.slane %v754_v11, 1  ;;  %v778_v41 = vshll.u32 %v10560_v34, 16  ;;  %v957_v42 = vrot.slane %v747_v9, 1 }
  0x1e   : > { %1433 = vmatpush1.bf16.msra.mxu0 %v9833_v4  ;;  %v764_v30 = vrot.slane %v762_v27, 1  ;;  %v772_v37 = vrot.slane %v770_v32, 1  ;;  %v958_v43 = vrot.slane %v749_v10, 2  ;;  %v960_v44 = vrot.slane %v758_v25, 1  ;;  %v9860_v10 = vld [vmem:[%s15556_s1 + $0xb0] sm:$0xff]  }
  0x1f   : > { %1434 = vmatprep.subr.bf16.mxu0 %v15572_v1  ;;  %v752_v15 = vor.u32 %v751_v13, %v747_v9  ;;  %v760_v33 = vor.u32 %v758_v25, %v756_v14  ;;  %v786_v45 = vshll.u32 %v10567_v38, 16  ;;  %v961_v46 = vrot.slane %v754_v11, 2  ;;  %v10613_v9 = vld [vmem:[%s10492_s28 + $0x38] sm:$0xff]  }
  0x20   : > { %v768_v47 = vor.u32 %v766_v31, %v764_v30  ;;  %v959_v48 = vor.u32 %v958_v43, %v957_v42  ;;  %v780_v54 = vrot.slane %v778_v41, 1  ;;  %v782_v55 = vshrl.u32 %v10560_v34, 16 }
  0x21   : > { %v757_v16 = vsel %vm15590_vm0, %v752_v15, %v756_v14  ;;  %v765_v39 = vsel %vm15590_vm0, %v760_v33, %v764_v30  ;;  %v962_v50 = vor.u32 %v961_v46, %v960_v44  ;;  %v788_v56 = vrot.slane %v786_v45, 1  ;;  %v10660_v30 = vld [vmem:[%s10492_s28 + $0x48] sm:$0xff]  }
  0x22   : > { %1435 = vmatpush1.bf16.msra.mxu0 %v9834_v5  ;;  %1458 = vmatprep.mubr.bf16.mxu0 %v757_v16  ;;  %v773_v52 = vsel %vm15590_vm0, %v768_v47, %v772_v37  ;;  %v790_v57 = vshrl.u32 %v10567_v38, 16  ;;  %v964_v58 = vrot.slane %v766_v31, 1  ;;  %v965_v59 = vrot.slane %v762_v27, 2  ;;  %v9868_v31 = vld [vmem:[%s15556_s1 + $0xd0] sm:$0xff]   ;;  %v9875_v46 = vld [vmem:[%s15556_s1 + $0xe8] sm:$0xff]  }
  0x23   : > { %1436 = vmatprep.subr.bf16.mxu0 %v15572_v1  ;;  %v10582_v51 = vsel %vm15569_vm1, %v959_v48, %v962_v50  ;;  %v776_v60 = vor.u32 %v774_v35, %v772_v37  ;;  %v968_v3 = vrot.slane %v774_v35, 1  ;;  %v969_v4 = vrot.slane %v770_v32, 2  ;;  %v10697_v48 = vld [vmem:[%s10492_s28 + $0x58] sm:$0xff]  }
  0x24   : > { %v966_v63 = vor.u32 %v965_v59, %v964_v58  ;;  %v794_v5 = vshll.u32 %v10599_v62, 16  ;;  %v798_v14 = vshrl.u32 %v10599_v62, 16  ;;  %v972_v15 = vrot.slane %v782_v55, 1  ;;  %v10717_v58 = vld [vmem:[%s10492_s28 + $0x60] sm:$0xff]  }
  0x25   : > { %v781_v2 = vsel %vm15590_vm0, %v776_v60, %v780_v54  ;;  %v973_v16 = vrot.slane %v778_v41, 2  ;;  %v818_v35 = vshll.u32 %v10660_v30, 16  ;;  %v822_v42 = vshrl.u32 %v10660_v30, 16 }
  0x26   : > { %1437 = vmatpush1.bf16.msra.mxu0 %v9835_v8  ;;  %v10602_v0 = vsel %vm15569_vm1, %v962_v50, %v966_v63  ;;  %v970_v8 = vor.u32 %v969_v4, %v968_v3  ;;  %v796_v13 = vrot.slane %v794_v5, 1  ;;  %v15570_v60 = vmov 0.0   ;;  %v10729_v4 = vld [vmem:[%s10492_s28 + $0x68] sm:$0xff]  }
  0x27   : > { %1438 = vmatprep.subr.bf16.mxu0 %v15572_v1  ;;  %v820_v44 = vrot.slane %v818_v35, 1 }
  0x28   : > { %v10619_v11 = vsel %vm15569_vm1, %v966_v63, %v970_v8 }
  0x2a   : > { %1439 = vmatpush1.bf16.msra.mxu0 %v9836_v12 }
  0x2b   : > { %1440 = vmatprep.subr.bf16.mxu0 %v15572_v1 }
  0x2e   : > { %1441 = vmatpush1.bf16.msra.mxu0 %v9837_v17  ;;  %v802_v17 = vshll.u32 %v10613_v9, 16 }
  0x2f   : > { %1442 = vmatprep.subr.bf16.mxu0 %v15572_v1 }
  0x30   : > { %v804_v25 = vrot.slane %v802_v17, 1 }
  0x32   : > { %1443 = vmatpush1.bf16.msra.mxu0 %v9838_v18  ;;  %v9862_v18 = vld [vmem:[%s15556_s1 + $0xb8] sm:$0xff]  }
  0x33   : > { %1444 = vmatprep.subr.bf16.mxu0 %v15572_v1 }
  0x36   : > { %1445 = vmatpush1.bf16.msra.mxu0 %v9839_v19  ;;  %v792_v19 = vor.u32 %v790_v57, %v788_v56 }
  0x37   : > { %1446 = vmatprep.subr.bf16.mxu0 %v15572_v1 }
  0x3a   : > { %1447 = vmatpush1.bf16.msra.mxu0 %v9840_v20  ;;  %v10634_v20 = vor.u32 %v973_v16, %v972_v15  ;;  %v854_v16 = vshrl.u32 %v10729_v4, 16 }
  0x3b   : > { %1448 = vmatprep.subr.bf16.mxu0 %v15572_v1 }
  0x3e   : > { %1449 = vmatpush1.bf16.msra.mxu0 %v9841_v21  ;;  %v10637_v21 = vld [vmem:[%s10492_s28 + $0x40] sm:$0xff]  }
  0x3f   : > { %1450 = vmatprep.subr.bf16.mxu0 %v15572_v1  ;;  %v810_v27 = vshll.u32 %v10637_v21, 16 }
  0x41   : > { %v812_v33 = vrot.slane %v810_v27, 1 }
  0x42   : > { %1451 = vmatpush1.bf16.msra.mxu0 %v9842_v22  ;;  %v9864_v22 = vld [vmem:[%s15556_s1 + $0xc0] sm:$0xff]  }
  0x43   : > { %1452 = vmatprep.subr.bf16.mxu0 %v15572_v1 }
  0x46   : > { %1453 = vmatpush1.bf16.msra.mxu0 %v9843_v24  ;;  %v797_v24 = vsel %vm15590_vm0, %v792_v19, %v796_v13 }
  0x47   : > { %1454 = vmatprep.subr.bf16.mxu0 %v15572_v1 }
  0x4a   : > { %1455 = vmatpush1.bf16.msra.mxu0 %v9844_v26  ;;  %v806_v26 = vshrl.u32 %v10613_v9, 16 }
  0x4b   : > { %1456 = vmatprep.subr.bf16.mxu0 %v15572_v1 }
  0x4c   : > { %v808_v37 = vor.u32 %v806_v26, %v804_v25 }
  0x4e   : > { %1457 = vmatpush1.bf16.msra.mxu0 %v9845_v29  ;;  %v800_v29 = vor.u32 %v798_v14, %v796_v13  ;;  %v813_v41 = vsel %vm15590_vm0, %v808_v37, %v812_v33  ;;  %v10740_v13 = vld [vmem:[%s10492_s28 + $0x70] sm:$0xff]  }
  0x4f   : > { %1595 = vmatprep.subr.bf16.mxu0 %v15572_v1  ;;  %v858_v19 = vshll.u32 %v10740_v13, 16 }
  0x50   : > { %v805_v32 = vsel %vm15590_vm0, %v800_v29, %v804_v25 }
  0x51   : > { %1459 = vmatmul.mubr.bf16.vlgmr.msra.gmra.mrb[0].mxu0 %v10496_v6  ;;  %v9858_v6 = vld [vmem:[%s15556_s1 + $0xa8] sm:$0xff]   ;;  %v860_v29 = vrot.slane %v858_v19, 1 }
  0x52   : > { %1596 = vmatpush1.bf16.msra.mxu0 %v9848_v36  ;;  %1466 = vmatprep.mubr.bf16.mxu0 %v765_v39  ;;  %v9871_v36 = vld [vmem:[%s15556_s1 + $0xd8] sm:$0xff]   ;;  %v10678_v39 = vld [vmem:[%s10492_s28 + $0x50] sm:$0xff]  }
  0x53   : > { %1597 = vmatprep.subr.bf16.mxu0 %v15572_v1  ;;  %v826_v43 = vshll.u32 %v10678_v39, 16 }
  0x56   : > { %1598 = vmatpush1.bf16.msra.mxu0 %v9850_v40  ;;  %v9873_v40 = vld [vmem:[%s15556_s1 + $0xe0] sm:$0xff]  }
  0x57   : > { %1599 = vmatprep.subr.bf16.mxu0 %v15572_v1 }
  0x59   : > { %1467 = vmatmul.mubr.bf16.gmra.mrb[4].mxu0 %v10499_v7  ;;  %v784_v7 = vor.u32 %v782_v55, %v780_v54  ;;  %v834_v54 = vshll.u32 %v10697_v48, 16  ;;  %v9879_v55 = vld [vmem:[%s15556_s1 + $0xf8] sm:$0xff]  }
  0x5a   : > { %1474 = vmatprep.mubr.bf16.mxu0 %v773_v52  ;;  %1600 = vmatpush1.bf16.msra.mxu0 %v9852_v49  ;;  %v9877_v49 = vld [vmem:[%s15556_s1 + $0xf0] sm:$0xff]   ;;  %v828_v52 = vrot.slane %v826_v43, 1 }
  0x5b   : > { %1601 = vmatprep.subr.bf16.mxu0 %v15572_v1  ;;  %v789_v12 = vsel %vm15590_vm0, %v784_v7, %v788_v56  ;;  %v824_v56 = vor.u32 %v822_v42, %v820_v44  ;;  %v836_v63 = vrot.slane %v834_v54, 1  ;;  %v846_v7 = vshrl.u32 %v10717_v58, 16 }
  0x5d   : > { %v829_v59 = vsel %vm15590_vm0, %v824_v56, %v828_v52 }
  0x5e   : > { %1602 = vmatpush1.bf16.msra.mxu0 %v9854_v53  ;;  %v830_v53 = vshrl.u32 %v10678_v39, 16 }
  0x5f   : > { %1603 = vmatprep.subr.bf16.mxu0 %v15572_v1 }
  0x60   : > { %v832_v3 = vor.u32 %v830_v53, %v828_v52 }
  0x61   : > { %1475 = vmatmul.mubr.bf16.gmra.mrb[8].mxu0 %v10538_v23  ;;  %v10644_v23 = vsel %vm15569_vm1, %v970_v8, %v10634_v20 }
  0x62   : > { %1482 = vmatprep.mubr.bf16.mxu0 %v781_v2  ;;  %1604 = vmatpush1.bf16.msra.mxu0 %v9856_v61  ;;  %v838_v61 = vshrl.u32 %v10697_v48, 16  ;;  %v842_v2 = vshll.u32 %v10717_v58, 16 }
  0x63   : > { %1605 = vmatprep.subr.bf16.mxu0 %v15572_v1 }
  0x64   : > { %v844_v8 = vrot.slane %v842_v2, 1 }
  0x66   : > { %1606 = vmatpush1.bf16.msra.mxu0 %v9858_v6  ;;  %v837_v6 = vsel %vm15590_vm0, %v832_v3, %v836_v63 }
  0x67   : > { %1607 = vmatprep.subr.bf16.mxu0 %v15572_v1 }
  0x69   : > { %1483 = vmatmul.mubr.bf16.gmra.mrb[12].mxu0 %v10550_v28  ;;  %v9866_v28 = vld [vmem:[%s15556_s1 + $0xc8] sm:$0xff]  }
  0x6a   : > { %1490 = vmatprep.mubr.bf16.mxu0 %v789_v12  ;;  %1608 = vmatpush1.bf16.msra.mxu0 %v9860_v10  ;;  %v850_v10 = vshll.u32 %v10729_v4, 16  ;;  %v840_v12 = vor.u32 %v838_v61, %v836_v63 }
  0x6b   : > { %1609 = vmatprep.subr.bf16.mxu0 %v15572_v1 }
  0x6c   : > { %v845_v15 = vsel %vm15590_vm0, %v840_v12, %v844_v8  ;;  %v10798_v12 = vld [vmem:[%s10492_s28 + $0x8] sm:$0xff]  }
  0x6e   : > { %1610 = vmatpush1.bf16.msra.mxu0 %v9862_v18  ;;  %v852_v18 = vrot.slane %v850_v10, 1 }
  0x6f   : > { %1611 = vmatprep.subr.bf16.mxu0 %v15572_v1 }
  0x71   : > { %1491 = vmatmul.mubr.bf16.gmra.mrb[16].mxu0 %v10560_v34  ;;  %v814_v34 = vshrl.u32 %v10637_v21, 16 }
  0x72   : > { %1498 = vmatprep.mubr.bf16.mxu0 %v797_v24  ;;  %1612 = vmatpush1.bf16.msra.mxu0 %v9864_v22  ;;  %v848_v22 = vor.u32 %v846_v7, %v844_v8  ;;  %v10751_v24 = vld [vmem:[%s10492_s28 + $0x78] sm:$0xff]  }
  0x73   : > { %1613 = vmatprep.subr.bf16.mxu0 %v15572_v1  ;;  %v816_v47 = vor.u32 %v814_v34, %v812_v33  ;;  %v10762_v33 = vld [vmem:[%s10492_s28 + $0x80] sm:$0xff]   ;;  %v870_v37 = vshrl.u32 %v10751_v24, 16 }
  0x74   : > { %v853_v25 = vsel %vm15590_vm0, %v848_v22, %v852_v18  ;;  %v9880_v22 = vld [vmem:[%s15556_s1 + $0x100] sm:$0xff]  }
  0x75   : > { %v821_v50 = vsel %vm15590_vm0, %v816_v47, %v820_v44 }
  0x76   : > { %1614 = vmatpush1.bf16.msra.mxu0 %v9866_v28  ;;  %v862_v28 = vshrl.u32 %v10740_v13, 16 }
  0x77   : > { %1615 = vmatprep.subr.bf16.mxu0 %v15572_v1 }
  0x78   : > { %v864_v44 = vor.u32 %v862_v28, %v860_v29 }
  0x79   : > { %1499 = vmatmul.mubr.bf16.gmra.mrb[20].mxu0 %v10567_v38 }
  0x7a   : > { %1506 = vmatprep.mubr.bf16.mxu0 %v805_v32  ;;  %1616 = vmatpush1.bf16.msra.mxu0 %v9868_v31  ;;  %v866_v31 = vshll.u32 %v10751_v24, 16  ;;  %v856_v32 = vor.u32 %v854_v16, %v852_v18 }
  0x7b   : > { %1617 = vmatprep.subr.bf16.mxu0 %v15572_v1 }
  0x7e   : > { %1618 = vmatpush1.bf16.msra.mxu0 %v9871_v36  ;;  %v861_v36 = vsel %vm15590_vm0, %v856_v32, %v860_v29  ;;  %v9881_v29 = vld [vmem:[%s15556_s1 + $0x108] sm:$0xff]  }
  0x7f   : > { %1619 = vmatprep.subr.bf16.mxu0 %v15572_v1 }
  0x81   : > { %1507 = vmatmul.mubr.bf16.gmra.mrb[24].mxu0 %v10599_v62 }
  0x82   : > { %1514 = vmatprep.mubr.bf16.mxu0 %v813_v41  ;;  %1620 = vmatpush1.bf16.msra.mxu0 %v9873_v40  ;;  %v868_v40 = vrot.slane %v866_v31, 1  ;;  %v874_v41 = vshll.u32 %v10762_v33, 16 }
  0x83   : > { %1621 = vmatprep.subr.bf16.mxu0 %v15572_v1 }
  0x84   : > { %v869_v47 = vsel %vm15590_vm0, %v864_v44, %v868_v40  ;;  %v9883_v44 = vld [vmem:[%s15556_s1 + $0x118] sm:$0xff]  }
  0x86   : > { %1622 = vmatpush1.bf16.msra.mxu0 %v9875_v46  ;;  %v10773_v46 = vld [vmem:[%s10492_s28 + $0x88] ss:$0 sps:$4 sm:$0x33]  }
  0x87   : > { %1623 = vmatprep.subr.bf16.mxu0 %v15572_v1  ;;  %v882_v52 = vshll.u32 %v10773_v46, 16 }
  0x89   : > { %1515 = vmatmul.mubr.bf16.gmra.mrb[28].mxu0 %v10613_v9  ;;  %v884_v63 = vrot.slane %v882_v52, 1 }
  0x8a   : > { %1522 = vmatprep.mubr.bf16.mxu0 %v821_v50  ;;  %1624 = vmatpush1.bf16.msra.mxu0 %v9877_v49  ;;  %v876_v49 = vrot.slane %v874_v41, 1  ;;  %v878_v50 = vshrl.u32 %v10762_v33, 16 }
  0x8b   : > { %1625 = vmatprep.subr.bf16.mxu0 %v15572_v1 }
  0x8e   : > { %1626 = vmatpush1.bf16.msra.mxu0 %v9879_v55  ;;  %v872_v55 = vor.u32 %v870_v37, %v868_v40 }
  0x8f   : > { %8707 = vmatprep.subr.bf16.mxu0 %v15570_v60 }
  0x90   : > { %v877_v56 = vsel %vm15590_vm0, %v872_v55, %v876_v49  ;;  %v977_v55 = vrot.slane %v786_v45, 2  ;;  %v9886_v45 = vld [vmem:[%s15556_s1 + $0x130] sm:$0xff]  }
  0x91   : > { %1523 = vmatmul.mubr.bf16.gmra.mrb[32].mxu0 %v10637_v21 }
  0x92   : > { %1530 = vmatprep.mubr.bf16.mxu0 %v829_v59  ;;  %v880_v59 = vor.u32 %v878_v50, %v876_v49  ;;  %v9884_v49 = vld [vmem:[%s15556_s1 + $0x120] sm:$0xff]  }
  0x94   : > { %v885_v3 = vsel %vm15590_vm0, %v880_v59, %v884_v63  ;;  %v9885_v63 = vld [vmem:[%s15556_s1 + $0x128] sm:$0xff]  }
  0x99   : > { %1531 = vmatmul.mubr.bf16.gmra.mrb[36].mxu0 %v10660_v30 }
  0x9a   : > { %1538 = vmatprep.mubr.bf16.mxu0 %v837_v6  ;;  %v10794_v6 = vld [vmem:[%s10492_s28] sm:$0xff]  }
  0x9b   : > { %v904_v8 = vrot.slane %v10794_v6, 1 }
  0xa1   : > { %1539 = vmatmul.mubr.bf16.gmra.mrb[40].mxu0 %v10678_v39 }
  0xa2   : > { %1546 = vmatprep.mubr.bf16.mxu0 %v845_v15  ;;  %v905_v15 = vrot.slane %v10798_v12, 1 }
  0xa4   : > { %v906_v18 = vsel %vm15591_vm2, %v904_v8, %v905_v15  ;;  %v981_v8 = vrot.slane %v794_v5, 2 }
  0xa9   : > { %1547 = vmatmul.mubr.bf16.gmra.mrb[44].mxu0 %v10697_v48 }
  0xaa   : > { %1554 = vmatprep.mubr.bf16.mxu0 %v853_v25 }
  0xb1   : > { %1555 = vmatmul.mubr.bf16.gmra.mrb[48].mxu0 %v10717_v58 }
  0xb2   : > { %1562 = vmatprep.mubr.bf16.mxu0 %v861_v36  ;;  %v9882_v36 = vld [vmem:[%s15556_s1 + $0x110] sm:$0xff]  }
  0xb9   : > { %1563 = vmatmul.mubr.bf16.gmra.mrb[52].mxu0 %v10729_v4 }
  0xba   : > { %1570 = vmatprep.mubr.bf16.mxu0 %v869_v47 }
  0xc1   : > { %1571 = vmatmul.mubr.bf16.gmra.mrb[56].mxu0 %v10740_v13 }
  0xc2   : > { %1578 = vmatprep.mubr.bf16.mxu0 %v877_v56  ;;  %v10839_v56 = vld [vmem:[%s10492_s28 + $0x20] sm:$0xff]  }
  0xc3   : > { %v911_v59 = vrot.slane %v10839_v56, 1 }
  0xc9   : > { %1579 = vmatmul.mubr.bf16.gmra.mrb[60].mxu0 %v10751_v24 }
  0xca   : > { %1586 = vmatprep.mubr.bf16.mxu0 %v885_v3 }
  0xd1   : > { %1587 = vmatmul.mubr.bf16.gmra.mrb[64].mxu0 %v10762_v33 }
  0xd2   : > { %1627 = vmatprep.mubr.bf16.mxu0 %v10582_v51  ;;  %v10807_v51 = vld [vmem:[%s10492_s28 + $0x10] sm:$0xff]  }
  0xd3   : > { %v907_v25 = vrot.slane %v10807_v51, 1 }
  0xd5   : > { %v908_v32 = vsel %vm15591_vm2, %v905_v15, %v907_v25  ;;  %v10858_v15 = vld [vmem:[%s10492_s28 + $0x28] sm:$0xff]  }
  0xd9   : > { %1628 = vmatmul.mubr.bf16.vlgmr.msra.gmra.mrb[0].mxu0 %v906_v18  ;;  %v913_v18 = vrot.slane %v10858_v15, 1 }
  0xda   : > { %8708 = vmatpush3.bf16.msra.mxu0 %v9880_v22  ;;  %1635 = vmatprep.mubr.bf16.mxu0 %v10602_v0  ;;  %v10821_v0 = vld [vmem:[%s10492_s28 + $0x18] sm:$0xff]  }
  0xdb   : > { %8709 = vmatprep.subr.bf16.mxu0 %v15570_v60  ;;  %v909_v40 = vrot.slane %v10821_v0, 1  ;;  %v9887_v22 = vld [vmem:[%s15556_s1 + $0x138] sm:$0xff]  }
  0xdd   : > { %v910_v47 = vsel %vm15591_vm2, %v907_v25, %v909_v40  ;;  %v912_v38 = vsel %vm15591_vm2, %v909_v40, %v911_v59  ;;  %v984_v25 = vrot.slane %v806_v26, 1  ;;  %v989_v26 = vrot.slane %v810_v27, 2 }
  0xde   : > { %8710 = vmatpush3.bf16.msra.mxu0 %v9881_v29  ;;  %v985_v29 = vrot.slane %v802_v17, 2  ;;  %v917_v17 = vrot.slane %v10613_v9, 1 }
  0xdf   : > { %8711 = vmatprep.subr.bf16.mxu0 %v15570_v60 }
  0xe1   : > { %1636 = vmatmul.mubr.bf16.gmra.mrb[4].mxu0 %v908_v32  ;;  %v915_v32 = vrot.slane %v10599_v62, 1 }
  0xe2   : > { %1643 = vmatprep.mubr.bf16.mxu0 %v10619_v11  ;;  %8712 = vmatpush3.bf16.msra.mxu0 %v9882_v36  ;;  %v976_v11 = vrot.slane %v790_v57, 1  ;;  %v986_v36 = vor.u32 %v985_v29, %v984_v25  ;;  %v1009_v25 = vrot.slane %v850_v10, 2 }
  0xe3   : > { %8713 = vmatprep.subr.bf16.mxu0 %v15570_v60  ;;  %v916_v40 = vsel %vm15591_vm2, %v913_v18, %v915_v32 }
  0xe4   : > { %v978_v3 = vor.u32 %v977_v55, %v976_v11  ;;  %v918_v11 = vsel %vm15591_vm2, %v915_v32, %v917_v17  ;;  %v992_v55 = vrot.slane %v822_v42, 1  ;;  %v921_v42 = vrot.slane %v10660_v30, 1 }
  0xe6   : > { %8714 = vmatpush3.bf16.msra.mxu0 %v9883_v44  ;;  %v979_v57 = vsel %vm15569_vm1, %v10634_v20, %v978_v3 }
  0xe7   : > { %8715 = vmatprep.subr.bf16.mxu0 %v15570_v60 }
  0xe9   : > { %1644 = vmatmul.mubr.bf16.gmra.mrb[8].mxu0 %v910_v47  ;;  %v988_v47 = vrot.slane %v814_v34, 1  ;;  %v919_v34 = vrot.slane %v10637_v21, 1 }
  0xea   : > { %1651 = vmatprep.mubr.bf16.mxu0 %v10644_v23  ;;  %8716 = vmatpush3.bf16.msra.mxu0 %v9884_v49  ;;  %v980_v23 = vrot.slane %v798_v14, 1  ;;  %v914_v14 = vsel %vm15591_vm2, %v911_v59, %v913_v18  ;;  %v993_v59 = vrot.slane %v818_v35, 2  ;;  %v1004_v18 = vrot.slane %v846_v7, 1 }
  0xeb   : > { %8717 = vmatprep.subr.bf16.mxu0 %v15570_v60  ;;  %v990_v49 = vor.u32 %v989_v26, %v988_v47  ;;  %v927_v7 = vrot.slane %v10717_v58, 1  ;;  %v1016_v26 = vrot.slane %v870_v37, 1  ;;  %v933_v37 = vrot.slane %v10751_v24, 1 }
  0xec   : > { %v982_v20 = vor.u32 %v981_v8, %v980_v23  ;;  %v994_v27 = vor.u32 %v993_v59, %v992_v55  ;;  %v1001_v23 = vrot.slane %v834_v54, 2  ;;  %v1021_v55 = vrot.slane %v874_v41, 2 }
  0xed   : > { %v991_v62 = vsel %vm15569_vm1, %v986_v36, %v990_v49  ;;  %v1024_v59 = vshrl.u32 %v10773_v46, 16 }
  0xee   : > { %8718 = vmatpush3.bf16.msra.mxu0 %v9885_v63  ;;  %v983_v5 = vsel %vm15569_vm1, %v978_v3, %v982_v20  ;;  %v987_v44 = vsel %vm15569_vm1, %v982_v20, %v986_v36  ;;  %v920_v63 = vsel %vm15591_vm2, %v917_v17, %v919_v34  ;;  %v995_v9 = vsel %vm15569_vm1, %v990_v49, %v994_v27 }
  0xef   : > { %8719 = vmatprep.subr.bf16.mxu0 %v15570_v60  ;;  %v996_v3 = vrot.slane %v830_v53, 1  ;;  %v923_v53 = vrot.slane %v10678_v39, 1  ;;  %v1012_v36 = vrot.slane %v862_v28, 1  ;;  %v1017_v17 = vrot.slane %v866_v31, 2 }
  0xf0   : > { %v931_v28 = vrot.slane %v10740_v13, 1 }
  0xf1   : > { %1652 = vmatmul.mubr.bf16.gmra.mrb[12].mxu0 %v912_v38  ;;  %v997_v38 = vrot.slane %v826_v43, 2  ;;  %v924_v8 = vsel %vm15591_vm2, %v921_v42, %v923_v53 }
  0xf2   : > { %1659 = vmatprep.mubr.bf16.mxu0 %v979_v57  ;;  %8720 = vmatpush3.bf16.msra.mxu0 %v9886_v45  ;;  %v922_v45 = vsel %vm15591_vm2, %v919_v34, %v921_v42  ;;  %v1000_v57 = vrot.slane %v838_v61, 1  ;;  %v925_v61 = vrot.slane %v10697_v48, 1  ;;  %v934_v34 = vsel %vm15591_vm2, %v931_v28, %v933_v37 }
  0xf3   : > { %8721 = vmatprep.subr.bf16.mxu0 %v15570_v60  ;;  %v998_v35 = vor.u32 %v997_v38, %v996_v3  ;;  %v937_v42 = vrot.slane %v10773_v46, 1 }
  0xf4   : > { %v1002_v43 = vor.u32 %v1001_v23, %v1000_v57  ;;  %v926_v20 = vsel %vm15591_vm2, %v923_v53, %v925_v61  ;;  %v928_v29 = vsel %vm15591_vm2, %v925_v61, %v927_v7  ;;  %v9888_v57 = vld [vmem:[%s15558_s3] sm:$0xff]   ;;  %v1051_v23 = vrot.slane %v10807_v51, 2  ;;  %v9890_v53 = vld [vmem:[%s15558_s3 + $0x10] sm:$0xff]  }
  0xf5   : > { %v999_v21 = vsel %vm15569_vm1, %v994_v27, %v998_v35  ;;  %3065 = vmatpush1.bf16.msra.mxu1 %v9888_v57  ;;  %v1053_v51 = vrot.slane %v10821_v0, 2  ;;  %v1055_v0 = vrot.slane %v10839_v56, 2  ;;  %v10322_v61 = vld [vmem:[%s10492_s28 + $0x30] sm:$0xff]  }
  0xf6   : > { %8722 = vmatpush3.bf16.msra.mxu0 %v9887_v22  ;;  %v1003_v30 = vsel %vm15569_vm1, %v998_v35, %v1002_v43  ;;  %v1005_v22 = vrot.slane %v842_v2, 2  ;;  %3066 = vmatprep.subr.bf16.mxu1 %v15572_v1 }
  0xf7   : > { %4621 = vmatprep.subr.bf16.mxu0 %v15572_v1 }
  0xf8   : > { %v1006_v54 = vor.u32 %v1005_v22, %v1004_v18  ;;  %v1057_v18 = vrot.slane %v10858_v15, 2  ;;  %v10324_v15 = vld [vmem:[%s10492_s28 + $0x40] sm:$0xff]  }
  0xf9   : > { %1660 = vmatmul.mubr.bf16.gmra.mrb[16].mxu0 %v914_v14 }
  0xfa   : > { %1667 = vmatprep.mubr.bf16.mxu0 %v983_v5  ;;  %v1007_v14 = vsel %vm15569_vm1, %v1002_v43, %v1006_v54  ;;  %v1008_v5 = vrot.slane %v854_v16, 1  ;;  %v929_v16 = vrot.slane %v10729_v4, 1  ;;  %v9891_v43 = vld [vmem:[%s15558_s3 + $0x18] sm:$0xff]   ;;  %v1058_v22 = vsel %vm15579_vm4, %v1055_v0, %v1057_v18 }
  0xfc   : > { %v1010_v2 = vor.u32 %v1009_v25, %v1008_v5  ;;  %v932_v49 = vsel %vm15591_vm2, %v929_v16, %v931_v28  ;;  %v1063_v25 = vrot.slane %v10324_v15, 2  ;;  %v9895_v28 = vld [vmem:[%s15558_s3 + $0x38] sm:$0xff]  }
  0xfe   : > { %v1011_v32 = vsel %vm15569_vm1, %v1006_v54, %v1010_v2  ;;  %v1059_v54 = vrot.slane %v10322_v61, 2 }
 0x100   : > { %v1060_v56 = vsel %vm15579_vm4, %v1057_v18, %v1059_v54 }
 0x101   : > { %1668 = vmatmul.mubr.bf16.gmra.mrb[20].mxu0 %v916_v40  ;;  %v1013_v40 = vrot.slane %v858_v19, 2  ;;  %v1018_v19 = vor.u32 %v1017_v17, %v1016_v26  ;;  %v9894_v26 = vld [vmem:[%s15558_s3 + $0x30] sm:$0xff]  }
 0x102   : > { %1675 = vmatprep.mubr.bf16.mxu0 %v987_v44  ;;  %v930_v44 = vsel %vm15591_vm2, %v927_v7, %v929_v16  ;;  %v1069_v16 = vrot.slane %v10697_v48, 2  ;;  %v9893_v48 = vld [vmem:[%s15558_s3 + $0x28] sm:$0xff]  }
 0x103   : > { %v1014_v10 = vor.u32 %v1013_v40, %v1012_v36  ;;  %v1067_v36 = vrot.slane %v10678_v39, 2  ;;  %v9892_v39 = vld [vmem:[%s15558_s3 + $0x20] sm:$0xff]  }
 0x105   : > { %v1015_v47 = vsel %vm15569_vm1, %v1010_v2, %v1014_v10  ;;  %v10325_v2 = vld [vmem:[%s10492_s28 + $0x48] sm:$0xff]  }
 0x109   : > { %1676 = vmatmul.mubr.bf16.gmra.mrb[24].mxu0 %v918_v11  ;;  %v1019_v11 = vsel %vm15569_vm1, %v1014_v10, %v1018_v19  ;;  %v1070_v10 = vsel %vm15579_vm4, %v1067_v36, %v1069_v16 }
 0x10a   : > { %1683 = vmatprep.mubr.bf16.mxu0 %v991_v62  ;;  %v1020_v62 = vrot.slane %v878_v50, 1  ;;  %v935_v50 = vrot.slane %v10762_v33, 1 }
 0x10c   : > { %v1022_v31 = vor.u32 %v1021_v55, %v1020_v62  ;;  %v936_v3 = vsel %vm15591_vm2, %v933_v37, %v935_v50  ;;  %v938_v35 = vsel %vm15591_vm2, %v935_v50, %v937_v42  ;;  %v9898_v62 = vld [vmem:[%s15558_s3 + $0x50] sm:$0xff]   ;;  %v9899_v37 = vld [vmem:[%s15558_s3 + $0x58] sm:$0xff]   ;;  %v427_v50 = vlaneseq }
 0x10e   : > { %v1023_v27 = vsel %vm15569_vm1, %v1018_v19, %v1022_v31  ;;  %v9896_v19 = vld [vmem:[%s15558_s3 + $0x40] sm:$0xff]  }
 0x111   : > { %1684 = vmatmul.mubr.bf16.gmra.mrb[28].mxu0 %v920_v63  ;;  %v1026_v63 = vrot.slane %v1024_v59, 1 }
 0x112   : > { %1691 = vmatprep.mubr.bf16.mxu0 %v995_v9  ;;  %v1027_v9 = vrot.slane %v882_v52, 2  ;;  %v1048_v52 = vrot.slane %v10794_v6, 2  ;;  %v9889_v6 = vld [vmem:[%s15558_s3 + $0x8] sm:$0xff]  }
 0x113   : > { %3067 = vmatpush1.bf16.msra.mxu1 %v9889_v6 }
 0x114   : > { %v1028_v41 = vor.u32 %v1027_v9, %v1026_v63  ;;  %3068 = vmatprep.subr.bf16.mxu1 %v15572_v1  ;;  %v9903_v9 = vld [vmem:[%s15558_s3 + $0x78] sm:$0xff]  }
 0x116   : > { %v1029_v38 = vsel %vm15569_vm1, %v1022_v31, %v1028_v41  ;;  %v9900_v31 = vld [vmem:[%s15558_s3 + $0x60] sm:$0xff]  }
 0x117   : > { %3069 = vmatpush1.bf16.msra.mxu1 %v9890_v53  ;;  %v11085_v41 = vld [vmem:[%s15557_s2] ss:$0 sm:$0xff] }
 0x118   : > { %3070 = vmatprep.subr.bf16.mxu1 %v15572_v1 }
 0x119   : > { %1692 = vmatmul.mubr.bf16.gmra.mrb[32].mxu0 %v922_v45  ;;  %v1049_v45 = vrot.slane %v10798_v12, 2 }
 0x11a   : > { %1699 = vmatprep.mubr.bf16.mxu0 %v999_v21 }
 0x11b   : > { %v1050_v21 = vsel %vm15579_vm4, %v1048_v52, %v1049_v45  ;;  %v1052_v12 = vsel %vm15579_vm4, %v1049_v45, %v1051_v23  ;;  %3071 = vmatpush1.bf16.msra.mxu1 %v9891_v43 }
 0x11c   : > { %3072 = vmatprep.subr.bf16.mxu1 %v15572_v1 }
 0x11f   : > { %3073 = vmatpush1.bf16.msra.mxu1 %v9892_v39 }
 0x120   : > { %3074 = vmatprep.subr.bf16.mxu1 %v15572_v1 }
 0x121   : > { %1700 = vmatmul.mubr.bf16.gmra.mrb[36].mxu0 %v924_v8  ;;  %v1054_v8 = vsel %vm15579_vm4, %v1051_v23, %v1053_v51 }
 0x122   : > { %1707 = vmatprep.mubr.bf16.mxu0 %v1003_v30  ;;  %v1056_v30 = vsel %vm15579_vm4, %v1053_v51, %v1055_v0 }
 0x123   : > { %3075 = vmatpush1.bf16.msra.mxu1 %v9893_v48 }
 0x124   : > { %3076 = vmatprep.subr.bf16.mxu1 %v15572_v1 }
 0x127   : > { %3077 = vmatpush1.bf16.msra.mxu1 %v9894_v26 }
 0x128   : > { %3078 = vmatprep.subr.bf16.mxu1 %v15572_v1 }
 0x129   : > { %1708 = vmatmul.mubr.bf16.gmra.mrb[40].mxu0 %v926_v20  ;;  %v10323_v20 = vld [vmem:[%s10492_s28 + $0x38] sm:$0xff]   ;;  %s8084_s28 = sshll.u32 %s10351_s17, 8 }
 0x12a   : > { %1715 = vmatprep.mubr.bf16.mxu0 %v1007_v14  ;;  %v1061_v14 = vrot.slane %v10323_v20, 2  ;;  %s8085_s12 = sadd.s32 4294967286, %s8084_s28 }
 0x12b   : > { %3079 = vmatpush1.bf16.msra.mxu1 %v9895_v28  ;;  %v15740_v28 = vmov 0 }
 0x12c   : > { %v1062_v5 = vsel %vm15579_vm4, %v1059_v54, %v1061_v14  ;;  %v1064_v7 = vsel %vm15579_vm4, %v1061_v14, %v1063_v25  ;;  %3080 = vmatprep.subr.bf16.mxu1 %v15572_v1 }
 0x12f   : > { %3081 = vmatpush1.bf16.msra.mxu1 %v9896_v19 }
 0x130   : > { %3082 = vmatprep.subr.bf16.mxu1 %v15572_v1 }
 0x131   : > { %1716 = vmatmul.mubr.bf16.gmra.mrb[44].mxu0 %v928_v29  ;;  %v1065_v29 = vrot.slane %v10325_v2, 2 }
 0x132   : > { %1723 = vmatprep.mubr.bf16.mxu0 %v1011_v32 }
 0x133   : > { %v1066_v32 = vsel %vm15579_vm4, %v1063_v25, %v1065_v29  ;;  %v1068_v40 = vsel %vm15579_vm4, %v1065_v29, %v1067_v36 }
 0x139   : > { %1724 = vmatmul.mubr.bf16.gmra.mrb[48].mxu0 %v930_v44  ;;  %v1071_v44 = vrot.slane %v10717_v58, 2  ;;  %v1073_v58 = vrot.slane %v10729_v4, 2  ;;  %v1075_v4 = vrot.slane %v10740_v13, 2  ;;  %v1077_v13 = vrot.slane %v10751_v24, 2 }
 0x13a   : > { %1731 = vmatprep.mubr.bf16.mxu0 %v1015_v47  ;;  %v1079_v24 = vrot.slane %v10762_v33, 2  ;;  %v1081_v33 = vrot.slane %v10773_v46, 2  ;;  %v11080_v46 = vshrl.u32 %v427_v50, 7 }
 0x13b   : > { %v1072_v47 = vsel %vm15579_vm4, %v1069_v16, %v1071_v44  ;;  %v1074_v17 = vsel %vm15579_vm4, %v1071_v44, %v1073_v58  ;;  %v1078_v55 = vsel %vm15579_vm4, %v1075_v4, %v1077_v13 }
 0x13c   : > { %v1080_v59 = vsel %vm15579_vm4, %v1077_v13, %v1079_v24  ;;  %v1082_v63 = vsel %vm15579_vm4, %v1079_v24, %v1081_v33  ;;  %v431_v53 = vadd.s32 24, %v11080_v46  ;;  %v432_v0 = vadd.s32 32, %v11080_v46 }
 0x13d   : > { %v434_v61 = vadd.s32 48, %v11080_v46  ;;  %v435_v54 = vadd.s32 56, %v11080_v46  ;;  %v437_v14 = vadd.s32 72, %v11080_v46  ;;  %v439_v15 = vadd.s32 88, %v11080_v46 }
 0x13e   : > { %v440_v25 = vadd.s32 96, %v11080_v46  ;;  %v441_v29 = vadd.s32 104, %v11080_v46  ;;  %v443_v39 = vadd.s32 120, %v11080_v46  ;;  %v15743_v13 = vmov 0 }
 0x13f   : > { %v445_v24 = vadd.s32 136, %v11080_v46 }
 0x141   : > { %1732 = vmatmul.mubr.bf16.gmra.mrb[52].mxu0 %v932_v49  ;;  %v1076_v49 = vsel %vm15579_vm4, %v1073_v58, %v1075_v4 }
 0x142   : > { %1739 = vmatprep.mubr.bf16.mxu0 %v1019_v11  ;;  %v9897_v11 = vld [vmem:[%s15558_s3 + $0x48] sm:$0xff]  }
 0x143   : > { %3083 = vmatpush1.bf16.msra.mxu1 %v9897_v11 }
 0x144   : > { %3084 = vmatprep.subr.bf16.mxu1 %v15572_v1 }
 0x147   : > { %3085 = vmatpush1.bf16.msra.mxu1 %v9898_v62 }
 0x148   : > { %3086 = vmatprep.subr.bf16.mxu1 %v15572_v1 }
 0x149   : > { %1740 = vmatmul.mubr.bf16.gmra.mrb[56].mxu0 %v934_v34  ;;  %v9901_v34 = vld [vmem:[%s15558_s3 + $0x68] sm:$0xff]  }
 0x14a   : > { %1747 = vmatprep.mubr.bf16.mxu0 %v1023_v27  ;;  %v9902_v27 = vld [vmem:[%s15558_s3 + $0x70] sm:$0xff]  }
 0x14b   : > { %3087 = vmatpush1.bf16.msra.mxu1 %v9899_v37  ;;  %v444_v37 = vadd.s32 128, %v11080_v46 }
 0x14c   : > { %3088 = vmatprep.subr.bf16.mxu1 %v15572_v1 }
 0x14f   : > { %3089 = vmatpush1.bf16.msra.mxu1 %v9900_v31  ;;  %v446_v31 = vadd.s32 144, %v11080_v46 }
 0x150   : > { %3090 = vmatprep.subr.bf16.mxu1 %v15572_v1 }
 0x151   : > { %1748 = vmatmul.mubr.bf16.gmra.mrb[60].mxu0 %v936_v3  ;;  %v11087_v3 = vstv %s8085_s12 }
 0x152   : > { %1755 = vmatprep.mubr.bf16.mxu0 %v1029_v38  ;;  %v429_v38 = vadd.s32 8, %v11080_v46  ;;  %v464_v45 = vadd.s32 %v11087_v3, %v11080_v46  ;;  %v11119_v36 = vadd.s32 %v11087_v3, %v432_v0  ;;  %v11130_v44 = vadd.s32 %v11087_v3, %v435_v54 }
 0x153   : > { %3091 = vmatpush1.bf16.msra.mxu1 %v9901_v34  ;;  %v11137_v48 = vadd.s32 %v11087_v3, %v437_v14  ;;  %v11143_v26 = vadd.s32 %v11087_v3, %v439_v15  ;;  %v11152_v19 = vadd.s32 %v11087_v3, %v440_v25  ;;  %v11171_v33 = vadd.s32 %v11087_v3, %v443_v39 }
 0x154   : > { %3092 = vmatprep.subr.bf16.mxu1 %v15572_v1  ;;  %v465_v57 = vadd.s32 %v11087_v3, %v429_v38  ;;  %vm499_vm5 = vcmp.ge.s32.totalorder %v464_v45, 0  ;;  %vm534_vm6 = vcmp.lt.s32.totalorder %v464_v45, 300  ;;  %v449_v38 = vadd.s32 168, %v11080_v46 }
 0x155   : > { %vm11147_vm14 = vmand %vm499_vm5, %vm534_vm6  ;;  %vm503_vm5 = vcmp.ge.s32.totalorder %v11119_v36, 0  ;;  %vm538_vm6 = vcmp.lt.s32.totalorder %v11119_v36, 300  ;;  %v15746_v14 = vmov 0  ;;  %v453_v25 = vadd.s32 200, %v11080_v46 }
 0x156   : > { %vm500_vm7 = vcmp.ge.s32.totalorder %v465_v57, 0  ;;  %vm535_vm8 = vcmp.lt.s32.totalorder %v465_v57, 300  ;;  %v15741_v28 = vsel %vm11147_vm14, 4294967295, %v15740_v28  ;;  %v15755_v36 = vmov 0 }
 0x157   : > { %3093 = vmatpush1.bf16.msra.mxu1 %v9902_v27  ;;  %15742 = vst [vmem:[#allocation2_spill] sm:$0xff] %v15741_v28  ;;  %vm11162_vm15 = vmand %vm500_vm7, %vm535_vm8  ;;  %v447_v27 = vadd.s32 152, %v11080_v46 }
 0x158   : > { %3094 = vmatprep.subr.bf16.mxu1 %v15572_v1  ;;  %v15744_v13 = vsel %vm11162_vm15, 4294967295, %v15743_v13 }
 0x159   : > { %1756 = vmatmul.mubr.bf16.gmra.mrb[64].mxu0 %v938_v35  ;;  %15745 = vst [vmem:[#allocation3_spill] sm:$0xff] %v15744_v13  ;;  %v11200_v0 = vadd.s32 %v11087_v3, %v447_v27 }
 0x15a   : > { %8723 = vmatprep.mubr.msk.bf16.mxu0 %vm15567_vm3, %v15570_v60 }
 0x15b   : > { %3095 = vmatpush1.bf16.msra.mxu1 %v9903_v9 }
 0x15c   : > { %3233 = vmatprep.subr.bf16.mxu1 %v15572_v1 }
 0x161   : > { %8724 = vmatmul.mubr.bf16.vlgmr.msra.gmra.mrb[0].mxu0 %v1050_v21 }
 0x162   : > { %8727 = vmatprep.mubr.msk.bf16.mxu0 %vm15567_vm3, %v15570_v60 }
 0x169   : > { %8728 = vmatmul.mubr.bf16.gmra.mrb[4].mxu0 %v1052_v12  ;;  %v430_v12 = vadd.s32 16, %v11080_v46 }
 0x16a   : > { %8731 = vmatprep.mubr.msk.bf16.mxu0 %vm15567_vm3, %v15570_v60 }
 0x16b   : > { %v11098_v51 = vadd.s32 %v11087_v3, %v430_v12  ;;  %v11192_v12 = vadd.s32 %v11087_v3, %v445_v24 }
 0x16d   : > { %vm501_vm10 = vcmp.ge.s32.totalorder %v11098_v51, 0  ;;  %vm536_vm11 = vcmp.lt.s32.totalorder %v11098_v51, 300  ;;  %v15749_v51 = vmov 0 }
 0x171   : > { %8732 = vmatmul.mubr.bf16.gmra.mrb[8].mxu0 %v1054_v8  ;;  %v11101_v8 = vadd.s32 %v11087_v3, %v431_v53  ;;  %v11195_v53 = vadd.s32 %v11087_v3, %v446_v31 }
 0x172   : > { %8735 = vmatprep.mubr.msk.bf16.mxu0 %vm15567_vm3, %v15570_v60 }
 0x173   : > { %vm502_vm12 = vcmp.ge.s32.totalorder %v11101_v8, 0  ;;  %vm537_vm13 = vcmp.lt.s32.totalorder %v11101_v8, 300 }
 0x179   : > { %8736 = vmatmul.mubr.bf16.gmra.mrb[12].mxu0 %v1056_v30  ;;  %v433_v30 = vadd.s32 40, %v11080_v46 }
 0x17a   : > { %8739 = vmatprep.mubr.msk.bf16.mxu0 %vm15567_vm3, %v15570_v60 }
 0x181   : > { %8740 = vmatmul.mubr.bf16.gmra.mrb[16].mxu0 %v1058_v22 }
 0x182   : > { %8743 = vmatprep.mubr.msk.bf16.mxu0 %vm15567_vm3, %v15570_v60 }
 0x189   : > { %8744 = vmatmul.mubr.bf16.gmra.mrb[20].mxu0 %v1060_v56  ;;  %v436_v56 = vadd.s32 64, %v11080_v46 }
 0x18a   : > { %8747 = vmatprep.mubr.msk.bf16.mxu0 %vm15567_vm3, %v15570_v60 }
 0x191   : > { %8748 = vmatmul.mubr.bf16.gmra.mrb[24].mxu0 %v1062_v5  ;;  %v438_v5 = vadd.s32 80, %v11080_v46 }
 0x192   : > { %8751 = vmatprep.mubr.msk.bf16.mxu0 %vm15567_vm3, %v15570_v60 }
 0x193   : > { %v11140_v58 = vadd.s32 %v11087_v3, %v438_v5 }
 0x199   : > { %8752 = vmatmul.mubr.bf16.gmra.mrb[28].mxu0 %v1064_v7 }
 0x19a   : > { %8755 = vmatprep.mubr.msk.bf16.mxu0 %vm15567_vm3, %v15570_v60 }
 0x1a1   : > { %8756 = vmatmul.mubr.bf16.gmra.mrb[32].mxu0 %v1066_v32  ;;  %v442_v32 = vadd.s32 112, %v11080_v46 }
 0x1a2   : > { %8759 = vmatprep.mubr.msk.bf16.mxu0 %vm15567_vm3, %v15570_v60 }
 0x1a3   : > { %v11158_v11 = vadd.s32 %v11087_v3, %v442_v32 }
 0x1a9   : > { %8760 = vmatmul.mubr.bf16.gmra.mrb[36].mxu0 %v1068_v40  ;;  %v11122_v40 = vadd.s32 %v11087_v3, %v433_v30 }
 0x1aa   : > { %8763 = vmatprep.mubr.msk.bf16.mxu0 %vm15567_vm3, %v15570_v60 }
 0x1ab   : > { %vm504_vm7 = vcmp.ge.s32.totalorder %v11122_v40, 0  ;;  %vm539_vm8 = vcmp.lt.s32.totalorder %v11122_v40, 300 }
 0x1ac   : > { %vm11296_vm1 = vmand %vm504_vm7, %vm539_vm8  ;;  %vm15761_vm8 = vsmask.f32 6400 }
 0x1ad   : > { %v15756_v36 = vsel %vm11296_vm1, 4294967295, %v15755_v36 }
 0x1ae   : > { %15757 = vst [vmem:[#allocation7_spill] sm:$0xff] %v15756_v36 }
 0x1b1   : > { %8764 = vmatmul.mubr.bf16.gmra.mrb[40].mxu0 %v1070_v10  ;;  %v11127_v10 = vadd.s32 %v11087_v3, %v434_v61 }
 0x1b2   : > { %8767 = vmatprep.mubr.msk.bf16.mxu0 %vm15567_vm3, %v15570_v60 }
 0x1b9   : > { %8768 = vmatmul.mubr.bf16.gmra.mrb[44].mxu0 %v1072_v47  ;;  %v11134_v47 = vadd.s32 %v11087_v3, %v436_v56  ;;  %v11209_v56 = vadd.s32 %v11087_v3, %v449_v38 }
 0x1ba   : > { %8771 = vmatprep.mubr.msk.bf16.mxu0 %vm15567_vm3, %v15570_v60 }
 0x1c1   : > { %8772 = vmatmul.mubr.bf16.gmra.mrb[48].mxu0 %v1074_v17 }
 0x1c2   : > { %8775 = vmatprep.mubr.msk.bf16.mxu0 %vm15567_vm3, %v15570_v60 }
 0x1c9   : > { %8776 = vmatmul.mubr.bf16.gmra.mrb[52].mxu0 %v1076_v49  ;;  %v11155_v49 = vadd.s32 %v11087_v3, %v441_v29 }
 0x1ca   : > { %8779 = vmatprep.mubr.msk.bf16.mxu0 %vm15567_vm3, %v15570_v60 }
 0x1d1   : > { %8780 = vmatmul.mubr.bf16.gmra.mrb[56].mxu0 %v1078_v55 }
 0x1d2   : > { %8783 = vmatprep.mubr.msk.bf16.mxu0 %vm15567_vm3, %v15570_v60 }
 0x1d9   : > { %8784 = vmatmul.mubr.bf16.gmra.mrb[60].mxu0 %v1080_v59 }
 0x1da   : > { %8787 = vmatprep.mubr.msk.bf16.mxu0 %vm15567_vm3, %v15570_v60  ;;  %vm11215_vm3 = vmand %vm501_vm10, %vm536_vm11  ;;  %vm505_vm11 = vcmp.ge.s32.totalorder %v11127_v10, 0 }
 0x1db   : > { %v15747_v14 = vsel %vm11215_vm3, 4294967295, %v15746_v14  ;;  %vm11232_vm10 = vmand %vm502_vm12, %vm537_vm13  ;;  %vm540_vm12 = vcmp.lt.s32.totalorder %v11127_v10, 300  ;;  %v15764_v10 = vmov 0 }
 0x1dc   : > { %15748 = vst [vmem:[#allocation4_spill] sm:$0xff] %v15747_v14  ;;  %v15750_v51 = vsel %vm11232_vm10, 4294967295, %v15749_v51  ;;  %vm11282_vm13 = vmand %vm503_vm5, %vm538_vm6  ;;  %vm542_vm6 = vcmp.lt.s32.totalorder %v11134_v47, 300  ;;  %vm15762_vm5 = vcmp.lt.s32.totalorder %v11130_v44, 300 }
 0x1dd   : > { %15751 = vst [vmem:[#allocation5_spill] sm:$0xff] %v15750_v51  ;;  %vm11348_vm7 = vmand %vm505_vm11, %vm540_vm12  ;;  %vm15763_vm11 = vcmp.ge.s32.totalorder %v11130_v44, 0 }
 0x1de   : > { %vm11366_vm12 = vmand %vm15763_vm11, %vm15762_vm5  ;;  %vm15770_vm11 = vcmp.ge.s32.totalorder %v11134_v47, 0  ;;  %v15776_v47 = vmov 0 }
 0x1df   : > { %v15765_v10 = vsel %vm11366_vm12, 4294967295, %v15764_v10  ;;  %vm11423_vm5 = vmand %vm15770_vm11, %vm542_vm6  ;;  %vm15775_vm6 = vcmp.ge.s32.totalorder %v11137_v48, 0 }
 0x1e0   : > { %15766 = vst [vmem:[#allocation9_spill] sm:$0xff] %v15765_v10 }
 0x1e1   : > { %8788 = vmatmul.mubr.bf16.gmra.mrb[64].mxu0 %v1082_v63  ;;  %v448_v63 = vadd.s32 160, %v11080_v46 }
 0x1e3   : > { %v11203_v30 = vadd.s32 %v11087_v3, %v448_v63 }
 0x234   : > { %v1798_v42 = vpop.f32.mrb[0].mxu0 }
 0x235   : > { %v9107_v35 = vadd.f32 %v11085_v41, %v1798_v42  ;;  %v8725_v52 = vpop.f32.mrb[1].mxu0  ;;  %v450_v42 = vadd.s32 176, %v11080_v46 }
 0x236   : > { %v1801_v21 = vpop.f32.mrb[2].mxu0 }
 0x237   : > { %10048 = vtanh.f32 %v9107_v35  ;;  %v9108_v23 = vadd.f32 %v11085_v41, %v1801_v21  ;;  %v8726_v6 = vpop.f32.mrb[3].mxu0  ;;  %v451_v35 = vadd.s32 184, %v11080_v46  ;;  %v11220_v5 = vadd.s32 %v11087_v3, %v450_v42 }
 0x238   : > { %v11189_v6 = vadd.s32 %v11087_v3, %v444_v37  ;;  %v11260_v42 = vadd.s32 %v11087_v3, %v453_v25 }
 0x239   : > { %10050 = vtanh.f32 %v9108_v23  ;;  %v11223_v15 = vadd.s32 %v11087_v3, %v451_v35 }
 0x23c   : > { %v1806_v43 = vpop.f32.mrb[4].mxu0 }
 0x23d   : > { %v9109_v18 = vadd.f32 %v11085_v41, %v1806_v43  ;;  %v8729_v22 = vpop.f32.mrb[5].mxu0 }
 0x23e   : > { %v1809_v20 = vpop.f32.mrb[6].mxu0 }
 0x23f   : > { %10052 = vtanh.f32 %v9109_v18  ;;  %v9110_v7 = vadd.f32 %v11085_v41, %v1809_v20  ;;  %v8730_v2 = vpop.f32.mrb[7].mxu0  ;;  %v452_v18 = vadd.s32 192, %v11080_v46 }
 0x241   : > { %v10049_v16 = vpop.eup %10048  ;;  %10054 = vtanh.f32 %v9110_v7  ;;  %v454_v7 = vadd.s32 208, %v11080_v46 }
 0x242   : > { %v2072_v4 = vrot.slane %v10049_v16, 6  ;;  %v455_v16 = vadd.s32 216, %v11080_v46 }
 0x243   : > { %v10051_v17 = vpop.eup %10050  ;;  %v11263_v35 = vadd.s32 %v11087_v3, %v454_v7  ;;  %v15752_v7 = vmov 0 }
 0x244   : > { %v2073_v62 = vrot.slane %v10051_v17, 6  ;;  %v1814_v55 = vpop.f32.mrb[8].mxu0  ;;  %v2174_v52 = vsel %vm11147_vm14, %v2072_v4, 0.0  ;;  %v15753_v7 = vsel %vm11282_vm13, 4294967295, %v15752_v7 }
 0x245   : > { %v9111_v59 = vadd.f32 %v11085_v41, %v1814_v55  ;;  %v8733_v34 = vpop.f32.mrb[9].mxu0  ;;  %v11241_v55 = vadd.s32 %v11087_v3, %v452_v18  ;;  %15754 = vst [vmem:[#allocation6_spill] sm:$0xff] %v15753_v7 }
 0x246   : > { %v2074_v9 = vsel %vm15597_vm9, %v2072_v4, %v2073_v62  ;;  %v1817_v50 = vpop.f32.mrb[10].mxu0  ;;  %v457_v34 = vadd.s32 232, %v11080_v46 }
 0x247   : > { %v2175_v45 = vsel %vm11162_vm15, %v2074_v9, 0.0  ;;  %10056 = vtanh.f32 %v9111_v59  ;;  %v9112_v21 = vadd.f32 %v11085_v41, %v1817_v50  ;;  %v8734_v57 = vpop.f32.mrb[11].mxu0 }
 0x248   : > { %v11184_v23 = vpack.c.bf16 %v2175_v45, %v2174_v52  ;;  %v11266_v52 = vadd.s32 %v11087_v3, %v455_v16  ;;  %v459_v16 = vadd.s32 248, %v11080_v46 }
 0x249   : > { %v10053_v43 = vpop.eup %10052  ;;  %10058 = vtanh.f32 %v9112_v21 }
 0x24a   : > { %v2075_v22 = vrot.slane %v10053_v43, 6  ;;  %v2229_v61 = vshrl.u32 %v11184_v23, 16  ;;  %v2231_v54 = vshll.u32 %v11184_v23, 16  ;;  %v2380_v21 = vrot.slane %v11184_v23, 1 }
 0x24b   : > { %v10055_v20 = vpop.eup %10054  ;;  %v458_v43 = vadd.s32 240, %v11080_v46 }
 0x24c   : > { %v2076_v2 = vsel %vm15597_vm9, %v2073_v62, %v2075_v22  ;;  %v2077_v29 = vrot.slane %v10055_v20, 6  ;;  %v1822_v32 = vpop.f32.mrb[12].mxu0  ;;  %v11237_v39 = vrot.slane %v2229_v61, 1  ;;  %v456_v62 = vadd.s32 224, %v11080_v46 }
 0x24d   : > { %v9113_v17 = vadd.f32 %v11085_v41, %v1822_v32  ;;  %v8737_v4 = vpop.f32.mrb[13].mxu0  ;;  %v11244_v37 = vrot.slane %v2231_v54, 2  ;;  %v2176_v8 = vsel %vm11215_vm3, %v2076_v2, 0.0  ;;  %v2233_v59 = vrot.slane %v2231_v54, 1 }
 0x24e   : > { %v2078_v24 = vsel %vm15597_vm9, %v2075_v22, %v2077_v29  ;;  %v1825_v31 = vpop.f32.mrb[14].mxu0  ;;  %v11272_v57 = vadd.s32 %v11087_v3, %v456_v62  ;;  %v11287_v32 = vadd.s32 %v11087_v3, %v457_v34  ;;  %v11305_v34 = vadd.s32 %v11087_v3, %v458_v43 }
 0x24f   : > { %v2177_v27 = vsel %vm11232_vm10, %v2078_v24, 0.0  ;;  %10060 = vtanh.f32 %v9113_v17  ;;  %v9114_v63 = vadd.f32 %v11085_v41, %v1825_v31  ;;  %v8738_v9 = vpop.f32.mrb[15].mxu0  ;;  %v2415_v50 = vor.u32 %v11244_v37, %v11237_v39 }
 0x250   : > { %v11255_v38 = vpack.c.bf16 %v2177_v27, %v2176_v8  ;;  %v2234_v2 = vor.u32 %v2233_v59, %v2229_v61 }
 0x251   : > { %v10057_v45 = vpop.eup %10056  ;;  %10062 = vtanh.f32 %v9114_v63 }
 0x252   : > { %v2079_v18 = vrot.slane %v10057_v45, 6  ;;  %v2236_v22 = vshll.u32 %v11255_v38, 16  ;;  %v2240_v54 = vshrl.u32 %v11255_v38, 16  ;;  %v2381_v20 = vrot.slane %v11255_v38, 1 }
 0x253   : > { %v10059_v25 = vpop.eup %10058  ;;  %v15574_v17 = vrot.slane %v11255_v38, 2 }
 0x254   : > { %v2080_v4 = vsel %vm15597_vm9, %v2077_v29, %v2079_v18  ;;  %v2081_v62 = vrot.slane %v10059_v25, 6  ;;  %v1830_v8 = vpop.f32.mrb[16].mxu0  ;;  %v2238_v61 = vrot.slane %v2236_v22, 1  ;;  %v11301_v24 = vsel %vm15591_vm2, %v2380_v21, %v2381_v20 }
 0x255   : > { %v9115_v31 = vadd.f32 %v11085_v41, %v1830_v8  ;;  %v8741_v59 = vpop.f32.mrb[17].mxu0  ;;  %v460_v29 = vadd.s32 256, %v11080_v46  ;;  %v2416_v27 = vrot.slane %v2240_v54, 1  ;;  %v2417_v45 = vrot.slane %v2236_v22, 2 }
 0x256   : > { %v2082_v40 = vsel %vm15597_vm9, %v2079_v18, %v2081_v62  ;;  %v1833_v63 = vpop.f32.mrb[18].mxu0  ;;  %v11310_v9 = vsel %vm15590_vm0, %v2234_v2, %v2238_v61  ;;  %v2486_v25 = vrot.slane %v11184_v23, 2  ;;  %v2178_v21 = vsel %vm11282_vm13, %v2080_v4, 0.0 }
 0x257   : > { %v2179_v8 = vsel %vm11296_vm1, %v2082_v40, 0.0  ;;  %10064 = vtanh.f32 %v9115_v31  ;;  %v9116_v43 = vadd.f32 %v11085_v41, %v1833_v63  ;;  %v8742_v59 = vpop.f32.mrb[19].mxu0  ;;  %v11323_v18 = vadd.s32 %v11087_v3, %v459_v16 }
 0x258   : > { %v11318_v60 = vpack.c.bf16 %v2179_v8, %v2178_v21  ;;  %v11325_v23 = vor.u32 %v2417_v45, %v2416_v27  ;;  %v11330_v22 = vsel %vm15579_vm4, %v2486_v25, %v15574_v17  ;;  %v11335_v4 = vadd.s32 %v11087_v3, %v460_v29 }
 0x259   : > { %v10061_v2 = vpop.eup %10060  ;;  %10066 = vtanh.f32 %v9116_v43  ;;  %v11338_v31 = vadd.s32 264, %v11080_v46  ;;  %v462_v16 = vadd.s32 272, %v11080_v46  ;;  %v15758_v29 = vmov 0 }
 0x25a   : > { %v2083_v27 = vrot.slane %v10061_v2, 6  ;;  %v2244_v40 = vshll.u32 %v11318_v60, 16  ;;  %v2248_v63 = vshrl.u32 %v11318_v60, 16  ;;  %v2383_v45 = vrot.slane %v11318_v60, 1 }
 0x25b   : > { %v10063_v25 = vpop.eup %10062  ;;  %v15759_v29 = vsel %vm11348_vm7, 4294967295, %v15758_v29  ;;  %v2242_v21 = vor.u32 %v2240_v54, %v2238_v61  ;;  %v2607_v8 = vrot.slane %v11310_v9, 1  ;;  %v2610_v46 = vrot.slane %v11301_v24, 1 }
 0x25c   : > { %15760 = vst [vmem:[#allocation8_spill] sm:$0xff] %v15759_v29  ;;  %v11359_v43 = vsel %vm15761_vm8, %v2415_v50, %v11325_v23  ;;  %v2084_v59 = vsel %vm15597_vm9, %v2081_v62, %v2083_v27  ;;  %v2085_v54 = vrot.slane %v10063_v25, 6  ;;  %v1838_v61 = vpop.f32.mrb[20].mxu0  ;;  %v2246_v9 = vrot.slane %v2244_v40, 1 }
 0x25d   : > { %v11371_v2 = vsel %vm15591_vm2, %v2381_v20, %v2383_v45  ;;  %v9117_v39 = vadd.f32 %v11085_v41, %v1838_v61  ;;  %v8745_v37 = vpop.f32.mrb[21].mxu0  ;;  %v2420_v62 = vrot.slane %v2248_v63, 1  ;;  %v2180_v44 = vsel %vm11348_vm7, %v2084_v59, 0.0 }
 0x25e   : > { %v2086_v17 = vsel %vm15597_vm9, %v2083_v27, %v2085_v54  ;;  %v1841_v36 = vpop.f32.mrb[22].mxu0  ;;  %v11380_v25 = vsel %vm15590_vm0, %v2242_v21, %v2246_v9  ;;  %v2421_v7 = vrot.slane %v2244_v40, 2  ;;  %v9904_v27 = vld [vmem:[%s15558_s3 + $0x80] sm:$0xff]   ;;  %v11394_v40 = vadd.s32 %v11087_v3, %v462_v16 }
 0x25f   : > { %v2181_v20 = vsel %vm11366_vm12, %v2086_v17, 0.0  ;;  %10068 = vtanh.f32 %v9117_v39  ;;  %v9118_v61 = vadd.f32 %v11085_v41, %v1841_v36  ;;  %v8746_v37 = vpop.f32.mrb[23].mxu0  ;;  %v15580_v50 = vrot.slane %v11380_v25, 1 }
 0x260   : > { %v11386_v1 = vpack.c.bf16 %v2181_v20, %v2180_v44  ;;  %v11396_v17 = vor.u32 %v2421_v7, %v2420_v62  ;;  %v15767_v36 = vrot.slane %v11371_v2, 1  ;;  %v15768_v16 = vrot.slane %v11318_v60, 2 }
 0x261   : > { %v10065_v59 = vpop.eup %10064  ;;  %10070 = vtanh.f32 %v9118_v61  ;;  %v2609_v39 = vsel %vm15591_vm2, %v2607_v8, %v15580_v50  ;;  %v15769_v7 = vrot.slane %v11255_v38, 2  ;;  %v15771_v38 = vmov 0 }
 0x262   : > { %v11401_v21 = vsel %vm15591_vm2, %v2610_v46, %v15767_v36  ;;  %v2616_v46 = vrot.slane %v11330_v22, 1  ;;  %v2087_v44 = vrot.slane %v10065_v59, 6  ;;  %3096 = vmatprep.mubr.bf16.mxu1 %v2609_v39  ;;  %v2252_v20 = vshll.u32 %v11386_v1, 16 }
 0x263   : > { %v11413_v62 = vsel %vm15579_vm4, %v15769_v7, %v15768_v16  ;;  %v2256_v37 = vshrl.u32 %v11386_v1, 16  ;;  %v15585_v61 = vrot.slane %v11386_v1, 1  ;;  %v10067_v36 = vpop.eup %10066  ;;  %v15772_v38 = vsel %vm11423_vm5, 4294967295, %v15771_v38  ;;  %3097 = vmatmul.mubr.bf16.vlgmr.msra.gmra.mrb[0].mxu1 %v11301_v24 }
 0x264   : > { %15773 = vst [vmem:[#allocation10_spill] sm:$0xff] %v15772_v38  ;;  %v2250_v22 = vor.u32 %v2248_v63, %v2246_v9  ;;  %v11431_v8 = vsel %vm15761_vm8, %v11325_v23, %v11396_v17  ;;  %v2613_v59 = vrot.slane %v11359_v43, 1  ;;  %v2088_v16 = vsel %vm15597_vm9, %v2085_v54, %v2087_v44  ;;  %v1846_v63 = vpop.f32.mrb[24].mxu0  ;;  %3234 = vmatpush1.bf16.msra.mxu1 %v9904_v27  ;;  %v9905_v23 = vld [vmem:[%s15558_s3 + $0x88] sm:$0xff]  }
 0x265   : > { %vm15774_vm4 = vcmp.lt.s32.totalorder %v11137_v48, 300  ;;  %v2089_v24 = vrot.slane %v10067_v36, 6  ;;  %v2254_v9 = vrot.slane %v2252_v20, 1  ;;  %v11450_v43 = vsel %vm15591_vm2, %v2383_v45, %v15585_v61  ;;  %v8749_v48 = vpop.f32.mrb[25].mxu0 }
 0x266   : > { %vm11440_vm11 = vmand %vm15775_vm6, %vm15774_vm4  ;;  %v9119_v54 = vadd.f32 %v11085_v41, %v1846_v63  ;;  %v15779_v7 = vmov 0   ;;  %v15586_v36 = vrot.slane %v11431_v8, 1  ;;  %v2182_v50 = vsel %vm11423_vm5, %v2088_v16, 0.0  ;;  %v1849_v29 = vpop.f32.mrb[26].mxu0 }
 0x267   : > { %v15777_v47 = vsel %vm11440_vm11, 4294967295, %v15776_v47  ;;  %3235 = vmatprep.subr.bf16.mxu1 %v15779_v7  ;;  %v2090_v10 = vsel %vm15597_vm9, %v2087_v44, %v2089_v24  ;;  %v11461_v45 = vsel %vm15590_vm0, %v2250_v22, %v2254_v9  ;;  %v2424_v61 = vrot.slane %v2256_v37, 1  ;;  %v8750_v27 = vpop.f32.mrb[27].mxu0  ;;  %v9906_v44 = vld [vmem:[%s15558_s3 + $0x90] sm:$0xff]  }
 0x268   : > { %15778 = vst [vmem:[#allocation11_spill] sm:$0xff] %v15777_v47  ;;  %v2183_v63 = vsel %vm11440_vm11, %v2090_v10, 0.0  ;;  %10072 = vtanh.f32 %v9119_v54  ;;  %v9120_v48 = vadd.f32 %v11085_v41, %v1849_v29  ;;  %v15587_v16 = vrot.slane %v11461_v45, 1  ;;  %3236 = vmatpush1.bf16.msra.mxu1 %v9905_v23 }
 0x269   : > { %v11469_v39 = vpack.c.bf16 %v2183_v63, %v2182_v50  ;;  %v11477_v10 = vsel %vm15591_vm2, %v2613_v59, %v15586_v36  ;;  %v2425_v22 = vrot.slane %v2252_v20, 2  ;;  %v15780_v54 = vrot.slane %v11450_v43, 1  ;;  %v10069_v50 = vpop.eup %10068  ;;  %3237 = vmatprep.subr.bf16.mxu1 %v15779_v7 }
 0x26a   : > { %v15781_v29 = vrot.slane %v11371_v2, 1  ;;  %10074 = vtanh.f32 %v9120_v48  ;;  %v15782_v23 = vrot.slane %v11380_v25, 1  ;;  %v15783_v20 = vrot.slane %v11413_v62, 1 }
 0x26b   : > { %vm15786_vm6 = vcmask 1045504   ;;  %v2091_v48 = vrot.slane %v10069_v50, 6  ;;  %v2260_v25 = vshll.u32 %v11469_v39, 16  ;;  %v10071_v47 = vpop.eup %10070  ;;  %vm15787_vm4 = vcmp.lt.s32.totalorder %v11140_v58, 300 }
 0x26c   : > { %v11484_v27 = vsel %vm15591_vm2, %v15781_v29, %v15780_v54  ;;  %v2620_v59 = vsel %vm15591_vm2, %v15782_v23, %v15587_v16  ;;  %v11497_v63 = vsel %vm15591_vm2, %v2616_v46, %v15783_v20  ;;  %v15784_v54 = vrot.slane %v11386_v1, 2  ;;  %3238 = vmatpush1.bf16.msra.mxu1 %v9906_v44 }
 0x26d   : > { %v15785_v29 = vrot.slane %v11318_v60, 2  ;;  %3104 = vmatprep.mubr.bf16.mxu1 %v2620_v59  ;;  %v15594_v23 = vrot.slane %v11469_v39, 1  ;;  %v11510_v16 = vadd.s32 %v11087_v3, %v11338_v31  ;;  %vm15788_vm8 = vcmp.ge.s32.totalorder %v11140_v58, 0  ;;  %3239 = vmatprep.subr.bf16.mxu1 %v15779_v7 }
 0x26e   : > { %vm11516_vm0 = vmand %vm15788_vm8, %vm15787_vm4  ;;  %v15789_v60 = vmov 0  ;;  %3105 = vmatmul.mubr.bf16.gmra.mrb[4].mxu1 %v11371_v2  ;;  %v2258_v46 = vor.u32 %v2256_v37, %v2254_v9  ;;  %v2264_v50 = vshrl.u32 %v11469_v39, 16  ;;  %v11522_v59 = vor.u32 %v2425_v22, %v2424_v61 }
 0x26f   : > { %v11504_v36 = vsel %vm15786_vm6, %v15785_v29, %v15784_v54  ;;  %v15790_v60 = vsel %vm11516_vm0, 4294967295, %v15789_v60  ;;  %v2092_v3 = vsel %vm15597_vm9, %v2089_v24, %v2091_v48  ;;  %vm15792_vm6 = vcmp.lt.s32.totalorder %v11143_v26, 300  ;;  %v1854_v54 = vpop.f32.mrb[28].mxu0  ;;  %v9907_v24 = vld [vmem:[%s15558_s3 + $0x98] sm:$0xff]  }
 0x270   : > { %15791 = vst [vmem:[#allocation12_spill] sm:$0xff] %v15790_v60  ;;  %vm15793_vm2 = vcmp.ge.s32.totalorder %v11143_v26, 0  ;;  %v15794_v58 = vmov 0  ;;  %v2093_v31 = vrot.slane %v10071_v47, 6  ;;  %v2262_v2 = vrot.slane %v2260_v25, 1  ;;  %v8753_v9 = vpop.f32.mrb[29].mxu0  ;;  %3240 = vmatpush1.bf16.msra.mxu1 %v9907_v24 }
 0x271   : > { %vm11530_vm11 = vmand %vm15793_vm2, %vm15792_vm6  ;;  %v15797_v37 = vrot.slane %v11386_v1, 1  ;;  %vm15798_vm4 = vcmask 1046528   ;;  %v9121_v26 = vadd.f32 %v11085_v41, %v1854_v54  ;;  %vm15799_vm2 = vsmask.f32 6400  ;;  %3241 = vmatprep.subr.bf16.mxu1 %v15779_v7 }
 0x272   : > { %v15795_v58 = vsel %vm11530_vm11, 4294967295, %v15794_v58  ;;  %v11550_v47 = vsel %vm15799_vm2, %v11396_v17, %v11522_v59  ;;  %v2184_v29 = vsel %vm11516_vm0, %v2092_v3, 0.0  ;;  %vm15800_vm8 = vsmask.f32 7424  ;;  %vm15802_vm2 = vmmov %vm15798_vm4 }
 0x273   : > { %15796 = vst [vmem:[#allocation13_spill] sm:$0xff] %v15795_v58  ;;  %v11539_v61 = vsel %vm15798_vm4, %v15797_v37, %v15594_v23  ;;  %v2094_v37 = vsel %vm15597_vm9, %v2091_v48, %v2093_v31  ;;  %v1857_v23 = vpop.f32.mrb[30].mxu0  ;;  %v11557_v54 = vsel %vm15800_vm8, %v2258_v46, %v2262_v2  ;;  %v15599_v9 = vrot.slane %v11550_v47, 1  ;;  %v9908_v46 = vld [vmem:[%s15558_s3 + $0xa0] sm:$0xff]   ;;  %vm15804_vm4 = vmmov %vm15802_vm2 }
 0x274   : > { %v2185_v20 = vsel %vm11530_vm11, %v2094_v37, 0.0  ;;  %10076 = vtanh.f32 %v9121_v26  ;;  %v9122_v17 = vadd.f32 %v11085_v41, %v1857_v23  ;;  %v8754_v44 = vpop.f32.mrb[31].mxu0  ;;  %v15598_v3 = vrot.slane %v11557_v54, 1  ;;  %v10073_v23 = vpop.eup %10072  ;;  %vm15809_vm8 = vmmov %vm15802_vm2  ;;  %3242 = vmatpush1.bf16.msra.mxu1 %v9908_v46 }
 0x275   : > { %v11566_v48 = vpack.c.bf16 %v2185_v20, %v2184_v29  ;;  %v15801_v37 = vrot.slane %v11431_v8, 1  ;;  %v2428_v26 = vrot.slane %v2264_v50, 1  ;;  %v2429_v58 = vrot.slane %v2260_v25, 2  ;;  %3243 = vmatprep.subr.bf16.mxu1 %v15779_v7 }
 0x276   : > { %10078 = vtanh.f32 %v9122_v17  ;;  %v15803_v20 = vrot.slane %v11461_v45, 1  ;;  %v15805_v8 = vrot.slane %v11539_v61, 1  ;;  %v15806_v44 = vrot.slane %v11450_v43, 1 }
 0x277   : > { %v11576_v22 = vsel %vm15802_vm2, %v15801_v37, %v15599_v9  ;;  %v15807_v29 = vrot.slane %v11504_v36, 1  ;;  %v15808_v37 = vrot.slane %v11413_v62, 1  ;;  %vm15810_vm6 = vcmp.lt.s32.totalorder %v11152_v19, 300  ;;  %v10075_v9 = vpop.eup %10074 }
 0x278   : > { %v2628_v24 = vsel %vm15804_vm4, %v15803_v20, %v15598_v3  ;;  %v11591_v25 = vsel %vm15802_vm2, %v15806_v44, %v15805_v8  ;;  %vm15811_vm4 = vcmp.ge.s32.totalorder %v11152_v19, 0  ;;  %v15812_v45 = vmov 0 }
 0x279   : > { %v11598_v17 = vsel %vm15809_vm8, %v15808_v37, %v15807_v29  ;;  %vm11604_vm9 = vmand %vm15811_vm4, %vm15810_vm6  ;;  %v2095_v20 = vrot.slane %v10073_v23, 6  ;;  %3112 = vmatprep.mubr.bf16.mxu1 %v2628_v24  ;;  %v2266_v3 = vor.u32 %v2264_v50, %v2262_v2  ;;  %v2268_v8 = vshll.u32 %v11566_v48, 16 }
 0x27a   : > { %v15813_v45 = vsel %vm11604_vm9, 4294967295, %v15812_v45  ;;  %v15604_v44 = vrot.slane %v11566_v48, 1  ;;  %3113 = vmatmul.mubr.bf16.gmra.mrb[8].mxu1 %v11450_v43  ;;  %v2272_v62 = vshrl.u32 %v11566_v48, 16  ;;  %v11612_v29 = vor.u32 %v2429_v58, %v2428_v26  ;;  %v1862_v26 = vpop.f32.mrb[32].mxu0 }
 0x27b   : > { %15814 = vst [vmem:[#allocation14_spill] sm:$0xff] %v15813_v45  ;;  %v15815_v19 = vrot.slane %v11469_v39, 2  ;;  %v15816_v37 = vrot.slane %v11386_v1, 2  ;;  %vm15817_vm6 = vcmask 1045504   ;;  %vm15818_vm8 = vcmask 1041408  }
 0x27c   : > { %v2096_v2 = vsel %vm15818_vm8, %v2093_v31, %v2095_v20  ;;  %vm15819_vm2 = vcmp.lt.s32.totalorder %v11155_v49, 300  ;;  %vm15820_vm4 = vcmp.ge.s32.totalorder %v11155_v49, 0  ;;  %v15821_v43 = vmov 0  ;;  %v9909_v31 = vld [vmem:[%s15558_s3 + $0xa8] sm:$0xff]  }
 0x27d   : > { %v11619_v60 = vsel %vm15817_vm6, %v15816_v37, %v15815_v19  ;;  %vm11627_vm11 = vmand %vm15820_vm4, %vm15819_vm2  ;;  %v2097_v58 = vrot.slane %v10075_v9, 6  ;;  %v2270_v23 = vrot.slane %v2268_v8, 1  ;;  %v15824_v1 = vrot.slane %v11469_v39, 1  ;;  %v8757_v9 = vpop.f32.mrb[33].mxu0  ;;  %3244 = vmatpush1.bf16.msra.mxu1 %v9909_v31 }
 0x27e   : > { %v15822_v43 = vsel %vm11627_vm11, 4294967295, %v15821_v43  ;;  %vm15825_vm6 = vcmask 1046528   ;;  %v2186_v49 = vsel %vm11604_vm9, %v2096_v2, 0.0  ;;  %v9123_v19 = vadd.f32 %v11085_v41, %v1862_v26  ;;  %3245 = vmatprep.subr.bf16.mxu1 %v15779_v7 }
 0x27f   : > { %15823 = vst [vmem:[#allocation15_spill] sm:$0xff] %v15822_v43  ;;  %v11636_v24 = vsel %vm15825_vm6, %v15824_v1, %v15604_v44  ;;  %vm15826_vm8 = vsmask.f32 6400  ;;  %vm15827_vm2 = vcmask 1041408   ;;  %v1865_v44 = vpop.f32.mrb[34].mxu0  ;;  %v2274_v45 = vor.u32 %v2272_v62, %v2270_v23 }
 0x280   : > { %v11649_v1 = vsel %vm15826_vm8, %v11522_v59, %v11612_v29  ;;  %v2098_v46 = vsel %vm15827_vm2, %v2095_v20, %v2097_v58  ;;  %vm15828_vm4 = vsmask.f32 7424  ;;  %10080 = vtanh.f32 %v9123_v19  ;;  %v8758_v9 = vpop.f32.mrb[35].mxu0  ;;  %vm15830_vm8 = vmmov %vm15825_vm6 }
 0x281   : > { %v11653_v50 = vsel %vm15828_vm4, %v2266_v3, %v2270_v23  ;;  %v15612_v2 = vrot.slane %v11649_v1, 1  ;;  %v2187_v26 = vsel %vm11627_vm11, %v2098_v46, 0.0  ;;  %v9124_v59 = vadd.f32 %v11085_v41, %v1865_v44  ;;  %v9910_v3 = vld [vmem:[%s15558_s3 + $0xb0] sm:$0xff]   ;;  %v10077_v44 = vpop.eup %10076 }
 0x282   : > { %v15611_v20 = vrot.slane %v11653_v50, 1  ;;  %v11662_v37 = vpack.c.bf16 %v2187_v26, %v2186_v49  ;;  %v15829_v23 = vrot.slane %v11550_v47, 1  ;;  %v2432_v19 = vrot.slane %v2272_v62, 1  ;;  %3246 = vmatpush1.bf16.msra.mxu1 %v9910_v3 }
 0x283   : > { %v2433_v43 = vrot.slane %v2268_v8, 2  ;;  %10082 = vtanh.f32 %v9124_v59  ;;  %v15831_v31 = vrot.slane %v11557_v54, 1  ;;  %v15832_v47 = vrot.slane %v11636_v24, 1  ;;  %3247 = vmatprep.subr.bf16.mxu1 %v15779_v7 }
 0x284   : > { %v11672_v46 = vsel %vm15830_vm8, %v15829_v23, %v15612_v2  ;;  %v15833_v26 = vrot.slane %v11539_v61, 1  ;;  %vm15834_vm8 = vmmov %vm15825_vm6  ;;  %v15617_v62 = vrot.slane %v11619_v60, 1  ;;  %vm15835_vm2 = vcmp.lt.s32.totalorder %v11158_v11, 300 }
 0x285   : > { %v2636_v49 = vsel %vm15825_vm6, %v15831_v31, %v15611_v20  ;;  %vm15836_vm4 = vcmp.ge.s32.totalorder %v11158_v11, 0  ;;  %v15837_v59 = vmov 0  ;;  %v2099_v54 = vrot.slane %v10077_v44, 6 }
 0x286   : > { %v11687_v8 = vsel %vm15834_vm8, %v15833_v26, %v15832_v47  ;;  %vm11694_vm9 = vmand %vm15836_vm4, %vm15835_vm2  ;;  %3120 = vmatprep.mubr.bf16.mxu1 %v2636_v49  ;;  %v2276_v9 = vshll.u32 %v11662_v37, 16  ;;  %v2280_v23 = vshrl.u32 %v11662_v37, 16  ;;  %v10079_v47 = vpop.eup %10078  ;;  %v11702_v26 = vor.u32 %v2433_v43, %v2432_v19  ;;  %v1870_v19 = vpop.f32.mrb[36].mxu0 }
 0x287   : > { %v15838_v59 = vsel %vm11694_vm9, 4294967295, %v15837_v59  ;;  %3121 = vmatmul.mubr.bf16.gmra.mrb[12].mxu1 %v11539_v61  ;;  %v15840_v11 = vrot.slane %v11504_v36, 1  ;;  %v15841_v44 = vrot.slane %v11566_v48, 2  ;;  %v15842_v49 = vrot.slane %v11469_v39, 2 }
 0x288   : > { %15839 = vst [vmem:[#allocation16_spill] sm:$0xff] %v15838_v59  ;;  %vm15843_vm2 = vcmask 1045504   ;;  %vm15844_vm4 = vcmask 1041408   ;;  %vm15845_vm8 = vcmp.lt.s32.totalorder %v11171_v33, 300  ;;  %vm15846_vm11 = vcmp.ge.s32.totalorder %v11171_v33, 0 }
 0x289   : > { %v11709_v20 = vsel %vm15825_vm6, %v15840_v11, %v15617_v62  ;;  %v11716_v2 = vsel %vm15843_vm2, %v15842_v49, %v15841_v44  ;;  %v2100_v61 = vsel %vm15844_vm4, %v2097_v58, %v2099_v54  ;;  %vm11724_vm0 = vmand %vm15846_vm11, %vm15845_vm8  ;;  %v15847_v36 = vmov 0  ;;  %v9911_v58 = vld [vmem:[%s15558_s3 + $0xb8] sm:$0xff]  }
 0x28a   : > { %v15848_v36 = vsel %vm11724_vm0, 4294967295, %v15847_v36  ;;  %v2101_v43 = vrot.slane %v10079_v47, 6  ;;  %v2278_v11 = vrot.slane %v2276_v9, 1  ;;  %v15850_v39 = vrot.slane %v11662_v37, 1  ;;  %v8761_v47 = vpop.f32.mrb[37].mxu0  ;;  %vm15853_vm2 = vmmov %vm15844_vm4  ;;  %3248 = vmatpush1.bf16.msra.mxu1 %v9911_v58 }
 0x28b   : > { %15849 = vst [vmem:[#allocation17_spill] sm:$0xff] %v15848_v36  ;;  %v15851_v44 = vrot.slane %v11566_v48, 1  ;;  %v2188_v33 = vsel %vm11694_vm9, %v2100_v61, 0.0  ;;  %v9125_v31 = vadd.f32 %v11085_v41, %v1870_v19  ;;  %vm15852_vm11 = vsmask.f32 6400  ;;  %vm15858_vm8 = vmmov %vm15825_vm6  ;;  %3249 = vmatprep.subr.bf16.mxu1 %v15779_v7 }
 0x28c   : > { %v2102_v3 = vsel %vm15853_vm2, %v2099_v54, %v2101_v43  ;;  %vm15854_vm4 = vsmask.f32 7424  ;;  %v2282_v59 = vor.u32 %v2280_v23, %v2278_v11  ;;  %v2437_v36 = vrot.slane %v2276_v9, 2 }
 0x28d   : > { %v11733_v49 = vsel %vm15825_vm6, %v15851_v44, %v15850_v39  ;;  %v11746_v39 = vsel %vm15852_vm11, %v11612_v29, %v11702_v26  ;;  %v1873_v44 = vpop.f32.mrb[38].mxu0  ;;  %v11750_v38 = vsel %vm15854_vm4, %v2274_v45, %v2278_v11  ;;  %v2189_v19 = vsel %vm11724_vm0, %v2102_v3, 0.0  ;;  %v9912_v45 = vld [vmem:[%s15558_s3 + $0xc0] sm:$0xff]   ;;  %vm15856_vm11 = vmmov %vm15825_vm6 }
 0x28e   : > { %v15625_v61 = vrot.slane %v11746_v39, 1  ;;  %10084 = vtanh.f32 %v9125_v31  ;;  %v9126_v29 = vadd.f32 %v11085_v41, %v1873_v44  ;;  %v8762_v47 = vpop.f32.mrb[39].mxu0  ;;  %v15624_v54 = vrot.slane %v11750_v38, 1  ;;  %v10081_v44 = vpop.eup %10080  ;;  %3250 = vmatpush1.bf16.msra.mxu1 %v9912_v45 }
 0x28f   : > { %v11759_v62 = vpack.c.bf16 %v2189_v19, %v2188_v33  ;;  %v15855_v11 = vrot.slane %v11649_v1, 1  ;;  %v2436_v31 = vrot.slane %v2280_v23, 1  ;;  %v15857_v58 = vrot.slane %v11653_v50, 1  ;;  %3251 = vmatprep.subr.bf16.mxu1 %v15779_v7 }
 0x290   : > { %10086 = vtanh.f32 %v9126_v29  ;;  %v15859_v1 = vrot.slane %v11733_v49, 1  ;;  %v15860_v19 = vrot.slane %v11636_v24, 1  ;;  %v15630_v23 = vrot.slane %v11716_v2, 1 }
 0x291   : > { %v11769_v3 = vsel %vm15856_vm11, %v15855_v11, %v15625_v61  ;;  %v2644_v33 = vsel %vm15858_vm8, %v15857_v58, %v15624_v54  ;;  %vm15861_vm11 = vmmov %vm15825_vm6  ;;  %vm15862_vm2 = vcmp.lt.s32.totalorder %v11189_v6, 300  ;;  %vm15863_vm4 = vcmp.ge.s32.totalorder %v11189_v6, 0 }
 0x292   : > { %v11784_v9 = vsel %vm15861_vm11, %v15860_v19, %v15859_v1  ;;  %vm11791_vm6 = vmand %vm15863_vm4, %vm15862_vm2  ;;  %v15864_v29 = vmov 0  ;;  %v2103_v50 = vrot.slane %v10081_v44, 6  ;;  %3128 = vmatprep.mubr.bf16.mxu1 %v2644_v33  ;;  %v2284_v47 = vshll.u32 %v11759_v62, 16  ;;  %v10083_v1 = vpop.eup %10082 }
 0x293   : > { %v15865_v29 = vsel %vm11791_vm6, 4294967295, %v15864_v29  ;;  %v2288_v11 = vshrl.u32 %v11759_v62, 16  ;;  %3129 = vmatmul.mubr.bf16.gmra.mrb[16].mxu1 %v11636_v24  ;;  %v11799_v19 = vor.u32 %v2437_v36, %v2436_v31  ;;  %v15867_v6 = vrot.slane %v11619_v60, 1  ;;  %v1878_v31 = vpop.f32.mrb[40].mxu0 }
 0x294   : > { %15866 = vst [vmem:[#allocation18_spill] sm:$0xff] %v15865_v29  ;;  %v15869_v44 = vrot.slane %v11662_v37, 2  ;;  %v15870_v33 = vrot.slane %v11566_v48, 2  ;;  %vm15871_vm2 = vcmask 1045504   ;;  %vm15872_vm4 = vcmask 1041408  }
 0x295   : > { %v11806_v54 = vsel %vm15858_vm8, %v15867_v6, %v15630_v23  ;;  %v2104_v24 = vsel %vm15872_vm4, %v2101_v43, %v2103_v50  ;;  %vm15873_vm11 = vcmp.lt.s32.totalorder %v11192_v12, 300  ;;  %vm15874_vm0 = vcmp.ge.s32.totalorder %v11192_v12, 0  ;;  %v9913_v43 = vld [vmem:[%s15558_s3 + $0xc8] sm:$0xff]  }
 0x296   : > { %15868 = vst [vmem:[#allocation19_spill] sm:$0xff] %v11806_v54  ;;  %v11813_v61 = vsel %vm15871_vm2, %v15870_v33, %v15869_v44  ;;  %vm11821_vm9 = vmand %vm15874_vm0, %vm15873_vm11  ;;  %v15875_v60 = vmov 0  ;;  %v2105_v36 = vrot.slane %v10083_v1, 6  ;;  %v2286_v6 = vrot.slane %v2284_v47, 1  ;;  %v8765_v1 = vpop.f32.mrb[41].mxu0  ;;  %3252 = vmatpush1.bf16.msra.mxu1 %v9913_v43 }
 0x297   : > { %v15876_v60 = vsel %vm11821_vm9, 4294967295, %v15875_v60  ;;  %v15878_v48 = vrot.slane %v11759_v62, 1  ;;  %v15879_v44 = vrot.slane %v11662_v37, 1  ;;  %v2190_v12 = vsel %vm11791_vm6, %v2104_v24, 0.0  ;;  %vm15881_vm2 = vmmov %vm15872_vm4  ;;  %3253 = vmatprep.subr.bf16.mxu1 %v15779_v7 }
 0x298   : > { %15877 = vst [vmem:[#allocation20_spill] sm:$0xff] %v15876_v60  ;;  %v9127_v58 = vadd.f32 %v11085_v41, %v1878_v31  ;;  %vm15880_vm0 = vsmask.f32 6400  ;;  %v2106_v45 = vsel %vm15881_vm2, %v2103_v50, %v2105_v36  ;;  %vm15882_vm4 = vsmask.f32 7424 }
 0x299   : > { %v11830_v33 = vsel %vm15858_vm8, %v15879_v44, %v15878_v48  ;;  %v11843_v48 = vsel %vm15880_vm0, %v11702_v26, %v11799_v19  ;;  %v1881_v44 = vpop.f32.mrb[42].mxu0  ;;  %v11847_v51 = vsel %vm15882_vm4, %v2282_v59, %v2286_v6  ;;  %v2290_v29 = vor.u32 %v2288_v11, %v2286_v6  ;;  %v9914_v59 = vld [vmem:[%s15558_s3 + $0xd0] sm:$0xff]   ;;  %vm15884_vm0 = vmmov %vm15858_vm8 }
 0x29a   : > { %v15638_v24 = vrot.slane %v11843_v48, 1  ;;  %v2191_v31 = vsel %vm11821_vm9, %v2106_v45, 0.0  ;;  %10088 = vtanh.f32 %v9127_v58  ;;  %v9128_v26 = vadd.f32 %v11085_v41, %v1881_v44  ;;  %v8766_v1 = vpop.f32.mrb[43].mxu0  ;;  %v10085_v44 = vpop.eup %10084  ;;  %vm15886_vm11 = vmmov %vm15884_vm0  ;;  %3254 = vmatpush1.bf16.msra.mxu1 %v9914_v59 }
 0x29b   : > { %v15637_v50 = vrot.slane %v11847_v51, 1  ;;  %v11856_v23 = vpack.c.bf16 %v2191_v31, %v2190_v12  ;;  %v15883_v6 = vrot.slane %v11746_v39, 1  ;;  %v2440_v58 = vrot.slane %v2288_v11, 1  ;;  %3255 = vmatprep.subr.bf16.mxu1 %v15779_v7 }
 0x29c   : > { %v2441_v60 = vrot.slane %v2284_v47, 2  ;;  %10090 = vtanh.f32 %v9128_v26  ;;  %v15885_v43 = vrot.slane %v11750_v38, 1  ;;  %v15887_v39 = vrot.slane %v11830_v33, 1 }
 0x29d   : > { %v11866_v45 = vsel %vm15884_vm0, %v15883_v6, %v15638_v24  ;;  %v15888_v31 = vrot.slane %v11733_v49, 1  ;;  %v15643_v11 = vrot.slane %v11813_v61, 1  ;;  %vm15889_vm2 = vcmp.lt.s32.totalorder %v11195_v53, 300 }
 0x29e   : > { %v2652_v12 = vsel %vm15886_vm11, %v15885_v43, %v15637_v50  ;;  %vm15890_vm4 = vcmp.ge.s32.totalorder %v11195_v53, 0  ;;  %v15891_v26 = vmov 0  ;;  %v2107_v38 = vrot.slane %v10085_v44, 6  ;;  %vm15895_vm11 = vmmov %vm15884_vm0 }
 0x29f   : > { %v11881_v47 = vsel %vm15884_vm0, %v15888_v31, %v15887_v39  ;;  %vm11888_vm8 = vmand %vm15890_vm4, %vm15889_vm2  ;;  %3136 = vmatprep.mubr.bf16.mxu1 %v2652_v12  ;;  %v2292_v1 = vshll.u32 %v11856_v23, 16  ;;  %v2296_v6 = vshrl.u32 %v11856_v23, 16  ;;  %v10087_v39 = vpop.eup %10086  ;;  %v11896_v31 = vor.u32 %v2441_v60, %v2440_v58  ;;  %v1886_v58 = vpop.f32.mrb[44].mxu0 }
 0x2a0   : > { %v15892_v26 = vsel %vm11888_vm8, 4294967295, %v15891_v26  ;;  %3137 = vmatmul.mubr.bf16.gmra.mrb[20].mxu1 %v11733_v49  ;;  %v15894_v53 = vrot.slane %v11716_v2, 1  ;;  %v15897_v44 = vrot.slane %v11759_v62, 2  ;;  %v15898_v12 = vrot.slane %v11662_v37, 2 }
 0x2a1   : > { %15893 = vst [vmem:[#allocation21_spill] sm:$0xff] %v15892_v26  ;;  %vm15899_vm2 = vcmask 1045504   ;;  %vm15900_vm4 = vcmask 1041408   ;;  %vm15901_vm0 = vcmp.lt.s32.totalorder %v11200_v0, 300  ;;  %vm15902_vm9 = vcmp.ge.s32.totalorder %v11200_v0, 0 }
 0x2a2   : > { %v11903_v50 = vsel %vm15895_vm11, %v15894_v53, %v15643_v11  ;;  %v11910_v24 = vsel %vm15899_vm2, %v15898_v12, %v15897_v44  ;;  %v2108_v49 = vsel %vm15900_vm4, %v2105_v36, %v2107_v38  ;;  %vm11918_vm6 = vmand %vm15902_vm9, %vm15901_vm0  ;;  %v15903_v2 = vmov 0  ;;  %v9915_v36 = vld [vmem:[%s15558_s3 + $0xd8] sm:$0xff]  }
 0x2a3   : > { %15896 = vst [vmem:[#allocation22_spill] sm:$0xff] %v11903_v50  ;;  %v15904_v2 = vsel %vm11918_vm6, 4294967295, %v15903_v2  ;;  %v2109_v60 = vrot.slane %v10087_v39, 6  ;;  %v2294_v53 = vrot.slane %v2292_v1, 1  ;;  %v15906_v37 = vrot.slane %v11856_v23, 1  ;;  %v8769_v39 = vpop.f32.mrb[45].mxu0  ;;  %vm15909_vm2 = vmmov %vm15900_vm4  ;;  %3256 = vmatpush1.bf16.msra.mxu1 %v9915_v36 }
 0x2a4   : > { %15905 = vst [vmem:[#allocation23_spill] sm:$0xff] %v15904_v2  ;;  %v15907_v44 = vrot.slane %v11759_v62, 1  ;;  %v2192_v0 = vsel %vm11888_vm8, %v2108_v49, 0.0  ;;  %v9129_v43 = vadd.f32 %v11085_v41, %v1886_v58  ;;  %vm15908_vm9 = vsmask.f32 6400  ;;  %v9916_v39 = vld [vmem:[%s15558_s3 + $0xe0] sm:$0xff]   ;;  %3257 = vmatprep.subr.bf16.mxu1 %v15779_v7 }
 0x2a5   : > { %v2110_v59 = vsel %vm15909_vm2, %v2107_v38, %v2109_v60  ;;  %vm15910_vm4 = vsmask.f32 7424  ;;  %v2298_v26 = vor.u32 %v2296_v6, %v2294_v53  ;;  %v2444_v11 = vrot.slane %v2296_v6, 1 }
 0x2a6   : > { %v11927_v12 = vsel %vm15895_vm11, %v15907_v44, %v15906_v37  ;;  %v11940_v37 = vsel %vm15908_vm9, %v11799_v19, %v11896_v31  ;;  %v1889_v44 = vpop.f32.mrb[46].mxu0  ;;  %v11944_v14 = vsel %vm15910_vm4, %v2290_v29, %v2294_v53  ;;  %v2193_v41 = vsel %vm11918_vm6, %v2110_v59, 0.0  ;;  %v11954_v19 = vld [vmem:[%s15557_s2] ss:$0 sm:$0xff]  ;;  %vm15912_vm9 = vmmov %vm15895_vm11 }
 0x2a7   : > { %v15651_v49 = vrot.slane %v11940_v37, 1  ;;  %10092 = vtanh.f32 %v9129_v43  ;;  %v9130_v38 = vadd.f32 %v11954_v19, %v1889_v44  ;;  %v8770_v29 = vpop.f32.mrb[47].mxu0  ;;  %v15650_v58 = vrot.slane %v11944_v14, 1  ;;  %v10089_v44 = vpop.eup %10088  ;;  %vm15914_vm0 = vmmov %vm15912_vm9  ;;  %3258 = vmatpush1.bf16.msra.mxu1 %v9916_v39 }
 0x2a8   : > { %v11958_v53 = vpack.c.bf16 %v2193_v41, %v2192_v0  ;;  %v15911_v43 = vrot.slane %v11843_v48, 1  ;;  %v2445_v2 = vrot.slane %v2292_v1, 2  ;;  %v15913_v36 = vrot.slane %v11847_v51, 1  ;;  %3259 = vmatprep.subr.bf16.mxu1 %v15779_v7 }
 0x2a9   : > { %10094 = vtanh.f32 %v9130_v38  ;;  %v15915_v48 = vrot.slane %v11927_v12, 1  ;;  %v15916_v41 = vrot.slane %v11830_v33, 1  ;;  %v15656_v6 = vrot.slane %v11910_v24, 1 }
 0x2aa   : > { %v11968_v59 = vsel %vm15912_vm9, %v15911_v43, %v15651_v49  ;;  %v2660_v0 = vsel %vm15914_vm0, %v15913_v36, %v15650_v58  ;;  %vm15917_vm9 = vmmov %vm15914_vm0  ;;  %vm15918_vm2 = vcmp.lt.s32.totalorder %v11203_v30, 300  ;;  %vm15919_vm4 = vcmp.ge.s32.totalorder %v11203_v30, 0 }
 0x2ab   : > { %v11983_v1 = vsel %vm15917_vm9, %v15916_v41, %v15915_v48  ;;  %vm11990_vm11 = vmand %vm15919_vm4, %vm15918_vm2  ;;  %v15920_v38 = vmov 0  ;;  %v2111_v51 = vrot.slane %v10089_v44, 6  ;;  %3144 = vmatprep.mubr.bf16.mxu1 %v2660_v0  ;;  %v2300_v29 = vshll.u32 %v11958_v53, 16  ;;  %v10091_v48 = vpop.eup %10090 }
 0x2ac   : > { %v15921_v38 = vsel %vm11990_vm11, 4294967295, %v15920_v38  ;;  %v2304_v43 = vshrl.u32 %v11958_v53, 16  ;;  %3145 = vmatmul.mubr.bf16.gmra.mrb[24].mxu1 %v11830_v33  ;;  %v11998_v41 = vor.u32 %v2445_v2, %v2444_v11  ;;  %v15923_v30 = vrot.slane %v11813_v61, 1  ;;  %v1894_v2 = vpop.f32.mrb[48].mxu0 }
 0x2ad   : > { %15922 = vst [vmem:[#allocation24_spill] sm:$0xff] %v15921_v38  ;;  %v15925_v44 = vrot.slane %v11856_v23, 2  ;;  %v15926_v0 = vrot.slane %v11759_v62, 2  ;;  %vm15927_vm2 = vcmask 1045504   ;;  %vm15928_vm4 = vcmask 1041408  }
 0x2ae   : > { %v12005_v58 = vsel %vm15914_vm0, %v15923_v30, %v15656_v6  ;;  %v2112_v33 = vsel %vm15928_vm4, %v2109_v60, %v2111_v51  ;;  %vm15929_vm9 = vcmp.lt.s32.totalorder %v11209_v56, 300  ;;  %vm15930_vm6 = vcmp.ge.s32.totalorder %v11209_v56, 0  ;;  %v9917_v60 = vld [vmem:[%s15558_s3 + $0xe8] sm:$0xff]  }
 0x2af   : > { %15924 = vst [vmem:[#allocation25_spill] sm:$0xff] %v12005_v58  ;;  %v12012_v49 = vsel %vm15927_vm2, %v15926_v0, %v15925_v44  ;;  %vm12020_vm8 = vmand %vm15930_vm6, %vm15929_vm9  ;;  %v15931_v61 = vmov 0  ;;  %v2113_v11 = vrot.slane %v10091_v48, 6  ;;  %v2302_v30 = vrot.slane %v2300_v29, 1  ;;  %v8773_v48 = vpop.f32.mrb[49].mxu0  ;;  %3260 = vmatpush1.bf16.msra.mxu1 %v9917_v60 }
 0x2b0   : > { %v15932_v61 = vsel %vm12020_vm8, 4294967295, %v15931_v61  ;;  %v15934_v62 = vrot.slane %v11958_v53, 1  ;;  %v15935_v44 = vrot.slane %v11856_v23, 1  ;;  %v2194_v56 = vsel %vm11990_vm11, %v2112_v33, 0.0  ;;  %vm15937_vm2 = vmmov %vm15928_vm4  ;;  %3261 = vmatprep.subr.bf16.mxu1 %v15779_v7 }
 0x2b1   : > { %15933 = vst [vmem:[#allocation26_spill] sm:$0xff] %v15932_v61  ;;  %v9131_v36 = vadd.f32 %v11954_v19, %v1894_v2  ;;  %vm15936_vm6 = vsmask.f32 6400  ;;  %v2114_v39 = vsel %vm15937_vm2, %v2111_v51, %v2113_v11  ;;  %vm15938_vm4 = vsmask.f32 7424  ;;  %vm15942_vm9 = vmmov %vm15914_vm0 }
 0x2b2   : > { %v12029_v0 = vsel %vm15914_vm0, %v15935_v44, %v15934_v62  ;;  %v12042_v62 = vsel %vm15936_vm6, %v11896_v31, %v11998_v41  ;;  %v1897_v44 = vpop.f32.mrb[50].mxu0  ;;  %v12046_v13 = vsel %vm15938_vm4, %v2298_v26, %v2302_v30  ;;  %v2306_v38 = vor.u32 %v2304_v43, %v2302_v30  ;;  %v9918_v26 = vld [vmem:[%s15558_s3 + $0xf0] sm:$0xff]   ;;  %vm15940_vm6 = vmmov %vm15914_vm0 }
 0x2b3   : > { %v15664_v33 = vrot.slane %v12042_v62, 1  ;;  %v2195_v2 = vsel %vm12020_vm8, %v2114_v39, 0.0  ;;  %10096 = vtanh.f32 %v9131_v36  ;;  %v9132_v31 = vadd.f32 %v11954_v19, %v1897_v44  ;;  %v8774_v48 = vpop.f32.mrb[51].mxu0  ;;  %v10093_v44 = vpop.eup %10092  ;;  %3262 = vmatpush1.bf16.msra.mxu1 %v9918_v26 }
 0x2b4   : > { %v15663_v51 = vrot.slane %v12046_v13, 1  ;;  %v12055_v6 = vpack.c.bf16 %v2195_v2, %v2194_v56  ;;  %v15939_v30 = vrot.slane %v11940_v37, 1  ;;  %v2448_v36 = vrot.slane %v2304_v43, 1  ;;  %3263 = vmatprep.subr.bf16.mxu1 %v15779_v7 }
 0x2b5   : > { %v2449_v61 = vrot.slane %v2300_v29, 2  ;;  %10098 = vtanh.f32 %v9132_v31  ;;  %v15941_v60 = vrot.slane %v11944_v14, 1  ;;  %v15943_v37 = vrot.slane %v12029_v0, 1 }
 0x2b6   : > { %v12065_v39 = vsel %vm15940_vm6, %v15939_v30, %v15664_v33  ;;  %v15944_v2 = vrot.slane %v11927_v12, 1  ;;  %vm15945_vm6 = vmmov %vm15914_vm0  ;;  %v2665_v43 = vrot.slane %v12012_v49, 1  ;;  %vm15946_vm2 = vcmp.lt.s32.totalorder %v11220_v5, 300 }
 0x2b7   : > { %v2668_v56 = vsel %vm15942_vm9, %v15941_v60, %v15663_v51  ;;  %vm15947_vm4 = vcmp.ge.s32.totalorder %v11220_v5, 0  ;;  %v15948_v31 = vmov 0  ;;  %v2115_v14 = vrot.slane %v10093_v44, 6  ;;  %vm15952_vm9 = vmmov %vm15945_vm6 }
 0x2b8   : > { %v12080_v29 = vsel %vm15945_vm6, %v15944_v2, %v15943_v37  ;;  %vm12087_vm0 = vmand %vm15947_vm4, %vm15946_vm2  ;;  %3152 = vmatprep.mubr.bf16.mxu1 %v2668_v56  ;;  %v2308_v48 = vshll.u32 %v12055_v6, 16  ;;  %v2312_v30 = vshrl.u32 %v12055_v6, 16  ;;  %v10095_v37 = vpop.eup %10094  ;;  %v12095_v49 = vor.u32 %v2449_v61, %v2448_v36  ;;  %v1902_v61 = vpop.f32.mrb[52].mxu0 }
 0x2b9   : > { %v15949_v31 = vsel %vm12087_vm0, 4294967295, %v15948_v31  ;;  %3153 = vmatmul.mubr.bf16.gmra.mrb[28].mxu1 %v11927_v12  ;;  %v15951_v2 = vrot.slane %v11910_v24, 1  ;;  %v15954_v51 = vrot.slane %v11958_v53, 2  ;;  %v15955_v44 = vrot.slane %v11856_v23, 2 }
 0x2ba   : > { %15950 = vst [vmem:[#allocation27_spill] sm:$0xff] %v15949_v31  ;;  %vm15956_vm2 = vcmask 1045504   ;;  %vm15957_vm4 = vcmask 1041408   ;;  %vm15958_vm6 = vcmp.lt.s32.totalorder %v11223_v15, 300  ;;  %vm15959_vm8 = vcmp.ge.s32.totalorder %v11223_v15, 0 }
 0x2bb   : > { %v12100_v5 = vsel %vm15952_vm9, %v15951_v2, %v2665_v43  ;;  %v12107_v56 = vsel %vm15956_vm2, %v15955_v44, %v15954_v51  ;;  %v2116_v60 = vsel %vm15957_vm4, %v2113_v11, %v2115_v14  ;;  %vm12115_vm11 = vmand %vm15959_vm8, %vm15958_vm6  ;;  %v15960_v24 = vmov 0  ;;  %v9919_v11 = vld [vmem:[%s15558_s3 + $0xf8] sm:$0xff]  }
 0x2bc   : > { %15953 = vst [vmem:[#allocation28_spill] sm:$0xff] %v12100_v5  ;;  %v15961_v24 = vsel %vm12115_vm11, 4294967295, %v15960_v24  ;;  %v2117_v12 = vrot.slane %v10095_v37, 6  ;;  %v2310_v36 = vrot.slane %v2308_v48, 1  ;;  %v15963_v23 = vrot.slane %v12055_v6, 1  ;;  %v8777_v37 = vpop.f32.mrb[53].mxu0  ;;  %vm15966_vm2 = vmmov %vm15957_vm4  ;;  %3264 = vmatpush1.bf16.msra.mxu1 %v9919_v11 }
 0x2bd   : > { %15962 = vst [vmem:[#allocation29_spill] sm:$0xff] %v15961_v24  ;;  %v15964_v51 = vrot.slane %v11958_v53, 1  ;;  %v2196_v15 = vsel %vm12087_vm0, %v2116_v60, 0.0  ;;  %v9133_v44 = vadd.f32 %v11954_v19, %v1902_v61  ;;  %vm15965_vm8 = vsmask.f32 6400  ;;  %v10097_v24 = vpop.eup %10096 }
 0x2be   : > { %v2118_v26 = vsel %vm15966_vm2, %v2115_v14, %v2117_v12  ;;  %vm15967_vm4 = vsmask.f32 7424  ;;  %v2314_v31 = vor.u32 %v2312_v30, %v2310_v36  ;;  %vm15976_vm2 = vcmp.lt.s32.totalorder %v11241_v55, 300 }
 0x2bf   : > { %v12124_v2 = vsel %vm15952_vm9, %v15964_v51, %v15963_v23  ;;  %v12137_v23 = vsel %vm15965_vm8, %v11998_v41, %v12095_v49  ;;  %v1905_v51 = vpop.f32.mrb[54].mxu0  ;;  %v12141_v28 = vsel %vm15967_vm4, %v2306_v38, %v2310_v36  ;;  %v2197_v61 = vsel %vm12115_vm11, %v2118_v26, 0.0  ;;  %vm15969_vm8 = vmmov %vm15952_vm9 }
 0x2c0   : > { %v2671_v60 = vrot.slane %v12137_v23, 1  ;;  %10100 = vtanh.f32 %v9133_v44  ;;  %v9134_v41 = vadd.f32 %v11954_v19, %v1905_v51  ;;  %v8778_v37 = vpop.f32.mrb[55].mxu0  ;;  %v2675_v14 = vrot.slane %v12141_v28, 1  ;;  %vm15971_vm6 = vmmov %vm15969_vm8 }
 0x2c1   : > { %v12150_v33 = vpack.c.bf16 %v2197_v61, %v2196_v15  ;;  %v15968_v38 = vrot.slane %v12042_v62, 1  ;;  %v2452_v23 = vrot.slane %v2312_v30, 1  ;;  %v2453_v26 = vrot.slane %v2308_v48, 2 }
 0x2c2   : > { %10102 = vtanh.f32 %v9134_v41  ;;  %v15970_v44 = vrot.slane %v12046_v13, 1  ;;  %v15972_v15 = vmov 0.0   ;;  %v15973_v11 = vrot.slane %v12124_v2, 1 }
 0x2c3   : > { %v12155_v36 = vsel %vm15969_vm8, %v15968_v38, %v2671_v60  ;;  %8791 = vmatprep.subr.bf16.mxu1 %v15972_v15  ;;  %v15974_v62 = vrot.slane %v12029_v0, 1  ;;  %vm15975_vm8 = vmmov %vm15971_vm6  ;;  %v2673_v48 = vrot.slane %v12107_v56, 1  ;;  %vm15977_vm4 = vcmp.ge.s32.totalorder %v11241_v55, 0  ;;  %v10099_v38 = vpop.eup %10098 }
 0x2c4   : > { %v2676_v28 = vsel %vm15971_vm6, %v15970_v44, %v2675_v14  ;;  %vm12175_vm9 = vmand %vm15977_vm4, %vm15976_vm2  ;;  %v15978_v30 = vmov 0  ;;  %v2119_v13 = vrot.slane %v10097_v24, 6  ;;  %v2316_v61 = vshll.u32 %v12150_v33, 16 }
 0x2c5   : > { %v12168_v51 = vsel %vm15975_vm8, %v15974_v62, %v15973_v11  ;;  %v15979_v30 = vsel %vm12175_vm9, 4294967295, %v15978_v30  ;;  %3160 = vmatprep.mubr.bf16.mxu1 %v2676_v28  ;;  %v2320_v41 = vshrl.u32 %v12150_v33, 16  ;;  %v2401_v37 = vrot.slane %v12150_v33, 1 }
 0x2c6   : > { %15980 = vst [vmem:[#allocation30_spill] sm:$0xff] %v15979_v30  ;;  %3161 = vmatmul.mubr.bf16.gmra.mrb[32].mxu1 %v12029_v0  ;;  %v2454_v56 = vor.u32 %v2453_v26, %v2452_v23  ;;  %v12184_v44 = vsel %vm15971_vm6, %v2665_v43, %v2673_v48  ;;  %v15982_v55 = vrot.slane %v12055_v6, 2  ;;  %v15983_v11 = vrot.slane %v11958_v53, 2  ;;  %v1910_v23 = vpop.f32.mrb[56].mxu0 }
 0x2c7   : > { %15981 = vst [vmem:[#allocation31_spill] sm:$0xff] %v12184_v44  ;;  %vm15984_vm2 = vcmask 1045504   ;;  %vm15985_vm4 = vcmask 1041408   ;;  %vm15986_vm8 = vcmp.lt.s32.totalorder %v11260_v42, 300  ;;  %vm15987_vm11 = vcmp.ge.s32.totalorder %v11260_v42, 0  ;;  %v8781_v28 = vpop.f32.mrb[57].mxu0 }
 0x2c8   : > { %v12191_v24 = vsel %vm15984_vm2, %v15983_v11, %v15982_v55  ;;  %v2120_v62 = vsel %vm15985_vm4, %v2117_v12, %v2119_v13  ;;  %vm12199_vm0 = vmand %vm15987_vm11, %vm15986_vm8  ;;  %v15988_v0 = vmov 0  ;;  %v2121_v43 = vrot.slane %v10099_v38, 6  ;;  %v1913_v5 = vpop.f32.mrb[58].mxu0 }
 0x2c9   : > { %v15989_v0 = vsel %vm12199_vm0, 4294967295, %v15988_v0  ;;  %v2318_v26 = vrot.slane %v2316_v61, 1  ;;  %v15991_v53 = vrot.slane %v12055_v6, 1  ;;  %v2198_v11 = vsel %vm12175_vm9, %v2120_v62, 0.0  ;;  %vm15993_vm2 = vmmov %vm15985_vm4  ;;  %v8782_v62 = vpop.f32.mrb[59].mxu0 }
 0x2ca   : > { %15990 = vst [vmem:[#allocation32_spill] sm:$0xff] %v15989_v0  ;;  %v9135_v12 = vadd.f32 %v11954_v19, %v1910_v23  ;;  %vm15992_vm11 = vsmask.f32 6400  ;;  %v2122_v38 = vsel %vm15993_vm2, %v2119_v13, %v2121_v43  ;;  %vm15994_vm4 = vsmask.f32 7424  ;;  %vm15996_vm8 = vmmov %vm15971_vm6 }
 0x2cb   : > { %v12206_v55 = vsel %vm15971_vm6, %v15991_v53, %v2401_v37  ;;  %v2455_v44 = vsel %vm15992_vm11, %v12095_v49, %v2454_v56  ;;  %v12216_v58 = vsel %vm15994_vm4, %v2314_v31, %v2318_v26  ;;  %v2322_v50 = vor.u32 %v2320_v41, %v2318_v26  ;;  %vm15995_vm11 = vmmov %vm15971_vm6  ;;  %v10101_v26 = vpop.eup %10100 }
 0x2cc   : > { %v15685_v42 = vrot.slane %v12206_v55, 1  ;;  %v2679_v53 = vrot.slane %v2455_v44, 1  ;;  %v2199_v30 = vsel %vm12199_vm0, %v2122_v38, 0.0  ;;  %10104 = vtanh.f32 %v9135_v12  ;;  %v10103_v38 = vpop.eup %10102 }
 0x2cd   : > { %v9136_v28 = vadd.f32 %v11954_v19, %v1913_v5  ;;  %v2683_v49 = vrot.slane %v12216_v58, 1  ;;  %v12224_v13 = vpack.c.bf16 %v2199_v30, %v2198_v11  ;;  %v2456_v23 = vrot.slane %v2320_v41, 1 }
 0x2ce   : > { %v12227_v31 = vsel %vm15995_vm11, %v2671_v60, %v2679_v53  ;;  %v2457_v44 = vrot.slane %v2316_v61, 2  ;;  %v15997_v5 = vrot.slane %v12124_v2, 1  ;;  %v2681_v60 = vrot.slane %v12191_v24, 1 }
 0x2cf   : > { %10106 = vtanh.f32 %v9136_v28  ;;  %v2684_v12 = vsel %vm15996_vm8, %v2675_v14, %v2683_v49  ;;  %vm15998_vm11 = vcmp.lt.s32.totalorder %v11263_v35, 300  ;;  %vm15999_vm0 = vcmp.ge.s32.totalorder %v11263_v35, 0  ;;  %vm16003_vm8 = vmmov %vm15971_vm6 }
 0x2d0   : > { %v12237_v58 = vsel %vm15971_vm6, %v15997_v5, %v15685_v42  ;;  %vm12244_vm9 = vmand %vm15999_vm0, %vm15998_vm11  ;;  %v16000_v30 = vmov 0  ;;  %v2123_v61 = vrot.slane %v10101_v26, 6  ;;  %3168 = vmatprep.mubr.bf16.mxu1 %v2684_v12  ;;  %v2324_v14 = vshll.u32 %v12224_v13, 16 }
 0x2d1   : > { %v16001_v30 = vsel %vm12244_vm9, 4294967295, %v16000_v30  ;;  %v2328_v41 = vshrl.u32 %v12224_v13, 16  ;;  %v2403_v11 = vrot.slane %v12224_v13, 1  ;;  %3169 = vmatmul.mubr.bf16.gmra.mrb[36].mxu1 %v12124_v2  ;;  %v2458_v24 = vor.u32 %v2457_v44, %v2456_v23  ;;  %vm16008_vm6 = vmmov %vm15993_vm2  ;;  %v1918_v23 = vpop.f32.mrb[60].mxu0 }
 0x2d2   : > { %16002 = vst [vmem:[#allocation33_spill] sm:$0xff] %v16001_v30  ;;  %v12253_v28 = vsel %vm16003_vm8, %v2673_v48, %v2681_v60  ;;  %v16005_v35 = vrot.slane %v12150_v33, 2  ;;  %v16006_v62 = vrot.slane %v12055_v6, 2  ;;  %vm16007_vm0 = vcmask 1045504  }
 0x2d3   : > { %16004 = vst [vmem:[#allocation34_spill] sm:$0xff] %v12253_v28  ;;  %v2124_v5 = vsel %vm16008_vm6, %v2121_v43, %v2123_v61  ;;  %vm16009_vm11 = vcmp.lt.s32.totalorder %v11266_v52, 300  ;;  %vm16010_vm2 = vcmp.ge.s32.totalorder %v11266_v52, 0  ;;  %v16011_v2 = vmov 0  ;;  %v8785_v43 = vpop.f32.mrb[61].mxu0 }
 0x2d4   : > { %v12260_v26 = vsel %vm16007_vm0, %v16006_v62, %v16005_v35  ;;  %vm12268_vm4 = vmand %vm16010_vm2, %vm16009_vm11  ;;  %v2125_v48 = vrot.slane %v10103_v38, 6  ;;  %v2326_v44 = vrot.slane %v2324_v14, 1  ;;  %v12273_v6 = vsel %vm16003_vm8, %v2401_v37, %v2403_v11  ;;  %v1921_v0 = vpop.f32.mrb[62].mxu0 }
 0x2d5   : > { %v16012_v2 = vsel %vm12268_vm4, 4294967295, %v16011_v2  ;;  %v2200_v35 = vsel %vm12244_vm9, %v2124_v5, 0.0  ;;  %v9137_v62 = vadd.f32 %v11954_v19, %v1918_v23  ;;  %vm16014_vm0 = vsmask.f32 6400  ;;  %vm16015_vm2 = vmmov %vm16008_vm6  ;;  %v8786_v43 = vpop.f32.mrb[63].mxu0 }
 0x2d6   : > { %16013 = vst [vmem:[#allocation35_spill] sm:$0xff] %v16012_v2  ;;  %v12280_v52 = vsel %vm16014_vm0, %v2454_v56, %v2458_v24  ;;  %v2126_v42 = vsel %vm16015_vm2, %v2123_v61, %v2125_v48  ;;  %vm16016_vm6 = vsmask.f32 7424  ;;  %v2330_v28 = vor.u32 %v2328_v41, %v2326_v44  ;;  %vm16017_vm0 = vmmov %vm16003_vm8 }
 0x2d7   : > { %v12284_v38 = vsel %vm16016_vm6, %v2322_v50, %v2326_v44  ;;  %v2687_v37 = vrot.slane %v12280_v52, 1  ;;  %v2201_v5 = vsel %vm12268_vm4, %v2126_v42, 0.0  ;;  %10108 = vtanh.f32 %v9137_v62  ;;  %v10105_v52 = vpop.eup %10104  ;;  %vm16018_vm4 = vmmov %vm16017_vm0 }
 0x2d8   : > { %v9138_v23 = vadd.f32 %v11954_v19, %v1921_v0  ;;  %v2691_v12 = vrot.slane %v12284_v38, 1  ;;  %v12291_v56 = vpack.c.bf16 %v2201_v5, %v2200_v35  ;;  %v2460_v61 = vrot.slane %v2328_v41, 1  ;;  %vm16021_vm11 = vmmov %vm16017_vm0 }
 0x2d9   : > { %v12296_v50 = vsel %vm16017_vm0, %v2679_v53, %v2687_v37  ;;  %v2461_v44 = vrot.slane %v2324_v14, 2  ;;  %v16019_v42 = vrot.slane %v12273_v6, 1  ;;  %v16020_v35 = vrot.slane %v12206_v55, 1 }
 0x2da   : > { %10110 = vtanh.f32 %v9138_v23  ;;  %v2692_v0 = vsel %vm16018_vm4, %v2683_v49, %v2691_v12  ;;  %v2689_v53 = vrot.slane %v12260_v26, 1  ;;  %vm16022_vm0 = vcmp.lt.s32.totalorder %v11272_v57, 300  ;;  %v10107_v23 = vpop.eup %10106 }
 0x2db   : > { %v12306_v62 = vsel %vm16021_vm11, %v16020_v35, %v16019_v42  ;;  %vm16023_vm8 = vcmp.ge.s32.totalorder %v11272_v57, 0  ;;  %v16024_v14 = vmov 0  ;;  %v2127_v41 = vrot.slane %v10105_v52, 6  ;;  %3176 = vmatprep.mubr.bf16.mxu1 %v2692_v0 }
 0x2dc   : > { %vm12313_vm9 = vmand %vm16023_vm8, %vm16022_vm0  ;;  %v2332_v49 = vshll.u32 %v12291_v56, 16  ;;  %v2336_v38 = vshrl.u32 %v12291_v56, 16  ;;  %v2405_v5 = vrot.slane %v12291_v56, 1  ;;  %3177 = vmatmul.mubr.bf16.gmra.mrb[40].mxu1 %v12206_v55  ;;  %v2462_v26 = vor.u32 %v2461_v44, %v2460_v61  ;;  %v1926_v61 = vpop.f32.mrb[64].mxu0 }
 0x2dd   : > { %v16025_v14 = vsel %vm12313_vm9, 4294967295, %v16024_v14  ;;  %v12322_v43 = vsel %vm16018_vm4, %v2681_v60, %v2689_v53  ;;  %v16028_v57 = vrot.slane %v12224_v13, 2  ;;  %v16029_v42 = vrot.slane %v12150_v33, 2  ;;  %vm16031_vm8 = vmmov %vm16015_vm2 }
 0x2de   : > { %16026 = vst [vmem:[#allocation36_spill] sm:$0xff] %v16025_v14  ;;  %16027 = vst [vmem:[#allocation37_spill] sm:$0xff] %v12322_v43  ;;  %vm16030_vm11 = vcmask 1045504   ;;  %v2128_v35 = vsel %vm16031_vm8, %v2125_v48, %v2127_v41  ;;  %vm16032_vm0 = vcmp.lt.s32.totalorder %v11287_v32, 300  ;;  %vm16033_vm2 = vcmp.ge.s32.totalorder %v11287_v32, 0  ;;  %v8789_v48 = vpop.f32.mrb[65].mxu0 }
 0x2df   : > { %v12329_v52 = vsel %vm16030_vm11, %v16029_v42, %v16028_v57  ;;  %vm12337_vm6 = vmand %vm16033_vm2, %vm16032_vm0  ;;  %v16034_v55 = vmov 0  ;;  %v2129_v60 = vrot.slane %v10107_v23, 6  ;;  %v2334_v44 = vrot.slane %v2332_v49, 1  ;;  %v1929_v30 = vpop.f32.mrb[66].mxu0 }
 0x2e0   : > { %v16035_v55 = vsel %vm12337_vm6, 4294967295, %v16034_v55  ;;  %v12342_v33 = vsel %vm16018_vm4, %v2403_v11, %v2405_v5  ;;  %v2202_v57 = vsel %vm12313_vm9, %v2128_v35, 0.0  ;;  %v9139_v42 = vadd.f32 %v11954_v19, %v1926_v61  ;;  %vm16038_vm2 = vmmov %vm16031_vm8  ;;  %v8790_v61 = vpop.f32.mrb[67].mxu0 }
 0x2e1   : > { %16036 = vst [vmem:[#allocation38_spill] sm:$0xff] %v16035_v55  ;;  %v2701_v0 = vrot.slane %v12342_v33, 1  ;;  %vm16037_vm11 = vsmask.f32 6400  ;;  %v2130_v2 = vsel %vm16038_vm2, %v2127_v41, %v2129_v60  ;;  %vm16039_vm8 = vsmask.f32 7424 }
 0x2e2   : > { %v2463_v32 = vsel %vm16037_vm11, %v2458_v24, %v2462_v26  ;;  %v2335_v23 = vsel %vm16039_vm8, %v2330_v28, %v2334_v44  ;;  %v2338_v43 = vor.u32 %v2336_v38, %v2334_v44  ;;  %v2203_v11 = vsel %vm12337_vm6, %v2130_v2, 0.0  ;;  %vm16040_vm8 = vmmov %vm16018_vm4  ;;  %v10109_v44 = vpop.eup %10108 }
 0x2e3   : > { %v2695_v54 = vrot.slane %v2463_v32, 1  ;;  %10112 = vtanh.f32 %v9139_v42  ;;  %v9140_v35 = vadd.f32 %v11954_v19, %v1929_v30  ;;  %v2699_v48 = vrot.slane %v2335_v23, 1  ;;  %vm16042_vm6 = vmmov %vm16018_vm4 }
 0x2e4   : > { %v12356_v24 = vpack.c.bf16 %v2203_v11, %v2202_v57  ;;  %v2464_v41 = vrot.slane %v2336_v38, 1  ;;  %v2465_v2 = vrot.slane %v2332_v49, 2  ;;  %v16041_v19 = vrot.slane %v12273_v6, 1  ;;  %v10111_v23 = vpop.eup %10110 }
 0x2e5   : > { %v12361_v28 = vsel %vm16040_vm8, %v2687_v37, %v2695_v54  ;;  %10114 = vtanh.f32 %v9140_v35  ;;  %v2700_v42 = vsel %vm16018_vm4, %v2691_v12, %v2699_v48  ;;  %v2697_v57 = vrot.slane %v12329_v52, 1 }
 0x2e6   : > { %v12368_v30 = vsel %vm16042_vm6, %v16041_v19, %v2701_v0  ;;  %v2131_v32 = vrot.slane %v10109_v44, 6  ;;  %3184 = vmatprep.mubr.bf16.mxu1 %v2700_v42  ;;  %v2340_v37 = vshll.u32 %v12356_v24, 16  ;;  %v2344_v38 = vshrl.u32 %v12356_v24, 16 }
 0x2e7   : > { %v2407_v49 = vrot.slane %v12356_v24, 1  ;;  %vm16043_vm8 = vcmp.lt.s32.totalorder %v11305_v34, 300  ;;  %vm16044_vm4 = vcmp.ge.s32.totalorder %v11305_v34, 0  ;;  %v16045_v12 = vmov 0  ;;  %3185 = vmatmul.mubr.bf16.gmra.mrb[44].mxu1 %v12273_v6 }
 0x2e8   : > { %vm12378_vm0 = vmand %vm16044_vm4, %vm16043_vm8  ;;  %v2466_v52 = vor.u32 %v2465_v2, %v2464_v41  ;;  %v12384_v11 = vsel %vm16042_vm6, %v2689_v53, %v2697_v57  ;;  %v16049_v35 = vrot.slane %v12291_v56, 2  ;;  %v16050_v61 = vrot.slane %v12224_v13, 2 }
 0x2e9   : > { %v16046_v12 = vsel %vm12378_vm0, 4294967295, %v16045_v12  ;;  %16048 = vst [vmem:[#allocation40_spill] sm:$0xff] %v12384_v11  ;;  %vm16051_vm11 = vcmask 1045504   ;;  %v2513_v42 = vrot.slane %v12356_v24, 2  ;;  %v2132_v34 = vsel %vm16038_vm2, %v2129_v60, %v2131_v32 }
 0x2ea   : > { %16047 = vst [vmem:[#allocation39_spill] sm:$0xff] %v16046_v12  ;;  %v2512_v44 = vsel %vm16051_vm11, %v16050_v61, %v16049_v35  ;;  %vm16052_vm8 = vcmp.lt.s32.totalorder %v11323_v18, 300  ;;  %vm16053_vm4 = vcmp.ge.s32.totalorder %v11323_v18, 0  ;;  %v16054_v6 = vmov 0 }
 0x2eb   : > { %vm12397_vm9 = vmand %vm16053_vm4, %vm16052_vm8  ;;  %v2133_v53 = vrot.slane %v10111_v23, 6  ;;  %v2342_v41 = vrot.slane %v2340_v37, 1  ;;  %v12402_v2 = vsel %vm16042_vm6, %v2405_v5, %v2407_v49  ;;  %vm16057_vm11 = vsmask.f32 6400 }
 0x2ec   : > { %v16055_v6 = vsel %vm12397_vm9, 4294967295, %v16054_v6  ;;  %v2709_v13 = vrot.slane %v12402_v2, 1  ;;  %v2467_v24 = vsel %vm16057_vm11, %v2462_v26, %v2466_v52  ;;  %v2468_v60 = vrot.slane %v2344_v38, 1  ;;  %vm16059_vm4 = vmmov %vm16042_vm6 }
 0x2ed   : > { %16056 = vst [vmem:[#allocation41_spill] sm:$0xff] %v16055_v6  ;;  %v2204_v19 = vsel %vm12378_vm0, %v2132_v34, 0.0  ;;  %v2134_v18 = vsel %vm16038_vm2, %v2131_v32, %v2133_v53  ;;  %vm16058_vm8 = vsmask.f32 7424  ;;  %v2703_v61 = vrot.slane %v2467_v24, 1  ;;  %vm16060_vm6 = vmmov %vm16059_vm4 }
 0x2ee   : > { %v2343_v35 = vsel %vm16058_vm8, %v2338_v43, %v2342_v41  ;;  %v2205_v23 = vsel %vm12397_vm9, %v2134_v18, 0.0  ;;  %v2469_v55 = vrot.slane %v2340_v37, 2  ;;  %v12414_v14 = vsel %vm16059_vm4, %v2701_v0, %v2709_v13  ;;  %v10113_v43 = vpop.eup %10112  ;;  %vm16063_vm2 = vmmov %vm16059_vm4 }
 0x2ef   : > { %v2707_v5 = vrot.slane %v2343_v35, 1  ;;  %v12416_v11 = vpack.c.bf16 %v2205_v23, %v2204_v19  ;;  %v12419_v26 = vsel %vm16060_vm6, %v2695_v54, %v2703_v61  ;;  %v2705_v12 = vrot.slane %v2512_v44, 1 }
 0x2f0   : > { %v16061_v34 = vrot.slane %v12291_v56, 2  ;;  %vm16062_vm11 = vcmask 1045504   ;;  %v2346_v6 = vor.u32 %v2344_v38, %v2342_v41  ;;  %v2470_v18 = vor.u32 %v2469_v55, %v2468_v60 }
 0x2f1   : > { %v2708_v24 = vsel %vm16063_vm2, %v2699_v48, %v2707_v5  ;;  %vm16064_vm8 = vcmp.lt.s32.totalorder %v11335_v4, 300  ;;  %vm16065_vm4 = vcmp.ge.s32.totalorder %v11335_v4, 0  ;;  %v16066_v0 = vmov 0  ;;  %v10115_v48 = vpop.eup %10114 }
 0x2f2   : > { %v2514_v32 = vsel %vm16062_vm11, %v16061_v34, %v2513_v42  ;;  %vm12429_vm5 = vmand %vm16065_vm4, %vm16064_vm8  ;;  %v2135_v54 = vrot.slane %v10113_v43, 6  ;;  %3192 = vmatprep.mubr.bf16.mxu1 %v2708_v24  ;;  %v2348_v56 = vshll.u32 %v12416_v11, 16  ;;  %v2352_v37 = vshrl.u32 %v12416_v11, 16 }
 0x2f3   : > { %v2713_v35 = vrot.slane %v2514_v32, 1  ;;  %v16067_v0 = vsel %vm12429_vm5, 4294967295, %v16066_v0  ;;  %v2409_v44 = vrot.slane %v12416_v11, 1  ;;  %vm16069_vm6 = vcmp.lt.s32.totalorder %v11394_v40, 300  ;;  %3193 = vmatmul.mubr.bf16.gmra.mrb[48].mxu1 %v12342_v33 }
 0x2f4   : > { %16068 = vst [vmem:[#allocation42_spill] sm:$0xff] %v16067_v0  ;;  %vm16070_vm11 = vcmp.ge.s32.totalorder %v11394_v40, 0  ;;  %vm16071_vm8 = vsmask.f32 6400  ;;  %vm16072_vm4 = vcmask 1046528   ;;  %v2515_v41 = vrot.slane %v12416_v11, 2 }
 0x2f5   : > { %vm603_vm2 = vmand %vm16070_vm11, %vm16069_vm6  ;;  %v2471_v4 = vsel %vm16071_vm8, %v2466_v52, %v2470_v18  ;;  %v12443_v55 = vsel %vm16072_vm4, %v2697_v57, %v2705_v12  ;;  %vm16076_vm0 = vcmask 1041408   ;;  %vm16077_vm12 = vcmp.lt.s32.totalorder %v11510_v16, 300 }
 0x2f6   : > { %16073 = vst [vmem:[#allocation43_spill] sm:$0xff] %v12443_v55  ;;  %vm16074_vm9 = vmmov %vm16072_vm4  ;;  %v2136_v60 = vsel %vm16076_vm0, %v2133_v53, %v2135_v54  ;;  %vm16078_vm7 = vcmp.ge.s32.totalorder %v11510_v16, 0  ;;  %v16079_v40 = vmov 0  ;;  %v2137_v33 = vrot.slane %v10115_v48, 6 }
 0x2f7   : > { %v12446_v38 = vsel %vm16074_vm9, %v2705_v12, %v2713_v35  ;;  %vm12454_vm1 = vmand %vm16078_vm7, %vm16077_vm12  ;;  %v2350_v52 = vrot.slane %v2348_v56, 1  ;;  %v2206_v12 = vsel %vm12429_vm5, %v2136_v60, 0.0  ;;  %v2711_v23 = vrot.slane %v2471_v4, 1 }
 0x2f8   : > { %16075 = vst [vmem:[#allocation44_spill] sm:$0xff] %v12446_v38  ;;  %v16080_v40 = vsel %vm12454_vm1, 4294967295, %v16079_v40  ;;  %vm16082_vm6 = vmmov %vm16072_vm4  ;;  %v2208_v53 = vsel %vm603_vm2, %v2137_v33, 0.0  ;;  %v2472_v32 = vrot.slane %v2352_v37, 1  ;;  %v2473_v38 = vrot.slane %v2348_v56, 2 }
 0x2f9   : > { %16081 = vst [vmem:[#allocation45_spill] sm:$0xff] %v16080_v40  ;;  %v2410_v57 = vsel %vm16082_vm6, %v2407_v49, %v2409_v44  ;;  %vm16083_vm9 = vmmov %vm16076_vm0  ;;  %vm16084_vm0 = vsmask.f32 7424  ;;  %v2226_v43 = vpack.c.bf16 %v2208_v53, %v2208_v53  ;;  %vm16087_vm11 = vcmask 1045504  }
 0x2fa   : > { %v2717_v19 = vrot.slane %v2410_v57, 1  ;;  %v2138_v11 = vsel %vm16083_vm9, %v2135_v54, %v2137_v33  ;;  %v2351_v34 = vsel %vm16084_vm0, %v2346_v6, %v2350_v52  ;;  %vm16085_vm7 = vmmov %vm16072_vm4  ;;  %v2516_v4 = vsel %vm16087_vm11, %v2513_v42, %v2515_v41 }
 0x2fb   : > { %v2207_v16 = vsel %vm12454_vm1, %v2138_v11, 0.0  ;;  %v2715_v24 = vrot.slane %v2351_v34, 1  ;;  %v12466_v48 = vsel %vm16085_vm7, %v2703_v61, %v2711_v23  ;;  %vm16086_vm12 = vmmov %vm16072_vm4  ;;  %v2481_v54 = vshll.u32 %v2226_v43, 16 }
 0x2fc   : > { %v2225_v49 = vpack.c.bf16 %v2207_v16, %v2206_v12  ;;  %v12469_v60 = vsel %vm16086_vm12, %v2709_v13, %v2717_v19  ;;  %v2519_v33 = vrot.slane %v2226_v43, 2  ;;  %vm16088_vm2 = vmmov %vm16072_vm4  ;;  %v2721_v0 = vrot.slane %v2516_v4, 1 }
 0x2fd   : > { %v2716_v6 = vsel %vm16088_vm2, %v2707_v5, %v2715_v24  ;;  %v2474_v34 = vor.u32 %v2473_v38, %v2472_v32  ;;  %v2483_v61 = vrot.slane %v2481_v54, 2  ;;  %v2354_v56 = vor.u32 %v2352_v37, %v2350_v52  ;;  %vm16089_vm8 = vmmov %vm16088_vm2 }
 0x2fe   : > { %3200 = vmatprep.mubr.bf16.mxu1 %v2716_v6  ;;  %v2356_v40 = vshll.u32 %v2225_v49, 16  ;;  %v2360_v11 = vshrl.u32 %v2225_v49, 16  ;;  %v12473_v53 = vrot.slane %v2225_v49, 1  ;;  %v12477_v13 = vsel %vm16089_vm8, %v2713_v35, %v2721_v0  ;;  %vm16090_vm4 = vmmov %vm16088_vm2 }
 0x2ff   : > { %3201 = vmatmul.mubr.bf16.gmra.mrb[52].mxu1 %v12402_v2  ;;  %v2517_v12 = vrot.slane %v2225_v49, 2  ;;  %vm16091_vm6 = vsmask.f32 6400  ;;  %vm16092_vm9 = vmmov %vm16084_vm0 }
 0x300   : > { %v2358_v42 = vrot.slane %v2356_v40, 1  ;;  %v2476_v16 = vrot.slane %v2360_v11, 1  ;;  %v2412_v5 = vsel %vm16090_vm4, %v2409_v44, %v12473_v53  ;;  %v2475_v43 = vsel %vm16091_vm6, %v2470_v18, %v2474_v34  ;;  %vm16093_vm0 = vmmov %vm16087_vm11 }
 0x301   : > { %v2725_v4 = vrot.slane %v2412_v5, 1  ;;  %v2719_v6 = vrot.slane %v2475_v43, 1  ;;  %v2477_v55 = vrot.slane %v2356_v40, 2  ;;  %v2733_v38 = vrot.slane %v12473_v53, 1  ;;  %vm16094_vm7 = vmmov %vm16093_vm0 }
 0x302   : > { %v2359_v32 = vsel %vm16092_vm9, %v2354_v56, %v2358_v42  ;;  %v2362_v2 = vor.u32 %v2360_v11, %v2358_v42  ;;  %v2518_v37 = vsel %vm16093_vm0, %v2515_v41, %v2517_v12  ;;  %v12486_v35 = vsel %vm16094_vm7, %v2517_v12, %v2519_v33  ;;  %vm16095_vm12 = vmmov %vm16088_vm2 }
 0x303   : > { %v2723_v52 = vrot.slane %v2359_v32, 1  ;;  %v12489_v49 = vsel %vm16095_vm12, %v2711_v23, %v2719_v6  ;;  %v2478_v44 = vor.u32 %v2477_v55, %v2476_v16  ;;  %vm16096_vm11 = vmmov %vm16088_vm2  ;;  %v12497_v40 = vsel %vm16088_vm2, %v2725_v4, %v2733_v38 }
 0x304   : > { %v12492_v18 = vsel %vm16096_vm11, %v2717_v19, %v2725_v4  ;;  %v2731_v54 = vrot.slane %v2362_v2, 1  ;;  %v2729_v11 = vrot.slane %v2518_v37, 1  ;;  %v2737_v41 = vrot.slane %v12486_v35, 1  ;;  %vm16097_vm8 = vmmov %vm16088_vm2 }
 0x305   : > { %v2724_v33 = vsel %vm16097_vm8, %v2715_v24, %v2723_v52  ;;  %vm16098_vm4 = vmmov %vm16091_vm6  ;;  %vm15724_vm8 = vcmask 1043456  }
 0x306   : > { %v2479_v56 = vsel %vm16098_vm4, %v2474_v34, %v2478_v44  ;;  %vm16099_vm6 = vmmov %vm16098_vm4  ;;  %3208 = vmatprep.mubr.bf16.mxu1 %v2724_v33  ;;  %vm16120_vm4 = vcmask 1045504  }
 0x307   : > { %v12503_v23 = vsel %vm16099_vm6, %v2478_v44, %v2483_v61  ;;  %vm16100_vm9 = vmmov %vm16088_vm2  ;;  %v2727_v19 = vrot.slane %v2479_v56, 1  ;;  %3209 = vmatmul.mubr.bf16.gmra.mrb[56].mxu1 %v2410_v57  ;;  %v9921_v57 = vld [vmem:[%s15558_s3 + $0x108] sm:$0xff]   ;;  %v9943_v61 = vld [vmem:[%s15560_s5 + $0x78] sm:$0xff]   ;;  %vm16121_vm6 = vsmask.f32 7424 }
 0x308   : > { %v2732_v55 = vsel %vm16100_vm9, %v2723_v52, %v2731_v54  ;;  %v2735_v12 = vrot.slane %v12503_v23, 1  ;;  %vm16101_vm0 = vmmov %vm16088_vm2  ;;  %vm16105_vm2 = vmmov 0  }
 0x309   : > { %v12508_v42 = vsel %vm16101_vm0, %v2721_v0, %v2729_v11  ;;  %vm16102_vm7 = vmmov %vm16101_vm0  ;;  %3216 = vmatprep.mubr.bf16.mxu1 %v2732_v55  ;;  %v9920_v0 = vld [vmem:[%s15558_s3 + $0x100] sm:$0xff]  }
 0x30a   : > { %v12513_v16 = vsel %vm16102_vm7, %v2729_v11, %v2737_v41  ;;  %vm16103_vm12 = vmmov %vm16101_vm0  ;;  %vm16125_vm7 = vsmask.f32 6400 }
 0x30b   : > { %v2728_v24 = vsel %vm16103_vm12, %v2719_v6, %v2727_v19  ;;  %vm16104_vm11 = vmmov %vm16101_vm0 }
 0x30c   : > { %v2736_v34 = vsel %vm16104_vm11, %v2727_v19, %v2735_v12  ;;  %vm16126_vm12 = vmmov %vm16120_vm4  ;;  %v16308_v19 = vld [vmem:[#allocation36_spill] sm:$0xff] }
 0x30f   : > { %3217 = vmatmul.mubr.bf16.gmra.mrb[60].mxu1 %v2412_v5 }
 0x310   : > { %3224 = vmatprep.mubr.bf16.mxu1 %v2731_v54 }
 0x317   : > { %3225 = vmatmul.mubr.bf16.gmra.mrb[64].mxu1 %v12473_v53  ;;  %v9942_v53 = vld [vmem:[%s15560_s5 + $0x70] sm:$0xff]  }
 0x318   : > { %3265 = vmatprep.mubr.bf16.mxu1 %v11477_v10  ;;  %v9922_v10 = vld [vmem:[%s15558_s3 + $0x110] sm:$0xff]  }
 0x31f   : > { %3266 = vmatmul.mubr.bf16.vlgmr.msra.gmra.mrb[0].mxu1 %v11401_v21  ;;  %v9923_v21 = vld [vmem:[%s15558_s3 + $0x118] sm:$0xff]  }
 0x320   : > { %3273 = vmatprep.mubr.bf16.mxu1 %v11576_v22  ;;  %8792 = vmatpush3.bf16.msra.mxu1 %v9920_v0  ;;  %v9924_v22 = vld [vmem:[%s15558_s3 + $0x120] sm:$0xff]  }
 0x321   : > { %8793 = vmatprep.subr.bf16.mxu1 %v15972_v15 }
 0x324   : > { %8794 = vmatpush3.bf16.msra.mxu1 %v9921_v57 }
 0x325   : > { %8795 = vmatprep.subr.bf16.mxu1 %v15972_v15 }
 0x327   : > { %3274 = vmatmul.mubr.bf16.gmra.mrb[4].mxu1 %v11484_v27  ;;  %v9925_v27 = vld [vmem:[%s15558_s3 + $0x128] sm:$0xff]  }
 0x328   : > { %3281 = vmatprep.mubr.bf16.mxu1 %v11672_v46  ;;  %8796 = vmatpush3.bf16.msra.mxu1 %v9922_v10  ;;  %v9926_v46 = vld [vmem:[%s15558_s3 + $0x130] sm:$0xff]  }
 0x329   : > { %8797 = vmatprep.subr.bf16.mxu1 %v15972_v15 }
 0x32c   : > { %8798 = vmatpush3.bf16.msra.mxu1 %v9923_v21 }
 0x32d   : > { %8799 = vmatprep.subr.bf16.mxu1 %v15972_v15 }
 0x32f   : > { %3282 = vmatmul.mubr.bf16.gmra.mrb[8].mxu1 %v11591_v25  ;;  %v9927_v25 = vld [vmem:[%s15558_s3 + $0x138] sm:$0xff]  }
 0x330   : > { %3289 = vmatprep.mubr.bf16.mxu1 %v11769_v3  ;;  %8800 = vmatpush3.bf16.msra.mxu1 %v9924_v22  ;;  %v9929_v3 = vld [vmem:[%s15560_s5 + $0x8] sm:$0xff]  }
 0x331   : > { %8801 = vmatprep.subr.bf16.mxu1 %v15972_v15 }
 0x334   : > { %8802 = vmatpush3.bf16.msra.mxu1 %v9925_v27 }
 0x335   : > { %8803 = vmatprep.subr.bf16.mxu1 %v15972_v15 }
 0x337   : > { %3290 = vmatmul.mubr.bf16.gmra.mrb[12].mxu1 %v11687_v8  ;;  %v9928_v8 = vld [vmem:[%s15560_s5] sm:$0xff]  }
 0x338   : > { %3297 = vmatprep.mubr.bf16.mxu1 %v11866_v45  ;;  %8804 = vmatpush3.bf16.msra.mxu1 %v9926_v46  ;;  %v9931_v45 = vld [vmem:[%s15560_s5 + $0x18] sm:$0xff]  }
 0x339   : > { %8805 = vmatprep.subr.bf16.mxu1 %v15972_v15  ;;  %4622 = vmatpush1.bf16.msra.mxu0 %v9928_v8 }
 0x33a   : > { %4623 = vmatprep.subr.bf16.mxu0 %v15779_v7 }
 0x33c   : > { %8806 = vmatpush3.bf16.msra.mxu1 %v9927_v25 }
 0x33d   : > { %6205 = vmatprep.subr.bf16.mxu1 %v15779_v7  ;;  %4624 = vmatpush1.bf16.msra.mxu0 %v9929_v3 }
 0x33e   : > { %4625 = vmatprep.subr.bf16.mxu0 %v15779_v7 }
 0x33f   : > { %3298 = vmatmul.mubr.bf16.gmra.mrb[16].mxu1 %v11784_v9  ;;  %v9930_v9 = vld [vmem:[%s15560_s5 + $0x10] sm:$0xff]  }
 0x340   : > { %3305 = vmatprep.mubr.bf16.mxu1 %v11968_v59  ;;  %v9935_v59 = vld [vmem:[%s15560_s5 + $0x38] sm:$0xff]  }
 0x341   : > { %4626 = vmatpush1.bf16.msra.mxu0 %v9930_v9 }
 0x342   : > { %4627 = vmatprep.subr.bf16.mxu0 %v15779_v7 }
 0x345   : > { %4628 = vmatpush1.bf16.msra.mxu0 %v9931_v45 }
 0x346   : > { %4629 = vmatprep.subr.bf16.mxu0 %v15779_v7 }
 0x347   : > { %3306 = vmatmul.mubr.bf16.gmra.mrb[20].mxu1 %v11881_v47  ;;  %v9933_v47 = vld [vmem:[%s15560_s5 + $0x28] sm:$0xff]  }
 0x348   : > { %3313 = vmatprep.mubr.bf16.mxu1 %v12065_v39  ;;  %v9937_v39 = vld [vmem:[%s15560_s5 + $0x48] sm:$0xff]  }
 0x34f   : > { %3314 = vmatmul.mubr.bf16.gmra.mrb[24].mxu1 %v11983_v1  ;;  %v16106_v1 = vld [vmem:[#allocation19_spill] sm:$0xff] }
 0x350   : > { %3321 = vmatprep.mubr.bf16.mxu1 %v12155_v36  ;;  %v9938_v36 = vld [vmem:[%s15560_s5 + $0x50] sm:$0xff]  }
 0x357   : > { %3322 = vmatmul.mubr.bf16.gmra.mrb[28].mxu1 %v12080_v29  ;;  %v16107_v29 = vld [vmem:[#allocation22_spill] sm:$0xff] }
 0x358   : > { %3329 = vmatprep.mubr.bf16.mxu1 %v12227_v31  ;;  %v16109_v31 = vld [vmem:[#allocation28_spill] sm:$0xff] }
 0x35f   : > { %3330 = vmatmul.mubr.bf16.gmra.mrb[32].mxu1 %v12168_v51  ;;  %v16108_v51 = vld [vmem:[#allocation25_spill] sm:$0xff] }
 0x360   : > { %3337 = vmatprep.mubr.bf16.mxu1 %v12296_v50  ;;  %v16111_v50 = vld [vmem:[#allocation34_spill] sm:$0xff] }
 0x367   : > { %3338 = vmatmul.mubr.bf16.gmra.mrb[36].mxu1 %v12237_v58  ;;  %v16110_v58 = vld [vmem:[#allocation31_spill] sm:$0xff] }
 0x368   : > { %3345 = vmatprep.mubr.bf16.mxu1 %v12361_v28  ;;  %v16114_v28 = vld [vmem:[#allocation43_spill] sm:$0xff] }
 0x36f   : > { %3346 = vmatmul.mubr.bf16.gmra.mrb[40].mxu1 %v12306_v62  ;;  %v16112_v62 = vld [vmem:[#allocation37_spill] sm:$0xff] }
 0x370   : > { %3353 = vmatprep.mubr.bf16.mxu1 %v12419_v26  ;;  %v9939_v26 = vld [vmem:[%s15560_s5 + $0x58] sm:$0xff]  }
 0x377   : > { %3354 = vmatmul.mubr.bf16.gmra.mrb[44].mxu1 %v12368_v30  ;;  %v16115_v30 = vld [vmem:[#allocation44_spill] sm:$0xff] }
 0x378   : > { %3361 = vmatprep.mubr.bf16.mxu1 %v12466_v48  ;;  %v9940_v48 = vld [vmem:[%s15560_s5 + $0x60] sm:$0xff]  }
 0x37f   : > { %3362 = vmatmul.mubr.bf16.gmra.mrb[48].mxu1 %v12414_v14  ;;  %v16113_v14 = vld [vmem:[#allocation40_spill] sm:$0xff] }
 0x380   : > { %3369 = vmatprep.mubr.bf16.mxu1 %v12489_v49 }
 0x387   : > { %3370 = vmatmul.mubr.bf16.gmra.mrb[52].mxu1 %v12469_v60  ;;  %v9941_v60 = vld [vmem:[%s15560_s5 + $0x68] sm:$0xff]  }
 0x388   : > { %3377 = vmatprep.mubr.bf16.mxu1 %v2728_v24 }
 0x38f   : > { %3378 = vmatmul.mubr.bf16.gmra.mrb[56].mxu1 %v12492_v18 }
 0x390   : > { %3385 = vmatprep.mubr.bf16.mxu1 %v2736_v34 }
 0x397   : > { %3386 = vmatmul.mubr.bf16.gmra.mrb[60].mxu1 %v12497_v40 }
 0x398   : > { %3393 = vmatprep.mubr.bf16.mxu1 %v2735_v12 }
 0x39f   : > { %3394 = vmatmul.mubr.bf16.gmra.mrb[64].mxu1 %v2733_v38 }
 0x3a0   : > { %8807 = vmatprep.mubr.msk.bf16.mxu1 %vm16105_vm2, %v15972_v15 }
 0x3a7   : > { %8808 = vmatmul.mubr.bf16.vlgmr.msra.gmra.mrb[0].mxu1 %v11497_v63  ;;  %v9932_v63 = vld [vmem:[%s15560_s5 + $0x20] sm:$0xff]  }
 0x3a8   : > { %8811 = vmatprep.mubr.msk.bf16.mxu1 %vm16105_vm2, %v15972_v15  ;;  %4630 = vmatpush1.bf16.msra.mxu0 %v9932_v63 }
 0x3a9   : > { %4631 = vmatprep.subr.bf16.mxu0 %v15779_v7 }
 0x3ac   : > { %4632 = vmatpush1.bf16.msra.mxu0 %v9933_v47 }
 0x3ad   : > { %4633 = vmatprep.subr.bf16.mxu0 %v15779_v7 }
 0x3af   : > { %8812 = vmatmul.mubr.bf16.gmra.mrb[4].mxu1 %v11598_v17  ;;  %v9934_v17 = vld [vmem:[%s15560_s5 + $0x30] sm:$0xff]  }
 0x3b0   : > { %8815 = vmatprep.mubr.msk.bf16.mxu1 %vm16105_vm2, %v15972_v15  ;;  %4634 = vmatpush1.bf16.msra.mxu0 %v9934_v17 }
 0x3b1   : > { %4635 = vmatprep.subr.bf16.mxu0 %v15779_v7 }
 0x3b4   : > { %4636 = vmatpush1.bf16.msra.mxu0 %v9935_v59 }
 0x3b5   : > { %4637 = vmatprep.subr.bf16.mxu0 %v15779_v7 }
 0x3b7   : > { %8816 = vmatmul.mubr.bf16.gmra.mrb[8].mxu1 %v11709_v20  ;;  %v9936_v20 = vld [vmem:[%s15560_s5 + $0x40] sm:$0xff]  }
 0x3b8   : > { %8819 = vmatprep.mubr.msk.bf16.mxu1 %vm16105_vm2, %v15972_v15  ;;  %4638 = vmatpush1.bf16.msra.mxu0 %v9936_v20 }
 0x3b9   : > { %4639 = vmatprep.subr.bf16.mxu0 %v15779_v7 }
 0x3bc   : > { %4640 = vmatpush1.bf16.msra.mxu0 %v9937_v39 }
 0x3bd   : > { %4641 = vmatprep.subr.bf16.mxu0 %v15779_v7 }
 0x3bf   : > { %8820 = vmatmul.mubr.bf16.gmra.mrb[12].mxu1 %v16106_v1 }
 0x3c0   : > { %8823 = vmatprep.mubr.msk.bf16.mxu1 %vm16105_vm2, %v15972_v15  ;;  %4642 = vmatpush1.bf16.msra.mxu0 %v9938_v36 }
 0x3c1   : > { %4643 = vmatprep.subr.bf16.mxu0 %v15779_v7 }
 0x3c4   : > { %4644 = vmatpush1.bf16.msra.mxu0 %v9939_v26 }
 0x3c5   : > { %4645 = vmatprep.subr.bf16.mxu0 %v15779_v7 }
 0x3c7   : > { %8824 = vmatmul.mubr.bf16.gmra.mrb[16].mxu1 %v16107_v29 }
 0x3c8   : > { %8827 = vmatprep.mubr.msk.bf16.mxu1 %vm16105_vm2, %v15972_v15  ;;  %4646 = vmatpush1.bf16.msra.mxu0 %v9940_v48 }
 0x3c9   : > { %4647 = vmatprep.subr.bf16.mxu0 %v15779_v7 }
 0x3cc   : > { %4648 = vmatpush1.bf16.msra.mxu0 %v9941_v60 }
 0x3cd   : > { %4649 = vmatprep.subr.bf16.mxu0 %v15779_v7 }
 0x3cf   : > { %8828 = vmatmul.mubr.bf16.gmra.mrb[20].mxu1 %v16108_v51 }
 0x3d0   : > { %8831 = vmatprep.mubr.msk.bf16.mxu1 %vm16105_vm2, %v15972_v15  ;;  %4650 = vmatpush1.bf16.msra.mxu0 %v9942_v53 }
 0x3d1   : > { %4651 = vmatprep.subr.bf16.mxu0 %v15779_v7 }
 0x3d4   : > { %4652 = vmatpush1.bf16.msra.mxu0 %v9943_v61 }
 0x3d5   : > { %4789 = vmatprep.subr.bf16.mxu0 %v15779_v7 }
 0x3d7   : > { %8832 = vmatmul.mubr.bf16.gmra.mrb[24].mxu1 %v16109_v31 }
 0x3d8   : > { %8835 = vmatprep.mubr.msk.bf16.mxu1 %vm16105_vm2, %v15972_v15 }
 0x3df   : > { %8836 = vmatmul.mubr.bf16.gmra.mrb[28].mxu1 %v16110_v58 }
 0x3e0   : > { %8839 = vmatprep.mubr.msk.bf16.mxu1 %vm16105_vm2, %v15972_v15 }
 0x3e7   : > { %8840 = vmatmul.mubr.bf16.gmra.mrb[32].mxu1 %v16111_v50 }
 0x3e8   : > { %8843 = vmatprep.mubr.msk.bf16.mxu1 %vm16105_vm2, %v15972_v15 }
 0x3ef   : > { %8844 = vmatmul.mubr.bf16.gmra.mrb[36].mxu1 %v16112_v62 }
 0x3f0   : > { %8847 = vmatprep.mubr.msk.bf16.mxu1 %vm16105_vm2, %v15972_v15 }
 0x3f7   : > { %8848 = vmatmul.mubr.bf16.gmra.mrb[40].mxu1 %v16113_v14 }
 0x3f8   : > { %8851 = vmatprep.mubr.msk.bf16.mxu1 %vm16105_vm2, %v15972_v15 }
 0x3ff   : > { %8852 = vmatmul.mubr.bf16.gmra.mrb[44].mxu1 %v16114_v28 }
 0x400   : > { %8855 = vmatprep.mubr.msk.bf16.mxu1 %vm16105_vm2, %v15972_v15 }
 0x407   : > { %8856 = vmatmul.mubr.bf16.gmra.mrb[48].mxu1 %v16115_v30 }
 0x408   : > { %8859 = vmatprep.mubr.msk.bf16.mxu1 %vm16105_vm2, %v15972_v15 }
 0x40f   : > { %8860 = vmatmul.mubr.bf16.gmra.mrb[52].mxu1 %v12477_v13  ;;  %v12705_v13 = vld [vmem:[%s15559_s4] ss:$0 sm:$0xff] }
 0x410   : > { %8863 = vmatprep.mubr.msk.bf16.mxu1 %vm16105_vm2, %v15972_v15 }
 0x417   : > { %8864 = vmatmul.mubr.bf16.gmra.mrb[56].mxu1 %v12508_v42  ;;  %v16292_v42 = vld [vmem:[#allocation35_spill] sm:$0xff] }
 0x418   : > { %8867 = vmatprep.mubr.msk.bf16.mxu1 %vm16105_vm2, %v15972_v15 }
 0x41f   : > { %8868 = vmatmul.mubr.bf16.gmra.mrb[60].mxu1 %v12513_v16 }
 0x420   : > { %8871 = vmatprep.mubr.msk.bf16.mxu1 %vm16105_vm2, %v15972_v15 }
 0x427   : > { %8872 = vmatmul.mubr.bf16.gmra.mrb[64].mxu1 %v2737_v41 }
 0x47a   : > { %v3436_v5 = vpop.f32.mrb[0].mxu1 }
 0x47b   : > { %v9141_v43 = vadd.f32 %v12705_v13, %v3436_v5  ;;  %v8809_v4 = vpop.f32.mrb[1].mxu1 }
 0x47c   : > { %v3439_v6 = vpop.f32.mrb[2].mxu1 }
 0x47d   : > { %10116 = vtanh.f32 %v9141_v43  ;;  %v9142_v38 = vadd.f32 %v12705_v13, %v3439_v6  ;;  %v8810_v32 = vpop.f32.mrb[3].mxu1 }
 0x47f   : > { %10118 = vtanh.f32 %v9142_v38 }
 0x482   : > { %v3444_v2 = vpop.f32.mrb[4].mxu1 }
 0x483   : > { %v9143_v37 = vadd.f32 %v12705_v13, %v3444_v2  ;;  %v8813_v35 = vpop.f32.mrb[5].mxu1 }
 0x484   : > { %v3447_v52 = vpop.f32.mrb[6].mxu1 }
 0x485   : > { %10120 = vtanh.f32 %v9143_v37  ;;  %v9144_v49 = vadd.f32 %v12705_v13, %v3447_v52  ;;  %v8814_v44 = vpop.f32.mrb[7].mxu1 }
 0x487   : > { %v10117_v18 = vpop.eup %10116  ;;  %10122 = vtanh.f32 %v9144_v49 }
 0x488   : > { %v3640_v40 = vrot.slane %v10117_v18, 4  ;;  %v16271_v18 = vld [vmem:[#allocation32_spill] sm:$0xff] }
 0x489   : > { %v10119_v54 = vpop.eup %10118 }
 0x48a   : > { %v3641_v11 = vrot.slane %v10119_v54, 4  ;;  %v3452_v41 = vpop.f32.mrb[8].mxu1  ;;  %v3741_v12 = vsel %vm11147_vm14, %v3640_v40, 0.0 }
 0x48b   : > { %v9145_v33 = vadd.f32 %v12705_v13, %v3452_v41  ;;  %v8817_v56 = vpop.f32.mrb[9].mxu1 }
 0x48c   : > { %v3642_v23 = vsel %vm15724_vm8, %v3640_v40, %v3641_v11  ;;  %v3455_v55 = vpop.f32.mrb[10].mxu1  ;;  %v16123_v40 = vld [vmem:[#allocation7_spill] sm:$0xff] }
 0x48d   : > { %v3742_v16 = vsel %vm11162_vm15, %v3642_v23, 0.0  ;;  %10124 = vtanh.f32 %v9145_v33  ;;  %v9146_v24 = vadd.f32 %v12705_v13, %v3455_v55  ;;  %v8818_v34 = vpop.f32.mrb[11].mxu1  ;;  %vm16124_vm9 = vnez %v16123_v40 }
 0x48e   : > { %v3775_v0 = vpack.c.bf16 %v3742_v16, %v3741_v12 }
 0x48f   : > { %v10121_v57 = vpop.eup %10120  ;;  %10126 = vtanh.f32 %v9146_v24 }
 0x490   : > { %v3643_v10 = vrot.slane %v10121_v57, 4  ;;  %v3794_v21 = vshrl.u32 %v3775_v0, 16  ;;  %v3796_v22 = vshll.u32 %v3775_v0, 16  ;;  %v4045_v62 = vrot.slane %v3775_v0, 2 }
 0x491   : > { %v10123_v27 = vpop.eup %10122  ;;  %v3945_v44 = vrot.slane %v3775_v0, 1 }
 0x492   : > { %v3644_v46 = vsel %vm15724_vm8, %v3641_v11, %v3643_v10  ;;  %v3645_v25 = vrot.slane %v10123_v27, 4  ;;  %v3460_v8 = vpop.f32.mrb[12].mxu1  ;;  %v3978_v3 = vrot.slane %v3794_v21, 1  ;;  %v3979_v63 = vrot.slane %v3796_v22, 2 }
 0x493   : > { %v9147_v9 = vadd.f32 %v12705_v13, %v3460_v8  ;;  %v8821_v45 = vpop.f32.mrb[13].mxu1  ;;  %v3743_v17 = vsel %vm11215_vm3, %v3644_v46, 0.0  ;;  %v3798_v20 = vrot.slane %v3796_v22, 1 }
 0x494   : > { %v3646_v59 = vsel %vm15724_vm8, %v3643_v10, %v3645_v25  ;;  %v3463_v1 = vpop.f32.mrb[14].mxu1  ;;  %v3980_v31 = vor.u32 %v3979_v63, %v3978_v3 }
 0x495   : > { %v3744_v29 = vsel %vm11232_vm10, %v3646_v59, 0.0  ;;  %10128 = vtanh.f32 %v9147_v9  ;;  %v9148_v36 = vadd.f32 %v12705_v13, %v3463_v1  ;;  %v8822_v51 = vpop.f32.mrb[15].mxu1  ;;  %v3799_v60 = vor.u32 %v3798_v20, %v3794_v21  ;;  %v16127_v20 = vld [vmem:[#allocation8_spill] sm:$0xff] }
 0x496   : > { %v12726_v58 = vpack.c.bf16 %v3744_v29, %v3743_v17  ;;  %vm16128_vm11 = vnez %v16127_v20 }
 0x497   : > { %v10125_v50 = vpop.eup %10124  ;;  %10130 = vtanh.f32 %v9148_v36 }
 0x498   : > { %v3647_v14 = vrot.slane %v10125_v50, 4  ;;  %v3801_v28 = vshll.u32 %v12726_v58, 16  ;;  %v3805_v30 = vshrl.u32 %v12726_v58, 16  ;;  %v4046_v26 = vrot.slane %v12726_v58, 2  ;;  %v16130_v50 = vld [vmem:[#allocation9_spill] sm:$0xff] }
 0x499   : > { %v10127_v48 = vpop.eup %10126  ;;  %v3946_v53 = vrot.slane %v12726_v58, 1 }
 0x49a   : > { %v3648_v61 = vsel %vm15724_vm8, %v3645_v25, %v3647_v14  ;;  %v3649_v5 = vrot.slane %v10127_v48, 4  ;;  %v3468_v43 = vpop.f32.mrb[16].mxu1  ;;  %v3803_v4 = vrot.slane %v3801_v28, 1  ;;  %v12734_v6 = vsel %vm16120_vm4, %v4045_v62, %v4046_v26  ;;  %vm16129_vm4 = vmmov %vm16121_vm6  ;;  %v9944_v48 = vld [vmem:[%s15560_s5 + $0x80] sm:$0xff]  }
 0x49b   : > { %v9149_v38 = vadd.f32 %v12705_v13, %v3468_v43  ;;  %v8825_v32 = vpop.f32.mrb[17].mxu1  ;;  %v3981_v2 = vrot.slane %v3805_v30, 1  ;;  %v3982_v49 = vrot.slane %v3801_v28, 2  ;;  %v3745_v54 = vsel %vm11282_vm13, %v3648_v61, 0.0 }
 0x49c   : > { %v3650_v37 = vsel %vm15724_vm8, %v3647_v14, %v3649_v5  ;;  %v3471_v35 = vpop.f32.mrb[18].mxu1  ;;  %v3804_v52 = vsel %vm16121_vm6, %v3799_v60, %v3803_v4  ;;  %v3947_v55 = vsel %vm16101_vm0, %v3945_v44, %v3946_v53  ;;  %v3807_v10 = vor.u32 %v3805_v30, %v3803_v4 }
 0x49d   : > { %v3746_v11 = vsel %vm16124_vm9, %v3650_v37, 0.0  ;;  %10132 = vtanh.f32 %v9149_v38  ;;  %v9150_v41 = vadd.f32 %v12705_v13, %v3471_v35  ;;  %v8826_v33 = vpop.f32.mrb[19].mxu1  ;;  %v3983_v23 = vor.u32 %v3982_v49, %v3981_v2 }
 0x49e   : > { %v12744_v56 = vpack.c.bf16 %v3746_v11, %v3745_v54  ;;  %v4173_v21 = vrot.slane %v12734_v6, 2  ;;  %v4164_v17 = vrot.slane %v3804_v52, 2  ;;  %vm16131_vm6 = vnez %v16130_v50  ;;  %v16250_v50 = vld [vmem:[#allocation29_spill] sm:$0xff] }
 0x49f   : > { %v10129_v12 = vpop.eup %10128  ;;  %10134 = vtanh.f32 %v9150_v41  ;;  %v12752_v22 = vsel %vm16125_vm7, %v3980_v31, %v3983_v23  ;;  %vm16132_vm7 = vmmov %vm16126_vm12  ;;  %vm16330_vm9 = vsmask.f32 7424 }
 0x4a0   : > { %v3651_v16 = vrot.slane %v10129_v12, 4  ;;  %v3809_v24 = vshll.u32 %v12744_v56, 16  ;;  %v3813_v34 = vshrl.u32 %v12744_v56, 16  ;;  %v4048_v0 = vrot.slane %v12744_v56, 2 }
 0x4a1   : > { %v10131_v57 = vpop.eup %10130  ;;  %v3948_v27 = vrot.slane %v12744_v56, 1 }
 0x4a2   : > { %v3652_v46 = vsel %vm15724_vm8, %v3649_v5, %v3651_v16  ;;  %v3653_v25 = vrot.slane %v10131_v57, 4  ;;  %v3476_v8 = vpop.f32.mrb[20].mxu1  ;;  %v3811_v3 = vrot.slane %v3809_v24, 1  ;;  %v12757_v9 = vsel %vm16126_vm12, %v4046_v26, %v4048_v0  ;;  %vm16133_vm12 = vmmov %vm16132_vm7 }
 0x4a3   : > { %v9151_v45 = vadd.f32 %v12705_v13, %v3476_v8  ;;  %v8829_v63 = vpop.f32.mrb[21].mxu1  ;;  %v4174_v59 = vrot.slane %v12757_v9, 2  ;;  %v3985_v1 = vrot.slane %v3813_v34, 1  ;;  %v3747_v29 = vsel %vm16128_vm11, %v3652_v46, 0.0 }
 0x4a4   : > { %v3654_v36 = vsel %vm15724_vm8, %v3651_v16, %v3653_v25  ;;  %v3479_v51 = vpop.f32.mrb[22].mxu1  ;;  %v3812_v31 = vsel %vm16129_vm4, %v3807_v10, %v3811_v3  ;;  %v3986_v58 = vrot.slane %v3809_v24, 2  ;;  %v12778_v61 = vsel %vm16101_vm0, %v3946_v53, %v3948_v27  ;;  %vm16135_vm0 = vmmov %vm16132_vm7 }
 0x4a5   : > { %v3748_v62 = vsel %vm16131_vm6, %v3654_v36, 0.0  ;;  %10136 = vtanh.f32 %v9151_v45  ;;  %v9152_v14 = vadd.f32 %v12705_v13, %v3479_v51  ;;  %v8830_v28 = vpop.f32.mrb[23].mxu1  ;;  %v4165_v30 = vrot.slane %v3812_v31, 2  ;;  %v16140_v45 = vld [vmem:[#allocation11_spill] sm:$0xff]  ;;  %v9946_v36 = vld [vmem:[%s15560_s5 + $0x90] sm:$0xff]  }
 0x4a6   : > { %v12768_v26 = vpack.c.bf16 %v3748_v62, %v3747_v29  ;;  %v12773_v60 = vor.u32 %v3986_v58, %v3985_v1  ;;  %v4167_v5 = vrot.slane %v3947_v55, 2  ;;  %v4168_v38 = vrot.slane %v12778_v61, 2 }
 0x4a7   : > { %v10133_v43 = vpop.eup %10132  ;;  %10138 = vtanh.f32 %v9152_v14  ;;  %v4166_v4 = vsel %vm16132_vm7, %v4164_v17, %v4165_v30  ;;  %v12785_v32 = vsel %vm16133_vm12, %v4173_v21, %v4174_v59  ;;  %v3815_v49 = vor.u32 %v3813_v34, %v3811_v3  ;;  %vm16136_vm7 = vmmov %vm16135_vm0  ;;  %v16137_v21 = vld [vmem:[#allocation10_spill] sm:$0xff] }
 0x4a8   : > { %v3655_v2 = vrot.slane %v10133_v43, 4  ;;  %4653 = vmatprep.mubr.bf16.mxu0 %v4166_v4  ;;  %v3817_v37 = vshll.u32 %v12768_v26, 16  ;;  %v3821_v35 = vshrl.u32 %v12768_v26, 16  ;;  %v4050_v53 = vrot.slane %v12768_v26, 2 }
 0x4a9   : > { %v10135_v52 = vpop.eup %10134  ;;  %4654 = vmatmul.mubr.bf16.vlgmr.msra.gmra.mrb[68].mxu0 %v12734_v6  ;;  %vm16134_vm4 = vsmask.f32 6400  ;;  %v12796_v54 = vsel %vm16135_vm0, %v4167_v5, %v4168_v38  ;;  %v3950_v11 = vrot.slane %v12768_v26, 1  ;;  %v9945_v6 = vld [vmem:[%s15560_s5 + $0x88] sm:$0xff]   ;;  %v4170_v57 = vrot.slane %v12752_v22, 2 }
 0x4aa   : > { %v12793_v44 = vsel %vm16134_vm4, %v3983_v23, %v12773_v60  ;;  %v3656_v41 = vsel %vm15724_vm8, %v3653_v25, %v3655_v2  ;;  %v3657_v33 = vrot.slane %v10135_v52, 4  ;;  %v3484_v55 = vpop.f32.mrb[24].mxu1  ;;  %4790 = vmatpush1.bf16.msra.mxu0 %v9944_v48  ;;  %v3819_v12 = vrot.slane %v3817_v37, 1 }
 0x4ab   : > { %v12804_v16 = vsel %vm16136_vm7, %v4048_v0, %v4050_v53  ;;  %v9153_v23 = vadd.f32 %v12705_v13, %v3484_v55  ;;  %v8833_v24 = vpop.f32.mrb[25].mxu1  ;;  %4791 = vmatprep.subr.bf16.mxu0 %v15779_v7  ;;  %v4171_v10 = vrot.slane %v12793_v44, 2  ;;  %vm16138_vm12 = vnez %v16137_v21 }
 0x4ac   : > { %v4182_v34 = vrot.slane %v12804_v16, 2  ;;  %v3749_v46 = vsel %vm16138_vm12, %v3656_v41, 0.0  ;;  %v3658_v25 = vsel %vm15724_vm8, %v3655_v2, %v3657_v33  ;;  %v3487_v8 = vpop.f32.mrb[26].mxu1  ;;  %vm16139_vm4 = vsmask.f32 7424  ;;  %vm16143_vm8 = vmmov %vm16136_vm7 }
 0x4ad   : > { %v3820_v0 = vsel %vm16139_vm4, %v3815_v49, %v3819_v12  ;;  %v3989_v3 = vrot.slane %v3821_v35, 1  ;;  %vm16141_vm0 = vnez %v16140_v45  ;;  %10140 = vtanh.f32 %v9153_v23  ;;  %v8834_v1 = vpop.f32.mrb[27].mxu1 }
 0x4ae   : > { %v3750_v63 = vsel %vm16141_vm0, %v3658_v25, 0.0  ;;  %v9154_v17 = vadd.f32 %v12705_v13, %v3487_v8  ;;  %v4176_v29 = vrot.slane %v3820_v0, 2  ;;  %4792 = vmatpush1.bf16.msra.mxu0 %v9945_v6  ;;  %v12824_v51 = vsel %vm16136_vm7, %v4170_v57, %v4171_v10 }
 0x4af   : > { %v12818_v22 = vpack.c.bf16 %v3750_v63, %v3749_v46  ;;  %v3990_v31 = vrot.slane %v3817_v37, 2  ;;  %vm16142_vm4 = vcmask 1046528   ;;  %v10137_v62 = vpop.eup %10136  ;;  %4793 = vmatprep.subr.bf16.mxu0 %v15779_v7  ;;  %v12841_v48 = vsel %vm16136_vm7, %v4174_v59, %v4182_v34  ;;  %v16151_v46 = vld [vmem:[#allocation13_spill] sm:$0xff]  ;;  %v9948_v63 = vld [vmem:[%s15560_s5 + $0xa0] sm:$0xff]  }
 0x4b0   : > { %v12831_v58 = vsel %vm16142_vm4, %v3948_v27, %v3950_v11  ;;  %10142 = vtanh.f32 %v9154_v17  ;;  %v4177_v14 = vsel %vm16143_vm8, %v4165_v30, %v4176_v29  ;;  %v3659_v61 = vrot.slane %v10137_v62, 4  ;;  %vm16144_vm8 = vmmov %vm16136_vm7 }
 0x4b1   : > { %v4178_v28 = vrot.slane %v12831_v58, 2  ;;  %4661 = vmatprep.mubr.bf16.mxu0 %v4177_v14  ;;  %v3825_v56 = vshll.u32 %v12818_v22, 16  ;;  %v4052_v27 = vrot.slane %v12818_v22, 2  ;;  %v10139_v5 = vpop.eup %10138  ;;  %v3823_v30 = vor.u32 %v3821_v35, %v3819_v12  ;;  %v16147_v12 = vld [vmem:[#allocation12_spill] sm:$0xff] }
 0x4b2   : > { %4662 = vmatmul.mubr.bf16.gmra.mrb[72].mxu0 %v12757_v9  ;;  %v3829_v43 = vshrl.u32 %v12818_v22, 16  ;;  %v3991_v4 = vor.u32 %v3990_v31, %v3989_v3  ;;  %vm16145_vm4 = vcmask 1043456   ;;  %v3661_v37 = vrot.slane %v10139_v5, 4  ;;  %v3492_v52 = vpop.f32.mrb[28].mxu1  ;;  %v9947_v9 = vld [vmem:[%s15560_s5 + $0x98] sm:$0xff]  }
 0x4b3   : > { %v12850_v2 = vsel %vm16144_vm8, %v4168_v38, %v4178_v28  ;;  %v3660_v59 = vsel %vm16145_vm4, %v3657_v33, %v3659_v61  ;;  %v3827_v49 = vrot.slane %v3825_v56, 1  ;;  %4794 = vmatpush1.bf16.msra.mxu0 %v9946_v36  ;;  %v12854_v44 = vsel %vm16136_vm7, %v4050_v53, %v4052_v27  ;;  %v8837_v41 = vpop.f32.mrb[29].mxu1 }
 0x4b4   : > { %v9155_v35 = vadd.f32 %v12705_v13, %v3492_v52  ;;  %v4190_v55 = vrot.slane %v12854_v44, 2  ;;  %4795 = vmatprep.subr.bf16.mxu0 %v15779_v7  ;;  %vm16146_vm8 = vsmask.f32 6400  ;;  %v3952_v33 = vrot.slane %v12818_v22, 1  ;;  %v3495_v23 = vpop.f32.mrb[30].mxu1 }
 0x4b5   : > { %v12864_v38 = vsel %vm16146_vm8, %v12773_v60, %v3991_v4  ;;  %vm16148_vm4 = vnez %v16147_v12  ;;  %vm16149_vm7 = vcmask 1043456   ;;  %vm16150_vm0 = vsmask.f32 7424  ;;  %v8838_v8 = vpop.f32.mrb[31].mxu1 }
 0x4b6   : > { %v3751_v53 = vsel %vm16148_vm4, %v3660_v59, 0.0  ;;  %v3662_v6 = vsel %vm16149_vm7, %v3659_v61, %v3661_v37  ;;  %v12871_v24 = vsel %vm16150_vm0, %v3823_v30, %v3827_v49  ;;  %v4180_v57 = vrot.slane %v12864_v38, 2 }
 0x4b7   : > { %vm16152_vm12 = vnez %v16151_v46  ;;  %10144 = vtanh.f32 %v9155_v35  ;;  %v9156_v60 = vadd.f32 %v12705_v13, %v3495_v23  ;;  %v4184_v0 = vrot.slane %v12871_v24, 2  ;;  %4796 = vmatpush1.bf16.msra.mxu0 %v9947_v9  ;;  %v10141_v31 = vpop.eup %10140 }
 0x4b8   : > { %v3752_v25 = vsel %vm16152_vm12, %v3662_v6, 0.0  ;;  %vm16153_vm0 = vcmask 1045504   ;;  %v3993_v1 = vrot.slane %v3829_v43, 1  ;;  %v3994_v36 = vrot.slane %v3825_v56, 2  ;;  %4797 = vmatprep.subr.bf16.mxu0 %v15779_v7 }
 0x4b9   : > { %v12878_v3 = vpack.c.bf16 %v3752_v25, %v3751_v53  ;;  %v12884_v17 = vsel %vm16153_vm0, %v4171_v10, %v4180_v57  ;;  %10146 = vtanh.f32 %v9156_v60  ;;  %vm16154_vm8 = vmmov %vm16153_vm0  ;;  %vm16155_vm7 = vcmask 1046528  }
 0x4ba   : > { %v4185_v62 = vsel %vm16154_vm8, %v4176_v29, %v4184_v0  ;;  %v12893_v14 = vsel %vm16155_vm7, %v3950_v11, %v3952_v33  ;;  %v12900_v10 = vsel %vm16153_vm0, %v4182_v34, %v4190_v55  ;;  %v3663_v61 = vrot.slane %v10141_v31, 4  ;;  %v10143_v30 = vpop.eup %10142  ;;  %v3500_v35 = vpop.f32.mrb[32].mxu1  ;;  %vm16157_vm7 = vmmov %vm16153_vm0 }
 0x4bb   : > { %4669 = vmatprep.mubr.bf16.mxu0 %v4185_v62  ;;  %v3831_v56 = vor.u32 %v3829_v43, %v3827_v49  ;;  %v3833_v29 = vshll.u32 %v12878_v3, 16  ;;  %v4054_v5 = vrot.slane %v12878_v3, 2  ;;  %v3837_v26 = vshrl.u32 %v12878_v3, 16  ;;  %4798 = vmatpush1.bf16.msra.mxu0 %v9948_v63  ;;  %v16158_v49 = vld [vmem:[#allocation14_spill] sm:$0xff]  ;;  %v8841_v6 = vpop.f32.mrb[33].mxu1  ;;  %v16163_v63 = vld [vmem:[#allocation15_spill] sm:$0xff] }
 0x4bc   : > { %4670 = vmatmul.mubr.bf16.gmra.mrb[76].mxu0 %v12804_v16  ;;  %v3995_v11 = vor.u32 %v3994_v36, %v3993_v1  ;;  %v4186_v59 = vrot.slane %v12893_v14, 2  ;;  %v3954_v52 = vrot.slane %v12878_v3, 1  ;;  %vm16156_vm8 = vcmask 1043456   ;;  %v9949_v16 = vld [vmem:[%s15560_s5 + $0xa8] sm:$0xff]   ;;  %4799 = vmatprep.subr.bf16.mxu0 %v15779_v7  ;;  %v3503_v24 = vpop.f32.mrb[34].mxu1 }
 0x4bd   : > { %v3664_v34 = vsel %vm16156_vm8, %v3661_v37, %v3663_v61  ;;  %v3665_v9 = vrot.slane %v10143_v30, 4  ;;  %v3835_v41 = vrot.slane %v3833_v29, 1  ;;  %v12910_v43 = vsel %vm16157_vm7, %v4052_v27, %v4054_v5  ;;  %v8842_v31 = vpop.f32.mrb[35].mxu1 }
 0x4be   : > { %vm16159_vm0 = vnez %v16158_v49  ;;  %v9157_v53 = vadd.f32 %v12705_v13, %v3500_v35  ;;  %v15725_v23 = vrot.slane %v12910_v43, 2  ;;  %vm16160_vm8 = vsmask.f32 6400 }
 0x4bf   : > { %v3753_v38 = vsel %vm16159_vm0, %v3664_v34, 0.0  ;;  %v3996_v37 = vsel %vm16160_vm8, %v3991_v4, %v3995_v11  ;;  %vm16161_vm12 = vcmask 1043456   ;;  %vm16162_vm7 = vsmask.f32 7424  ;;  %4800 = vmatpush1.bf16.msra.mxu0 %v9949_v16  ;;  %v9950_v4 = vld [vmem:[%s15560_s5 + $0xb0] sm:$0xff]  }
 0x4c0   : > { %v3666_v27 = vsel %vm16161_vm12, %v3663_v61, %v3665_v9  ;;  %v12923_v25 = vsel %vm16162_vm7, %v3831_v56, %v3835_v41  ;;  %v3839_v60 = vor.u32 %v3837_v26, %v3835_v41  ;;  %v4188_v8 = vrot.slane %v3996_v37, 2  ;;  %4801 = vmatprep.subr.bf16.mxu0 %v15779_v7 }
 0x4c1   : > { %vm16164_vm4 = vnez %v16163_v63  ;;  %10148 = vtanh.f32 %v9157_v53  ;;  %v9158_v36 = vadd.f32 %v12705_v13, %v3503_v24  ;;  %v4192_v62 = vrot.slane %v12923_v25, 2  ;;  %v10145_v35 = vpop.eup %10144 }
 0x4c2   : > { %v3754_v1 = vsel %vm16164_vm4, %v3666_v27, 0.0  ;;  %vm16165_vm12 = vcmask 1045504   ;;  %v3997_v34 = vrot.slane %v3837_v26, 1  ;;  %v3998_v16 = vrot.slane %v3833_v29, 2  ;;  %v3508_v27 = vpop.f32.mrb[36].mxu1 }
 0x4c3   : > { %v12929_v30 = vpack.c.bf16 %v3754_v1, %v3753_v38  ;;  %v12935_v61 = vsel %vm16165_vm12, %v4180_v57, %v4188_v8  ;;  %vm16166_vm8 = vmmov %vm16165_vm12  ;;  %10150 = vtanh.f32 %v9158_v36  ;;  %vm16168_vm12 = vcmask 1046528   ;;  %v10147_v53 = vpop.eup %10146  ;;  %4802 = vmatpush1.bf16.msra.mxu0 %v9950_v4  ;;  %v9951_v1 = vld [vmem:[%s15560_s5 + $0xb8] sm:$0xff]   ;;  %v16172_v36 = vld [vmem:[#allocation16_spill] sm:$0xff] }
 0x4c4   : > { %v12942_v56 = vsel %vm16166_vm8, %v4178_v28, %v4186_v59  ;;  %vm16167_vm7 = vmmov %vm16166_vm8  ;;  %v12951_v57 = vsel %vm16168_vm12, %v3952_v33, %v3954_v52  ;;  %v3667_v38 = vrot.slane %v10145_v35, 4  ;;  %v3669_v37 = vrot.slane %v10147_v53, 4  ;;  %4803 = vmatprep.subr.bf16.mxu0 %v15779_v7  ;;  %v16176_v53 = vld [vmem:[#allocation17_spill] sm:$0xff] }
 0x4c5   : > { %v4193_v41 = vsel %vm16167_vm7, %v4184_v0, %v4192_v62  ;;  %v3841_v58 = vshll.u32 %v12929_v30, 16  ;;  %v3845_v28 = vshrl.u32 %v12929_v30, 16  ;;  %v4056_v26 = vrot.slane %v12929_v30, 2  ;;  %vm16169_vm8 = vmmov %vm16167_vm7 }
 0x4c6   : > { %4677 = vmatprep.mubr.bf16.mxu0 %v4193_v41  ;;  %v12957_v0 = vor.u32 %v3998_v16, %v3997_v34  ;;  %v15727_v29 = vrot.slane %v12951_v57, 2  ;;  %v15726_v22 = vrot.slane %v12929_v30, 1  ;;  %v12966_v33 = vsel %vm16169_vm8, %v4190_v55, %v15725_v23  ;;  %vm16171_vm12 = vmmov %vm16169_vm8  ;;  %v8845_v55 = vpop.f32.mrb[37].mxu1 }
 0x4c7   : > { %4678 = vmatmul.mubr.bf16.gmra.mrb[80].mxu0 %v12854_v44  ;;  %vm16170_vm7 = vcmask 1043456   ;;  %v3843_v24 = vrot.slane %v3841_v58, 1  ;;  %v12970_v25 = vsel %vm16171_vm12, %v4054_v5, %v4056_v26  ;;  %vm16173_vm4 = vnez %v16172_v36  ;;  %v3511_v4 = vpop.f32.mrb[38].mxu1 }
 0x4c8   : > { %v3668_v6 = vsel %vm16170_vm7, %v3665_v9, %v3667_v38  ;;  %v9159_v44 = vadd.f32 %v12705_v13, %v3508_v27  ;;  %vm16174_vm8 = vsmask.f32 6400  ;;  %v3670_v5 = vsel %vm16170_vm7, %v3667_v38, %v3669_v37  ;;  %v8846_v55 = vpop.f32.mrb[39].mxu1  ;;  %4804 = vmatpush1.bf16.msra.mxu0 %v9951_v1 }
 0x4c9   : > { %v3755_v31 = vsel %vm16173_vm4, %v3668_v6, 0.0  ;;  %v4000_v9 = vsel %vm16174_vm8, %v3995_v11, %v12957_v0  ;;  %vm16175_vm12 = vsmask.f32 7424  ;;  %v3847_v41 = vor.u32 %v3845_v28, %v3843_v24  ;;  %v9952_v11 = vld [vmem:[%s15560_s5 + $0xc0] sm:$0xff]   ;;  %4805 = vmatprep.subr.bf16.mxu0 %v15779_v7 }
 0x4ca   : > { %v12984_v35 = vsel %vm16175_vm12, %v3839_v60, %v3843_v24  ;;  %v4196_v16 = vrot.slane %v4000_v9, 2  ;;  %vm16177_vm4 = vnez %v16176_v53  ;;  %10152 = vtanh.f32 %v9159_v44  ;;  %v3516_v55 = vpop.f32.mrb[40].mxu1 }
 0x4cb   : > { %v3756_v6 = vsel %vm16177_vm4, %v3670_v5, 0.0  ;;  %v9160_v27 = vadd.f32 %v12705_v13, %v3511_v4  ;;  %v4200_v23 = vrot.slane %v12984_v35, 2  ;;  %vm16178_vm8 = vcmask 1045504   ;;  %v10149_v44 = vpop.eup %10148 }
 0x4cc   : > { %v12990_v34 = vpack.c.bf16 %v3756_v6, %v3755_v31  ;;  %v12996_v60 = vsel %vm16178_vm8, %v4188_v8, %v4196_v16  ;;  %vm16179_vm7 = vmmov %vm16178_vm8  ;;  %v4001_v24 = vrot.slane %v3845_v28, 1  ;;  %v4002_v1 = vrot.slane %v3841_v58, 2  ;;  %4806 = vmatpush1.bf16.msra.mxu0 %v9952_v11 }
 0x4cd   : > { %v13003_v38 = vsel %vm16179_vm7, %v4186_v59, %v15727_v29  ;;  %10154 = vtanh.f32 %v9160_v27  ;;  %vm16180_vm12 = vmmov %vm16179_vm7  ;;  %vm16181_vm8 = vcmask 1046528   ;;  %v3671_v9 = vrot.slane %v10149_v44, 4  ;;  %v10151_v5 = vpop.eup %10150  ;;  %4807 = vmatprep.subr.bf16.mxu0 %v15779_v7 }
 0x4ce   : > { %v4201_v31 = vsel %vm16180_vm12, %v4192_v62, %v4200_v23  ;;  %v13012_v8 = vsel %vm16181_vm8, %v3954_v52, %v15726_v22  ;;  %v3849_v14 = vshll.u32 %v12990_v34, 16  ;;  %v3853_v59 = vshrl.u32 %v12990_v34, 16  ;;  %vm16186_vm8 = vmmov %vm16179_vm7 }
 0x4cf   : > { %4685 = vmatprep.mubr.bf16.mxu0 %v4201_v31  ;;  %v4058_v28 = vrot.slane %v12990_v34, 2  ;;  %v13018_v62 = vor.u32 %v4002_v1, %v4001_v24  ;;  %v16182_v52 = vrot.slane %v12970_v25, 2  ;;  %v16183_v4 = vrot.slane %v12910_v43, 2  ;;  %v9953_v24 = vld [vmem:[%s15560_s5 + $0xc8] sm:$0xff]   ;;  %v16187_v1 = vld [vmem:[#allocation18_spill] sm:$0xff] }
 0x4d0   : > { %4686 = vmatmul.mubr.bf16.gmra.mrb[84].mxu0 %v12910_v43  ;;  %vm16185_vm12 = vcmask 1043456   ;;  %v3673_v27 = vrot.slane %v10151_v5, 4  ;;  %v3851_v44 = vrot.slane %v3849_v14, 1  ;;  %vm16188_vm4 = vnez %v16187_v1 }
 0x4d1   : > { %v13027_v35 = vsel %vm16179_vm7, %v16183_v4, %v16182_v52  ;;  %v3672_v6 = vsel %vm16185_vm12, %v3669_v37, %v3671_v9  ;;  %v13031_v31 = vsel %vm16186_vm8, %v4056_v26, %v4058_v28  ;;  %v9161_v43 = vadd.f32 %v12705_v13, %v3516_v55  ;;  %v8849_v52 = vpop.f32.mrb[41].mxu1  ;;  %4808 = vmatpush1.bf16.msra.mxu0 %v9953_v24 }
 0x4d2   : > { %16184 = vst [vmem:[#allocation19_spill] sm:$0xff] %v13027_v35  ;;  %v3757_v22 = vsel %vm16188_vm4, %v3672_v6, 0.0  ;;  %vm16189_vm7 = vsmask.f32 6400  ;;  %v3674_v37 = vsel %vm16185_vm12, %v3671_v9, %v3673_v27  ;;  %v3519_v11 = vpop.f32.mrb[42].mxu1  ;;  %v3855_v3 = vor.u32 %v3853_v59, %v3851_v44  ;;  %v16191_v6 = vld [vmem:[#allocation20_spill] sm:$0xff]  ;;  %4809 = vmatprep.subr.bf16.mxu0 %v15779_v7 }
 0x4d3   : > { %v4004_v26 = vsel %vm16189_vm7, %v12957_v0, %v13018_v62  ;;  %vm16190_vm8 = vsmask.f32 7424  ;;  %vm16192_vm4 = vnez %v16191_v6  ;;  %10156 = vtanh.f32 %v9161_v43  ;;  %v8850_v4 = vpop.f32.mrb[43].mxu1  ;;  %v9954_v0 = vld [vmem:[%s15560_s5 + $0xd0] sm:$0xff]  }
 0x4d4   : > { %v13046_v5 = vsel %vm16190_vm8, %v3847_v41, %v3851_v44  ;;  %v4204_v29 = vrot.slane %v4004_v26, 2  ;;  %v3758_v55 = vsel %vm16192_vm4, %v3674_v37, 0.0  ;;  %v9162_v52 = vadd.f32 %v12705_v13, %v3519_v11  ;;  %v10153_v26 = vpop.eup %10152 }
 0x4d5   : > { %v4208_v58 = vrot.slane %v13046_v5, 2  ;;  %v13052_v1 = vpack.c.bf16 %v3758_v55, %v3757_v22  ;;  %vm16193_vm7 = vcmask 1045504   ;;  %v16194_v9 = vrot.slane %v13012_v8, 2  ;;  %4810 = vmatpush1.bf16.msra.mxu0 %v9954_v0 }
 0x4d6   : > { %v13058_v41 = vsel %vm16193_vm7, %v4196_v16, %v4204_v29  ;;  %v16195_v44 = vrot.slane %v12951_v57, 2  ;;  %vm16196_vm12 = vmmov %vm16193_vm7  ;;  %v4005_v4 = vrot.slane %v3853_v59, 1  ;;  %10158 = vtanh.f32 %v9162_v52  ;;  %4811 = vmatprep.subr.bf16.mxu0 %v15779_v7 }
 0x4d7   : > { %vm16197_vm8 = vmmov %vm16193_vm7  ;;  %v4006_v24 = vrot.slane %v3849_v14, 2  ;;  %v16198_v37 = vrot.slane %v12990_v34, 1  ;;  %v16199_v16 = vrot.slane %v12929_v30, 1  ;;  %vm16200_vm7 = vcmask 1046528   ;;  %v10155_v52 = vpop.eup %10154 }
 0x4d8   : > { %v13065_v43 = vsel %vm16196_vm12, %v16195_v44, %v16194_v9  ;;  %v4209_v22 = vsel %vm16197_vm8, %v4200_v23, %v4208_v58  ;;  %v3675_v5 = vrot.slane %v10153_v26, 4  ;;  %v3857_v57 = vshll.u32 %v13052_v1, 16  ;;  %vm16203_vm12 = vmmov %vm16197_vm8 }
 0x4d9   : > { %v13074_v11 = vsel %vm16200_vm7, %v16199_v16, %v16198_v37  ;;  %4693 = vmatprep.mubr.bf16.mxu0 %v4209_v22  ;;  %v3861_v59 = vshrl.u32 %v13052_v1, 16  ;;  %v4060_v55 = vrot.slane %v13052_v1, 2  ;;  %v13080_v23 = vor.u32 %v4006_v24, %v4005_v4  ;;  %v3524_v16 = vpop.f32.mrb[44].mxu1  ;;  %vm16206_vm7 = vmmov %vm16203_vm12  ;;  %v9955_v4 = vld [vmem:[%s15560_s5 + $0xd8] sm:$0xff]  }
 0x4da   : > { %4694 = vmatmul.mubr.bf16.gmra.mrb[88].mxu0 %v12970_v25  ;;  %v16201_v9 = vrot.slane %v13031_v31, 2  ;;  %v16202_v44 = vrot.slane %v12970_v25, 2  ;;  %vm16205_vm8 = vcmask 1043456   ;;  %v3677_v37 = vrot.slane %v10155_v52, 4  ;;  %v16207_v24 = vld [vmem:[#allocation21_spill] sm:$0xff] }
 0x4db   : > { %v3676_v22 = vsel %vm16205_vm8, %v3673_v27, %v3675_v5  ;;  %v3859_v6 = vrot.slane %v3857_v57, 1  ;;  %v13093_v53 = vsel %vm16206_vm7, %v4058_v28, %v4060_v55  ;;  %vm16208_vm4 = vnez %v16207_v24  ;;  %4812 = vmatpush1.bf16.msra.mxu0 %v9955_v4 }
 0x4dc   : > { %v13089_v26 = vsel %vm16203_vm12, %v16202_v44, %v16201_v9  ;;  %v3759_v30 = vsel %vm16208_vm4, %v3676_v22, 0.0  ;;  %v9163_v25 = vadd.f32 %v12705_v13, %v3524_v16  ;;  %v8853_v9 = vpop.f32.mrb[45].mxu1  ;;  %vm16209_vm12 = vsmask.f32 6400  ;;  %v16211_v22 = vld [vmem:[#allocation23_spill] sm:$0xff]  ;;  %4813 = vmatprep.subr.bf16.mxu0 %v15779_v7 }
 0x4dd   : > { %16204 = vst [vmem:[#allocation22_spill] sm:$0xff] %v13089_v26  ;;  %v4008_v28 = vsel %vm16209_vm12, %v13018_v62, %v13080_v23  ;;  %v3678_v27 = vsel %vm16205_vm8, %v3675_v5, %v3677_v37  ;;  %v3527_v0 = vpop.f32.mrb[46].mxu1  ;;  %vm16210_vm7 = vsmask.f32 7424  ;;  %v3863_v14 = vor.u32 %v3861_v59, %v3859_v6  ;;  %v9956_v62 = vld [vmem:[%s15560_s5 + $0xe0] sm:$0xff]  }
 0x4de   : > { %v13108_v52 = vsel %vm16210_vm7, %v3855_v3, %v3859_v6  ;;  %v4212_v24 = vrot.slane %v4008_v28, 2  ;;  %vm16212_vm4 = vnez %v16211_v22  ;;  %10160 = vtanh.f32 %v9163_v25  ;;  %v8854_v44 = vpop.f32.mrb[47].mxu1  ;;  %v10157_v28 = vpop.eup %10156 }
 0x4df   : > { %v3760_v16 = vsel %vm16212_vm4, %v3678_v27, 0.0  ;;  %v9164_v9 = vadd.f32 %v12705_v13, %v3527_v0  ;;  %v4216_v36 = vrot.slane %v13108_v52, 2  ;;  %vm16213_vm12 = vcmask 1045504   ;;  %4814 = vmatpush1.bf16.msra.mxu0 %v9956_v62 }
 0x4e0   : > { %v13114_v63 = vpack.c.bf16 %v3760_v16, %v3759_v30  ;;  %v13120_v3 = vsel %vm16213_vm12, %v4204_v29, %v4212_v24  ;;  %v16214_v6 = vrot.slane %v13074_v11, 2  ;;  %v16215_v5 = vrot.slane %v13012_v8, 2  ;;  %vm16216_vm8 = vmmov %vm16213_vm12  ;;  %4815 = vmatprep.subr.bf16.mxu0 %v15779_v7 }
 0x4e1   : > { %v4009_v44 = vrot.slane %v3861_v59, 1  ;;  %10162 = vtanh.f32 %v9164_v9  ;;  %vm16217_vm7 = vmmov %vm16216_vm8  ;;  %v4010_v4 = vrot.slane %v3857_v57, 2  ;;  %v16218_v27 = vrot.slane %v13052_v1, 1  ;;  %v10159_v9 = vpop.eup %10158 }
 0x4e2   : > { %v13127_v25 = vsel %vm16216_vm8, %v16215_v5, %v16214_v6  ;;  %v4217_v30 = vsel %vm16217_vm7, %v4208_v58, %v4216_v36  ;;  %v16219_v29 = vrot.slane %v12990_v34, 1  ;;  %vm16220_vm12 = vcmask 1046528   ;;  %vm16223_vm8 = vmmov %vm16217_vm7 }
 0x4e3   : > { %v3679_v52 = vrot.slane %v10157_v28, 4  ;;  %4701 = vmatprep.mubr.bf16.mxu0 %v4217_v30  ;;  %v3865_v8 = vshll.u32 %v13114_v63, 16  ;;  %v3869_v59 = vshrl.u32 %v13114_v63, 16  ;;  %v4062_v16 = vrot.slane %v13114_v63, 2 }
 0x4e4   : > { %v13136_v0 = vsel %vm16220_vm12, %v16219_v29, %v16218_v27  ;;  %4702 = vmatmul.mubr.bf16.gmra.mrb[92].mxu0 %v13031_v31  ;;  %v13142_v58 = vor.u32 %v4010_v4, %v4009_v44  ;;  %v16221_v6 = vrot.slane %v13093_v53, 2  ;;  %v16222_v5 = vrot.slane %v13031_v31, 2  ;;  %v3532_v29 = vpop.f32.mrb[48].mxu1  ;;  %vm16226_vm12 = vmmov %vm16223_vm8  ;;  %v9957_v44 = vld [vmem:[%s15560_s5 + $0xe8] sm:$0xff]   ;;  %v16227_v4 = vld [vmem:[#allocation24_spill] sm:$0xff] }
 0x4e5   : > { %vm16225_vm7 = vcmask 1043456   ;;  %v3681_v27 = vrot.slane %v10159_v9, 4  ;;  %v3867_v22 = vrot.slane %v3865_v8, 1  ;;  %v13155_v49 = vsel %vm16226_vm12, %v4060_v55, %v4062_v16  ;;  %4816 = vmatpush1.bf16.msra.mxu0 %v9957_v44 }
 0x4e6   : > { %v13151_v28 = vsel %vm16223_vm8, %v16222_v5, %v16221_v6  ;;  %v3680_v30 = vsel %vm16225_vm7, %v3677_v37, %v3679_v52  ;;  %vm16228_vm4 = vnez %v16227_v4  ;;  %v9165_v31 = vadd.f32 %v12705_v13, %v3532_v29  ;;  %v8857_v6 = vpop.f32.mrb[49].mxu1  ;;  %4817 = vmatprep.subr.bf16.mxu0 %v15779_v7 }
 0x4e7   : > { %16224 = vst [vmem:[#allocation25_spill] sm:$0xff] %v13151_v28  ;;  %v3761_v34 = vsel %vm16228_vm4, %v3680_v30, 0.0  ;;  %vm16229_vm8 = vsmask.f32 6400  ;;  %v3682_v37 = vsel %vm16225_vm7, %v3679_v52, %v3681_v27  ;;  %v3535_v62 = vpop.f32.mrb[50].mxu1  ;;  %v3871_v57 = vor.u32 %v3869_v59, %v3867_v22  ;;  %v16231_v30 = vld [vmem:[#allocation26_spill] sm:$0xff] }
 0x4e8   : > { %v4012_v55 = vsel %vm16229_vm8, %v13080_v23, %v13142_v58  ;;  %vm16230_vm12 = vsmask.f32 7424  ;;  %vm16232_vm4 = vnez %v16231_v30  ;;  %10164 = vtanh.f32 %v9165_v31  ;;  %v8858_v5 = vpop.f32.mrb[51].mxu1  ;;  %v9958_v23 = vld [vmem:[%s15560_s5 + $0xf0] sm:$0xff]  }
 0x4e9   : > { %v13170_v9 = vsel %vm16230_vm12, %v3863_v14, %v3867_v22  ;;  %v4220_v4 = vrot.slane %v4012_v55, 2  ;;  %v3762_v29 = vsel %vm16232_vm4, %v3682_v37, 0.0  ;;  %v9166_v6 = vadd.f32 %v12705_v13, %v3535_v62  ;;  %v10161_v55 = vpop.eup %10160  ;;  %4818 = vmatpush1.bf16.msra.mxu0 %v9958_v23 }
 0x4ea   : > { %v4224_v46 = vrot.slane %v13170_v9, 2  ;;  %v13176_v12 = vpack.c.bf16 %v3762_v29, %v3761_v34  ;;  %vm16233_vm8 = vcmask 1045504   ;;  %v16234_v22 = vrot.slane %v13136_v0, 2  ;;  %4819 = vmatprep.subr.bf16.mxu0 %v15779_v7 }
 0x4eb   : > { %v13182_v14 = vsel %vm16233_vm8, %v4212_v24, %v4220_v4  ;;  %v16235_v52 = vrot.slane %v13074_v11, 2  ;;  %vm16236_vm7 = vmmov %vm16233_vm8  ;;  %v4013_v5 = vrot.slane %v3869_v59, 1  ;;  %10166 = vtanh.f32 %v9166_v6  ;;  %v10163_v6 = vpop.eup %10162 }
 0x4ec   : > { %vm16237_vm12 = vmmov %vm16236_vm7  ;;  %v4014_v44 = vrot.slane %v3865_v8, 2  ;;  %v16238_v37 = vrot.slane %v13114_v63, 1  ;;  %v16239_v24 = vrot.slane %v13052_v1, 1  ;;  %vm16240_vm8 = vcmask 1046528  }
 0x4ed   : > { %v13189_v31 = vsel %vm16236_vm7, %v16235_v52, %v16234_v22  ;;  %v4225_v34 = vsel %vm16237_vm12, %v4216_v36, %v4224_v46  ;;  %v3683_v9 = vrot.slane %v10161_v55, 4  ;;  %v3873_v11 = vshll.u32 %v13176_v12, 16 }
 0x4ee   : > { %v13198_v62 = vsel %vm16240_vm8, %v16239_v24, %v16238_v37  ;;  %4709 = vmatprep.mubr.bf16.mxu0 %v4225_v34  ;;  %v3877_v59 = vshrl.u32 %v13176_v12, 16  ;;  %v4064_v29 = vrot.slane %v13176_v12, 2  ;;  %v4015_v36 = vor.u32 %v4014_v44, %v4013_v5  ;;  %v3540_v24 = vpop.f32.mrb[52].mxu1  ;;  %vm16245_vm8 = vmmov %vm16236_vm7  ;;  %v9959_v5 = vld [vmem:[%s15560_s5 + $0xf8] sm:$0xff]   ;;  %v16246_v44 = vld [vmem:[#allocation27_spill] sm:$0xff] }
 0x4ef   : > { %4710 = vmatmul.mubr.bf16.gmra.mrb[96].mxu0 %v13093_v53  ;;  %v16241_v1 = vrot.slane %v13155_v49, 2  ;;  %v16242_v52 = vrot.slane %v13093_v53, 2  ;;  %vm16244_vm12 = vcmask 1043456   ;;  %v3685_v37 = vrot.slane %v10163_v6, 4 }
 0x4f0   : > { %v3684_v34 = vsel %vm16244_vm12, %v3681_v27, %v3683_v9  ;;  %v3875_v30 = vrot.slane %v3873_v11, 1  ;;  %v13215_v45 = vsel %vm16245_vm8, %v4062_v16, %v4064_v29  ;;  %vm16247_vm4 = vnez %v16246_v44  ;;  %4820 = vmatpush1.bf16.msra.mxu0 %v9959_v5 }
 0x4f1   : > { %v13211_v55 = vsel %vm16236_vm7, %v16242_v52, %v16241_v1  ;;  %v3763_v22 = vsel %vm16247_vm4, %v3684_v34, 0.0  ;;  %v9167_v53 = vadd.f32 %v12705_v13, %v3540_v24  ;;  %v8861_v1 = vpop.f32.mrb[53].mxu1  ;;  %vm16248_vm7 = vsmask.f32 6400  ;;  %8875 = vmatprep.subr.bf16.mxu0 %v15972_v15 }
 0x4f2   : > { %16243 = vst [vmem:[#allocation28_spill] sm:$0xff] %v13211_v55  ;;  %v4016_v27 = vsel %vm16248_vm7, %v13142_v58, %v4015_v36  ;;  %v3686_v16 = vsel %vm16244_vm12, %v3683_v9, %v3685_v37  ;;  %v3543_v23 = vpop.f32.mrb[54].mxu1  ;;  %vm16249_vm8 = vsmask.f32 7424  ;;  %v3879_v8 = vor.u32 %v3877_v59, %v3875_v30 }
 0x4f3   : > { %v3876_v6 = vsel %vm16249_vm8, %v3871_v57, %v3875_v30  ;;  %v4228_v21 = vrot.slane %v4016_v27, 2  ;;  %vm16251_vm0 = vnez %v16250_v50  ;;  %10168 = vtanh.f32 %v9167_v53  ;;  %v8862_v1 = vpop.f32.mrb[55].mxu1 }
 0x4f4   : > { %v3764_v34 = vsel %vm16251_vm0, %v3686_v16, 0.0  ;;  %v9168_v24 = vadd.f32 %v12705_v13, %v3543_v23  ;;  %v4232_v52 = vrot.slane %v3876_v6, 2  ;;  %vm16252_vm4 = vcmask 1045504   ;;  %v10165_v16 = vpop.eup %10164 }
 0x4f5   : > { %v13232_v44 = vpack.c.bf16 %v3764_v34, %v3763_v22  ;;  %v13235_v58 = vsel %vm16252_vm4, %v4220_v4, %v4228_v21  ;;  %v16253_v9 = vrot.slane %v13198_v62, 2  ;;  %v16254_v57 = vrot.slane %v13136_v0, 2  ;;  %vm16255_vm7 = vmmov %vm16252_vm4 }
 0x4f6   : > { %v4017_v27 = vrot.slane %v3877_v59, 1  ;;  %10170 = vtanh.f32 %v9168_v24  ;;  %vm16256_vm12 = vmmov %vm16252_vm4  ;;  %v4018_v22 = vrot.slane %v3873_v11, 2  ;;  %v16257_v5 = vrot.slane %v13176_v12, 1  ;;  %v10167_v24 = vpop.eup %10166 }
 0x4f7   : > { %v13242_v30 = vsel %vm16255_vm7, %v16254_v57, %v16253_v9  ;;  %v4233_v53 = vsel %vm16256_vm12, %v4224_v46, %v4232_v52  ;;  %v16258_v4 = vrot.slane %v13114_v63, 1  ;;  %vm16259_vm4 = vcmask 1046528   ;;  %vm16262_vm8 = vmmov %vm16255_vm7 }
 0x4f8   : > { %v3687_v6 = vrot.slane %v10165_v16, 4  ;;  %4717 = vmatprep.mubr.bf16.mxu0 %v4233_v53  ;;  %v3881_v0 = vshll.u32 %v13232_v44, 16  ;;  %v3885_v59 = vshrl.u32 %v13232_v44, 16  ;;  %v4066_v34 = vrot.slane %v13232_v44, 2  ;;  %vm16265_vm12 = vmmov %vm16262_vm8 }
 0x4f9   : > { %v13251_v23 = vsel %vm16259_vm4, %v16258_v4, %v16257_v5  ;;  %4718 = vmatmul.mubr.bf16.gmra.mrb[100].mxu0 %v13155_v49  ;;  %v4019_v46 = vor.u32 %v4018_v22, %v4017_v27  ;;  %v16260_v63 = vrot.slane %v13215_v45, 2  ;;  %v16261_v9 = vrot.slane %v13155_v49, 2  ;;  %v3548_v5 = vpop.f32.mrb[56].mxu1  ;;  %v16266_v27 = vld [vmem:[#allocation30_spill] sm:$0xff] }
 0x4fa   : > { %vm16264_vm7 = vcmask 1043456   ;;  %v3689_v53 = vrot.slane %v10167_v24, 4  ;;  %v3883_v4 = vrot.slane %v3881_v0, 1  ;;  %v13268_v50 = vsel %vm16265_vm12, %v4064_v29, %v4066_v34  ;;  %v8865_v11 = vpop.f32.mrb[57].mxu1 }
 0x4fb   : > { %v13264_v57 = vsel %vm16262_vm8, %v16261_v9, %v16260_v63  ;;  %v3688_v16 = vsel %vm16264_vm7, %v3685_v37, %v3687_v6  ;;  %vm16267_vm4 = vnez %v16266_v27  ;;  %v9169_v1 = vadd.f32 %v12705_v13, %v3548_v5  ;;  %vm16269_vm8 = vmmov %vm16264_vm7  ;;  %v3551_v9 = vpop.f32.mrb[58].mxu1  ;;  %v13282_v13 = vld [vmem:[%s15559_s4] ss:$0 sm:$0xff] }
 0x4fc   : > { %16263 = vst [vmem:[#allocation31_spill] sm:$0xff] %v13264_v57  ;;  %v3765_v22 = vsel %vm16267_vm4, %v3688_v16, 0.0  ;;  %vm16268_vm0 = vsmask.f32 6400  ;;  %v3690_v63 = vsel %vm16269_vm8, %v3687_v6, %v3689_v53  ;;  %vm16270_vm7 = vsmask.f32 7424 }
 0x4fd   : > { %v4020_v49 = vsel %vm16268_vm0, %v4015_v36, %v4019_v46  ;;  %v3884_v37 = vsel %vm16270_vm7, %v3879_v8, %v3883_v4  ;;  %v3887_v24 = vor.u32 %v3885_v59, %v3883_v4  ;;  %vm16272_vm12 = vnez %v16271_v18  ;;  %v8866_v16 = vpop.f32.mrb[59].mxu1 }
 0x4fe   : > { %v4236_v40 = vrot.slane %v4020_v49, 2  ;;  %v3766_v29 = vsel %vm16272_vm12, %v3690_v63, 0.0  ;;  %10172 = vtanh.f32 %v9169_v1  ;;  %v9170_v11 = vadd.f32 %v13282_v13, %v3551_v9  ;;  %v10169_v63 = vpop.eup %10168 }
 0x4ff   : > { %v4240_v36 = vrot.slane %v3884_v37, 2  ;;  %v13285_v5 = vpack.c.bf16 %v3766_v29, %v3765_v22  ;;  %vm16273_vm0 = vcmask 1045504   ;;  %v16274_v8 = vrot.slane %v13251_v23, 2 }
 0x500   : > { %v13288_v6 = vsel %vm16273_vm0, %v4228_v21, %v4236_v40  ;;  %v16275_v4 = vrot.slane %v13198_v62, 2  ;;  %vm16276_vm8 = vmmov %vm16273_vm0  ;;  %v4021_v49 = vrot.slane %v3885_v59, 1  ;;  %10174 = vtanh.f32 %v9170_v11 }
 0x501   : > { %vm16277_vm7 = vmmov %vm16273_vm0  ;;  %v4022_v9 = vrot.slane %v3881_v0, 2  ;;  %v16278_v37 = vrot.slane %v13232_v44, 1  ;;  %v16279_v22 = vrot.slane %v13176_v12, 1  ;;  %vm16280_vm12 = vcmask 1046528  }
 0x502   : > { %v13295_v1 = vsel %vm16276_vm8, %v16275_v4, %v16274_v8  ;;  %v4241_v20 = vsel %vm16277_vm7, %v4232_v52, %v4240_v36  ;;  %v3691_v29 = vrot.slane %v10169_v63, 4  ;;  %v3889_v62 = vshll.u32 %v13285_v5, 16  ;;  %v10171_v8 = vpop.eup %10170  ;;  %vm16286_vm8 = vmmov %vm16277_vm7 }
 0x503   : > { %v13303_v21 = vsel %vm16280_vm12, %v16279_v22, %v16278_v37  ;;  %4725 = vmatprep.mubr.bf16.mxu0 %v4241_v20  ;;  %v3893_v16 = vshrl.u32 %v13285_v5, 16  ;;  %v4068_v59 = vrot.slane %v13285_v5, 2  ;;  %v4023_v52 = vor.u32 %v4022_v9, %v4021_v49  ;;  %vm16283_vm12 = vmmov %vm16273_vm0  ;;  %v3556_v22 = vpop.f32.mrb[60].mxu1  ;;  %v16287_v49 = vld [vmem:[#allocation33_spill] sm:$0xff] }
 0x504   : > { %4726 = vmatmul.mubr.bf16.gmra.mrb[104].mxu0 %v13215_v45  ;;  %v16281_v12 = vrot.slane %v13268_v50, 2  ;;  %v16282_v4 = vrot.slane %v13215_v45, 2  ;;  %vm16285_vm0 = vcmask 1043456   ;;  %v3693_v37 = vrot.slane %v10171_v8, 4  ;;  %v8869_v0 = vpop.f32.mrb[61].mxu1 }
 0x505   : > { %v3692_v63 = vsel %vm16285_vm0, %v3689_v53, %v3691_v29  ;;  %v3891_v18 = vrot.slane %v3889_v62, 1  ;;  %v13320_v27 = vsel %vm16286_vm8, %v4066_v34, %v4068_v59  ;;  %vm16288_vm7 = vnez %v16287_v49 }
 0x506   : > { %v13316_v20 = vsel %vm16283_vm12, %v16282_v4, %v16281_v12  ;;  %v3767_v9 = vsel %vm16288_vm7, %v3692_v63, 0.0  ;;  %v9171_v11 = vadd.f32 %v13282_v13, %v3556_v22  ;;  %vm16289_vm4 = vsmask.f32 6400  ;;  %vm16290_vm12 = vmmov %vm16285_vm0  ;;  %v3559_v4 = vpop.f32.mrb[62].mxu1 }
 0x507   : > { %16284 = vst [vmem:[#allocation34_spill] sm:$0xff] %v13316_v20  ;;  %v4024_v45 = vsel %vm16289_vm4, %v4019_v46, %v4023_v52  ;;  %v3694_v12 = vsel %vm16290_vm12, %v3691_v29, %v3693_v37  ;;  %vm16291_vm0 = vsmask.f32 7424  ;;  %v3895_v8 = vor.u32 %v3893_v16, %v3891_v18  ;;  %v8870_v49 = vpop.f32.mrb[63].mxu1  ;;  %v16313_v20 = vld [vmem:[#allocation38_spill] sm:$0xff] }
 0x508   : > { %v3892_v53 = vsel %vm16291_vm0, %v3887_v24, %v3891_v18  ;;  %v4244_v47 = vrot.slane %v4024_v45, 2  ;;  %vm16293_vm8 = vnez %v16292_v42  ;;  %10176 = vtanh.f32 %v9171_v11  ;;  %v10173_v45 = vpop.eup %10172 }
 0x509   : > { %v3768_v34 = vsel %vm16293_vm8, %v3694_v12, 0.0  ;;  %v9172_v63 = vadd.f32 %v13282_v13, %v3559_v4  ;;  %v4248_v22 = vrot.slane %v3892_v53, 2  ;;  %vm16294_vm7 = vcmask 1045504  }
 0x50a   : > { %v13332_v0 = vpack.c.bf16 %v3768_v34, %v3767_v9  ;;  %v13335_v39 = vsel %vm16294_vm7, %v4236_v40, %v4244_v47  ;;  %v16295_v46 = vrot.slane %v13303_v21, 2  ;;  %v16296_v29 = vrot.slane %v13251_v23, 2  ;;  %vm16297_vm4 = vmmov %vm16294_vm7 }
 0x50b   : > { %v4025_v24 = vrot.slane %v3893_v16, 1  ;;  %10178 = vtanh.f32 %v9172_v63  ;;  %vm16298_vm12 = vmmov %vm16297_vm4  ;;  %v4026_v12 = vrot.slane %v3889_v62, 2  ;;  %v16299_v49 = vrot.slane %v13285_v5, 1  ;;  %v10175_v16 = vpop.eup %10174 }
 0x50c   : > { %v13342_v18 = vsel %vm16297_vm4, %v16296_v29, %v16295_v46  ;;  %v4249_v11 = vsel %vm16298_vm12, %v4240_v36, %v4248_v22  ;;  %v16300_v9 = vrot.slane %v13232_v44, 1  ;;  %vm16301_vm0 = vcmask 1046528   ;;  %vm16304_vm7 = vmmov %vm16297_vm4 }
 0x50d   : > { %v3695_v4 = vrot.slane %v10173_v45, 4  ;;  %4733 = vmatprep.mubr.bf16.mxu0 %v4249_v11  ;;  %v3897_v53 = vshll.u32 %v13332_v0, 16  ;;  %v3901_v23 = vshrl.u32 %v13332_v0, 16  ;;  %v4070_v34 = vrot.slane %v13332_v0, 2  ;;  %vm16307_vm12 = vmmov %vm16304_vm7 }
 0x50e   : > { %v3969_v40 = vsel %vm16301_vm0, %v16300_v9, %v16299_v49  ;;  %4734 = vmatmul.mubr.bf16.gmra.mrb[108].mxu0 %v13268_v50  ;;  %v4027_v63 = vor.u32 %v4026_v12, %v4025_v24  ;;  %v3970_v62 = vrot.slane %v13332_v0, 1  ;;  %v16302_v46 = vrot.slane %v13320_v27, 2  ;;  %v3564_v49 = vpop.f32.mrb[64].mxu1 }
 0x50f   : > { %v4250_v36 = vrot.slane %v3969_v40, 2  ;;  %v16303_v44 = vrot.slane %v13268_v50, 2  ;;  %vm16306_vm4 = vcmask 1043456   ;;  %v3697_v11 = vrot.slane %v10175_v16, 4  ;;  %v8873_v12 = vpop.f32.mrb[65].mxu1 }
 0x510   : > { %v3696_v45 = vsel %vm16306_vm4, %v3693_v37, %v3695_v4  ;;  %v3899_v9 = vrot.slane %v3897_v53, 1  ;;  %v13364_v42 = vsel %vm16307_vm12, %v4068_v59, %v4070_v34  ;;  %vm16309_vm0 = vnez %v16308_v19 }
 0x511   : > { %v13360_v29 = vsel %vm16304_vm7, %v16303_v44, %v16302_v46  ;;  %v3769_v24 = vsel %vm16309_vm0, %v3696_v45, 0.0  ;;  %v9173_v0 = vadd.f32 %v13282_v13, %v3564_v49  ;;  %v4262_v40 = vrot.slane %v13364_v42, 2  ;;  %vm16311_vm7 = vmmov %vm16306_vm4  ;;  %v3567_v44 = vpop.f32.mrb[66].mxu1 }
 0x512   : > { %16305 = vst [vmem:[#allocation37_spill] sm:$0xff] %v13360_v29  ;;  %vm16310_vm8 = vsmask.f32 6400  ;;  %v3698_v46 = vsel %vm16311_vm7, %v3695_v4, %v3697_v11  ;;  %vm16312_vm4 = vsmask.f32 7424  ;;  %v3903_v16 = vor.u32 %v3901_v23, %v3899_v9  ;;  %v8874_v19 = vpop.f32.mrb[67].mxu1 }
 0x513   : > { %v4028_v50 = vsel %vm16310_vm8, %v4023_v52, %v4027_v63  ;;  %v3900_v37 = vsel %vm16312_vm4, %v3895_v8, %v3899_v9  ;;  %vm16314_vm12 = vnez %v16313_v20  ;;  %10180 = vtanh.f32 %v9173_v0  ;;  %v10177_v9 = vpop.eup %10176 }
 0x514   : > { %v4252_v29 = vrot.slane %v4028_v50, 2  ;;  %v3770_v59 = vsel %vm16314_vm12, %v3698_v46, 0.0  ;;  %v9174_v45 = vadd.f32 %v13282_v13, %v3567_v44  ;;  %v4256_v49 = vrot.slane %v3900_v37, 2 }
 0x515   : > { %v13376_v12 = vpack.c.bf16 %v3770_v59, %v3769_v24  ;;  %vm16315_vm0 = vcmask 1045504   ;;  %v16316_v52 = vrot.slane %v13303_v21, 2  ;;  %v4029_v8 = vrot.slane %v3901_v23, 1  ;;  %v10179_v44 = vpop.eup %10178 }
 0x516   : > { %v13379_v57 = vsel %vm16315_vm0, %v4244_v47, %v4252_v29  ;;  %vm16317_vm8 = vmmov %vm16315_vm0  ;;  %10182 = vtanh.f32 %v9174_v45  ;;  %v4030_v0 = vrot.slane %v3897_v53, 2  ;;  %v16319_v13 = vrot.slane %v13285_v5, 1 }
 0x517   : > { %v13384_v4 = vsel %vm16317_vm8, %v16316_v52, %v4250_v36  ;;  %vm16318_vm7 = vmmov %vm16315_vm0  ;;  %vm16320_vm4 = vcmask 1046528   ;;  %v3699_v24 = vrot.slane %v10177_v9, 4  ;;  %v3905_v47 = vshll.u32 %v13376_v12, 16 }
 0x518   : > { %v4257_v50 = vsel %vm16318_vm7, %v4248_v22, %v4256_v49  ;;  %v3971_v19 = vsel %vm16320_vm4, %v16319_v13, %v3970_v62  ;;  %v3909_v46 = vshrl.u32 %v13376_v12, 16  ;;  %v4072_v21 = vrot.slane %v13376_v12, 2  ;;  %vm16324_vm7 = vmmov %vm16315_vm0 }
 0x519   : > { %4741 = vmatprep.mubr.bf16.mxu0 %v4257_v50  ;;  %v4031_v23 = vor.u32 %v4030_v0, %v4029_v8  ;;  %v4258_v37 = vrot.slane %v3971_v19, 2  ;;  %v3972_v22 = vrot.slane %v13376_v12, 1  ;;  %v16321_v53 = vrot.slane %v13320_v27, 2  ;;  %vm16326_vm12 = vmmov %vm16315_vm0  ;;  %v16327_v8 = vld [vmem:[#allocation39_spill] sm:$0xff] }
 0x51a   : > { %4742 = vmatmul.mubr.bf16.gmra.mrb[112].mxu0 %v13320_v27  ;;  %vm16323_vm8 = vcmask 1043456   ;;  %v3701_v45 = vrot.slane %v10179_v44, 4  ;;  %v3907_v52 = vrot.slane %v3905_v47, 1  ;;  %v4073_v9 = vsel %vm16324_vm7, %v4070_v34, %v4072_v21 }
 0x51b   : > { %v13398_v5 = vsel %vm16315_vm0, %v16321_v53, %v4262_v40  ;;  %v3700_v59 = vsel %vm16323_vm8, %v3697_v11, %v3699_v24  ;;  %v4270_v50 = vrot.slane %v4073_v9, 2  ;;  %vm16325_vm4 = vsmask.f32 6400  ;;  %vm16329_vm11 = vmmov %vm16323_vm8  ;;  %v16331_v53 = vld [vmem:[#allocation41_spill] sm:$0xff] }
 0x51c   : > { %16322 = vst [vmem:[#allocation40_spill] sm:$0xff] %v13398_v5  ;;  %v4032_v13 = vsel %vm16325_vm4, %v4027_v63, %v4031_v23  ;;  %v13404_v20 = vsel %vm16326_vm12, %v4250_v36, %v4258_v37  ;;  %vm16328_vm6 = vnez %v16327_v8  ;;  %v3702_v27 = vsel %vm16329_vm11, %v3699_v24, %v3701_v45  ;;  %vm16333_vm8 = vmmov %vm16324_vm7 }
 0x51d   : > { %v3771_v12 = vsel %vm16328_vm6, %v3700_v59, 0.0  ;;  %v3908_v0 = vsel %vm16330_vm9, %v3903_v16, %v3907_v52  ;;  %v4260_v19 = vrot.slane %v4032_v13, 2  ;;  %vm16332_vm0 = vnez %v16331_v53  ;;  %v10181_v59 = vpop.eup %10180  ;;  %vm16336_vm11 = vmmov %vm16324_vm7 }
 0x51e   : > { %v3772_v11 = vsel %vm16332_vm0, %v3702_v27, 0.0  ;;  %v4264_v44 = vrot.slane %v3908_v0, 2  ;;  %v4033_v5 = vrot.slane %v3909_v46, 1  ;;  %v4034_v34 = vrot.slane %v3905_v47, 2  ;;  %vm16337_vm9 = vmmov %vm16325_vm4 }
 0x51f   : > { %v3790_v55 = vpack.c.bf16 %v3772_v11, %v3771_v12  ;;  %v13413_v63 = vsel %vm16333_vm8, %v4252_v29, %v4260_v19  ;;  %vm16334_vm12 = vcmask 1046528   ;;  %v13417_v8 = vsel %vm16324_vm7, %v4262_v40, %v4270_v50  ;;  %vm16338_vm4 = vmmov %vm16324_vm7 }
 0x520   : > { %v3973_v36 = vsel %vm16334_vm12, %v3970_v62, %v3972_v22  ;;  %16335 = vst [vmem:[#allocation43_spill] sm:$0xff] %v13417_v8  ;;  %v4265_v24 = vsel %vm16336_vm11, %v4256_v49, %v4264_v44  ;;  %v4035_v16 = vor.u32 %v4034_v34, %v4033_v5  ;;  %v3703_v28 = vrot.slane %v10181_v59, 4  ;;  %v10183_v47 = vpop.eup %10182  ;;  %vm16340_vm12 = vmmov %vm16338_vm4 }
 0x521   : > { %v4266_v13 = vrot.slane %v3973_v36, 2  ;;  %4749 = vmatprep.mubr.bf16.mxu0 %v4265_v24  ;;  %v3913_v27 = vshll.u32 %v3790_v55, 16  ;;  %v3917_v0 = vshrl.u32 %v3790_v55, 16  ;;  %v4074_v53 = vrot.slane %v3790_v55, 2 }
 0x522   : > { %4750 = vmatmul.mubr.bf16.gmra.mrb[116].mxu0 %v13364_v42  ;;  %v3911_v29 = vor.u32 %v3909_v46, %v3907_v52  ;;  %v4036_v12 = vsel %vm16337_vm9, %v4031_v23, %v4035_v16  ;;  %v3974_v40 = vrot.slane %v3790_v55, 1  ;;  %vm16339_vm8 = vcmask 1043456   ;;  %vm16345_vm9 = vmmov %vm16338_vm4 }
 0x523   : > { %v13423_v62 = vsel %vm16338_vm4, %v4258_v37, %v4266_v13  ;;  %v3704_v11 = vsel %vm16339_vm8, %v3701_v45, %v3703_v28  ;;  %v3705_v49 = vrot.slane %v10183_v47, 4  ;;  %v3915_v5 = vrot.slane %v3913_v27, 1  ;;  %vm16342_vm7 = vmmov %vm16339_vm8 }
 0x524   : > { %v4075_v34 = vsel %vm16340_vm12, %v4072_v21, %v4074_v53  ;;  %v4268_v59 = vrot.slane %v4036_v12, 2  ;;  %v4037_v24 = vrot.slane %v3917_v0, 1  ;;  %v3773_v26 = vsel %vm12429_vm5, %v3704_v11, 0.0  ;;  %vm16347_vm8 = vmmov %vm16345_vm9 }
 0x525   : > { %v4278_v36 = vrot.slane %v4075_v34, 2  ;;  %v3706_v42 = vsel %vm16342_vm7, %v3703_v28, %v3705_v49  ;;  %vm16343_vm11 = vsmask.f32 7424  ;;  %v4038_v23 = vrot.slane %v3913_v27, 2  ;;  %vm16348_vm12 = vmmov %vm16347_vm8 }
 0x526   : > { %v3916_v46 = vsel %vm16343_vm11, %v3911_v29, %v3915_v5  ;;  %v3774_v55 = vsel %vm12454_vm1, %v3706_v42, 0.0  ;;  %v13434_v45 = vsel %vm16345_vm9, %v4260_v19, %v4268_v59  ;;  %vm16346_vm4 = vcmask 1046528   ;;  %vm16350_vm11 = vmmov %vm16347_vm8 }
 0x527   : > { %v4272_v52 = vrot.slane %v3916_v46, 2  ;;  %v3975_v21 = vsel %vm16346_vm4, %v3972_v22, %v3974_v40  ;;  %v3791_v47 = vpack.c.bf16 %v3774_v55, %v3773_v26  ;;  %v4039_v12 = vor.u32 %v4038_v23, %v4037_v24  ;;  %vm16351_vm9 = vmmov %vm16347_vm8 }
 0x528   : > { %v4274_v35 = vrot.slane %v3975_v21, 2  ;;  %v13438_v8 = vsel %vm16347_vm8, %v4270_v50, %v4278_v36  ;;  %vm16349_vm7 = vsmask.f32 6400  ;;  %v3919_v19 = vor.u32 %v3917_v0, %v3915_v5  ;;  %vm16352_vm4 = vmmov %vm16347_vm8 }
 0x529   : > { %v4273_v28 = vsel %vm16348_vm12, %v4264_v44, %v4272_v52  ;;  %v3921_v29 = vshll.u32 %v3791_v47, 16  ;;  %v3925_v27 = vshrl.u32 %v3791_v47, 16  ;;  %v13441_v11 = vrot.slane %v3791_v47, 2 }
 0x52a   : > { %4757 = vmatprep.mubr.bf16.mxu0 %v4273_v28  ;;  %v4040_v49 = vsel %vm16349_vm7, %v4035_v16, %v4039_v12  ;;  %v13445_v22 = vsel %vm16350_vm11, %v4266_v13, %v4274_v35  ;;  %v3976_v26 = vrot.slane %v3791_v47, 1  ;;  %vm16353_vm8 = vcmask 1046528   ;;  %vm16355_vm7 = vmmov %vm16352_vm4 }
 0x52b   : > { %4758 = vmatmul.mubr.bf16.gmra.mrb[120].mxu0 %v4073_v9  ;;  %v4276_v42 = vrot.slane %v4040_v49, 2  ;;  %v3923_v24 = vrot.slane %v3921_v29, 1  ;;  %v4041_v46 = vrot.slane %v3925_v27, 1  ;;  %v4077_v50 = vsel %vm16351_vm9, %v4074_v53, %v13441_v11  ;;  %vm16357_vm9 = vmmov %vm16352_vm4 }
 0x52c   : > { %v4042_v44 = vrot.slane %v3921_v29, 2  ;;  %v4286_v23 = vrot.slane %v4077_v50, 2  ;;  %v3977_v21 = vsel %vm16353_vm8, %v3974_v40, %v3976_v26  ;;  %v13453_v16 = vrot.slane %v3976_v26, 2  ;;  %vm16358_vm8 = vmmov %vm16352_vm4 }
 0x52d   : > { %v13450_v55 = vsel %vm16352_vm4, %v4268_v59, %v4276_v42  ;;  %vm16354_vm12 = vsmask.f32 7424  ;;  %v3927_v0 = vor.u32 %v3925_v27, %v3923_v24  ;;  %v4282_v5 = vrot.slane %v3977_v21, 2 }
 0x52e   : > { %v3924_v9 = vsel %vm16354_vm12, %v3919_v19, %v3923_v24  ;;  %v13456_v13 = vor.u32 %v4042_v44, %v4041_v46  ;;  %v13459_v28 = vsel %vm16355_vm7, %v4278_v36, %v4286_v23  ;;  %v4294_v53 = vrot.slane %v13441_v11, 2  ;;  %vm16359_vm12 = vmmov %vm16352_vm4  ;;  %v9960_v24 = vld [vmem:[%s15560_s5 + $0x100] sm:$0xff]  }
 0x52f   : > { %v4280_v47 = vrot.slane %v3924_v9, 2  ;;  %v4288_v29 = vrot.slane %v3927_v0, 2  ;;  %vm16356_vm11 = vsmask.f32 6400  ;;  %v13465_v40 = vsel %vm16357_vm9, %v4274_v35, %v4282_v5  ;;  %vm16360_vm7 = vmmov %vm16352_vm4 }
 0x530   : > { %v4044_v59 = vsel %vm16356_vm11, %v4039_v12, %v13456_v13  ;;  %v4292_v49 = vrot.slane %v13456_v13, 2  ;;  %v13471_v26 = vsel %vm16358_vm8, %v4282_v5, %v13453_v16  ;;  %v13476_v36 = vsel %vm16359_vm12, %v4286_v23, %v4294_v53  ;;  %vm16361_vm11 = vmmov %vm16352_vm4 }
 0x531   : > { %v4281_v27 = vsel %vm16352_vm4, %v4272_v52, %v4280_v47  ;;  %v4284_v19 = vrot.slane %v4044_v59, 2  ;;  %v4289_v12 = vsel %vm16360_vm7, %v4280_v47, %v4288_v29  ;;  %vm16362_vm9 = vmmov %vm16352_vm4  ;;  %vm15728_vm12 = vcmask 1044480  }
 0x532   : > { %4765 = vmatprep.mubr.bf16.mxu0 %v4281_v27  ;;  %vm16374_vm8 = vmmov %vm16352_vm4 }
 0x533   : > { %4766 = vmatmul.mubr.bf16.gmra.mrb[124].mxu0 %v4075_v34  ;;  %v4285_v35 = vsel %vm16361_vm11, %v4276_v42, %v4284_v19  ;;  %v4293_v52 = vsel %vm16362_vm9, %v4284_v19, %v4292_v49  ;;  %v9961_v34 = vld [vmem:[%s15560_s5 + $0x108] sm:$0xff]   ;;  %v13667_v42 = vld [vmem:[%s15561_s6] ss:$0 sm:$0xff]  ;;  %vm16378_vm7 = vmmov %vm16352_vm4  ;;  %vm16380_vm9 = vsmask.f32 7424 }
 0x534   : > { %4773 = vmatprep.mubr.bf16.mxu0 %v4289_v12  ;;  %vm16379_vm11 = vmmov %vm16352_vm4 }
 0x53b   : > { %4774 = vmatmul.mubr.bf16.gmra.mrb[128].mxu0 %v4077_v50 }
 0x53c   : > { %4781 = vmatprep.mubr.bf16.mxu0 %v4288_v29 }
 0x543   : > { %4782 = vmatmul.mubr.bf16.gmra.mrb[132].mxu0 %v13441_v11 }
 0x544   : > { %4821 = vmatprep.mubr.bf16.mxu0 %v12824_v51  ;;  %v9962_v51 = vld [vmem:[%s15560_s5 + $0x110] sm:$0xff]  }
 0x54b   : > { %4822 = vmatmul.mubr.bf16.vlgmr.msra.gmra.mrb[68].mxu0 %v12796_v54  ;;  %v9963_v54 = vld [vmem:[%s15560_s5 + $0x118] sm:$0xff]  }
 0x54c   : > { %4829 = vmatprep.mubr.bf16.mxu0 %v12884_v17  ;;  %8876 = vmatpush3.bf16.msra.mxu0 %v9960_v24  ;;  %v9964_v17 = vld [vmem:[%s15560_s5 + $0x120] sm:$0xff]  }
 0x54d   : > { %8877 = vmatprep.subr.bf16.mxu0 %v15972_v15 }
 0x550   : > { %8878 = vmatpush3.bf16.msra.mxu0 %v9961_v34 }
 0x551   : > { %8879 = vmatprep.subr.bf16.mxu0 %v15972_v15 }
 0x553   : > { %4830 = vmatmul.mubr.bf16.gmra.mrb[72].mxu0 %v12850_v2  ;;  %v9965_v2 = vld [vmem:[%s15560_s5 + $0x128] sm:$0xff]  }
 0x554   : > { %4837 = vmatprep.mubr.bf16.mxu0 %v12935_v61  ;;  %8880 = vmatpush3.bf16.msra.mxu0 %v9962_v51  ;;  %v9966_v61 = vld [vmem:[%s15560_s5 + $0x130] sm:$0xff]  }
 0x555   : > { %8881 = vmatprep.subr.bf16.mxu0 %v15972_v15 }
 0x558   : > { %8882 = vmatpush3.bf16.msra.mxu0 %v9963_v54 }
 0x559   : > { %8883 = vmatprep.subr.bf16.mxu0 %v15972_v15 }
 0x55b   : > { %4838 = vmatmul.mubr.bf16.gmra.mrb[76].mxu0 %v12942_v56  ;;  %v9967_v56 = vld [vmem:[%s15560_s5 + $0x138] sm:$0xff]  }
 0x55c   : > { %4845 = vmatprep.mubr.bf16.mxu0 %v12996_v60  ;;  %8884 = vmatpush3.bf16.msra.mxu0 %v9964_v17  ;;  %v9969_v60 = vld [vmem:[%s15562_s7 + $0x8] sm:$0xff]  }
 0x55d   : > { %8885 = vmatprep.subr.bf16.mxu0 %v15972_v15 }
 0x560   : > { %8886 = vmatpush3.bf16.msra.mxu0 %v9965_v2 }
 0x561   : > { %8887 = vmatprep.subr.bf16.mxu0 %v15972_v15 }
 0x563   : > { %4846 = vmatmul.mubr.bf16.gmra.mrb[80].mxu0 %v13003_v38  ;;  %v9970_v38 = vld [vmem:[%s15562_s7 + $0x10] sm:$0xff]  }
 0x564   : > { %4853 = vmatprep.mubr.bf16.mxu0 %v13058_v41  ;;  %8888 = vmatpush3.bf16.msra.mxu0 %v9966_v61  ;;  %v9971_v41 = vld [vmem:[%s15562_s7 + $0x18] sm:$0xff]  }
 0x565   : > { %8889 = vmatprep.subr.bf16.mxu0 %v15972_v15 }
 0x568   : > { %8890 = vmatpush3.bf16.msra.mxu0 %v9967_v56 }
 0x56b   : > { %4854 = vmatmul.mubr.bf16.gmra.mrb[84].mxu0 %v13065_v43  ;;  %v9973_v43 = vld [vmem:[%s15562_s7 + $0x28] sm:$0xff]  }
 0x56c   : > { %4861 = vmatprep.mubr.bf16.mxu0 %v13120_v3  ;;  %v9975_v3 = vld [vmem:[%s15562_s7 + $0x38] sm:$0xff]  }
 0x573   : > { %4862 = vmatmul.mubr.bf16.gmra.mrb[88].mxu0 %v13127_v25  ;;  %v9977_v25 = vld [vmem:[%s15562_s7 + $0x48] sm:$0xff]  }
 0x574   : > { %4869 = vmatprep.mubr.bf16.mxu0 %v13182_v14  ;;  %v16363_v14 = vld [vmem:[#allocation19_spill] sm:$0xff] }
 0x57b   : > { %4870 = vmatmul.mubr.bf16.gmra.mrb[92].mxu0 %v13189_v31  ;;  %v16364_v31 = vld [vmem:[#allocation22_spill] sm:$0xff] }
 0x57c   : > { %4877 = vmatprep.mubr.bf16.mxu0 %v13235_v58  ;;  %v16365_v58 = vld [vmem:[#allocation25_spill] sm:$0xff] }
 0x583   : > { %4878 = vmatmul.mubr.bf16.gmra.mrb[96].mxu0 %v13242_v30  ;;  %v16366_v30 = vld [vmem:[#allocation28_spill] sm:$0xff] }
 0x584   : > { %4885 = vmatprep.mubr.bf16.mxu0 %v13288_v6  ;;  %v16368_v6 = vld [vmem:[#allocation34_spill] sm:$0xff] }
 0x58b   : > { %4886 = vmatmul.mubr.bf16.gmra.mrb[100].mxu0 %v13295_v1  ;;  %v16369_v1 = vld [vmem:[#allocation37_spill] sm:$0xff] }
 0x58c   : > { %4893 = vmatprep.mubr.bf16.mxu0 %v13335_v39  ;;  %v9968_v39 = vld [vmem:[%s15562_s7] sm:$0xff]  }
 0x58d   : > { %6206 = vmatpush1.bf16.msra.mxu1 %v9968_v39 }
 0x58e   : > { %6207 = vmatprep.subr.bf16.mxu1 %v15779_v7 }
 0x591   : > { %6208 = vmatpush1.bf16.msra.mxu1 %v9969_v60 }
 0x592   : > { %6209 = vmatprep.subr.bf16.mxu1 %v15779_v7 }
 0x593   : > { %4894 = vmatmul.mubr.bf16.gmra.mrb[104].mxu0 %v13342_v18  ;;  %v16371_v18 = vld [vmem:[#allocation43_spill] sm:$0xff] }
 0x594   : > { %4901 = vmatprep.mubr.bf16.mxu0 %v13379_v57  ;;  %v16367_v57 = vld [vmem:[#allocation31_spill] sm:$0xff] }
 0x595   : > { %6210 = vmatpush1.bf16.msra.mxu1 %v9970_v38 }
 0x596   : > { %6211 = vmatprep.subr.bf16.mxu1 %v15779_v7 }
 0x599   : > { %6212 = vmatpush1.bf16.msra.mxu1 %v9971_v41 }
 0x59a   : > { %6213 = vmatprep.subr.bf16.mxu1 %v15779_v7 }
 0x59b   : > { %4902 = vmatmul.mubr.bf16.gmra.mrb[108].mxu0 %v13384_v4  ;;  %v9979_v4 = vld [vmem:[%s15562_s7 + $0x58] sm:$0xff]  }
 0x59c   : > { %4909 = vmatprep.mubr.bf16.mxu0 %v13413_v63  ;;  %v9980_v63 = vld [vmem:[%s15562_s7 + $0x60] sm:$0xff]  }
 0x5a3   : > { %4910 = vmatmul.mubr.bf16.gmra.mrb[112].mxu0 %v13404_v20  ;;  %v16370_v20 = vld [vmem:[#allocation40_spill] sm:$0xff] }
 0x5a4   : > { %4917 = vmatprep.mubr.bf16.mxu0 %v13434_v45  ;;  %v9983_v45 = vld [vmem:[%s15562_s7 + $0x78] sm:$0xff]  }
 0x5ab   : > { %4918 = vmatmul.mubr.bf16.gmra.mrb[116].mxu0 %v13423_v62  ;;  %v9982_v62 = vld [vmem:[%s15562_s7 + $0x70] sm:$0xff]  }
 0x5ac   : > { %4925 = vmatprep.mubr.bf16.mxu0 %v13450_v55 }
 0x5b3   : > { %4926 = vmatmul.mubr.bf16.gmra.mrb[120].mxu0 %v13445_v22 }
 0x5b4   : > { %4933 = vmatprep.mubr.bf16.mxu0 %v4285_v35 }
 0x5bb   : > { %4934 = vmatmul.mubr.bf16.gmra.mrb[124].mxu0 %v13465_v40 }
 0x5bc   : > { %4941 = vmatprep.mubr.bf16.mxu0 %v4293_v52 }
 0x5c3   : > { %4942 = vmatmul.mubr.bf16.gmra.mrb[128].mxu0 %v13471_v26 }
 0x5c4   : > { %4949 = vmatprep.mubr.bf16.mxu0 %v4292_v49 }
 0x5cb   : > { %4950 = vmatmul.mubr.bf16.gmra.mrb[132].mxu0 %v13453_v16 }
 0x5cc   : > { %8891 = vmatprep.mubr.msk.bf16.mxu0 %vm16105_vm2, %v15972_v15 }
 0x5d3   : > { %8892 = vmatmul.mubr.bf16.vlgmr.msra.gmra.mrb[68].mxu0 %v12785_v32  ;;  %v9972_v32 = vld [vmem:[%s15562_s7 + $0x20] sm:$0xff]  }
 0x5d4   : > { %8895 = vmatprep.mubr.msk.bf16.mxu0 %vm16105_vm2, %v15972_v15  ;;  %6214 = vmatpush1.bf16.msra.mxu1 %v9972_v32 }
 0x5d5   : > { %6215 = vmatprep.subr.bf16.mxu1 %v15779_v7 }
 0x5d8   : > { %6216 = vmatpush1.bf16.msra.mxu1 %v9973_v43 }
 0x5d9   : > { %6217 = vmatprep.subr.bf16.mxu1 %v15779_v7 }
 0x5db   : > { %8896 = vmatmul.mubr.bf16.gmra.mrb[72].mxu0 %v12841_v48  ;;  %v9974_v48 = vld [vmem:[%s15562_s7 + $0x30] sm:$0xff]  }
 0x5dc   : > { %8899 = vmatprep.mubr.msk.bf16.mxu0 %vm16105_vm2, %v15972_v15  ;;  %6218 = vmatpush1.bf16.msra.mxu1 %v9974_v48 }
 0x5dd   : > { %6219 = vmatprep.subr.bf16.mxu1 %v15779_v7 }
 0x5e0   : > { %6220 = vmatpush1.bf16.msra.mxu1 %v9975_v3 }
 0x5e1   : > { %6221 = vmatprep.subr.bf16.mxu1 %v15779_v7 }
 0x5e3   : > { %8900 = vmatmul.mubr.bf16.gmra.mrb[76].mxu0 %v12900_v10  ;;  %v9976_v10 = vld [vmem:[%s15562_s7 + $0x40] sm:$0xff]  }
 0x5e4   : > { %8903 = vmatprep.mubr.msk.bf16.mxu0 %vm16105_vm2, %v15972_v15  ;;  %6222 = vmatpush1.bf16.msra.mxu1 %v9976_v10 }
 0x5e5   : > { %6223 = vmatprep.subr.bf16.mxu1 %v15779_v7 }
 0x5e8   : > { %6224 = vmatpush1.bf16.msra.mxu1 %v9977_v25 }
 0x5e9   : > { %6225 = vmatprep.subr.bf16.mxu1 %v15779_v7 }
 0x5eb   : > { %8904 = vmatmul.mubr.bf16.gmra.mrb[80].mxu0 %v12966_v33  ;;  %v9978_v33 = vld [vmem:[%s15562_s7 + $0x50] sm:$0xff]  }
 0x5ec   : > { %8907 = vmatprep.mubr.msk.bf16.mxu0 %vm16105_vm2, %v15972_v15  ;;  %6226 = vmatpush1.bf16.msra.mxu1 %v9978_v33 }
 0x5ed   : > { %6227 = vmatprep.subr.bf16.mxu1 %v15779_v7 }
 0x5f0   : > { %6228 = vmatpush1.bf16.msra.mxu1 %v9979_v4 }
 0x5f1   : > { %6229 = vmatprep.subr.bf16.mxu1 %v15779_v7 }
 0x5f3   : > { %8908 = vmatmul.mubr.bf16.gmra.mrb[84].mxu0 %v16363_v14 }
 0x5f4   : > { %8911 = vmatprep.mubr.msk.bf16.mxu0 %vm16105_vm2, %v15972_v15  ;;  %6230 = vmatpush1.bf16.msra.mxu1 %v9980_v63 }
 0x5f5   : > { %6231 = vmatprep.subr.bf16.mxu1 %v15779_v7 }
 0x5fb   : > { %8912 = vmatmul.mubr.bf16.gmra.mrb[88].mxu0 %v16364_v31 }
 0x5fc   : > { %8915 = vmatprep.mubr.msk.bf16.mxu0 %vm16105_vm2, %v15972_v15 }
 0x603   : > { %8916 = vmatmul.mubr.bf16.gmra.mrb[92].mxu0 %v16365_v58 }
 0x604   : > { %8919 = vmatprep.mubr.msk.bf16.mxu0 %vm16105_vm2, %v15972_v15 }
 0x60b   : > { %8920 = vmatmul.mubr.bf16.gmra.mrb[96].mxu0 %v16366_v30 }
 0x60c   : > { %8923 = vmatprep.mubr.msk.bf16.mxu0 %vm16105_vm2, %v15972_v15 }
 0x613   : > { %8924 = vmatmul.mubr.bf16.gmra.mrb[100].mxu0 %v16367_v57 }
 0x614   : > { %8927 = vmatprep.mubr.msk.bf16.mxu0 %vm16105_vm2, %v15972_v15 }
 0x61b   : > { %8928 = vmatmul.mubr.bf16.gmra.mrb[104].mxu0 %v16368_v6 }
 0x61c   : > { %8931 = vmatprep.mubr.msk.bf16.mxu0 %vm16105_vm2, %v15972_v15 }
 0x623   : > { %8932 = vmatmul.mubr.bf16.gmra.mrb[108].mxu0 %v16369_v1 }
 0x624   : > { %8935 = vmatprep.mubr.msk.bf16.mxu0 %vm16105_vm2, %v15972_v15 }
 0x62b   : > { %8936 = vmatmul.mubr.bf16.gmra.mrb[112].mxu0 %v16370_v20 }
 0x62c   : > { %8939 = vmatprep.mubr.msk.bf16.mxu0 %vm16105_vm2, %v15972_v15 }
 0x633   : > { %8940 = vmatmul.mubr.bf16.gmra.mrb[116].mxu0 %v16371_v18 }
 0x634   : > { %8943 = vmatprep.mubr.msk.bf16.mxu0 %vm16105_vm2, %v15972_v15 }
 0x63b   : > { %8944 = vmatmul.mubr.bf16.gmra.mrb[120].mxu0 %v13438_v8  ;;  %v9981_v8 = vld [vmem:[%s15562_s7 + $0x68] sm:$0xff]  }
 0x63c   : > { %8947 = vmatprep.mubr.msk.bf16.mxu0 %vm16105_vm2, %v15972_v15  ;;  %6232 = vmatpush1.bf16.msra.mxu1 %v9981_v8 }
 0x63d   : > { %6233 = vmatprep.subr.bf16.mxu1 %v15779_v7 }
 0x640   : > { %6234 = vmatpush1.bf16.msra.mxu1 %v9982_v62 }
 0x641   : > { %6235 = vmatprep.subr.bf16.mxu1 %v15779_v7 }
 0x643   : > { %8948 = vmatmul.mubr.bf16.gmra.mrb[124].mxu0 %v13459_v28 }
 0x644   : > { %8951 = vmatprep.mubr.msk.bf16.mxu0 %vm16105_vm2, %v15972_v15  ;;  %6236 = vmatpush1.bf16.msra.mxu1 %v9983_v45 }
 0x645   : > { %6373 = vmatprep.subr.bf16.mxu1 %v15779_v7 }
 0x64b   : > { %8952 = vmatmul.mubr.bf16.gmra.mrb[128].mxu0 %v13476_v36  ;;  %v16533_v36 = vld [vmem:[#allocation35_spill] sm:$0xff] }
 0x64c   : > { %8955 = vmatprep.mubr.msk.bf16.mxu0 %vm16105_vm2, %v15972_v15 }
 0x653   : > { %8956 = vmatmul.mubr.bf16.gmra.mrb[132].mxu0 %v4294_v53 }
 0x6a6   : > { %v4991_v22 = vpop.f32.mrb[68].mxu0 }
 0x6a7   : > { %v9175_v46 = vadd.f32 %v13667_v42, %v4991_v22  ;;  %v8893_v11 = vpop.f32.mrb[69].mxu0 }
 0x6a8   : > { %v4994_v50 = vpop.f32.mrb[70].mxu0 }
 0x6a9   : > { %10184 = vtanh.f32 %v9175_v46  ;;  %v9176_v44 = vadd.f32 %v13667_v42, %v4994_v50  ;;  %v8894_v23 = vpop.f32.mrb[71].mxu0 }
 0x6ab   : > { %10186 = vtanh.f32 %v9176_v44 }
 0x6ae   : > { %v4999_v55 = vpop.f32.mrb[72].mxu0 }
 0x6af   : > { %v9177_v21 = vadd.f32 %v13667_v42, %v4999_v55  ;;  %v8897_v16 = vpop.f32.mrb[73].mxu0 }
 0x6b0   : > { %v5002_v9 = vpop.f32.mrb[74].mxu0 }
 0x6b1   : > { %10188 = vtanh.f32 %v9177_v21  ;;  %v9178_v0 = vadd.f32 %v13667_v42, %v5002_v9  ;;  %v8898_v13 = vpop.f32.mrb[75].mxu0 }
 0x6b3   : > { %v10185_v5 = vpop.eup %10184  ;;  %10190 = vtanh.f32 %v9178_v0 }
 0x6b4   : > { %v5192_v28 = vrot.slane %v10185_v5, 2 }
 0x6b5   : > { %v10187_v47 = vpop.eup %10186 }
 0x6b6   : > { %v5193_v53 = vrot.slane %v10187_v47, 2  ;;  %v5007_v29 = vpop.f32.mrb[76].mxu0  ;;  %v5291_v26 = vsel %vm11147_vm14, %v5192_v28, 0.0  ;;  %vm16376_vm14 = vmmov %vm16352_vm4 }
 0x6b7   : > { %v9179_v59 = vadd.f32 %v13667_v42, %v5007_v29  ;;  %v8901_v40 = vpop.f32.mrb[77].mxu0 }
 0x6b8   : > { %v5194_v49 = vsel %vm16352_vm4, %v5192_v28, %v5193_v53  ;;  %v5010_v27 = vpop.f32.mrb[78].mxu0  ;;  %vm16381_vm4 = vcmask 1046528   ;;  %v16383_v40 = vld [vmem:[#allocation7_spill] sm:$0xff] }
 0x6b9   : > { %v5292_v12 = vsel %vm11162_vm15, %v5194_v49, 0.0  ;;  %10192 = vtanh.f32 %v9179_v59  ;;  %v9180_v35 = vadd.f32 %v13667_v42, %v5010_v27  ;;  %v8902_v52 = vpop.f32.mrb[79].mxu0 }
 0x6ba   : > { %v5325_v24 = vpack.c.bf16 %v5292_v12, %v5291_v26 }
 0x6bb   : > { %v10189_v34 = vpop.eup %10188  ;;  %10194 = vtanh.f32 %v9180_v35 }
 0x6bc   : > { %v5195_v51 = vrot.slane %v10189_v34, 2  ;;  %v5344_v54 = vshrl.u32 %v5325_v24, 16  ;;  %v5346_v17 = vshll.u32 %v5325_v24, 16  ;;  %v5715_v1 = vrot.slane %v5325_v24, 3 }
 0x6bd   : > { %v10191_v2 = vpop.eup %10190  ;;  %v5495_v45 = vrot.slane %v5325_v24, 1 }
 0x6be   : > { %v5196_v61 = vsel %vm16374_vm8, %v5193_v53, %v5195_v51  ;;  %v5197_v56 = vrot.slane %v10191_v2, 2  ;;  %v5015_v39 = vpop.f32.mrb[80].mxu0  ;;  %v5528_v60 = vrot.slane %v5344_v54, 1  ;;  %v5529_v32 = vrot.slane %v5346_v17, 2 }
 0x6bf   : > { %v9181_v38 = vadd.f32 %v13667_v42, %v5015_v39  ;;  %v8905_v41 = vpop.f32.mrb[81].mxu0  ;;  %v5293_v48 = vsel %vm11215_vm3, %v5196_v61, 0.0  ;;  %v5348_v25 = vrot.slane %v5346_v17, 1  ;;  %v5595_v53 = vrot.slane %v5325_v24, 2 }
 0x6c0   : > { %v5198_v3 = vsel %vm16376_vm14, %v5195_v51, %v5197_v56  ;;  %v5018_v10 = vpop.f32.mrb[82].mxu0  ;;  %v5530_v30 = vor.u32 %v5529_v32, %v5528_v60  ;;  %vm16384_vm8 = vnez %v16383_v40  ;;  %vm16385_vm14 = vmmov %vm16378_vm7 }
 0x6c1   : > { %v5294_v33 = vsel %vm11232_vm10, %v5198_v3, 0.0  ;;  %10196 = vtanh.f32 %v9181_v38  ;;  %v9182_v31 = vadd.f32 %v13667_v42, %v5018_v10  ;;  %v8906_v58 = vpop.f32.mrb[83].mxu0  ;;  %v5349_v62 = vor.u32 %v5348_v25, %v5344_v54 }
 0x6c2   : > { %v13688_v57 = vpack.c.bf16 %v5294_v33, %v5293_v48  ;;  %v16387_v33 = vld [vmem:[#allocation8_spill] sm:$0xff] }
 0x6c3   : > { %v10193_v6 = vpop.eup %10192  ;;  %10198 = vtanh.f32 %v9182_v31 }
 0x6c4   : > { %v5199_v20 = vrot.slane %v10193_v6, 2  ;;  %v5351_v18 = vshll.u32 %v13688_v57, 16  ;;  %v5355_v4 = vshrl.u32 %v13688_v57, 16  ;;  %v5716_v63 = vrot.slane %v13688_v57, 3 }
 0x6c5   : > { %v10195_v8 = vpop.eup %10194  ;;  %v5496_v22 = vrot.slane %v13688_v57, 1  ;;  %v5596_v46 = vrot.slane %v13688_v57, 2 }
 0x6c6   : > { %v5200_v11 = vsel %vm16378_vm7, %v5197_v56, %v5199_v20  ;;  %v5201_v50 = vrot.slane %v10195_v8, 2  ;;  %v5023_v44 = vpop.f32.mrb[84].mxu0  ;;  %v5353_v23 = vrot.slane %v5351_v18, 1  ;;  %v13697_v55 = vsel %vm15728_vm12, %v5715_v1, %v5716_v63 }
 0x6c7   : > { %v9183_v21 = vadd.f32 %v13667_v42, %v5023_v44  ;;  %v8909_v16 = vpop.f32.mrb[85].mxu0  ;;  %v5531_v9 = vrot.slane %v5355_v4, 1  ;;  %v5532_v0 = vrot.slane %v5351_v18, 2  ;;  %v13703_v28 = vsel %vm16381_vm4, %v5495_v45, %v5496_v22  ;;  %vm16389_vm4 = vmmov %vm16379_vm11 }
 0x6c8   : > { %v5202_v13 = vsel %vm16379_vm11, %v5199_v20, %v5201_v50  ;;  %v5026_v5 = vpop.f32.mrb[86].mxu0  ;;  %v5354_v47 = vsel %vm16380_vm9, %v5349_v62, %v5353_v23  ;;  %v5295_v59 = vsel %vm11282_vm13, %v5200_v11, 0.0  ;;  %v5597_v35 = vsel %vm16385_vm14, %v5595_v53, %v5596_v46  ;;  %v16391_v62 = vld [vmem:[#allocation9_spill] sm:$0xff] }
 0x6c9   : > { %v5296_v49 = vsel %vm16384_vm8, %v5202_v13, 0.0  ;;  %10200 = vtanh.f32 %v9183_v21  ;;  %v9184_v27 = vadd.f32 %v13667_v42, %v5026_v5  ;;  %v8910_v19 = vpop.f32.mrb[87].mxu0  ;;  %v5533_v12 = vor.u32 %v5532_v0, %v5531_v9 }
 0x6ca   : > { %v13710_v26 = vpack.c.bf16 %v5296_v49, %v5295_v59  ;;  %v5357_v34 = vor.u32 %v5355_v4, %v5353_v23  ;;  %v5718_v51 = vrot.slane %v5354_v47, 3  ;;  %v5721_v24 = vrot.slane %v13703_v28, 3  ;;  %v9984_v23 = vld [vmem:[%s15562_s7 + $0x80] sm:$0xff]  }
 0x6cb   : > { %v10197_v52 = vpop.eup %10196  ;;  %10202 = vtanh.f32 %v9184_v27  ;;  %vm16386_vm7 = vsmask.f32 6400  ;;  %v5727_v41 = vrot.slane %v5597_v35, 3  ;;  %vm16388_vm9 = vnez %v16387_v33  ;;  %v16501_v33 = vld [vmem:[#allocation29_spill] sm:$0xff] }
 0x6cc   : > { %v5203_v54 = vrot.slane %v10197_v52, 2  ;;  %v5359_v17 = vshll.u32 %v13710_v26, 16  ;;  %v5363_v2 = vshrl.u32 %v13710_v26, 16  ;;  %v5730_v61 = vrot.slane %v13710_v26, 3 }
 0x6cd   : > { %v10199_v56 = vpop.eup %10198  ;;  %v13718_v39 = vsel %vm16386_vm7, %v5530_v30, %v5533_v12  ;;  %v5498_v60 = vrot.slane %v13710_v26, 1  ;;  %v5598_v38 = vrot.slane %v13710_v26, 2  ;;  %vm16390_vm14 = vsmask.f32 7424 }
 0x6ce   : > { %v5204_v32 = vsel %vm16379_vm11, %v5201_v50, %v5203_v54  ;;  %v5205_v48 = vrot.slane %v10199_v56, 2  ;;  %v5031_v3 = vpop.f32.mrb[88].mxu0  ;;  %v5361_v10 = vrot.slane %v5359_v17, 1  ;;  %v13724_v25 = vsel %vm15728_vm12, %v5716_v63, %v5730_v61 }
 0x6cf   : > { %v5297_v31 = vsel %vm16388_vm9, %v5204_v32, 0.0  ;;  %v9185_v58 = vadd.f32 %v13667_v42, %v5031_v3  ;;  %v8913_v30 = vpop.f32.mrb[89].mxu0  ;;  %v5535_v57 = vrot.slane %v5363_v2, 1  ;;  %v5536_v6 = vrot.slane %v5359_v17, 2 }
 0x6d0   : > { %v5206_v1 = vsel %vm16389_vm4, %v5203_v54, %v5205_v48  ;;  %v5034_v20 = vpop.f32.mrb[90].mxu0  ;;  %v5362_v18 = vsel %vm16390_vm14, %v5357_v34, %v5361_v10  ;;  %v5365_v4 = vor.u32 %v5363_v2, %v5361_v10  ;;  %v5724_v8 = vrot.slane %v13718_v39, 3 }
 0x6d1   : > { %vm16392_vm7 = vnez %v16391_v62  ;;  %10204 = vtanh.f32 %v9185_v58  ;;  %v9186_v45 = vadd.f32 %v13667_v42, %v5034_v20  ;;  %v8914_v11 = vpop.f32.mrb[91].mxu0  ;;  %v5719_v50 = vrot.slane %v5362_v18, 3  ;;  %v9986_v20 = vld [vmem:[%s15562_s7 + $0x90] sm:$0xff]  }
 0x6d2   : > { %v5298_v63 = vsel %vm16392_vm7, %v5206_v1, 0.0  ;;  %v5537_v21 = vor.u32 %v5536_v6, %v5535_v57  ;;  %vm16393_vm11 = vcmask 1046528   ;;  %v13748_v9 = vsel %vm16389_vm4, %v5596_v46, %v5598_v38 }
 0x6d3   : > { %v13735_v44 = vpack.c.bf16 %v5298_v63, %v5297_v31  ;;  %v13743_v16 = vsel %vm16393_vm11, %v5496_v22, %v5498_v60  ;;  %v10201_v0 = vpop.eup %10200  ;;  %10206 = vtanh.f32 %v9186_v45  ;;  %v5720_v13 = vsel %vm15728_vm12, %v5718_v51, %v5719_v50  ;;  %vm16396_vm11 = vmmov %vm16389_vm4  ;;  %v16401_v31 = vld [vmem:[#allocation11_spill] sm:$0xff] }
 0x6d4   : > { %v5722_v5 = vrot.slane %v13743_v16, 3  ;;  %v5728_v47 = vrot.slane %v13748_v9, 3  ;;  %v5207_v28 = vrot.slane %v10201_v0, 2  ;;  %6237 = vmatprep.mubr.bf16.mxu1 %v5720_v13  ;;  %vm16394_vm14 = vsmask.f32 6400 }
 0x6d5   : > { %v5367_v53 = vshll.u32 %v13735_v44, 16  ;;  %v5371_v22 = vshrl.u32 %v13735_v44, 16  ;;  %v5740_v59 = vrot.slane %v13735_v44, 3  ;;  %v10203_v49 = vpop.eup %10202  ;;  %6238 = vmatmul.mubr.bf16.vlgmr.msra.gmra.mrb[68].mxu1 %v13697_v55  ;;  %v13758_v46 = vsel %vm16394_vm14, %v5533_v12, %v5537_v21  ;;  %v9985_v55 = vld [vmem:[%s15562_s7 + $0x88] sm:$0xff]   ;;  %vm16399_vm14 = vmmov %vm16396_vm11 }
 0x6d6   : > { %v13761_v27 = vsel %vm15728_vm12, %v5721_v24, %v5722_v5  ;;  %v5500_v19 = vrot.slane %v13735_v44, 1  ;;  %v13767_v35 = vsel %vm15728_vm12, %v5727_v41, %v5728_v47  ;;  %v5208_v52 = vsel %vm16396_vm11, %v5205_v48, %v5207_v28  ;;  %v5039_v51 = vpop.f32.mrb[92].mxu0  ;;  %6374 = vmatpush1.bf16.msra.mxu1 %v9984_v23  ;;  %v16397_v24 = vld [vmem:[#allocation10_spill] sm:$0xff] }
 0x6d7   : > { %16395 = vst [vmem:[#allocation44_spill] sm:$0xff] %v13767_v35  ;;  %v5209_v34 = vrot.slane %v10203_v49, 2  ;;  %v5369_v54 = vrot.slane %v5367_v53, 1  ;;  %v13774_v12 = vsel %vm15728_vm12, %v5730_v61, %v5740_v59  ;;  %vm16398_vm4 = vnez %v16397_v24  ;;  %v8917_v56 = vpop.f32.mrb[93].mxu0  ;;  %6375 = vmatprep.subr.bf16.mxu1 %v15779_v7 }
 0x6d8   : > { %v5299_v17 = vsel %vm16398_vm4, %v5208_v52, 0.0  ;;  %v9187_v2 = vadd.f32 %v13667_v42, %v5039_v51  ;;  %v5725_v39 = vrot.slane %v13758_v46, 3  ;;  %v5539_v41 = vrot.slane %v5371_v22, 1  ;;  %v5042_v48 = vpop.f32.mrb[94].mxu0 }
 0x6d9   : > { %v5210_v32 = vsel %vm16399_vm14, %v5207_v28, %v5209_v34  ;;  %vm16400_vm11 = vsmask.f32 7424  ;;  %v5373_v10 = vor.u32 %v5371_v22, %v5369_v54  ;;  %v5540_v61 = vrot.slane %v5367_v53, 2  ;;  %v8918_v57 = vpop.f32.mrb[95].mxu0 }
 0x6da   : > { %v13783_v3 = vsel %vm16400_vm11, %v5365_v4, %v5369_v54  ;;  %vm16402_vm12 = vnez %v16401_v31  ;;  %10208 = vtanh.f32 %v9187_v2  ;;  %v9188_v30 = vadd.f32 %v13667_v42, %v5042_v48  ;;  %6376 = vmatpush1.bf16.msra.mxu1 %v9985_v55  ;;  %v16410_v54 = vld [vmem:[#allocation12_spill] sm:$0xff]  ;;  %v16413_v48 = vld [vmem:[#allocation13_spill] sm:$0xff]  ;;  %v16485_v31 = vld [vmem:[#allocation26_spill] sm:$0xff] }
 0x6db   : > { %v5300_v58 = vsel %vm16402_vm12, %v5210_v32, 0.0  ;;  %v5732_v6 = vrot.slane %v13783_v3, 3  ;;  %vm16403_vm14 = vcmask 1044480   ;;  %v5541_v4 = vor.u32 %v5540_v61, %v5539_v41  ;;  %v10205_v45 = vpop.eup %10204  ;;  %6377 = vmatprep.subr.bf16.mxu1 %v15779_v7 }
 0x6dc   : > { %v13789_v1 = vpack.c.bf16 %v5300_v58, %v5299_v17  ;;  %v13795_v18 = vsel %vm16403_vm14, %v5724_v8, %v5725_v39  ;;  %vm16404_vm11 = vcmask 1046528   ;;  %10210 = vtanh.f32 %v9188_v30  ;;  %vm16405_vm12 = vmmov %vm16403_vm14 }
 0x6dd   : > { %v13802_v63 = vsel %vm16404_vm11, %v5498_v60, %v5500_v19  ;;  %v5733_v11 = vsel %vm16405_vm12, %v5719_v50, %v5732_v6  ;;  %v5600_v16 = vrot.slane %v13735_v44, 2  ;;  %v5211_v8 = vrot.slane %v10205_v45, 2  ;;  %v10207_v60 = vpop.eup %10206 }
 0x6de   : > { %v5734_v23 = vrot.slane %v13802_v63, 3  ;;  %6245 = vmatprep.mubr.bf16.mxu1 %v5733_v11  ;;  %v5375_v0 = vshll.u32 %v13789_v1, 16  ;;  %v5379_v13 = vshrl.u32 %v13789_v1, 16  ;;  %v5750_v28 = vrot.slane %v13789_v1, 3  ;;  %v5047_v51 = vpop.f32.mrb[96].mxu0  ;;  %6378 = vmatpush1.bf16.msra.mxu1 %v9986_v20  ;;  %v9988_v20 = vld [vmem:[%s15562_s7 + $0xa0] sm:$0xff]  }
 0x6df   : > { %6246 = vmatmul.mubr.bf16.gmra.mrb[72].mxu1 %v13724_v25  ;;  %vm16406_vm14 = vsmask.f32 6400  ;;  %v5502_v22 = vrot.slane %v13789_v1, 1  ;;  %vm16407_vm11 = vcmask 1045504   ;;  %v5213_v52 = vrot.slane %v10207_v60, 2  ;;  %6379 = vmatprep.subr.bf16.mxu1 %v15779_v7 }
 0x6e0   : > { %v13813_v53 = vsel %vm16406_vm14, %v5537_v21, %v5541_v4  ;;  %v13816_v50 = vsel %vm16405_vm12, %v5722_v5, %v5734_v23  ;;  %v13824_v49 = vsel %vm16407_vm11, %v5598_v38, %v5600_v16  ;;  %vm16408_vm4 = vmmov %vm16407_vm11  ;;  %v5377_v25 = vrot.slane %v5375_v0, 1  ;;  %v9987_v5 = vld [vmem:[%s15562_s7 + $0x98] sm:$0xff]   ;;  %v8921_v38 = vpop.f32.mrb[97].mxu0 }
 0x6e1   : > { %v5212_v46 = vsel %vm16408_vm4, %v5209_v34, %v5211_v8  ;;  %vm16409_vm14 = vmmov %vm16405_vm12  ;;  %vm16411_vm12 = vnez %v16410_v54  ;;  %v9189_v26 = vadd.f32 %v13667_v42, %v5047_v51  ;;  %v5736_v34 = vrot.slane %v13813_v53, 3  ;;  %v5050_v56 = vpop.f32.mrb[98].mxu0 }
 0x6e2   : > { %v13828_v21 = vsel %vm16409_vm14, %v5740_v59, %v5750_v28  ;;  %v5301_v55 = vsel %vm16411_vm12, %v5212_v46, 0.0  ;;  %v5543_v17 = vrot.slane %v5379_v13, 1  ;;  %v5214_v2 = vsel %vm16408_vm4, %v5211_v8, %v5213_v52  ;;  %v8922_v58 = vpop.f32.mrb[99].mxu0  ;;  %6380 = vmatpush1.bf16.msra.mxu1 %v9987_v5 }
 0x6e3   : > { %vm16412_vm11 = vsmask.f32 7424  ;;  %v5381_v41 = vor.u32 %v5379_v13, %v5377_v25  ;;  %v5544_v32 = vrot.slane %v5375_v0, 2  ;;  %vm16414_vm14 = vnez %v16413_v48  ;;  %6381 = vmatprep.subr.bf16.mxu1 %v15779_v7  ;;  %v16426_v58 = vld [vmem:[#allocation15_spill] sm:$0xff] }
 0x6e4   : > { %v13840_v59 = vsel %vm16412_vm11, %v5373_v10, %v5377_v25  ;;  %v5302_v3 = vsel %vm16414_vm14, %v5214_v2, 0.0  ;;  %10212 = vtanh.f32 %v9189_v26  ;;  %v9190_v61 = vadd.f32 %v13667_v42, %v5050_v56  ;;  %v10209_v11 = vpop.eup %10208 }
 0x6e5   : > { %v5742_v30 = vrot.slane %v13840_v59, 3  ;;  %v13846_v57 = vpack.c.bf16 %v5302_v3, %v5301_v55  ;;  %vm16415_vm4 = vcmask 1044480   ;;  %v5545_v63 = vor.u32 %v5544_v32, %v5543_v17  ;;  %v16423_v17 = vld [vmem:[#allocation14_spill] sm:$0xff] }
 0x6e6   : > { %v13852_v10 = vsel %vm16415_vm4, %v5725_v39, %v5736_v34  ;;  %vm16416_vm11 = vcmask 1046528   ;;  %10214 = vtanh.f32 %v9190_v61  ;;  %vm16417_vm14 = vmmov %vm16415_vm4  ;;  %v15730_v13 = vrot.slane %v13824_v49, 3  ;;  %v5055_v38 = vpop.f32.mrb[100].mxu0  ;;  %6382 = vmatpush1.bf16.msra.mxu1 %v9988_v20 }
 0x6e7   : > { %v13859_v45 = vsel %vm16416_vm11, %v5500_v19, %v5502_v22  ;;  %v5743_v8 = vsel %vm16417_vm14, %v5732_v6, %v5742_v30  ;;  %v5215_v39 = vrot.slane %v10209_v11, 2  ;;  %v5383_v60 = vshll.u32 %v13846_v57, 16  ;;  %v10211_v19 = vpop.eup %10210  ;;  %vm16419_vm11 = vmmov %vm16417_vm14  ;;  %6383 = vmatprep.subr.bf16.mxu1 %v15779_v7 }
 0x6e8   : > { %v5744_v0 = vrot.slane %v13859_v45, 3  ;;  %6253 = vmatprep.mubr.bf16.mxu1 %v5743_v8  ;;  %v5387_v53 = vshrl.u32 %v13846_v57, 16  ;;  %v5760_v46 = vrot.slane %v13846_v57, 3  ;;  %vm16418_vm4 = vsmask.f32 6400  ;;  %vm16422_vm7 = vmmov %vm16419_vm11 }
 0x6e9   : > { %6254 = vmatmul.mubr.bf16.gmra.mrb[76].mxu1 %v13774_v12  ;;  %v13870_v51 = vsel %vm16418_vm4, %v5541_v4, %v5545_v63  ;;  %v5504_v25 = vrot.slane %v13846_v57, 1  ;;  %v13881_v5 = vsel %vm16419_vm11, %v5728_v47, %v15730_v13  ;;  %vm16421_vm12 = vcmask 1045504   ;;  %v8925_v47 = vpop.f32.mrb[101].mxu0 }
 0x6ea   : > { %v13873_v6 = vsel %vm16417_vm14, %v5734_v23, %v5744_v0  ;;  %16420 = vst [vmem:[#allocation19_spill] sm:$0xff] %v13881_v5  ;;  %v5216_v55 = vsel %vm16421_vm12, %v5213_v52, %v5215_v39  ;;  %v5217_v26 = vrot.slane %v10211_v19, 2  ;;  %v5385_v12 = vrot.slane %v5383_v60, 1  ;;  %v9989_v23 = vld [vmem:[%s15562_s7 + $0xa8] sm:$0xff]  }
 0x6eb   : > { %v13885_v4 = vsel %vm16422_vm7, %v5750_v28, %v5760_v46  ;;  %vm16424_vm4 = vnez %v16423_v17  ;;  %v9191_v9 = vadd.f32 %v13667_v42, %v5055_v38  ;;  %v5746_v52 = vrot.slane %v13870_v51, 3  ;;  %v5058_v28 = vpop.f32.mrb[102].mxu0  ;;  %6384 = vmatpush1.bf16.msra.mxu1 %v9989_v23  ;;  %v16469_v17 = vld [vmem:[#allocation23_spill] sm:$0xff] }
 0x6ec   : > { %v5303_v2 = vsel %vm16424_vm4, %v5216_v55, 0.0  ;;  %v5547_v56 = vrot.slane %v5387_v53, 1  ;;  %v5218_v59 = vsel %vm16421_vm12, %v5215_v39, %v5217_v26  ;;  %vm16425_vm7 = vsmask.f32 7424  ;;  %v8926_v11 = vpop.f32.mrb[103].mxu0  ;;  %v9990_v39 = vld [vmem:[%s15562_s7 + $0xb0] sm:$0xff]   ;;  %6385 = vmatprep.subr.bf16.mxu1 %v15779_v7 }
 0x6ed   : > { %v13897_v32 = vsel %vm16425_vm7, %v5381_v41, %v5385_v12  ;;  %v5389_v3 = vor.u32 %v5387_v53, %v5385_v12  ;;  %v5548_v61 = vrot.slane %v5383_v60, 2  ;;  %vm16427_vm14 = vnez %v16426_v58  ;;  %vm16429_vm7 = vmmov %vm16419_vm11 }
 0x6ee   : > { %v5304_v20 = vsel %vm16427_vm14, %v5218_v59, 0.0  ;;  %10216 = vtanh.f32 %v9191_v9  ;;  %v9192_v45 = vadd.f32 %v13667_v42, %v5058_v28  ;;  %v5752_v8 = vrot.slane %v13897_v32, 3  ;;  %v10213_v51 = vpop.eup %10212 }
 0x6ef   : > { %v13903_v19 = vpack.c.bf16 %v5304_v20, %v5303_v2  ;;  %v13909_v41 = vsel %vm16419_vm11, %v5736_v34, %v5746_v52  ;;  %v5549_v60 = vor.u32 %v5548_v61, %v5547_v56  ;;  %vm16428_vm12 = vcmask 1046528   ;;  %v5063_v61 = vpop.f32.mrb[104].mxu0  ;;  %6386 = vmatpush1.bf16.msra.mxu1 %v9990_v39  ;;  %v16435_v20 = vld [vmem:[#allocation16_spill] sm:$0xff] }
 0x6f0   : > { %v13916_v53 = vsel %vm16428_vm12, %v5502_v22, %v5504_v25  ;;  %10218 = vtanh.f32 %v9192_v45  ;;  %v5753_v55 = vsel %vm16429_vm7, %v5742_v30, %v5752_v8  ;;  %v15729_v12 = vrot.slane %v13789_v1, 2  ;;  %v10215_v22 = vpop.eup %10214  ;;  %vm16431_vm12 = vmmov %vm16429_vm7  ;;  %6387 = vmatprep.subr.bf16.mxu1 %v15779_v7 }
 0x6f1   : > { %v5754_v38 = vrot.slane %v13916_v53, 3  ;;  %v5219_v34 = vrot.slane %v10213_v51, 2  ;;  %6261 = vmatprep.mubr.bf16.mxu1 %v5753_v55  ;;  %v5391_v23 = vshll.u32 %v13903_v19, 16  ;;  %v5395_v2 = vshrl.u32 %v13903_v19, 16  ;;  %vm16434_vm4 = vmmov %vm16431_vm12 }
 0x6f2   : > { %v5770_v9 = vrot.slane %v13903_v19, 3  ;;  %6262 = vmatmul.mubr.bf16.gmra.mrb[80].mxu1 %v13828_v21  ;;  %vm16430_vm11 = vsmask.f32 6400  ;;  %v15732_v56 = vrot.slane %v13903_v19, 1  ;;  %vm16432_vm7 = vcmask 1045504  }
 0x6f3   : > { %v13927_v47 = vsel %vm16430_vm11, %v5545_v63, %v5549_v60  ;;  %v13930_v30 = vsel %vm16431_vm12, %v5744_v0, %v5754_v38  ;;  %v13938_v59 = vsel %vm16432_vm7, %v5600_v16, %v15729_v12  ;;  %vm16433_vm14 = vmmov %vm16432_vm7  ;;  %v5221_v32 = vrot.slane %v10215_v22, 2  ;;  %v9991_v0 = vld [vmem:[%s15562_s7 + $0xb8] sm:$0xff]   ;;  %v8929_v16 = vpop.f32.mrb[105].mxu0 }
 0x6f4   : > { %v5220_v28 = vsel %vm16433_vm14, %v5217_v26, %v5219_v34  ;;  %v5393_v21 = vrot.slane %v5391_v23, 1  ;;  %v13942_v63 = vsel %vm16434_vm4, %v5760_v46, %v5770_v9  ;;  %vm16436_vm11 = vnez %v16435_v20  ;;  %vm16437_vm14 = vmmov %vm16432_vm7  ;;  %v5066_v46 = vpop.f32.mrb[106].mxu0  ;;  %v16439_v22 = vld [vmem:[#allocation17_spill] sm:$0xff]  ;;  %6388 = vmatpush1.bf16.msra.mxu1 %v9991_v0 }
 0x6f5   : > { %v5305_v45 = vsel %vm16436_vm11, %v5220_v28, 0.0  ;;  %v9193_v44 = vadd.f32 %v13667_v42, %v5063_v61  ;;  %v5756_v26 = vrot.slane %v13927_v47, 3  ;;  %v5551_v11 = vrot.slane %v5395_v2, 1  ;;  %v8930_v61 = vpop.f32.mrb[107].mxu0  ;;  %6389 = vmatprep.subr.bf16.mxu1 %v15779_v7 }
 0x6f6   : > { %v5222_v53 = vsel %vm16437_vm14, %v5219_v34, %v5221_v32  ;;  %vm16438_vm4 = vsmask.f32 7424  ;;  %v5397_v51 = vor.u32 %v5395_v2, %v5393_v21  ;;  %v5552_v55 = vrot.slane %v5391_v23, 2  ;;  %v9992_v34 = vld [vmem:[%s15562_s7 + $0xc0] sm:$0xff]  }
 0x6f7   : > { %v13954_v39 = vsel %vm16438_vm4, %v5389_v3, %v5393_v21  ;;  %vm16440_vm12 = vnez %v16439_v22  ;;  %10220 = vtanh.f32 %v9193_v44  ;;  %v9194_v28 = vadd.f32 %v13667_v42, %v5066_v46  ;;  %v16453_v22 = vld [vmem:[#allocation20_spill] sm:$0xff] }
 0x6f8   : > { %v5306_v12 = vsel %vm16440_vm12, %v5222_v53, 0.0  ;;  %v5762_v16 = vrot.slane %v13954_v39, 3  ;;  %vm16441_vm7 = vcmask 1044480   ;;  %v5553_v23 = vor.u32 %v5552_v55, %v5551_v11  ;;  %v10217_v47 = vpop.eup %10216  ;;  %6390 = vmatpush1.bf16.msra.mxu1 %v9992_v34 }
 0x6f9   : > { %v13960_v13 = vpack.c.bf16 %v5306_v12, %v5305_v45  ;;  %v13966_v3 = vsel %vm16441_vm7, %v5746_v52, %v5756_v26  ;;  %vm16442_vm14 = vcmask 1046528   ;;  %10222 = vtanh.f32 %v9194_v28  ;;  %vm16443_vm4 = vmmov %vm16441_vm7  ;;  %6391 = vmatprep.subr.bf16.mxu1 %v15779_v7 }
 0x6fa   : > { %v13973_v2 = vsel %vm16442_vm14, %v5504_v25, %v15732_v56  ;;  %v5763_v12 = vsel %vm16443_vm4, %v5752_v8, %v5762_v16  ;;  %v15731_v0 = vrot.slane %v13938_v59, 3  ;;  %v5223_v52 = vrot.slane %v10217_v47, 2  ;;  %v10219_v25 = vpop.eup %10218  ;;  %vm16445_vm14 = vmmov %vm16443_vm4  ;;  %v16450_v47 = vld [vmem:[#allocation18_spill] sm:$0xff] }
 0x6fb   : > { %v5764_v21 = vrot.slane %v13973_v2, 3  ;;  %6269 = vmatprep.mubr.bf16.mxu1 %v5763_v12  ;;  %v5399_v45 = vshll.u32 %v13960_v13, 16  ;;  %v5403_v44 = vshrl.u32 %v13960_v13, 16  ;;  %v5780_v11 = vrot.slane %v13960_v13, 3  ;;  %v5071_v2 = vpop.f32.mrb[108].mxu0  ;;  %vm16449_vm11 = vmmov %vm16443_vm4 }
 0x6fc   : > { %6270 = vmatmul.mubr.bf16.gmra.mrb[84].mxu1 %v13885_v4  ;;  %vm16444_vm7 = vsmask.f32 6400  ;;  %v16446_v39 = vrot.slane %v13824_v49, 3  ;;  %vm16448_vm12 = vcmask 1045504   ;;  %v5225_v61 = vrot.slane %v10219_v25, 2 }
 0x6fd   : > { %v13984_v53 = vsel %vm16444_vm7, %v5549_v60, %v5553_v23  ;;  %v13987_v8 = vsel %vm16445_vm14, %v5754_v38, %v5764_v21  ;;  %v5224_v28 = vsel %vm16448_vm12, %v5221_v32, %v5223_v52  ;;  %v5401_v4 = vrot.slane %v5399_v45, 1  ;;  %v9993_v38 = vld [vmem:[%s15562_s7 + $0xc8] sm:$0xff]  }
 0x6fe   : > { %v13995_v55 = vsel %vm16443_vm4, %v16446_v39, %v15731_v0  ;;  %v13999_v60 = vsel %vm16449_vm11, %v5770_v9, %v5780_v11  ;;  %vm16451_vm7 = vnez %v16450_v47  ;;  %v9195_v49 = vadd.f32 %v13667_v42, %v5071_v2  ;;  %v8933_v39 = vpop.f32.mrb[109].mxu0  ;;  %6392 = vmatpush1.bf16.msra.mxu1 %v9993_v38 }
 0x6ff   : > { %16447 = vst [vmem:[#allocation22_spill] sm:$0xff] %v13995_v55  ;;  %v5307_v12 = vsel %vm16451_vm7, %v5224_v28, 0.0  ;;  %v5766_v32 = vrot.slane %v13984_v53, 3  ;;  %v5555_v25 = vrot.slane %v5403_v44, 1  ;;  %v5226_v0 = vsel %vm16448_vm12, %v5223_v52, %v5225_v61  ;;  %v5074_v9 = vpop.f32.mrb[110].mxu0  ;;  %v9994_v52 = vld [vmem:[%s15562_s7 + $0xd0] sm:$0xff]   ;;  %6393 = vmatprep.subr.bf16.mxu1 %v15779_v7 }
 0x700   : > { %vm16452_vm11 = vsmask.f32 7424  ;;  %v5405_v56 = vor.u32 %v5403_v44, %v5401_v4  ;;  %v5556_v46 = vrot.slane %v5399_v45, 2  ;;  %vm16454_vm14 = vnez %v16453_v22  ;;  %v8934_v2 = vpop.f32.mrb[111].mxu0 }
 0x701   : > { %v14011_v34 = vsel %vm16452_vm11, %v5397_v51, %v5401_v4  ;;  %v5308_v47 = vsel %vm16454_vm14, %v5226_v0, 0.0  ;;  %10224 = vtanh.f32 %v9195_v49  ;;  %v9196_v28 = vadd.f32 %v13667_v42, %v5074_v9  ;;  %v10221_v4 = vpop.eup %10220  ;;  %vm16458_vm11 = vmmov %vm16443_vm4 }
 0x702   : > { %v5772_v39 = vrot.slane %v14011_v34, 3  ;;  %v14017_v20 = vpack.c.bf16 %v5308_v47, %v5307_v12  ;;  %v14023_v51 = vsel %vm16443_vm4, %v5756_v26, %v5766_v32  ;;  %v5557_v45 = vor.u32 %v5556_v46, %v5555_v25  ;;  %6394 = vmatpush1.bf16.msra.mxu1 %v9994_v52 }
 0x703   : > { %v16455_v44 = vrot.slane %v13960_v13, 1  ;;  %v16456_v0 = vrot.slane %v13903_v19, 1  ;;  %vm16457_vm12 = vcmask 1046528   ;;  %10226 = vtanh.f32 %v9196_v28  ;;  %v10223_v9 = vpop.eup %10222  ;;  %6395 = vmatprep.subr.bf16.mxu1 %v15779_v7 }
 0x704   : > { %v5773_v47 = vsel %vm16458_vm11, %v5762_v16, %v5772_v39  ;;  %v15733_v12 = vrot.slane %v13846_v57, 2  ;;  %v5227_v26 = vrot.slane %v10221_v4, 2  ;;  %v5407_v46 = vshll.u32 %v14017_v20, 16  ;;  %v5079_v4 = vpop.f32.mrb[112].mxu0 }
 0x705   : > { %v14030_v53 = vsel %vm16457_vm12, %v16456_v0, %v16455_v44  ;;  %6277 = vmatprep.mubr.bf16.mxu1 %v5773_v47  ;;  %v5411_v49 = vshrl.u32 %v14017_v20, 16  ;;  %v5790_v25 = vrot.slane %v14017_v20, 3  ;;  %vm16459_vm4 = vsmask.f32 6400  ;;  %vm16460_vm12 = vmmov %vm16458_vm11  ;;  %v16465_v47 = vld [vmem:[#allocation21_spill] sm:$0xff] }
 0x706   : > { %v5774_v38 = vrot.slane %v14030_v53, 3  ;;  %6278 = vmatmul.mubr.bf16.gmra.mrb[88].mxu1 %v13942_v63  ;;  %v14041_v34 = vsel %vm16459_vm4, %v5553_v23, %v5557_v45  ;;  %v16461_v2 = vrot.slane %v13789_v1, 2  ;;  %vm16462_vm11 = vcmask 1045504   ;;  %vm16464_vm7 = vmmov %vm16460_vm12 }
 0x707   : > { %vm16463_vm14 = vmmov %vm16462_vm11  ;;  %v5229_v53 = vrot.slane %v10223_v9, 2  ;;  %v5409_v63 = vrot.slane %v5407_v46, 1  ;;  %v14056_v23 = vsel %vm16464_vm7, %v5780_v11, %v5790_v25  ;;  %vm16466_vm4 = vnez %v16465_v47 }
 0x708   : > { %v14044_v16 = vsel %vm16460_vm12, %v5764_v21, %v5774_v38  ;;  %v14052_v44 = vsel %vm16462_vm11, %v16461_v2, %v15733_v12  ;;  %v5228_v0 = vsel %vm16463_vm14, %v5225_v61, %v5227_v26  ;;  %v9995_v21 = vld [vmem:[%s15562_s7 + $0xd8] sm:$0xff]   ;;  %v9197_v1 = vadd.f32 %v13667_v42, %v5079_v4  ;;  %v8937_v2 = vpop.f32.mrb[113].mxu0  ;;  %vm16467_vm14 = vmmov %vm16462_vm11 }
 0x709   : > { %v5309_v28 = vsel %vm16466_vm4, %v5228_v0, 0.0  ;;  %v5776_v61 = vrot.slane %v14041_v34, 3  ;;  %v5559_v9 = vrot.slane %v5411_v49, 1  ;;  %v5230_v12 = vsel %vm16467_vm14, %v5227_v26, %v5229_v53  ;;  %v5082_v11 = vpop.f32.mrb[114].mxu0  ;;  %6396 = vmatpush1.bf16.msra.mxu1 %v9995_v21  ;;  %v9996_v26 = vld [vmem:[%s15562_s7 + $0xe0] sm:$0xff]  }
 0x70a   : > { %vm16468_vm7 = vsmask.f32 7424  ;;  %v5413_v22 = vor.u32 %v5411_v49, %v5409_v63  ;;  %v5560_v58 = vrot.slane %v5407_v46, 2  ;;  %vm16470_vm12 = vnez %v16469_v17  ;;  %v8938_v4 = vpop.f32.mrb[115].mxu0  ;;  %6397 = vmatprep.subr.bf16.mxu1 %v15779_v7 }
 0x70b   : > { %v14068_v52 = vsel %vm16468_vm7, %v5405_v56, %v5409_v63  ;;  %v5310_v47 = vsel %vm16470_vm12, %v5230_v12, 0.0  ;;  %10228 = vtanh.f32 %v9197_v1  ;;  %v9198_v0 = vadd.f32 %v13667_v42, %v5082_v11  ;;  %v10225_v63 = vpop.eup %10224 }
 0x70c   : > { %v5782_v2 = vrot.slane %v14068_v52, 3  ;;  %v14074_v48 = vpack.c.bf16 %v5310_v47, %v5309_v28  ;;  %vm16471_vm11 = vcmask 1044480   ;;  %v5561_v46 = vor.u32 %v5560_v58, %v5559_v9 }
 0x70d   : > { %v14080_v56 = vsel %vm16471_vm11, %v5766_v32, %v5776_v61  ;;  %v16472_v49 = vrot.slane %v14017_v20, 1  ;;  %v16473_v12 = vrot.slane %v13960_v13, 1  ;;  %vm16474_vm14 = vcmask 1046528   ;;  %vm16475_vm7 = vmmov %vm16471_vm11  ;;  %v10227_v11 = vpop.eup %10226  ;;  %6398 = vmatpush1.bf16.msra.mxu1 %v9996_v26 }
 0x70e   : > { %10230 = vtanh.f32 %v9198_v0  ;;  %v5783_v28 = vsel %vm16475_vm7, %v5772_v39, %v5782_v2  ;;  %v15734_v47 = vrot.slane %v14052_v44, 3  ;;  %v5231_v32 = vrot.slane %v10225_v63, 2  ;;  %v5087_v63 = vpop.f32.mrb[116].mxu0  ;;  %vm16481_vm4 = vmmov %vm16475_vm7  ;;  %6399 = vmatprep.subr.bf16.mxu1 %v15779_v7 }
 0x70f   : > { %v14087_v34 = vsel %vm16474_vm14, %v16473_v12, %v16472_v49  ;;  %6285 = vmatprep.mubr.bf16.mxu1 %v5783_v28  ;;  %v5415_v58 = vshll.u32 %v14074_v48, 16  ;;  %v5419_v1 = vshrl.u32 %v14074_v48, 16  ;;  %v5800_v9 = vrot.slane %v14074_v48, 3  ;;  %vm16477_vm14 = vmmov %vm16475_vm7  ;;  %v16482_v28 = vld [vmem:[#allocation24_spill] sm:$0xff] }
 0x710   : > { %v5784_v21 = vrot.slane %v14087_v34, 3  ;;  %6286 = vmatmul.mubr.bf16.gmra.mrb[92].mxu1 %v13999_v60  ;;  %vm16476_vm11 = vsmask.f32 6400  ;;  %v16478_v4 = vrot.slane %v13938_v59, 3  ;;  %vm16480_vm12 = vcmask 1045504  }
 0x711   : > { %v14098_v52 = vsel %vm16476_vm11, %v5557_v45, %v5561_v46  ;;  %v5232_v12 = vsel %vm16480_vm12, %v5229_v53, %v5231_v32  ;;  %v5233_v34 = vrot.slane %v10227_v11, 2  ;;  %v5417_v60 = vrot.slane %v5415_v58, 1 }
 0x712   : > { %v14101_v39 = vsel %vm16477_vm14, %v5774_v38, %v5784_v21  ;;  %v14109_v49 = vsel %vm16475_vm7, %v16478_v4, %v15734_v47  ;;  %v14113_v45 = vsel %vm16481_vm4, %v5790_v25, %v5800_v9  ;;  %v9997_v38 = vld [vmem:[%s15562_s7 + $0xe8] sm:$0xff]   ;;  %vm16483_vm11 = vnez %v16482_v28  ;;  %v8941_v4 = vpop.f32.mrb[117].mxu0 }
 0x713   : > { %16479 = vst [vmem:[#allocation25_spill] sm:$0xff] %v14109_v49  ;;  %v5311_v0 = vsel %vm16483_vm11, %v5232_v12, 0.0  ;;  %v9199_v59 = vadd.f32 %v13667_v42, %v5087_v63  ;;  %v5786_v53 = vrot.slane %v14098_v52, 3  ;;  %v5563_v11 = vrot.slane %v5419_v1, 1  ;;  %v5090_v25 = vpop.f32.mrb[118].mxu0  ;;  %6400 = vmatpush1.bf16.msra.mxu1 %v9997_v38 }
 0x714   : > { %v5234_v47 = vsel %vm16480_vm12, %v5231_v32, %v5233_v34  ;;  %vm16484_vm4 = vsmask.f32 7424  ;;  %v5421_v17 = vor.u32 %v5419_v1, %v5417_v60  ;;  %v5564_v54 = vrot.slane %v5415_v58, 2  ;;  %v8942_v63 = vpop.f32.mrb[119].mxu0  ;;  %v9998_v32 = vld [vmem:[%s15562_s7 + $0xf0] sm:$0xff]   ;;  %6401 = vmatprep.subr.bf16.mxu1 %v15779_v7 }
 0x715   : > { %v14125_v26 = vsel %vm16484_vm4, %v5413_v22, %v5417_v60  ;;  %vm16486_vm14 = vnez %v16485_v31  ;;  %10232 = vtanh.f32 %v9199_v59  ;;  %v9200_v12 = vadd.f32 %v13667_v42, %v5090_v25  ;;  %v10229_v60 = vpop.eup %10228  ;;  %vm16490_vm4 = vmmov %vm16475_vm7 }
 0x716   : > { %v5312_v28 = vsel %vm16486_vm14, %v5234_v47, 0.0  ;;  %v5792_v4 = vrot.slane %v14125_v26, 3  ;;  %v14137_v22 = vsel %vm16475_vm7, %v5776_v61, %v5786_v53  ;;  %v5565_v58 = vor.u32 %v5564_v54, %v5563_v11 }
 0x717   : > { %v14131_v24 = vpack.c.bf16 %v5312_v28, %v5311_v0  ;;  %v16487_v1 = vrot.slane %v14074_v48, 1  ;;  %v16488_v47 = vrot.slane %v14017_v20, 1  ;;  %vm16489_vm12 = vcmask 1046528   ;;  %6402 = vmatpush1.bf16.msra.mxu1 %v9998_v32 }
 0x718   : > { %10234 = vtanh.f32 %v9200_v12  ;;  %v5793_v0 = vsel %vm16490_vm4, %v5782_v2, %v5792_v4  ;;  %v15735_v28 = vrot.slane %v13903_v19, 2  ;;  %v5235_v59 = vrot.slane %v10229_v60, 2  ;;  %v10231_v25 = vpop.eup %10230  ;;  %v5095_v60 = vpop.f32.mrb[120].mxu0  ;;  %6403 = vmatprep.subr.bf16.mxu1 %v15779_v7 }
 0x719   : > { %v5513_v52 = vsel %vm16489_vm12, %v16488_v47, %v16487_v1  ;;  %6293 = vmatprep.mubr.bf16.mxu1 %v5793_v0  ;;  %v5423_v61 = vshll.u32 %v14131_v24, 16  ;;  %v5427_v54 = vshrl.u32 %v14131_v24, 16  ;;  %v5810_v11 = vrot.slane %v14131_v24, 3  ;;  %vm16492_vm12 = vmmov %vm16490_vm4  ;;  %v16497_v0 = vld [vmem:[#allocation27_spill] sm:$0xff] }
 0x71a   : > { %v5794_v38 = vrot.slane %v5513_v52, 3  ;;  %6294 = vmatmul.mubr.bf16.gmra.mrb[96].mxu1 %v14056_v23  ;;  %vm16491_vm7 = vsmask.f32 6400  ;;  %v16493_v63 = vrot.slane %v13846_v57, 2  ;;  %vm16494_vm4 = vcmask 1045504   ;;  %vm16496_vm11 = vmmov %vm16492_vm12 }
 0x71b   : > { %v14152_v26 = vsel %vm16491_vm7, %v5561_v46, %v5565_v58  ;;  %vm16495_vm14 = vmmov %vm16494_vm4  ;;  %v5237_v52 = vrot.slane %v10231_v25, 2  ;;  %v5425_v23 = vrot.slane %v5423_v61, 1  ;;  %v14167_v46 = vsel %vm16496_vm11, %v5800_v9, %v5810_v11 }
 0x71c   : > { %v14155_v2 = vsel %vm16492_vm12, %v5784_v21, %v5794_v38  ;;  %v14163_v1 = vsel %vm16494_vm4, %v16493_v63, %v15735_v28  ;;  %v5236_v47 = vsel %vm16495_vm14, %v5233_v34, %v5235_v59  ;;  %v9999_v21 = vld [vmem:[%s15562_s7 + $0xf8] sm:$0xff]   ;;  %vm16498_vm7 = vnez %v16497_v0  ;;  %v8945_v63 = vpop.f32.mrb[121].mxu0  ;;  %vm16499_vm14 = vmmov %vm16494_vm4 }
 0x71d   : > { %v5313_v12 = vsel %vm16498_vm7, %v5236_v47, 0.0  ;;  %v9201_v57 = vadd.f32 %v13667_v42, %v5095_v60  ;;  %v5796_v34 = vrot.slane %v14152_v26, 3  ;;  %v5567_v25 = vrot.slane %v5427_v54, 1  ;;  %v5098_v9 = vpop.f32.mrb[122].mxu0  ;;  %6404 = vmatpush1.bf16.msra.mxu1 %v9999_v21 }
 0x71e   : > { %v5238_v28 = vsel %vm16499_vm14, %v5235_v59, %v5237_v52  ;;  %vm16500_vm11 = vsmask.f32 7424  ;;  %v5429_v31 = vor.u32 %v5427_v54, %v5425_v23  ;;  %v5568_v62 = vrot.slane %v5423_v61, 2  ;;  %v8946_v60 = vpop.f32.mrb[123].mxu0  ;;  %8959 = vmatprep.subr.bf16.mxu1 %v15972_v15 }
 0x71f   : > { %v5426_v32 = vsel %vm16500_vm11, %v5421_v17, %v5425_v23  ;;  %vm16502_vm12 = vnez %v16501_v33  ;;  %10236 = vtanh.f32 %v9201_v57  ;;  %v9202_v47 = vadd.f32 %v13667_v42, %v5098_v9  ;;  %v10233_v54 = vpop.eup %10232 }
 0x720   : > { %v5314_v40 = vsel %vm16502_vm12, %v5238_v28, 0.0  ;;  %v5802_v63 = vrot.slane %v5426_v32, 3  ;;  %vm16503_vm4 = vcmask 1044480   ;;  %v5569_v59 = vor.u32 %v5568_v62, %v5567_v25 }
 0x721   : > { %v14182_v0 = vpack.c.bf16 %v5314_v40, %v5313_v12  ;;  %v14185_v7 = vsel %vm16503_vm4, %v5786_v53, %v5796_v34  ;;  %v16504_v26 = vrot.slane %v14131_v24, 1  ;;  %v16505_v17 = vrot.slane %v14074_v48, 1  ;;  %vm16507_vm11 = vmmov %vm16503_vm4 }
 0x722   : > { %vm16506_vm14 = vcmask 1046528   ;;  %10238 = vtanh.f32 %v9202_v47  ;;  %v5803_v28 = vsel %vm16507_vm11, %v5792_v4, %v5802_v63  ;;  %v15736_v40 = vrot.slane %v14163_v1, 3  ;;  %v10235_v21 = vpop.eup %10234  ;;  %vm16513_vm7 = vmmov %vm16507_vm11 }
 0x723   : > { %v5515_v61 = vsel %vm16506_vm14, %v16505_v17, %v16504_v26  ;;  %v5239_v12 = vrot.slane %v10233_v54, 2  ;;  %6301 = vmatprep.mubr.bf16.mxu1 %v5803_v28  ;;  %v5431_v53 = vshll.u32 %v14182_v0, 16  ;;  %v5435_v62 = vshrl.u32 %v14182_v0, 16  ;;  %vm16509_vm14 = vmmov %vm16507_vm11  ;;  %v5103_v26 = vpop.f32.mrb[124].mxu0  ;;  %v16514_v17 = vld [vmem:[#allocation30_spill] sm:$0xff] }
 0x724   : > { %v5804_v42 = vrot.slane %v5515_v61, 3  ;;  %v5820_v23 = vrot.slane %v14182_v0, 3  ;;  %6302 = vmatmul.mubr.bf16.gmra.mrb[100].mxu1 %v14113_v45  ;;  %vm16508_vm4 = vsmask.f32 6400  ;;  %v16510_v9 = vrot.slane %v14052_v44, 3  ;;  %v8949_v54 = vpop.f32.mrb[125].mxu0 }
 0x725   : > { %v14200_v57 = vsel %vm16508_vm4, %v5565_v58, %v5569_v59  ;;  %vm16512_vm12 = vcmask 1045504   ;;  %v5241_v60 = vrot.slane %v10235_v21, 2  ;;  %v5433_v45 = vrot.slane %v5431_v53, 1  ;;  %v14222_v61 = vld [vmem:[%s15561_s6] ss:$0 sm:$0xff] }
 0x726   : > { %v14203_v4 = vsel %vm16509_vm14, %v5794_v38, %v5804_v42  ;;  %v14211_v32 = vsel %vm16507_vm11, %v16510_v9, %v15736_v40  ;;  %v5240_v47 = vsel %vm16512_vm12, %v5237_v52, %v5239_v12  ;;  %v14215_v58 = vsel %vm16513_vm7, %v5810_v11, %v5820_v23  ;;  %v5106_v9 = vpop.f32.mrb[126].mxu0 }
 0x727   : > { %16511 = vst [vmem:[#allocation28_spill] sm:$0xff] %v14211_v32  ;;  %vm16515_vm4 = vnez %v16514_v17  ;;  %v9203_v44 = vadd.f32 %v14222_v61, %v5103_v26  ;;  %v5806_v28 = vrot.slane %v14200_v57, 3  ;;  %v5571_v52 = vrot.slane %v5435_v62, 1  ;;  %v16517_v17 = vld [vmem:[#allocation32_spill] sm:$0xff]  ;;  %v8950_v29 = vpop.f32.mrb[127].mxu0 }
 0x728   : > { %v5315_v38 = vsel %vm16515_vm4, %v5240_v47, 0.0  ;;  %v5242_v21 = vsel %vm16512_vm12, %v5239_v12, %v5241_v60  ;;  %vm16516_vm14 = vsmask.f32 7424  ;;  %v5437_v40 = vor.u32 %v5435_v62, %v5433_v45 }
 0x729   : > { %v5434_v11 = vsel %vm16516_vm14, %v5429_v31, %v5433_v45  ;;  %v5572_v25 = vrot.slane %v5431_v53, 2  ;;  %vm16518_vm7 = vnez %v16517_v17  ;;  %10240 = vtanh.f32 %v9203_v44  ;;  %v10237_v62 = vpop.eup %10236  ;;  %vm16522_vm14 = vmmov %vm16507_vm11 }
 0x72a   : > { %v5316_v47 = vsel %vm16518_vm7, %v5242_v21, 0.0  ;;  %v9204_v33 = vadd.f32 %v14222_v61, %v5106_v9  ;;  %v5812_v14 = vrot.slane %v5434_v11, 3  ;;  %v14234_v57 = vsel %vm16507_vm11, %v5796_v34, %v5806_v28 }
 0x72b   : > { %v14231_v26 = vpack.c.bf16 %v5316_v47, %v5315_v38  ;;  %v5573_v54 = vor.u32 %v5572_v25, %v5571_v52  ;;  %v16519_v12 = vrot.slane %v14182_v0, 1  ;;  %v16520_v31 = vrot.slane %v14131_v24, 1 }
 0x72c   : > { %vm16521_vm12 = vcmask 1046528   ;;  %10242 = vtanh.f32 %v9204_v33  ;;  %v5813_v45 = vsel %vm16522_vm14, %v5802_v63, %v5812_v14  ;;  %v15737_v29 = vrot.slane %v13960_v13, 2  ;;  %v10239_v52 = vpop.eup %10238 }
 0x72d   : > { %v5517_v53 = vsel %vm16521_vm12, %v16520_v31, %v16519_v12  ;;  %v5243_v21 = vrot.slane %v10237_v62, 2  ;;  %6309 = vmatprep.mubr.bf16.mxu1 %v5813_v45  ;;  %v5439_v38 = vshll.u32 %v14231_v26, 16  ;;  %v5443_v34 = vshrl.u32 %v14231_v26, 16  ;;  %vm16524_vm12 = vmmov %vm16522_vm14  ;;  %v16529_v62 = vld [vmem:[#allocation33_spill] sm:$0xff] }
 0x72e   : > { %v5814_v44 = vrot.slane %v5517_v53, 3  ;;  %v5830_v25 = vrot.slane %v14231_v26, 3  ;;  %6310 = vmatmul.mubr.bf16.gmra.mrb[104].mxu1 %v14167_v46  ;;  %vm16523_vm11 = vsmask.f32 6400  ;;  %v16525_v11 = vrot.slane %v13903_v19, 2  ;;  %v5111_v53 = vpop.f32.mrb[128].mxu0  ;;  %vm16528_vm4 = vmmov %vm16524_vm12 }
 0x72f   : > { %v14248_v9 = vsel %vm16523_vm11, %v5569_v59, %v5573_v54  ;;  %vm16526_vm14 = vcmask 1045504   ;;  %v5245_v31 = vrot.slane %v10239_v52, 2  ;;  %v5441_v46 = vrot.slane %v5439_v38, 1  ;;  %v8953_v63 = vpop.f32.mrb[129].mxu0 }
 0x730   : > { %v14251_v33 = vsel %vm16524_vm12, %v5804_v42, %v5814_v44  ;;  %v14259_v47 = vsel %vm16526_vm14, %v16525_v11, %v15737_v29  ;;  %vm16527_vm7 = vmmov %vm16526_vm14  ;;  %v14263_v59 = vsel %vm16528_vm4, %v5820_v23, %v5830_v25  ;;  %vm16530_vm11 = vnez %v16529_v62  ;;  %v5114_v29 = vpop.f32.mrb[130].mxu0 }
 0x731   : > { %v5244_v12 = vsel %vm16527_vm7, %v5241_v60, %v5243_v21  ;;  %v9205_v45 = vadd.f32 %v14222_v61, %v5111_v53  ;;  %v5816_v17 = vrot.slane %v14248_v9, 3  ;;  %v5575_v19 = vrot.slane %v5443_v34, 1  ;;  %vm16531_vm12 = vmmov %vm16527_vm7 }
 0x732   : > { %v5317_v42 = vsel %vm16530_vm11, %v5244_v12, 0.0  ;;  %v5246_v11 = vsel %vm16531_vm12, %v5243_v21, %v5245_v31  ;;  %vm16532_vm14 = vsmask.f32 7424  ;;  %v5445_v52 = vor.u32 %v5443_v34, %v5441_v46  ;;  %v8954_v12 = vpop.f32.mrb[131].mxu0 }
 0x733   : > { %v5442_v60 = vsel %vm16532_vm14, %v5437_v40, %v5441_v46  ;;  %v5576_v43 = vrot.slane %v5439_v38, 2  ;;  %vm16534_vm7 = vnez %v16533_v36  ;;  %10244 = vtanh.f32 %v9205_v45  ;;  %v10241_v34 = vpop.eup %10240  ;;  %vm16538_vm14 = vmmov %vm16528_vm4 }
 0x734   : > { %v5318_v23 = vsel %vm16534_vm7, %v5246_v11, 0.0  ;;  %v9206_v62 = vadd.f32 %v14222_v61, %v5114_v29  ;;  %v5822_v32 = vrot.slane %v5442_v60, 3  ;;  %v14277_v9 = vsel %vm16528_vm4, %v5806_v28, %v5816_v17 }
 0x735   : > { %v14274_v53 = vpack.c.bf16 %v5318_v23, %v5317_v42  ;;  %v5577_v63 = vor.u32 %v5576_v43, %v5575_v19  ;;  %v16535_v21 = vrot.slane %v14231_v26, 1  ;;  %v16536_v40 = vrot.slane %v14182_v0, 1 }
 0x736   : > { %vm16537_vm12 = vcmask 1046528   ;;  %10246 = vtanh.f32 %v9206_v62  ;;  %v5823_v46 = vsel %vm16538_vm14, %v5812_v14, %v5822_v32  ;;  %v15738_v29 = vrot.slane %v14259_v47, 3  ;;  %v10243_v19 = vpop.eup %10242 }
 0x737   : > { %v5519_v38 = vsel %vm16537_vm12, %v16536_v40, %v16535_v21  ;;  %v5247_v11 = vrot.slane %v10241_v34, 2  ;;  %6317 = vmatprep.mubr.bf16.mxu1 %v5823_v46  ;;  %v5447_v42 = vshll.u32 %v14274_v53, 16  ;;  %v5451_v28 = vshrl.u32 %v14274_v53, 16  ;;  %vm16540_vm12 = vmmov %vm16538_vm14 }
 0x738   : > { %v5824_v45 = vrot.slane %v5519_v38, 3  ;;  %v5840_v43 = vrot.slane %v14274_v53, 3  ;;  %6318 = vmatmul.mubr.bf16.gmra.mrb[108].mxu1 %v14215_v58  ;;  %vm16539_vm4 = vsmask.f32 6400  ;;  %v5520_v14 = vrot.slane %v14274_v53, 1  ;;  %vm16542_vm14 = vmmov %vm16540_vm12  ;;  %v5119_v38 = vpop.f32.mrb[132].mxu0 }
 0x739   : > { %v5578_v60 = vsel %vm16539_vm4, %v5573_v54, %v5577_v63  ;;  %v16541_v23 = vrot.slane %v14163_v1, 3  ;;  %vm16544_vm7 = vcmask 1045504   ;;  %v5249_v40 = vrot.slane %v10243_v19, 2  ;;  %vm16545_vm11 = vmmov %vm16540_vm12  ;;  %v16546_v54 = vld [vmem:[#allocation36_spill] sm:$0xff]  ;;  %v8957_v36 = vpop.f32.mrb[133].mxu0 }
 0x73a   : > { %v14292_v62 = vsel %vm16540_vm12, %v5814_v44, %v5824_v45  ;;  %v5248_v21 = vsel %vm16544_vm7, %v5245_v31, %v5247_v11  ;;  %v5449_v34 = vrot.slane %v5447_v42, 1  ;;  %v14304_v58 = vsel %vm16545_vm11, %v5830_v25, %v5840_v43  ;;  %vm16548_vm12 = vmmov %vm16544_vm7 }
 0x73b   : > { %v14300_v12 = vsel %vm16542_vm14, %v16541_v23, %v15738_v29  ;;  %vm16547_vm4 = vnez %v16546_v54  ;;  %v9207_v46 = vadd.f32 %v14222_v61, %v5119_v38  ;;  %v5826_v49 = vrot.slane %v5578_v60, 3  ;;  %v5122_v23 = vpop.f32.mrb[134].mxu0 }
 0x73c   : > { %16543 = vst [vmem:[#allocation31_spill] sm:$0xff] %v14300_v12  ;;  %v5319_v44 = vsel %vm16547_vm4, %v5248_v21, 0.0  ;;  %v5579_v55 = vrot.slane %v5451_v28, 1  ;;  %v5250_v1 = vsel %vm16548_vm12, %v5247_v11, %v5249_v40  ;;  %vm16549_vm14 = vsmask.f32 7424  ;;  %v16550_v12 = vld [vmem:[#allocation38_spill] sm:$0xff] }
 0x73d   : > { %v5450_v29 = vsel %vm16549_vm14, %v5445_v52, %v5449_v34  ;;  %v5453_v31 = vor.u32 %v5451_v28, %v5449_v34  ;;  %v5580_v19 = vrot.slane %v5447_v42, 2  ;;  %vm16551_vm7 = vnez %v16550_v12  ;;  %v8958_v25 = vpop.f32.mrb[135].mxu0  ;;  %v10245_v28 = vpop.eup %10244  ;;  %vm16554_vm14 = vmmov %vm16545_vm11 }
 0x73e   : > { %v5320_v5 = vsel %vm16551_vm7, %v5250_v1, 0.0  ;;  %10248 = vtanh.f32 %v9207_v46  ;;  %v5832_v35 = vrot.slane %v5450_v29, 3  ;;  %v14314_v21 = vsel %vm16545_vm11, %v5816_v17, %v5826_v49 }
 0x73f   : > { %v14316_v61 = vpack.c.bf16 %v5320_v5, %v5319_v44  ;;  %v5581_v36 = vor.u32 %v5580_v19, %v5579_v55  ;;  %v16552_v60 = vrot.slane %v14231_v26, 1  ;;  %vm16553_vm12 = vcmask 1046528  }
 0x740   : > { %v5610_v52 = vrot.slane %v14017_v20, 2  ;;  %v5833_v42 = vsel %vm16554_vm14, %v5822_v32, %v5832_v35  ;;  %v5612_v34 = vrot.slane %v14074_v48, 2  ;;  %v5251_v46 = vrot.slane %v10245_v28, 2  ;;  %v10247_v44 = vpop.eup %10246 }
 0x741   : > { %v5521_v11 = vsel %vm16553_vm12, %v16552_v60, %v5520_v14  ;;  %6325 = vmatprep.mubr.bf16.mxu1 %v5833_v42  ;;  %v5455_v5 = vshll.u32 %v14316_v61, 16  ;;  %v5459_v55 = vshrl.u32 %v14316_v61, 16  ;;  %v5850_v17 = vrot.slane %v14316_v61, 3  ;;  %vm16556_vm12 = vmmov %vm16554_vm14 }
 0x742   : > { %v5834_v38 = vrot.slane %v5521_v11, 3  ;;  %6326 = vmatmul.mubr.bf16.gmra.mrb[112].mxu1 %v14263_v59  ;;  %vm16555_vm11 = vsmask.f32 6400  ;;  %v5522_v48 = vrot.slane %v14316_v61, 1  ;;  %v16558_v1 = vrot.slane %v13960_v13, 2  ;;  %vm16561_vm4 = vmmov %vm16556_vm12 }
 0x743   : > { %v5582_v20 = vsel %vm16555_vm11, %v5577_v63, %v5581_v36  ;;  %vm16559_vm14 = vcmask 1045504   ;;  %v5253_v25 = vrot.slane %v10247_v44, 2  ;;  %v5457_v60 = vrot.slane %v5455_v5, 1 }
 0x744   : > { %v14331_v32 = vsel %vm16556_vm12, %v5824_v45, %v5834_v38  ;;  %v5611_v23 = vsel %vm16559_vm14, %v16558_v1, %v5610_v52  ;;  %vm16560_vm7 = vmmov %vm16559_vm14  ;;  %v5851_v11 = vsel %vm16561_vm4, %v5840_v43, %v5850_v17  ;;  %v5836_v42 = vrot.slane %v5582_v20, 3 }
 0x745   : > { %16557 = vst [vmem:[#allocation34_spill] sm:$0xff] %v14331_v32  ;;  %v5252_v19 = vsel %vm16560_vm7, %v5249_v40, %v5251_v46  ;;  %v5583_v63 = vrot.slane %v5459_v55, 1  ;;  %v5584_v29 = vrot.slane %v5455_v5, 2  ;;  %vm16563_vm11 = vmmov %vm16560_vm7  ;;  %vm16564_vm12 = vsmask.f32 7424 }
 0x746   : > { %v5321_v59 = vsel %vm16328_vm6, %v5252_v19, 0.0  ;;  %v5254_v45 = vsel %vm16563_vm11, %v5251_v46, %v5253_v25  ;;  %v5458_v12 = vsel %vm16564_vm12, %v5453_v31, %v5457_v60  ;;  %v5461_v54 = vor.u32 %v5459_v55, %v5457_v60  ;;  %vm16567_vm7 = vmmov %vm16561_vm4 }
 0x747   : > { %vm16565_vm9 = vcmask 1046528   ;;  %v5322_v40 = vsel %vm16332_vm0, %v5254_v45, 0.0  ;;  %v5842_v44 = vrot.slane %v5458_v12, 3  ;;  %v14347_v32 = vsel %vm16567_vm7, %v5826_v49, %v5836_v42  ;;  %vm16568_vm4 = vmmov %vm16563_vm11 }
 0x748   : > { %v5523_v13 = vsel %vm16565_vm9, %v5520_v14, %v5522_v48  ;;  %v5585_v43 = vor.u32 %v5584_v29, %v5583_v63  ;;  %v14349_v28 = vpack.c.bf16 %v5322_v40, %v5321_v59  ;;  %v5788_v19 = vrot.slane %v5611_v23, 3  ;;  %v10249_v46 = vpop.eup %10248  ;;  %vm16569_vm14 = vmmov %vm16567_vm7 }
 0x749   : > { %v5844_v20 = vrot.slane %v5523_v13, 3  ;;  %v5613_v5 = vsel %vm16568_vm4, %v5610_v52, %v5612_v34  ;;  %v5843_v31 = vsel %vm16569_vm14, %v5832_v35, %v5842_v44  ;;  %vm16570_vm11 = vsmask.f32 6400  ;;  %vm16572_vm9 = vmmov %vm16568_vm4 }
 0x74a   : > { %v5586_v55 = vsel %vm16570_vm11, %v5581_v36, %v5585_v43  ;;  %v5798_v14 = vrot.slane %v5613_v5, 3  ;;  %v16571_v60 = vrot.slane %v14131_v24, 2  ;;  %v5255_v49 = vrot.slane %v10249_v46, 2  ;;  %6333 = vmatprep.mubr.bf16.mxu1 %v5843_v31  ;;  %vm16573_vm12 = vmmov %vm16567_vm7 }
 0x74b   : > { %v5463_v29 = vshll.u32 %v14349_v28, 16  ;;  %v5467_v59 = vshrl.u32 %v14349_v28, 16  ;;  %v5860_v23 = vrot.slane %v14349_v28, 3  ;;  %6334 = vmatmul.mubr.bf16.gmra.mrb[116].mxu1 %v14304_v58  ;;  %v5846_v52 = vrot.slane %v5586_v55, 3  ;;  %vm16576_vm14 = vmmov %vm16567_vm7 }
 0x74c   : > { %v14357_v12 = vsel %vm16572_vm9, %v5612_v34, %v16571_v60  ;;  %v14364_v35 = vsel %vm16573_vm12, %v5834_v38, %v5844_v20  ;;  %v5524_v36 = vrot.slane %v14349_v28, 1  ;;  %v16574_v63 = vrot.slane %v14259_v47, 3  ;;  %vm16578_vm11 = vmmov %vm16567_vm7 }
 0x74d   : > { %v5256_v45 = vsel %vm16568_vm4, %v5253_v25, %v5255_v49  ;;  %v5324_v13 = vsel %vm12454_vm1, %v5255_v49, 0.0  ;;  %v5465_v40 = vrot.slane %v5463_v29, 1  ;;  %v5861_v5 = vsel %vm16576_vm14, %v5850_v17, %v5860_v23  ;;  %vm16582_vm4 = vmmov %vm16567_vm7 }
 0x74e   : > { %v14370_v34 = vsel %vm16567_vm7, %v16574_v63, %v5788_v19  ;;  %v5323_v46 = vsel %vm12429_vm5, %v5256_v45, 0.0  ;;  %v14379_v38 = vsel %vm16578_vm11, %v5836_v42, %v5846_v52  ;;  %v5587_v31 = vrot.slane %v5467_v59, 1  ;;  %vm16584_vm11 = vmmov %vm16582_vm4 }
 0x74f   : > { %16575 = vst [vmem:[#allocation37_spill] sm:$0xff] %v14370_v34  ;;  %v5588_v55 = vrot.slane %v5463_v29, 2  ;;  %v14381_v47 = vpack.c.bf16 %v5324_v13, %v5323_v46  ;;  %vm16579_vm9 = vsmask.f32 7424  ;;  %v5469_v63 = vor.u32 %v5467_v59, %v5465_v40 }
 0x750   : > { %v5466_v60 = vsel %vm16579_vm9, %v5461_v54, %v5465_v40  ;;  %vm16580_vm12 = vcmask 1046528   ;;  %v14386_v17 = vsel %vm16567_vm7, %v5788_v19, %v5798_v14  ;;  %vm16583_vm14 = vsmask.f32 6400  ;;  %vm16585_vm9 = vmmov %vm16582_vm4 }
 0x751   : > { %v5525_v25 = vsel %vm16580_vm12, %v5522_v48, %v5524_v36  ;;  %v5852_v37 = vrot.slane %v5466_v60, 3  ;;  %v5589_v49 = vor.u32 %v5588_v55, %v5587_v31  ;;  %16581 = vst [vmem:[#allocation40_spill] sm:$0xff] %v14386_v17  ;;  %v5471_v45 = vshll.u32 %v14381_v47, 16  ;;  %vm16586_vm7 = vmmov %vm16582_vm4 }
 0x752   : > { %v5854_v1 = vrot.slane %v5525_v25, 3  ;;  %v5475_v42 = vshrl.u32 %v14381_v47, 16  ;;  %v5870_v58 = vrot.slane %v14381_v47, 3  ;;  %v5526_v29 = vrot.slane %v14381_v47, 1 }
 0x753   : > { %v5853_v13 = vsel %vm16582_vm4, %v5842_v44, %v5852_v37  ;;  %v5590_v54 = vsel %vm16583_vm14, %v5585_v43, %v5589_v49  ;;  %v5808_v59 = vrot.slane %v14357_v12, 3  ;;  %v5473_v19 = vrot.slane %v5471_v45, 1  ;;  %vm16588_vm14 = vmmov %vm16586_vm7 }
 0x754   : > { %v14395_v48 = vsel %vm16584_vm11, %v5844_v20, %v5854_v1  ;;  %6341 = vmatprep.mubr.bf16.mxu1 %v5853_v13  ;;  %v5591_v40 = vrot.slane %v5475_v42, 1  ;;  %v5871_v46 = vsel %vm16585_vm9, %v5860_v23, %v5870_v58  ;;  %v5856_v31 = vrot.slane %v5590_v54, 3  ;;  %vm16589_vm11 = vmmov %vm16586_vm7 }
 0x755   : > { %6342 = vmatmul.mubr.bf16.gmra.mrb[120].mxu1 %v5851_v11  ;;  %v5592_v55 = vrot.slane %v5471_v45, 2  ;;  %v5527_v60 = vsel %vm16580_vm12, %v5524_v36, %v5526_v29  ;;  %v14400_v25 = vrot.slane %v5526_v29, 3  ;;  %v14403_v44 = vsel %vm16586_vm7, %v5798_v14, %v5808_v59  ;;  %vm16590_vm9 = vmmov %vm16586_vm7 }
 0x756   : > { %vm16587_vm4 = vsmask.f32 7424  ;;  %v5477_v20 = vor.u32 %v5475_v42, %v5473_v19  ;;  %v14407_v12 = vsel %vm16588_vm14, %v5846_v52, %v5856_v31  ;;  %v5864_v13 = vrot.slane %v5527_v60, 3  ;;  %vm16591_vm12 = vmmov %vm16586_vm7 }
 0x757   : > { %v5474_v43 = vsel %vm16587_vm4, %v5469_v63, %v5473_v19  ;;  %v14409_v34 = vor.u32 %v5592_v55, %v5591_v40  ;;  %v5616_v11 = vrot.slane %v14182_v0, 2  ;;  %v5618_v23 = vrot.slane %v14231_v26, 2  ;;  %vm16595_vm14 = vmmov %vm16590_vm9 }
 0x758   : > { %v5862_v17 = vrot.slane %v5474_v43, 3  ;;  %v5872_v36 = vrot.slane %v5477_v20, 3  ;;  %v14414_v45 = vsel %vm16589_vm11, %v5854_v1, %v5864_v13  ;;  %v14418_v14 = vsel %vm16590_vm9, %v5864_v13, %v14400_v25 }
 0x759   : > { %v5620_v63 = vrot.slane %v14274_v53, 2  ;;  %vm16592_vm7 = vsmask.f32 6400  ;;  %v5876_v29 = vrot.slane %v14409_v34, 3  ;;  %v16593_v0 = vrot.slane %v14131_v24, 2 }
 0x75a   : > { %v5863_v52 = vsel %vm16591_vm12, %v5852_v37, %v5862_v17  ;;  %v5594_v42 = vsel %vm16592_vm7, %v5589_v49, %v14409_v34  ;;  %vm16594_vm4 = vcmask 1045504   ;;  %v5873_v1 = vsel %vm16595_vm14, %v5862_v17, %v5872_v36  ;;  %vm16598_vm7 = vmmov %vm16591_vm12  ;;  %v10017_v34 = vld [vmem:[%s15564_s9 + $0x20] sm:$0xff]  }
 0x75b   : > { %v5617_v26 = vsel %vm16594_vm4, %v16593_v0, %v5616_v11  ;;  %6349 = vmatprep.mubr.bf16.mxu1 %v5863_v52  ;;  %v5866_v54 = vrot.slane %v5594_v42, 3  ;;  %vm16596_vm11 = vmmov %vm16594_vm4  ;;  %v5622_v37 = vrot.slane %v14316_v61, 2  ;;  %v5624_v49 = vrot.slane %v14349_v28, 2 }
 0x75c   : > { %v5818_v19 = vrot.slane %v5617_v26, 3  ;;  %v5619_v40 = vsel %vm16596_vm11, %v5616_v11, %v5618_v23  ;;  %vm16597_vm9 = vmmov %vm16594_vm4  ;;  %v10000_v26 = vld [vmem:[%s15562_s7 + $0x100] sm:$0xff]  }
 0x75d   : > { %v5828_v55 = vrot.slane %v5619_v40, 3  ;;  %v5621_v53 = vsel %vm16597_vm9, %v5618_v23, %v5620_v63  ;;  %v14434_v60 = vsel %vm16591_vm12, %v5856_v31, %v5866_v54  ;;  %v14439_v24 = vsel %vm16598_vm7, %v5866_v54, %v5876_v29  ;;  %vm16599_vm4 = vmmov %vm16598_vm7  ;;  %6350 = vmatmul.mubr.bf16.gmra.mrb[124].mxu1 %v5861_v5 }
 0x75e   : > { %v14442_v17 = vsel %vm16599_vm4, %v5808_v59, %v5818_v19  ;;  %v5838_v43 = vrot.slane %v5621_v53, 3  ;;  %vm16600_vm14 = vmmov %vm16599_vm4  ;;  %v5625_v28 = vsel %vm16597_vm9, %v5622_v37, %v5624_v49  ;;  %v5626_v31 = vrot.slane %v14381_v47, 2  ;;  %6357 = vmatprep.mubr.bf16.mxu1 %v5873_v1  ;;  %v10001_v1 = vld [vmem:[%s15562_s7 + $0x108] sm:$0xff]  }
 0x75f   : > { %v14445_v20 = vsel %vm16600_vm14, %v5818_v19, %v5828_v55  ;;  %vm16601_vm11 = vmmov %vm16597_vm9  ;;  %v5858_v23 = vrot.slane %v5625_v28, 3  ;;  %v10026_v28 = vld [vmem:[%s15564_s9 + $0x110] sm:$0xff]  }
 0x760   : > { %v5623_v61 = vsel %vm16601_vm11, %v5620_v63, %v5622_v37  ;;  %vm16602_vm12 = vmmov %vm16599_vm4  ;;  %v14454_v52 = vrot.slane %v5626_v31, 3 }
 0x761   : > { %v14451_v13 = vsel %vm16602_vm12, %v5828_v55, %v5838_v43  ;;  %v5848_v11 = vrot.slane %v5623_v61, 3  ;;  %vm16603_vm7 = vmmov %vm16597_vm9 }
 0x762   : > { %v5627_v59 = vsel %vm16603_vm7, %v5624_v49, %v5626_v31  ;;  %vm16604_vm14 = vmmov %vm16599_vm4 }
 0x763   : > { %v14457_v5 = vsel %vm16599_vm4, %v5838_v43, %v5848_v11  ;;  %v14460_v42 = vsel %vm16604_vm14, %v5848_v11, %v5858_v23  ;;  %v5868_v63 = vrot.slane %v5627_v59, 3  ;;  %vm16605_vm11 = vmmov %vm16599_vm4  ;;  %v10032_v43 = vld [vmem:[%s15564_s9 + $0xc0] sm:$0xff]  }
 0x764   : > { %vm16606_vm9 = vmmov %vm16599_vm4  ;;  %vm16622_vm4 = vsmask.f32 7424 }
 0x765   : > { %v14463_v0 = vsel %vm16605_vm11, %v5858_v23, %v5868_v63  ;;  %v14467_v47 = vsel %vm16606_vm9, %v5868_v63, %v14454_v52  ;;  %6358 = vmatmul.mubr.bf16.gmra.mrb[128].mxu1 %v5871_v46  ;;  %v10021_v46 = vld [vmem:[%s15564_s9 + $0x30] sm:$0xff]   ;;  %vm16620_vm12 = vmmov %vm16603_vm7  ;;  %vm16621_vm7 = vcmask 1046528  }
 0x766   : > { %6365 = vmatprep.mubr.bf16.mxu1 %v5872_v36  ;;  %vm8312_vm14 = vmpackc.low %vm11282_vm13, %vm11232_vm10 }
 0x767   : > { %vm16627_vm11 = vmmov %vm16620_vm12 }
 0x768   : > { %vm16628_vm9 = vmmov %vm16621_vm7 }
 0x76d   : > { %6366 = vmatmul.mubr.bf16.gmra.mrb[132].mxu1 %v5870_v58  ;;  %v10018_v58 = vld [vmem:[%s15564_s9 + $0x68] sm:$0xff]  }
 0x76e   : > { %6405 = vmatprep.mubr.bf16.mxu1 %v13795_v18  ;;  %v10002_v18 = vld [vmem:[%s15562_s7 + $0x110] sm:$0xff]  }
 0x775   : > { %6406 = vmatmul.mubr.bf16.vlgmr.msra.gmra.mrb[68].mxu1 %v13761_v27  ;;  %v10003_v27 = vld [vmem:[%s15562_s7 + $0x118] sm:$0xff]  }
 0x776   : > { %6413 = vmatprep.mubr.bf16.mxu1 %v13852_v10  ;;  %8960 = vmatpush3.bf16.msra.mxu1 %v10000_v26  ;;  %v10004_v10 = vld [vmem:[%s15562_s7 + $0x120] sm:$0xff]  }
 0x777   : > { %8961 = vmatprep.subr.bf16.mxu1 %v15972_v15 }
 0x77a   : > { %8962 = vmatpush3.bf16.msra.mxu1 %v10001_v1 }
 0x77b   : > { %8963 = vmatprep.subr.bf16.mxu1 %v15972_v15 }
 0x77d   : > { %6414 = vmatmul.mubr.bf16.gmra.mrb[72].mxu1 %v13816_v50  ;;  %v10005_v50 = vld [vmem:[%s15562_s7 + $0x128] sm:$0xff]  }
 0x77e   : > { %6421 = vmatprep.mubr.bf16.mxu1 %v13909_v41  ;;  %8964 = vmatpush3.bf16.msra.mxu1 %v10002_v18  ;;  %v10006_v41 = vld [vmem:[%s15562_s7 + $0x130] sm:$0xff]  }
 0x77f   : > { %8965 = vmatprep.subr.bf16.mxu1 %v15972_v15 }
 0x782   : > { %8966 = vmatpush3.bf16.msra.mxu1 %v10003_v27 }
 0x783   : > { %8967 = vmatprep.subr.bf16.mxu1 %v15972_v15 }
 0x785   : > { %6422 = vmatmul.mubr.bf16.gmra.mrb[76].mxu1 %v13873_v6  ;;  %v10007_v6 = vld [vmem:[%s15562_s7 + $0x138] sm:$0xff]  }
 0x786   : > { %6429 = vmatprep.mubr.bf16.mxu1 %v13966_v3  ;;  %8968 = vmatpush3.bf16.msra.mxu1 %v10004_v10  ;;  %v16608_v3 = vld [vmem:[#allocation44_spill] sm:$0xff] }
 0x787   : > { %8969 = vmatprep.subr.bf16.mxu1 %v15972_v15 }
 0x78a   : > { %8970 = vmatpush3.bf16.msra.mxu1 %v10005_v50 }
 0x78b   : > { %8971 = vmatprep.subr.bf16.mxu1 %v15972_v15 }
 0x78d   : > { %6430 = vmatmul.mubr.bf16.gmra.mrb[80].mxu1 %v13930_v30  ;;  %v16607_v30 = vld [vmem:[#allocation34_spill] sm:$0xff] }
 0x78e   : > { %6437 = vmatprep.mubr.bf16.mxu1 %v14023_v51  ;;  %8972 = vmatpush3.bf16.msra.mxu1 %v10006_v41  ;;  %v10009_v51 = vld [vmem:[%s15564_s9] sm:$0xff]  }
 0x78f   : > { %8973 = vmatprep.subr.bf16.mxu1 %v15972_v15 }
 0x792   : > { %8974 = vmatpush3.bf16.msra.mxu1 %v10007_v6 }
 0x795   : > { %6438 = vmatmul.mubr.bf16.gmra.mrb[84].mxu1 %v13987_v8  ;;  %v10008_v8 = vld [vmem:[%s15564_s9 + $0x40] sm:$0xff]  }
 0x796   : > { %6445 = vmatprep.mubr.bf16.mxu1 %v14080_v56  ;;  %9091 = vmatprep.subr.bf16.mxu1 %v10008_v8  ;;  %v16610_v56 = vld [vmem:[#allocation22_spill] sm:$0xff] }
 0x797   : > { %8459 = vmatprep.subr.bf16.mxu0 %v10008_v8 }
 0x798   : > { %8460 = vmatpush3.bf16.msra.mxu0 %v10009_v51 }
 0x79d   : > { %6446 = vmatmul.mubr.bf16.gmra.mrb[88].mxu1 %v14044_v16  ;;  %v16609_v16 = vld [vmem:[#allocation19_spill] sm:$0xff] }
 0x79e   : > { %6453 = vmatprep.mubr.bf16.mxu1 %v14137_v22  ;;  %v16612_v22 = vld [vmem:[#allocation28_spill] sm:$0xff] }
 0x7a5   : > { %6454 = vmatmul.mubr.bf16.gmra.mrb[92].mxu1 %v14101_v39  ;;  %v16611_v39 = vld [vmem:[#allocation25_spill] sm:$0xff] }
 0x7a6   : > { %6461 = vmatprep.mubr.bf16.mxu1 %v14185_v7  ;;  %v16614_v7 = vld [vmem:[#allocation37_spill] sm:$0xff] }
 0x7ad   : > { %6462 = vmatmul.mubr.bf16.gmra.mrb[96].mxu1 %v14155_v2  ;;  %v16613_v2 = vld [vmem:[#allocation31_spill] sm:$0xff] }
 0x7ae   : > { %6469 = vmatprep.mubr.bf16.mxu1 %v14234_v57  ;;  %v10010_v57 = vld [vmem:[%s15564_s9 + $0x48] sm:$0xff]  }
 0x7af   : > { %8461 = vmatprep.subr.bf16.mxu0 %v10010_v57 }
 0x7b5   : > { %6470 = vmatmul.mubr.bf16.gmra.mrb[100].mxu1 %v14203_v4  ;;  %v16615_v4 = vld [vmem:[#allocation40_spill] sm:$0xff] }
 0x7b6   : > { %6477 = vmatprep.mubr.bf16.mxu1 %v14277_v9  ;;  %v10012_v9 = vld [vmem:[%s15564_s9 + $0x50] sm:$0xff]  }
 0x7bd   : > { %6478 = vmatmul.mubr.bf16.gmra.mrb[104].mxu1 %v14251_v33  ;;  %v10011_v33 = vld [vmem:[%s15564_s9 + $0x8] sm:$0xff]  }
 0x7be   : > { %6485 = vmatprep.mubr.bf16.mxu1 %v14314_v21  ;;  %8462 = vmatpush3.bf16.msra.mxu0 %v10011_v33  ;;  %v10014_v21 = vld [vmem:[%s15564_s9 + $0x58] sm:$0xff]  }
 0x7bf   : > { %8463 = vmatprep.subr.bf16.mxu0 %v10012_v9 }
 0x7c5   : > { %6486 = vmatmul.mubr.bf16.gmra.mrb[108].mxu1 %v14292_v62  ;;  %v10013_v62 = vld [vmem:[%s15564_s9 + $0x10] sm:$0xff]  }
 0x7c6   : > { %6493 = vmatprep.mubr.bf16.mxu1 %v14347_v32  ;;  %8464 = vmatpush3.bf16.msra.mxu0 %v10013_v62  ;;  %v10015_v32 = vld [vmem:[%s15564_s9 + $0x18] sm:$0xff]  }
 0x7c7   : > { %8465 = vmatprep.subr.bf16.mxu0 %v10014_v21 }
 0x7ca   : > { %8466 = vmatpush3.bf16.msra.mxu0 %v10015_v32 }
 0x7cd   : > { %6494 = vmatmul.mubr.bf16.gmra.mrb[112].mxu1 %v16607_v30 }
 0x7ce   : > { %6501 = vmatprep.mubr.bf16.mxu1 %v14379_v38  ;;  %v10019_v38 = vld [vmem:[%s15564_s9 + $0x28] sm:$0xff]  }
 0x7d5   : > { %6502 = vmatmul.mubr.bf16.gmra.mrb[116].mxu1 %v14364_v35  ;;  %v10016_v35 = vld [vmem:[%s15564_s9 + $0x60] sm:$0xff]  }
 0x7d6   : > { %6509 = vmatprep.mubr.bf16.mxu1 %v14407_v12  ;;  %8467 = vmatprep.subr.bf16.mxu0 %v10016_v35  ;;  %v14643_v12 = vld [vmem:[%s15563_s8] ss:$0 sm:$0xff] }
 0x7d7   : > { %8468 = vmatpush3.bf16.msra.mxu0 %v10017_v34 }
 0x7d8   : > { %8469 = vmatprep.subr.bf16.mxu0 %v10018_v58 }
 0x7db   : > { %8470 = vmatpush3.bf16.msra.mxu0 %v10019_v38 }
 0x7dd   : > { %6510 = vmatmul.mubr.bf16.gmra.mrb[120].mxu1 %v14395_v48  ;;  %v10020_v48 = vld [vmem:[%s15564_s9 + $0x70] sm:$0xff]  }
 0x7de   : > { %6517 = vmatprep.mubr.bf16.mxu1 %v14434_v60  ;;  %8471 = vmatprep.subr.bf16.mxu0 %v10020_v48 }
 0x7df   : > { %8472 = vmatpush3.bf16.msra.mxu0 %v10021_v46 }
 0x7e5   : > { %6518 = vmatmul.mubr.bf16.gmra.mrb[124].mxu1 %v14414_v45 }
 0x7e6   : > { %6525 = vmatprep.mubr.bf16.mxu1 %v14439_v24 }
 0x7ed   : > { %6526 = vmatmul.mubr.bf16.gmra.mrb[128].mxu1 %v14418_v14 }
 0x7ee   : > { %6533 = vmatprep.mubr.bf16.mxu1 %v5876_v29 }
 0x7f5   : > { %6534 = vmatmul.mubr.bf16.gmra.mrb[132].mxu1 %v14400_v25  ;;  %v10022_v25 = vld [vmem:[%s15564_s9 + $0x78] sm:$0xff]  }
 0x7f6   : > { %8975 = vmatprep.mubr.msk.bf16.mxu1 %vm16105_vm2, %v15972_v15  ;;  %8473 = vmatprep.subr.bf16.mxu0 %v10022_v25 }
 0x7fd   : > { %8976 = vmatmul.mubr.bf16.vlgmr.msra.gmra.mrb[68].mxu1 %v16608_v3 }
 0x7fe   : > { %8979 = vmatprep.mubr.msk.bf16.mxu1 %vm16105_vm2, %v15972_v15  ;;  %9099 = vmatpush3.bf16.msra.mxu1 %v10009_v51 }
 0x7ff   : > { %9092 = vmatprep.subr.bf16.mxu1 %v10010_v57 }
 0x802   : > { %9100 = vmatpush3.bf16.msra.mxu1 %v10011_v33 }
 0x803   : > { %9093 = vmatprep.subr.bf16.mxu1 %v10012_v9 }
 0x805   : > { %8980 = vmatmul.mubr.bf16.gmra.mrb[72].mxu1 %v16609_v16 }
 0x806   : > { %8983 = vmatprep.mubr.msk.bf16.mxu1 %vm16105_vm2, %v15972_v15  ;;  %9101 = vmatpush3.bf16.msra.mxu1 %v10013_v62 }
 0x807   : > { %9094 = vmatprep.subr.bf16.mxu1 %v10014_v21 }
 0x80a   : > { %9102 = vmatpush3.bf16.msra.mxu1 %v10015_v32 }
 0x80b   : > { %9095 = vmatprep.subr.bf16.mxu1 %v10016_v35 }
 0x80d   : > { %8984 = vmatmul.mubr.bf16.gmra.mrb[76].mxu1 %v16610_v56 }
 0x80e   : > { %8987 = vmatprep.mubr.msk.bf16.mxu1 %vm16105_vm2, %v15972_v15  ;;  %9103 = vmatpush3.bf16.msra.mxu1 %v10017_v34 }
 0x80f   : > { %9096 = vmatprep.subr.bf16.mxu1 %v10018_v58 }
 0x812   : > { %9104 = vmatpush3.bf16.msra.mxu1 %v10019_v38 }
 0x813   : > { %9097 = vmatprep.subr.bf16.mxu1 %v10020_v48 }
 0x815   : > { %8988 = vmatmul.mubr.bf16.gmra.mrb[80].mxu1 %v16611_v39 }
 0x816   : > { %8991 = vmatprep.mubr.msk.bf16.mxu1 %vm16105_vm2, %v15972_v15  ;;  %9105 = vmatpush3.bf16.msra.mxu1 %v10021_v46 }
 0x817   : > { %9098 = vmatprep.subr.bf16.mxu1 %v10022_v25 }
 0x81d   : > { %8992 = vmatmul.mubr.bf16.gmra.mrb[84].mxu1 %v16612_v22 }
 0x81e   : > { %8995 = vmatprep.mubr.msk.bf16.mxu1 %vm16105_vm2, %v15972_v15 }
 0x825   : > { %8996 = vmatmul.mubr.bf16.gmra.mrb[88].mxu1 %v16613_v2 }
 0x826   : > { %8999 = vmatprep.mubr.msk.bf16.mxu1 %vm16105_vm2, %v15972_v15 }
 0x82d   : > { %9000 = vmatmul.mubr.bf16.gmra.mrb[92].mxu1 %v16614_v7 }
 0x82e   : > { %9003 = vmatprep.mubr.msk.bf16.mxu1 %vm16105_vm2, %v15972_v15 }
 0x835   : > { %9004 = vmatmul.mubr.bf16.gmra.mrb[96].mxu1 %v16615_v4 }
 0x836   : > { %9007 = vmatprep.mubr.msk.bf16.mxu1 %vm16105_vm2, %v15972_v15 }
 0x83d   : > { %9008 = vmatmul.mubr.bf16.gmra.mrb[100].mxu1 %v14403_v44  ;;  %v14637_v44 = vld [vmem:[%s15564_s9 + $0x100] sm:$0xff]  }
 0x83e   : > { %9011 = vmatprep.mubr.msk.bf16.mxu1 %vm16105_vm2, %v15972_v15 }
 0x845   : > { %9012 = vmatmul.mubr.bf16.gmra.mrb[104].mxu1 %v14442_v17 }
 0x846   : > { %9015 = vmatprep.mubr.msk.bf16.mxu1 %vm16105_vm2, %v15972_v15 }
 0x84d   : > { %9016 = vmatmul.mubr.bf16.gmra.mrb[108].mxu1 %v14445_v20 }
 0x84e   : > { %9019 = vmatprep.mubr.msk.bf16.mxu1 %vm16105_vm2, %v15972_v15 }
 0x855   : > { %9020 = vmatmul.mubr.bf16.gmra.mrb[112].mxu1 %v14451_v13 }
 0x856   : > { %9023 = vmatprep.mubr.msk.bf16.mxu1 %vm16105_vm2, %v15972_v15 }
 0x85d   : > { %9024 = vmatmul.mubr.bf16.gmra.mrb[116].mxu1 %v14457_v5 }
 0x85e   : > { %9027 = vmatprep.mubr.msk.bf16.mxu1 %vm16105_vm2, %v15972_v15 }
 0x865   : > { %9028 = vmatmul.mubr.bf16.gmra.mrb[120].mxu1 %v14460_v42 }
 0x866   : > { %9031 = vmatprep.mubr.msk.bf16.mxu1 %vm16105_vm2, %v15972_v15 }
 0x86d   : > { %9032 = vmatmul.mubr.bf16.gmra.mrb[124].mxu1 %v14463_v0 }
 0x86e   : > { %9035 = vmatprep.mubr.msk.bf16.mxu1 %vm16105_vm2, %v15972_v15 }
 0x875   : > { %9036 = vmatmul.mubr.bf16.gmra.mrb[128].mxu1 %v14467_v47 }
 0x876   : > { %9039 = vmatprep.mubr.msk.bf16.mxu1 %vm16105_vm2, %v15972_v15  ;;  %v10023_v15 = vld [vmem:[%s15564_s9 + $0x38] sm:$0xff]   ;;  %vm8309_vm2 = vmpackc.low %vm11215_vm3, %vm11162_vm15 }
 0x877   : > { %8474 = vmatpush3.bf16.msra.mxu0 %v10023_v15  ;;  %9106 = vmatpush3.bf16.msra.mxu1 %v10023_v15 }
 0x878   : > { %9043 = vmatprep.subr.bf16.mxu0 %v14637_v44  ;;  %8571 = vmatprep.subr.bf16.mxu1 %v10032_v43 }
 0x87d   : > { %9040 = vmatmul.mubr.bf16.gmra.mrb[132].mxu1 %v14454_v52 }
 0x8d0   : > { %v6575_v36 = vpop.f32.mrb[68].mxu1 }
 0x8d1   : > { %v9208_v45 = vadd.f32 %v14643_v12, %v6575_v36  ;;  %v8977_v14 = vpop.f32.mrb[69].mxu1  ;;  %v10025_v36 = vld [vmem:[%s15564_s9 + $0x108] sm:$0xff]  }
 0x8d2   : > { %v6578_v29 = vpop.f32.mrb[70].mxu1 }
 0x8d3   : > { %10250 = vtanh.f32 %v9208_v45  ;;  %v9209_v54 = vadd.f32 %v14643_v12, %v6578_v29  ;;  %v8978_v19 = vpop.f32.mrb[71].mxu1 }
 0x8d5   : > { %10252 = vtanh.f32 %v9209_v54  ;;  %v16624_v54 = vld [vmem:[#allocation8_spill] sm:$0xff] }
 0x8d8   : > { %v6583_v40 = vpop.f32.mrb[72].mxu1 }
 0x8d9   : > { %v9210_v55 = vadd.f32 %v14643_v12, %v6583_v40  ;;  %v8981_v53 = vpop.f32.mrb[73].mxu1 }
 0x8da   : > { %v6586_v37 = vpop.f32.mrb[74].mxu1 }
 0x8db   : > { %10254 = vtanh.f32 %v9210_v55  ;;  %v9211_v49 = vadd.f32 %v14643_v12, %v6586_v37  ;;  %v8982_v60 = vpop.f32.mrb[75].mxu1 }
 0x8dd   : > { %v14649_v24 = vpop.eup %10250  ;;  %10256 = vtanh.f32 %v9211_v49 }
 0x8de   : > { %v6742_v61 = vsel %vm11162_vm15, %v14649_v24, 0.0  ;;  %vm16626_vm15 = vsmask.f32 6400 }
 0x8df   : > { %v10253_v17 = vpop.eup %10252 }
 0x8e0   : > { %v6743_v31 = vsel %vm11215_vm3, %v10253_v17, 0.0  ;;  %v8310_v13 = vpack.c.bf16 %v10253_v17, %v14649_v24  ;;  %v6591_v11 = vpop.f32.mrb[76].mxu1  ;;  %vm16625_vm3 = vnez %v16624_v54 }
 0x8e1   : > { %v6775_v23 = vpack.c.bf16 %v6743_v31, %v6742_v61  ;;  %v9212_v59 = vadd.f32 %v14643_v12, %v6591_v11  ;;  %v8985_v52 = vpop.f32.mrb[77].mxu1 }
 0x8e2   : > { %v6594_v5 = vpop.f32.mrb[78].mxu1 }
 0x8e3   : > { %10258 = vtanh.f32 %v9212_v59  ;;  %v9213_v42 = vadd.f32 %v14643_v12, %v6594_v5  ;;  %v8986_v63 = vpop.f32.mrb[79].mxu1  ;;  %v6794_v0 = vshrl.u32 %v6775_v23, 16  ;;  %v6796_v47 = vshll.u32 %v6775_v23, 16 }
 0x8e4   : > { %v7092_v2 = vrot.slane %v6775_v23, 2  ;;  %v6958_v21 = vrot.slane %v6775_v23, 1 }
 0x8e5   : > { %v14662_v26 = vpop.eup %10254  ;;  %10260 = vtanh.f32 %v9213_v42  ;;  %v7007_v1 = vrot.slane %v6794_v0, 1  ;;  %v7008_v18 = vrot.slane %v6796_v47, 2  ;;  %v6798_v8 = vrot.slane %v6796_v47, 1  ;;  %v10027_v47 = vld [vmem:[%s15564_s9 + $0x118] sm:$0xff]  }
 0x8e6   : > { %v6744_v41 = vsel %vm11232_vm10, %v14662_v26, 0.0  ;;  %vm8315_vm10 = vmpackc.low %vm16625_vm3, %vm16384_vm8 }
 0x8e7   : > { %v14664_v27 = vpop.eup %10256  ;;  %v7009_v10 = vor.u32 %v7008_v18, %v7007_v1  ;;  %v6799_v9 = vor.u32 %v6798_v8, %v6794_v0  ;;  %v16630_v18 = vld [vmem:[#allocation9_spill] sm:$0xff] }
 0x8e8   : > { %v6745_v30 = vsel %vm11282_vm13, %v14664_v27, 0.0  ;;  %v6599_v3 = vpop.f32.mrb[80].mxu1  ;;  %v8313_v51 = vpack.c.bf16 %v14664_v27, %v14662_v26  ;;  %v10028_v26 = vld [vmem:[%s15564_s9 + $0x120] sm:$0xff]   ;;  %vm16635_vm13 = vmmov %vm16627_vm11 }
 0x8e9   : > { %v6776_v16 = vpack.c.bf16 %v6745_v30, %v6744_v41  ;;  %v9214_v56 = vadd.f32 %v14643_v12, %v6599_v3  ;;  %v8989_v39 = vpop.f32.mrb[81].mxu1  ;;  %v16632_v41 = vld [vmem:[#allocation10_spill] sm:$0xff] }
 0x8ea   : > { %v6602_v22 = vpop.f32.mrb[82].mxu1 }
 0x8eb   : > { %10262 = vtanh.f32 %v9214_v56  ;;  %v9215_v7 = vadd.f32 %v14643_v12, %v6602_v22  ;;  %v8990_v4 = vpop.f32.mrb[83].mxu1  ;;  %v6801_v57 = vshll.u32 %v6776_v16, 16  ;;  %v6805_v33 = vshrl.u32 %v6776_v16, 16 }
 0x8ec   : > { %v7093_v62 = vrot.slane %v6776_v16, 2  ;;  %v6959_v32 = vrot.slane %v6776_v16, 1 }
 0x8ed   : > { %v14676_v35 = vpop.eup %10258  ;;  %10264 = vtanh.f32 %v9215_v7  ;;  %v6803_v34 = vrot.slane %v6801_v57, 1  ;;  %v7010_v58 = vrot.slane %v6805_v33, 1  ;;  %v7011_v38 = vrot.slane %v6801_v57, 2 }
 0x8ee   : > { %v14683_v48 = vsel %vm16620_vm12, %v7092_v2, %v7093_v62  ;;  %v14686_v46 = vsel %vm16621_vm7, %v6958_v21, %v6959_v32  ;;  %v6746_v29 = vsel %vm16384_vm8, %v14676_v35, 0.0  ;;  %vm16631_vm12 = vnez %v16630_v18 }
 0x8ef   : > { %v14688_v25 = vpop.eup %10260  ;;  %v6804_v15 = vsel %vm16622_vm4, %v6799_v9, %v6803_v34  ;;  %v7012_v45 = vor.u32 %v7011_v38, %v7010_v58  ;;  %v6807_v31 = vor.u32 %v6805_v33, %v6803_v34  ;;  %vm16633_vm7 = vnez %v16632_v41 }
 0x8f0   : > { %v6747_v19 = vsel %vm16625_vm3, %v14688_v25, 0.0  ;;  %v6607_v40 = vpop.f32.mrb[84].mxu1  ;;  %7499 = vmatprep.mubr.bf16.mxu0 %v6804_v15  ;;  %v8316_v55 = vpack.c.bf16 %v14688_v25, %v14676_v35  ;;  %v10029_v15 = vld [vmem:[%s15564_s9 + $0x128] sm:$0xff]   ;;  %v10030_v35 = vld [vmem:[%s15564_s9 + $0x130] sm:$0xff]   ;;  %vm8318_vm8 = vmpackc.low %vm16633_vm7, %vm16631_vm12 }
 0x8f1   : > { %v14702_v53 = vpack.c.bf16 %v6747_v19, %v6746_v29  ;;  %v9216_v37 = vadd.f32 %v14643_v12, %v6607_v40  ;;  %v8993_v49 = vpop.f32.mrb[85].mxu1  ;;  %8311 = vmatmul.mubr.msk.bf16.vlgmr.msra.gmra.mrb[136].mxu0 %vm8309_vm2, %v8310_v13  ;;  %v14706_v60 = vsel %vm16626_vm15, %v7009_v10, %v7012_v45  ;;  %vm16629_vm2 = vmmov %vm16622_vm4  ;;  %v16640_v19 = vld [vmem:[#allocation12_spill] sm:$0xff] }
 0x8f2   : > { %v6610_v24 = vpop.f32.mrb[86].mxu1  ;;  %9044 = vmatpush3.bf16.msra.mxu0 %v14637_v44  ;;  %vm16634_vm4 = vmmov %vm16626_vm15 }
 0x8f3   : > { %10266 = vtanh.f32 %v9216_v37  ;;  %v9217_v17 = vadd.f32 %v14643_v12, %v6610_v24  ;;  %v8994_v43 = vpop.f32.mrb[87].mxu1  ;;  %v6809_v20 = vshll.u32 %v14702_v53, 16  ;;  %v6813_v61 = vshrl.u32 %v14702_v53, 16  ;;  %9045 = vmatprep.subr.bf16.mxu0 %v10025_v36  ;;  %vm16636_vm15 = vmmov %vm16628_vm9 }
 0x8f4   : > { %v7095_v13 = vrot.slane %v14702_v53, 2  ;;  %v6961_v11 = vrot.slane %v14702_v53, 1  ;;  %vm16643_vm3 = vmmov %vm16635_vm13 }
 0x8f5   : > { %v14717_v23 = vpop.eup %10262  ;;  %10268 = vtanh.f32 %v9217_v17  ;;  %v6811_v44 = vrot.slane %v6809_v20, 1  ;;  %v7014_v59 = vrot.slane %v6813_v61, 1  ;;  %v7015_v52 = vrot.slane %v6809_v20, 2 }
 0x8f6   : > { %9046 = vmatpush3.bf16.msra.mxu0 %v10025_v36  ;;  %v14724_v5 = vsel %vm16627_vm11, %v7093_v62, %v7095_v13  ;;  %v14727_v42 = vsel %vm16628_vm9, %v6959_v32, %v6961_v11  ;;  %v6748_v10 = vsel %vm16631_vm12, %v14717_v23, 0.0  ;;  %vm16641_vm9 = vnez %v16640_v19 }
 0x8f7   : > { %v14729_v63 = vpop.eup %10264  ;;  %v6812_v0 = vsel %vm16629_vm2, %v6807_v31, %v6811_v44  ;;  %9047 = vmatprep.subr.bf16.mxu0 %v10026_v28  ;;  %v7016_v1 = vor.u32 %v7015_v52, %v7014_v59  ;;  %v6815_v27 = vor.u32 %v6813_v61, %v6811_v44 }
 0x8f8   : > { %v6749_v30 = vsel %vm16633_vm7, %v14729_v63, 0.0  ;;  %v6615_v3 = vpop.f32.mrb[88].mxu1  ;;  %7507 = vmatprep.mubr.bf16.mxu0 %v6812_v0  ;;  %v8319_v8 = vpack.c.bf16 %v14729_v63, %v14717_v23  ;;  %vm16651_vm7 = vmmov %vm16643_vm3 }
 0x8f9   : > { %v14743_v16 = vpack.c.bf16 %v6749_v30, %v6748_v10  ;;  %v9218_v56 = vadd.f32 %v14643_v12, %v6615_v3  ;;  %v8997_v39 = vpop.f32.mrb[89].mxu1  ;;  %8314 = vmatmul.mubr.msk.bf16.gmra.mrb[140].mxu0 %vm8312_vm14, %v8313_v51  ;;  %v14755_v22 = vsel %vm16634_vm4, %v7012_v45, %v7016_v1  ;;  %vm16637_vm14 = vmmov %vm16629_vm2  ;;  %v16638_v45 = vld [vmem:[#allocation11_spill] sm:$0xff]  ;;  %v10031_v10 = vld [vmem:[%s15564_s9 + $0x138] sm:$0xff]  }
 0x8fa   : > { %v6618_v2 = vpop.f32.mrb[90].mxu1  ;;  %9048 = vmatpush3.bf16.msra.mxu0 %v10026_v28  ;;  %vm16639_vm11 = vnez %v16638_v45  ;;  %vm16642_vm2 = vmmov %vm16634_vm4  ;;  %v16646_v3 = vld [vmem:[#allocation13_spill] sm:$0xff]  ;;  %v16656_v45 = vld [vmem:[#allocation16_spill] sm:$0xff] }
 0x8fb   : > { %10270 = vtanh.f32 %v9218_v56  ;;  %v9219_v7 = vadd.f32 %v14643_v12, %v6618_v2  ;;  %v8998_v4 = vpop.f32.mrb[91].mxu1  ;;  %v6817_v57 = vshll.u32 %v14743_v16, 16  ;;  %v6821_v33 = vshrl.u32 %v14743_v16, 16  ;;  %9049 = vmatprep.subr.bf16.mxu0 %v10027_v47  ;;  %vm16644_vm4 = vmmov %vm16636_vm15  ;;  %v16648_v56 = vld [vmem:[#allocation14_spill] sm:$0xff] }
 0x8fc   : > { %v7097_v50 = vrot.slane %v14743_v16, 2  ;;  %v6963_v6 = vrot.slane %v14743_v16, 1  ;;  %vm8321_vm12 = vmpackc.low %vm16641_vm9, %vm16639_vm11 }
 0x8fd   : > { %v14765_v51 = vpop.eup %10266  ;;  %10272 = vtanh.f32 %v9219_v7  ;;  %v6819_v9 = vrot.slane %v6817_v57, 1  ;;  %v7018_v62 = vrot.slane %v6821_v33, 1  ;;  %v7019_v21 = vrot.slane %v6817_v57, 2 }
 0x8fe   : > { %9050 = vmatpush3.bf16.msra.mxu0 %v10027_v47  ;;  %v14772_v32 = vsel %vm16635_vm13, %v7095_v13, %v7097_v50  ;;  %v14775_v34 = vsel %vm16636_vm15, %v6961_v11, %v6963_v6  ;;  %v6750_v29 = vsel %vm16639_vm11, %v14765_v51, 0.0  ;;  %vm16647_vm13 = vnez %v16646_v3  ;;  %v16664_v3 = vld [vmem:[#allocation18_spill] sm:$0xff] }
 0x8ff   : > { %v14777_v58 = vpop.eup %10268  ;;  %v6820_v38 = vsel %vm16637_vm14, %v6815_v27, %v6819_v9  ;;  %9051 = vmatprep.subr.bf16.mxu0 %v10028_v26  ;;  %v7020_v36 = vor.u32 %v7019_v21, %v7018_v62  ;;  %v6823_v25 = vor.u32 %v6821_v33, %v6819_v9  ;;  %vm16649_vm15 = vnez %v16648_v56 }
 0x900   : > { %v6751_v40 = vsel %vm16641_vm9, %v14777_v58, 0.0  ;;  %v6623_v53 = vpop.f32.mrb[92].mxu1  ;;  %7515 = vmatprep.mubr.bf16.mxu0 %v6820_v38  ;;  %v8322_v37 = vpack.c.bf16 %v14777_v58, %v14765_v51  ;;  %vm8324_vm9 = vmpackc.low %vm16649_vm15, %vm16647_vm13 }
 0x901   : > { %v6779_v49 = vpack.c.bf16 %v6751_v40, %v6750_v29  ;;  %v9220_v24 = vadd.f32 %v14643_v12, %v6623_v53  ;;  %v9001_v17 = vpop.f32.mrb[93].mxu1  ;;  %8317 = vmatmul.mubr.msk.bf16.gmra.mrb[144].mxu0 %vm8315_vm10, %v8316_v55  ;;  %v14801_v43 = vsel %vm16642_vm2, %v7016_v1, %v7020_v36  ;;  %vm16645_vm10 = vmmov %vm16637_vm14 }
 0x902   : > { %v6626_v20 = vpop.f32.mrb[94].mxu1  ;;  %9052 = vmatpush3.bf16.msra.mxu0 %v10028_v26  ;;  %vm16650_vm14 = vmmov %vm16642_vm2 }
 0x903   : > { %10274 = vtanh.f32 %v9220_v24  ;;  %v9221_v61 = vadd.f32 %v14643_v12, %v6626_v20  ;;  %v9002_v28 = vpop.f32.mrb[95].mxu1  ;;  %v6825_v31 = vshll.u32 %v6779_v49, 16  ;;  %v6829_v13 = vshrl.u32 %v6779_v49, 16  ;;  %9053 = vmatprep.subr.bf16.mxu0 %v10029_v15  ;;  %vm16652_vm2 = vmmov %vm16644_vm4 }
 0x904   : > { %v7099_v14 = vrot.slane %v6779_v49, 2  ;;  %v6965_v54 = vrot.slane %v6779_v49, 1  ;;  %v16654_v49 = vld [vmem:[#allocation15_spill] sm:$0xff]  ;;  %vm16658_vm11 = vmmov %vm16650_vm14 }
 0x905   : > { %v14807_v55 = vpop.eup %10270  ;;  %10276 = vtanh.f32 %v9221_v61  ;;  %v6827_v11 = vrot.slane %v6825_v31, 1  ;;  %v7022_v44 = vrot.slane %v6829_v13, 1  ;;  %v7023_v59 = vrot.slane %v6825_v31, 2 }
 0x906   : > { %9054 = vmatpush3.bf16.msra.mxu0 %v10029_v15  ;;  %v14814_v52 = vsel %vm16643_vm3, %v7097_v50, %v7099_v14  ;;  %v14817_v0 = vsel %vm16644_vm4, %v6963_v6, %v6965_v54  ;;  %v6752_v16 = vsel %vm16647_vm13, %v14807_v55, 0.0  ;;  %vm16655_vm3 = vnez %v16654_v49  ;;  %vm16666_vm13 = vmmov %vm16658_vm11  ;;  %v16672_v49 = vld [vmem:[#allocation21_spill] sm:$0xff] }
 0x907   : > { %v14819_v47 = vpop.eup %10272  ;;  %v6828_v1 = vsel %vm16645_vm10, %v6823_v25, %v6827_v11  ;;  %9055 = vmatprep.subr.bf16.mxu0 %v10030_v35  ;;  %v7024_v30 = vor.u32 %v7023_v59, %v7022_v44  ;;  %v6831_v21 = vor.u32 %v6829_v13, %v6827_v11  ;;  %vm16657_vm4 = vnez %v16656_v45 }
 0x908   : > { %v6753_v39 = vsel %vm16649_vm15, %v14819_v47, 0.0  ;;  %v6631_v2 = vpop.f32.mrb[96].mxu1  ;;  %7523 = vmatprep.mubr.bf16.mxu0 %v6828_v1  ;;  %v8325_v7 = vpack.c.bf16 %v14819_v47, %v14807_v55  ;;  %vm8327_vm15 = vmpackc.low %vm16657_vm4, %vm16655_vm3 }
 0x909   : > { %v6780_v4 = vpack.c.bf16 %v6753_v39, %v6752_v16  ;;  %v9222_v57 = vadd.f32 %v14643_v12, %v6631_v2  ;;  %v9005_v33 = vpop.f32.mrb[97].mxu1  ;;  %8320 = vmatmul.mubr.msk.bf16.gmra.mrb[148].mxu0 %vm8318_vm8, %v8319_v8  ;;  %v14843_v26 = vsel %vm16650_vm14, %v7020_v36, %v7024_v30  ;;  %vm16653_vm8 = vmmov %vm16645_vm10 }
 0x90a   : > { %v6634_v27 = vpop.f32.mrb[98].mxu1  ;;  %9056 = vmatpush3.bf16.msra.mxu0 %v10030_v35  ;;  %vm16659_vm10 = vmmov %vm16651_vm7 }
 0x90b   : > { %10278 = vtanh.f32 %v9222_v57  ;;  %v9223_v50 = vadd.f32 %v14643_v12, %v6634_v27  ;;  %v9006_v6 = vpop.f32.mrb[99].mxu1  ;;  %v6833_v9 = vshll.u32 %v6780_v4, 16  ;;  %v6837_v62 = vshrl.u32 %v6780_v4, 16  ;;  %9057 = vmatprep.subr.bf16.mxu0 %v10031_v10  ;;  %vm16660_vm14 = vmmov %vm16652_vm2  ;;  %v16662_v57 = vld [vmem:[#allocation17_spill] sm:$0xff] }
 0x90c   : > { %v7101_v23 = vrot.slane %v6780_v4, 2  ;;  %v6967_v63 = vrot.slane %v6780_v4, 1 }
 0x90d   : > { %v14846_v41 = vpop.eup %10274  ;;  %10280 = vtanh.f32 %v9223_v50  ;;  %v6835_v18 = vrot.slane %v6833_v9, 1  ;;  %v7026_v8 = vrot.slane %v6837_v62, 1  ;;  %v7027_v38 = vrot.slane %v6833_v9, 2 }
 0x90e   : > { %9058 = vmatpush3.bf16.msra.mxu0 %v10031_v10  ;;  %v14853_v15 = vsel %vm16651_vm7, %v7099_v14, %v7101_v23  ;;  %v14856_v36 = vsel %vm16652_vm2, %v6965_v54, %v6967_v63  ;;  %v6754_v24 = vsel %vm16655_vm3, %v14846_v41, 0.0  ;;  %vm16663_vm7 = vnez %v16662_v57  ;;  %vm16674_vm3 = vmmov %vm16666_vm13  ;;  %v16680_v57 = vld [vmem:[#allocation24_spill] sm:$0xff] }
 0x90f   : > { %v14858_v29 = vpop.eup %10276  ;;  %v6836_v40 = vsel %vm16653_vm8, %v6831_v21, %v6835_v18  ;;  %v7028_v53 = vor.u32 %v7027_v38, %v7026_v8  ;;  %v6839_v44 = vor.u32 %v6837_v62, %v6835_v18  ;;  %vm16665_vm2 = vnez %v16664_v3 }
 0x910   : > { %v6755_v19 = vsel %vm16657_vm4, %v14858_v29, 0.0  ;;  %v6639_v17 = vpop.f32.mrb[100].mxu1  ;;  %7531 = vmatprep.mubr.bf16.mxu0 %v6836_v40  ;;  %v8328_v20 = vpack.c.bf16 %v14858_v29, %v14846_v41  ;;  %vm8330_vm4 = vmpackc.low %vm16665_vm2, %vm16663_vm7 }
 0x911   : > { %v6781_v61 = vpack.c.bf16 %v6755_v19, %v6754_v24  ;;  %v9224_v28 = vadd.f32 %v14643_v12, %v6639_v17  ;;  %v9009_v31 = vpop.f32.mrb[101].mxu1  ;;  %8323 = vmatmul.mubr.msk.bf16.gmra.mrb[152].mxu0 %vm8321_vm12, %v8322_v37  ;;  %v14874_v13 = vsel %vm16658_vm11, %v7024_v30, %v7028_v53  ;;  %vm16661_vm12 = vmmov %vm16653_vm8 }
 0x912   : > { %v6642_v35 = vpop.f32.mrb[102].mxu1  ;;  %vm16667_vm8 = vmmov %vm16659_vm10 }
 0x913   : > { %10282 = vtanh.f32 %v9224_v28  ;;  %v9225_v25 = vadd.f32 %v14643_v12, %v6642_v35  ;;  %v9010_v14 = vpop.f32.mrb[103].mxu1  ;;  %v6841_v54 = vshll.u32 %v6781_v61, 16  ;;  %v6845_v11 = vshrl.u32 %v6781_v61, 16  ;;  %vm16668_vm11 = vmmov %vm16660_vm14 }
 0x914   : > { %v7103_v59 = vrot.slane %v6781_v61, 2  ;;  %v6969_v1 = vrot.slane %v6781_v61, 1 }
 0x915   : > { %v14877_v10 = vpop.eup %10278  ;;  %10284 = vtanh.f32 %v9225_v25  ;;  %v6843_v16 = vrot.slane %v6841_v54, 1  ;;  %v7030_v39 = vrot.slane %v6845_v11, 1  ;;  %v7031_v51 = vrot.slane %v6841_v54, 2  ;;  %v16670_v25 = vld [vmem:[#allocation20_spill] sm:$0xff] }
 0x916   : > { %v14884_v58 = vsel %vm16659_vm10, %v7101_v23, %v7103_v59  ;;  %v14887_v37 = vsel %vm16660_vm14, %v6967_v63, %v6969_v1  ;;  %v6756_v33 = vsel %vm16663_vm7, %v14877_v10, 0.0  ;;  %vm16671_vm10 = vnez %v16670_v25  ;;  %vm16682_vm7 = vmmov %vm16674_vm3  ;;  %v16688_v25 = vld [vmem:[#allocation27_spill] sm:$0xff] }
 0x917   : > { %v14889_v30 = vpop.eup %10280  ;;  %v6844_v2 = vsel %vm16661_vm12, %v6839_v44, %v6843_v16  ;;  %v7032_v4 = vor.u32 %v7031_v51, %v7030_v39  ;;  %v6847_v40 = vor.u32 %v6845_v11, %v6843_v16  ;;  %vm16673_vm14 = vnez %v16672_v49 }
 0x918   : > { %v6757_v56 = vsel %vm16665_vm2, %v14889_v30, 0.0  ;;  %v6647_v27 = vpop.f32.mrb[104].mxu1  ;;  %7539 = vmatprep.mubr.bf16.mxu0 %v6844_v2  ;;  %v8331_v50 = vpack.c.bf16 %v14889_v30, %v14877_v10  ;;  %vm8333_vm2 = vmpackc.low %vm16673_vm14, %vm16671_vm10 }
 0x919   : > { %v6782_v6 = vpack.c.bf16 %v6757_v56, %v6756_v33  ;;  %v9226_v9 = vadd.f32 %v14643_v12, %v6647_v27  ;;  %v9013_v62 = vpop.f32.mrb[105].mxu1  ;;  %8326 = vmatmul.mubr.msk.bf16.gmra.mrb[156].mxu0 %vm8324_vm9, %v8325_v7  ;;  %v14905_v21 = vsel %vm16666_vm13, %v7028_v53, %v7032_v4  ;;  %vm16669_vm9 = vmmov %vm16661_vm12 }
 0x91a   : > { %v6650_v23 = vpop.f32.mrb[106].mxu1  ;;  %vm16675_vm12 = vmmov %vm16667_vm8 }
 0x91b   : > { %10286 = vtanh.f32 %v9226_v9  ;;  %v9227_v63 = vadd.f32 %v14643_v12, %v6650_v23  ;;  %v9014_v18 = vpop.f32.mrb[107].mxu1  ;;  %v6849_v8 = vshll.u32 %v6782_v6, 16  ;;  %v6853_v38 = vshrl.u32 %v6782_v6, 16  ;;  %vm16676_vm13 = vmmov %vm16668_vm11 }
 0x91c   : > { %v7105_v24 = vrot.slane %v6782_v6, 2  ;;  %v6971_v19 = vrot.slane %v6782_v6, 1 }
 0x91d   : > { %v14908_v17 = vpop.eup %10282  ;;  %10288 = vtanh.f32 %v9227_v63  ;;  %v6851_v61 = vrot.slane %v6849_v8, 1  ;;  %v7034_v28 = vrot.slane %v6853_v38, 1  ;;  %v7035_v55 = vrot.slane %v6849_v8, 2 }
 0x91e   : > { %v14915_v47 = vsel %vm16667_vm8, %v7103_v59, %v7105_v24  ;;  %v14918_v7 = vsel %vm16668_vm11, %v6969_v1, %v6971_v19  ;;  %v6758_v14 = vsel %vm16671_vm10, %v14908_v17, 0.0  ;;  %vm16681_vm11 = vnez %v16680_v57  ;;  %vm16690_vm10 = vmmov %vm16682_vm7 }
 0x91f   : > { %v14920_v53 = vpop.eup %10284  ;;  %v6852_v31 = vsel %vm16669_vm9, %v6847_v40, %v6851_v61  ;;  %v7036_v35 = vor.u32 %v7035_v55, %v7034_v28  ;;  %v6855_v27 = vor.u32 %v6853_v38, %v6851_v61  ;;  %v16678_v38 = vld [vmem:[#allocation23_spill] sm:$0xff] }
 0x920   : > { %v6759_v45 = vsel %vm16673_vm14, %v14920_v53, 0.0  ;;  %v6655_v54 = vpop.f32.mrb[108].mxu1  ;;  %7547 = vmatprep.mubr.bf16.mxu0 %v6852_v31  ;;  %v8334_v11 = vpack.c.bf16 %v14920_v53, %v14908_v17  ;;  %vm16679_vm8 = vnez %v16678_v38  ;;  %v16696_v38 = vld [vmem:[#allocation30_spill] sm:$0xff] }
 0x921   : > { %v6783_v44 = vpack.c.bf16 %v6759_v45, %v6758_v14  ;;  %v9228_v59 = vadd.f32 %v14643_v12, %v6655_v54  ;;  %v9017_v1 = vpop.f32.mrb[109].mxu1  ;;  %8329 = vmatmul.mubr.msk.bf16.gmra.mrb[160].mxu0 %vm8327_vm15, %v8328_v20  ;;  %v14936_v16 = vsel %vm16674_vm3, %v7032_v4, %v7036_v35  ;;  %vm16677_vm15 = vmmov %vm16669_vm9 }
 0x922   : > { %v6658_v39 = vpop.f32.mrb[110].mxu1  ;;  %vm16683_vm9 = vmmov %vm16675_vm12 }
 0x923   : > { %10290 = vtanh.f32 %v9228_v59  ;;  %v9229_v51 = vadd.f32 %v14643_v12, %v6658_v39  ;;  %v9018_v2 = vpop.f32.mrb[111].mxu1  ;;  %v6857_v33 = vshll.u32 %v6783_v44, 16  ;;  %v6861_v56 = vshrl.u32 %v6783_v44, 16  ;;  %vm16684_vm3 = vmmov %vm16676_vm13 }
 0x924   : > { %v7107_v6 = vrot.slane %v6783_v44, 2  ;;  %v6973_v9 = vrot.slane %v6783_v44, 1  ;;  %vm8336_vm14 = vmpackc.low %vm16681_vm11, %vm16679_vm8 }
 0x925   : > { %v14939_v62 = vpop.eup %10286  ;;  %10292 = vtanh.f32 %v9229_v51  ;;  %v6859_v23 = vrot.slane %v6857_v33, 1  ;;  %v7038_v63 = vrot.slane %v6861_v56, 1  ;;  %v7039_v41 = vrot.slane %v6857_v33, 2 }
 0x926   : > { %v14946_v29 = vsel %vm16675_vm12, %v7105_v24, %v7107_v6  ;;  %v14949_v20 = vsel %vm16676_vm13, %v6971_v19, %v6973_v9  ;;  %v6760_v40 = vsel %vm16679_vm8, %v14939_v62, 0.0  ;;  %vm16689_vm13 = vnez %v16688_v25  ;;  %vm16698_vm8 = vmmov %vm16690_vm10 }
 0x927   : > { %v14951_v4 = vpop.eup %10288  ;;  %v6860_v18 = vsel %vm16677_vm15, %v6855_v27, %v6859_v23  ;;  %v7040_v8 = vor.u32 %v7039_v41, %v7038_v63  ;;  %v6863_v1 = vor.u32 %v6861_v56, %v6859_v23  ;;  %v16686_v63 = vld [vmem:[#allocation26_spill] sm:$0xff] }
 0x928   : > { %v6761_v3 = vsel %vm16681_vm11, %v14951_v4, 0.0  ;;  %v6663_v61 = vpop.f32.mrb[112].mxu1  ;;  %7555 = vmatprep.mubr.bf16.mxu0 %v6860_v18  ;;  %v8337_v24 = vpack.c.bf16 %v14951_v4, %v14939_v62  ;;  %vm16687_vm12 = vnez %v16686_v63  ;;  %v16705_v63 = vld [vmem:[#allocation33_spill] sm:$0xff] }
 0x929   : > { %v6784_v19 = vpack.c.bf16 %v6761_v3, %v6760_v40  ;;  %v9230_v28 = vadd.f32 %v14643_v12, %v6663_v61  ;;  %v9021_v55 = vpop.f32.mrb[113].mxu1  ;;  %8332 = vmatmul.mubr.msk.bf16.gmra.mrb[164].mxu0 %vm8330_vm4, %v8331_v50  ;;  %v14967_v31 = vsel %vm16682_vm7, %v7036_v35, %v7040_v8  ;;  %vm16685_vm4 = vmmov %vm16677_vm15 }
 0x92a   : > { %v6666_v14 = vpop.f32.mrb[114].mxu1  ;;  %vm16691_vm15 = vmmov %vm16683_vm9 }
 0x92b   : > { %10294 = vtanh.f32 %v9230_v28  ;;  %v9231_v45 = vadd.f32 %v14643_v12, %v6666_v14  ;;  %v9022_v54 = vpop.f32.mrb[115].mxu1  ;;  %v6865_v44 = vshll.u32 %v6784_v19, 16  ;;  %v6869_v59 = vshrl.u32 %v6784_v19, 16  ;;  %vm16692_vm7 = vmmov %vm16684_vm3 }
 0x92c   : > { %v7109_v39 = vrot.slane %v6784_v19, 2  ;;  %v6975_v51 = vrot.slane %v6784_v19, 1  ;;  %vm8339_vm11 = vmpackc.low %vm16689_vm13, %vm16687_vm12 }
 0x92d   : > { %v14970_v2 = vpop.eup %10290  ;;  %10296 = vtanh.f32 %v9231_v45  ;;  %v6867_v33 = vrot.slane %v6865_v44, 1  ;;  %v7042_v27 = vrot.slane %v6869_v59, 1  ;;  %v7043_v10 = vrot.slane %v6865_v44, 2 }
 0x92e   : > { %v14977_v30 = vsel %vm16683_vm9, %v7107_v6, %v7109_v39  ;;  %v14980_v50 = vsel %vm16684_vm3, %v6973_v9, %v6975_v51  ;;  %v6762_v41 = vsel %vm16687_vm12, %v14970_v2, 0.0  ;;  %vm16697_vm3 = vnez %v16696_v38  ;;  %vm16707_vm12 = vmmov %vm16698_vm8 }
 0x92f   : > { %v14982_v35 = vpop.eup %10292  ;;  %v6868_v56 = vsel %vm16685_vm4, %v6863_v1, %v6867_v33  ;;  %v7044_v23 = vor.u32 %v7043_v10, %v7042_v27  ;;  %v6871_v54 = vor.u32 %v6869_v59, %v6867_v33 }
 0x930   : > { %v6763_v49 = vsel %vm16689_vm13, %v14982_v35, 0.0  ;;  %v6671_v18 = vpop.f32.mrb[116].mxu1  ;;  %7563 = vmatprep.mubr.bf16.mxu0 %v6868_v56  ;;  %v8340_v6 = vpack.c.bf16 %v14982_v35, %v14970_v2 }
 0x931   : > { %v6785_v9 = vpack.c.bf16 %v6763_v49, %v6762_v41  ;;  %v9232_v40 = vadd.f32 %v14643_v12, %v6671_v18  ;;  %v9025_v3 = vpop.f32.mrb[117].mxu1  ;;  %8335 = vmatmul.mubr.msk.bf16.gmra.mrb[168].mxu0 %vm8333_vm2, %v8334_v11  ;;  %v14998_v61 = vsel %vm16690_vm10, %v7040_v8, %v7044_v23  ;;  %vm16693_vm2 = vmmov %vm16685_vm4  ;;  %v16694_v41 = vld [vmem:[#allocation29_spill] sm:$0xff] }
 0x932   : > { %v6674_v19 = vpop.f32.mrb[118].mxu1  ;;  %vm16695_vm9 = vnez %v16694_v41  ;;  %vm16699_vm4 = vmmov %vm16691_vm15  ;;  %v16714_v41 = vld [vmem:[#allocation36_spill] sm:$0xff] }
 0x933   : > { %10298 = vtanh.f32 %v9232_v40  ;;  %v9233_v28 = vadd.f32 %v14643_v12, %v6674_v19  ;;  %v9026_v55 = vpop.f32.mrb[119].mxu1  ;;  %v6873_v14 = vshll.u32 %v6785_v9, 16  ;;  %v6877_v45 = vshrl.u32 %v6785_v9, 16  ;;  %vm16700_vm10 = vmmov %vm16692_vm7 }
 0x934   : > { %v7111_v44 = vrot.slane %v6785_v9, 2  ;;  %v6977_v1 = vrot.slane %v6785_v9, 1  ;;  %vm8342_vm13 = vmpackc.low %vm16697_vm3, %vm16695_vm9 }
 0x935   : > { %v15001_v27 = vpop.eup %10294  ;;  %10300 = vtanh.f32 %v9233_v28  ;;  %v6875_v10 = vrot.slane %v6873_v14, 1  ;;  %v7046_v56 = vrot.slane %v6877_v45, 1  ;;  %v7047_v17 = vrot.slane %v6873_v14, 2 }
 0x936   : > { %v15008_v53 = vsel %vm16691_vm15, %v7109_v39, %v7111_v44  ;;  %v15011_v11 = vsel %vm16692_vm7, %v6975_v51, %v6977_v1  ;;  %v6764_v49 = vsel %vm16695_vm9, %v15001_v27, 0.0  ;;  %vm16706_vm7 = vnez %v16705_v63  ;;  %vm16717_vm9 = vmmov %vm16707_vm12 }
 0x937   : > { %v15013_v8 = vpop.eup %10296  ;;  %v6876_v59 = vsel %vm16693_vm2, %v6871_v54, %v6875_v10  ;;  %v7048_v33 = vor.u32 %v7047_v17, %v7046_v56  ;;  %v6879_v56 = vor.u32 %v6877_v45, %v6875_v10 }
 0x938   : > { %v6765_v57 = vsel %vm16697_vm3, %v15013_v8, 0.0  ;;  %v6679_v18 = vpop.f32.mrb[120].mxu1  ;;  %7571 = vmatprep.mubr.bf16.mxu0 %v6876_v59 }
 0x939   : > { %v6786_v51 = vpack.c.bf16 %v6765_v57, %v6764_v49  ;;  %v9234_v9 = vadd.f32 %v14643_v12, %v6679_v18  ;;  %v9029_v40 = vpop.f32.mrb[121].mxu1  ;;  %8338 = vmatmul.mubr.msk.bf16.gmra.mrb[172].mxu0 %vm8336_vm14, %v8337_v24  ;;  %v15029_v3 = vsel %vm16698_vm8, %v7044_v23, %v7048_v33  ;;  %vm16702_vm14 = vmmov %vm16693_vm2 }
 0x93a   : > { %v6682_v19 = vpop.f32.mrb[122].mxu1  ;;  %vm16708_vm2 = vmmov %vm16699_vm4 }
 0x93b   : > { %10302 = vtanh.f32 %v9234_v9  ;;  %v9235_v28 = vadd.f32 %v14643_v12, %v6682_v19  ;;  %v9030_v55 = vpop.f32.mrb[123].mxu1  ;;  %v6881_v14 = vshll.u32 %v6786_v51, 16  ;;  %v6885_v54 = vshrl.u32 %v6786_v51, 16  ;;  %vm16709_vm8 = vmmov %vm16700_vm10 }
 0x93c   : > { %v7113_v17 = vrot.slane %v6786_v51, 2  ;;  %v6979_v59 = vrot.slane %v6786_v51, 1  ;;  %v16703_v51 = vld [vmem:[#allocation32_spill] sm:$0xff] }
 0x93d   : > { %v15032_v49 = vpop.eup %10298  ;;  %10304 = vtanh.f32 %v9235_v28  ;;  %v6883_v57 = vrot.slane %v6881_v14, 1  ;;  %v7050_v18 = vrot.slane %v6885_v54, 1  ;;  %v7051_v62 = vrot.slane %v6881_v14, 2 }
 0x93e   : > { %v15039_v4 = vsel %vm16699_vm4, %v7111_v44, %v7113_v17  ;;  %v15042_v24 = vsel %vm16700_vm10, %v6977_v1, %v6979_v59  ;;  %vm16704_vm15 = vnez %v16703_v51  ;;  %vm16715_vm10 = vnez %v16714_v41  ;;  %v10047_v41 = vld [vmem:[%s15564_s9 + $0xb8] sm:$0xff]  }
 0x93f   : > { %16701 = vst [vmem:[#allocation43_spill] sm:$0xff] %v15042_v24  ;;  %v15044_v23 = vpop.eup %10300  ;;  %v6884_v45 = vsel %vm16702_vm14, %v6879_v56, %v6883_v57  ;;  %v7052_v10 = vor.u32 %v7051_v62, %v7050_v18  ;;  %v6766_v9 = vsel %vm16704_vm15, %v15032_v49, 0.0  ;;  %v6887_v39 = vor.u32 %v6885_v54, %v6883_v57  ;;  %vm8345_vm3 = vmpackc.low %vm16706_vm7, %vm16704_vm15 }
 0x940   : > { %v6767_v25 = vsel %vm16706_vm7, %v15044_v23, 0.0  ;;  %v6687_v40 = vpop.f32.mrb[124].mxu1  ;;  %7579 = vmatprep.mubr.bf16.mxu0 %v6884_v45 }
 0x941   : > { %v6787_v1 = vpack.c.bf16 %v6767_v25, %v6766_v9  ;;  %v9236_v19 = vadd.f32 %v14643_v12, %v6687_v40  ;;  %v9033_v28 = vpop.f32.mrb[125].mxu1  ;;  %8341 = vmatmul.mubr.msk.bf16.gmra.mrb[176].mxu0 %vm8339_vm11, %v8340_v6  ;;  %v15060_v55 = vsel %vm16707_vm12, %v7048_v33, %v7052_v10  ;;  %vm16711_vm11 = vmmov %vm16702_vm14 }
 0x942   : > { %v6690_v14 = vpop.f32.mrb[126].mxu1  ;;  %vm16719_vm14 = vmmov %vm16708_vm2 }
 0x943   : > { %10306 = vtanh.f32 %v9236_v19  ;;  %v9237_v56 = vadd.f32 %v14643_v12, %v6690_v14  ;;  %v9034_v18 = vpop.f32.mrb[127].mxu1  ;;  %v6889_v62 = vshll.u32 %v6787_v1, 16  ;;  %v6893_v44 = vshrl.u32 %v6787_v1, 16  ;;  %vm16720_vm12 = vmmov %vm16709_vm8 }
 0x944   : > { %v7115_v45 = vrot.slane %v6787_v1, 2  ;;  %v6981_v9 = vrot.slane %v6787_v1, 1  ;;  %v16712_v1 = vld [vmem:[#allocation35_spill] sm:$0xff]  ;;  %vm16728_vm15 = vmmov %vm16719_vm14 }
 0x945   : > { %v15063_v25 = vpop.eup %10302  ;;  %10308 = vtanh.f32 %v9237_v56  ;;  %v6891_v40 = vrot.slane %v6889_v62, 1  ;;  %v7054_v28 = vrot.slane %v6893_v44, 1  ;;  %v7055_v2 = vrot.slane %v6889_v62, 2 }
 0x946   : > { %v15070_v35 = vsel %vm16708_vm2, %v7113_v17, %v7115_v45  ;;  %v15073_v6 = vsel %vm16709_vm8, %v6979_v59, %v6981_v9  ;;  %vm16713_vm4 = vnez %v16712_v1  ;;  %vm16727_vm8 = vmmov %vm16717_vm9 }
 0x947   : > { %16710 = vst [vmem:[#allocation2_spill] sm:$0xff] %v15073_v6  ;;  %v15075_v33 = vpop.eup %10304  ;;  %v6892_v54 = vsel %vm16711_vm11, %v6887_v39, %v6891_v40  ;;  %v7056_v57 = vor.u32 %v7055_v2, %v7054_v28  ;;  %v6768_v19 = vsel %vm16713_vm4, %v15063_v25, 0.0  ;;  %v16716_v39 = vpack.c.bf16 %v15013_v8, %v15001_v27  ;;  %vm8348_vm7 = vmpackc.low %vm16715_vm10, %vm16713_vm4 }
 0x948   : > { %v6769_v38 = vsel %vm16715_vm10, %v15075_v33, 0.0  ;;  %v6695_v14 = vpop.f32.mrb[128].mxu1  ;;  %7587 = vmatprep.mubr.bf16.mxu0 %v6892_v54  ;;  %vm16734_vm4 = vmmov %vm16727_vm8 }
 0x949   : > { %v6788_v59 = vpack.c.bf16 %v6769_v38, %v6768_v19  ;;  %v9238_v56 = vadd.f32 %v14643_v12, %v6695_v14  ;;  %v9037_v18 = vpop.f32.mrb[129].mxu1  ;;  %8344 = vmatmul.mubr.msk.bf16.gmra.mrb[180].mxu0 %vm8342_vm13, %v16716_v39  ;;  %v15091_v62 = vsel %vm16717_vm9, %v7052_v10, %v7056_v57  ;;  %v6895_v19 = vor.u32 %v6893_v44, %v6891_v40  ;;  %vm16722_vm13 = vmmov %vm16711_vm11 }
 0x94a   : > { %16718 = vst [vmem:[#allocation34_spill] sm:$0xff] %v15091_v62  ;;  %v6698_v28 = vpop.f32.mrb[130].mxu1  ;;  %9059 = vmatprep.mubr.bf16.mxu0 %v14683_v48  ;;  %v10033_v48 = vld [vmem:[%s15564_s9 + $0x80] sm:$0xff]   ;;  %vm16729_vm11 = vmmov %vm16720_vm12 }
 0x94b   : > { %10310 = vtanh.f32 %v9238_v56  ;;  %v9239_v2 = vadd.f32 %v14643_v12, %v6698_v28  ;;  %v9038_v54 = vpop.f32.mrb[131].mxu1  ;;  %v6897_v6 = vshll.u32 %v6788_v59, 16  ;;  %v6901_v17 = vshrl.u32 %v6788_v59, 16  ;;  %v16723_v28 = vld [vmem:[#allocation38_spill] sm:$0xff]  ;;  %vm16730_vm9 = vmmov %vm16722_vm13 }
 0x94c   : > { %v7117_v38 = vrot.slane %v6788_v59, 2  ;;  %v6983_v14 = vrot.slane %v6788_v59, 1  ;;  %vm16724_vm2 = vnez %v16723_v28  ;;  %vm16735_vm10 = vmmov %vm16719_vm14 }
 0x94d   : > { %v15095_v18 = vpop.eup %10306  ;;  %10312 = vtanh.f32 %v9239_v2  ;;  %v6899_v27 = vrot.slane %v6897_v6, 1  ;;  %v7058_v8 = vrot.slane %v6901_v17, 1  ;;  %v7059_v39 = vrot.slane %v6897_v6, 2  ;;  %v10034_v6 = vld [vmem:[%s15564_s9 + $0xc8] sm:$0xff]  }
 0x94e   : > { %v15105_v10 = vsel %vm16719_vm14, %v7115_v45, %v7117_v38  ;;  %v15108_v44 = vsel %vm16720_vm12, %v6981_v9, %v6983_v14  ;;  %v6770_v2 = vsel %vm16724_vm2, %v15095_v18, 0.0  ;;  %vm16737_vm14 = vmmov %vm16729_vm11 }
 0x94f   : > { %16721 = vst [vmem:[#allocation44_spill] sm:$0xff] %v15108_v44  ;;  %v15110_v40 = vpop.eup %10308  ;;  %v6900_v59 = vsel %vm16722_vm13, %v6895_v19, %v6899_v27  ;;  %v7060_v56 = vor.u32 %v7059_v39, %v7058_v8  ;;  %v16726_v8 = vpack.c.bf16 %v15044_v23, %v15032_v49  ;;  %v10036_v23 = vld [vmem:[%s15564_s9 + $0xd0] sm:$0xff]   ;;  %v6903_v63 = vor.u32 %v6901_v17, %v6899_v27  ;;  %vm16738_vm12 = vmmov %vm16730_vm9 }
 0x950   : > { %v6771_v45 = vsel %vm16328_vm6, %v15110_v40, 0.0  ;;  %v6703_v62 = vpop.f32.mrb[132].mxu1  ;;  %7595 = vmatprep.mubr.bf16.mxu1 %v6900_v59  ;;  %v8352_v9 = vpack.c.bf16 %v15110_v40, %v15095_v18  ;;  %vm16741_vm13 = vmmov %vm16729_vm11 }
 0x951   : > { %v6789_v44 = vpack.c.bf16 %v6771_v45, %v6770_v2  ;;  %v9240_v19 = vadd.f32 %v14643_v12, %v6703_v62  ;;  %v9041_v24 = vpop.f32.mrb[133].mxu1  ;;  %8347 = vmatmul.mubr.msk.bf16.vlgmr.msra.gmra.mrb[136].mxu1 %vm8345_vm3, %v16726_v8  ;;  %9060 = vmatmul.mubr.bf16.vlgmr.msra.gmra.mrb[184].mxu0 %v14724_v5  ;;  %v15135_v39 = vsel %vm16727_vm8, %v7056_v57, %v7060_v56  ;;  %v10035_v12 = vld [vmem:[%s15564_s9 + $0x88] sm:$0xff]   ;;  %vm8351_vm3 = vmpackc.low %vm16328_vm6, %vm16724_vm2 }
 0x952   : > { %v6706_v59 = vpop.f32.mrb[134].mxu1  ;;  %8572 = vmatpush3.bf16.msra.mxu1 %v10033_v48  ;;  %9063 = vmatprep.mubr.bf16.mxu0 %v14772_v32  ;;  %vm16740_vm6 = vmmov %vm16735_vm10 }
 0x953   : > { %10314 = vtanh.f32 %v9240_v19  ;;  %v9042_v49 = vpop.f32.mrb[135].mxu1  ;;  %8573 = vmatprep.subr.bf16.mxu1 %v10034_v6  ;;  %v6905_v24 = vshll.u32 %v6789_v44, 16  ;;  %v6909_v5 = vshrl.u32 %v6789_v44, 16  ;;  %v7119_v51 = vrot.slane %v6789_v44, 2  ;;  %v10037_v6 = vld [vmem:[%s15564_s9 + $0x90] sm:$0xff]   ;;  %vm16742_vm2 = vmmov %vm16730_vm9 }
 0x954   : > { %v6985_v57 = vrot.slane %v6789_v44, 1  ;;  %v10038_v44 = vld [vmem:[%s15564_s9 + $0xd8] sm:$0xff]   ;;  %v16733_v49 = vpack.c.bf16 %v15075_v33, %v15063_v25  ;;  %vm8354_vm8 = vmpackc.low %vm12429_vm5, %vm16332_vm0 }
 0x955   : > { %v15144_v62 = vpop.eup %10310  ;;  %v6907_v48 = vrot.slane %v6905_v24, 1  ;;  %v15147_v32 = vsel %vm16728_vm15, %v7117_v38, %v7119_v51  ;;  %v7062_v2 = vrot.slane %v6909_v5, 1  ;;  %v7063_v45 = vrot.slane %v6905_v24, 2 }
 0x956   : > { %8574 = vmatpush3.bf16.msra.mxu1 %v10035_v12  ;;  %v15157_v17 = vsel %vm16729_vm11, %v6983_v14, %v6985_v57  ;;  %v6772_v19 = vsel %vm16332_vm0, %v15144_v62, 0.0 }
 0x957   : > { %v15159_v27 = vpop.eup %10312  ;;  %v6908_v38 = vsel %vm16730_vm9, %v6903_v63, %v6907_v48  ;;  %8575 = vmatprep.subr.bf16.mxu1 %v10036_v23  ;;  %v7064_v1 = vor.u32 %v7063_v45, %v7062_v2  ;;  %v10039_v23 = vld [vmem:[%s15564_s9 + $0x98] sm:$0xff]  }
 0x958   : > { %v6773_v59 = vsel %vm12429_vm5, %v15159_v27, 0.0  ;;  %7603 = vmatprep.mubr.bf16.mxu1 %v6908_v38  ;;  %v8355_v14 = vpack.c.bf16 %v15159_v27, %v15144_v62  ;;  %v10040_v62 = vld [vmem:[%s15564_s9 + $0xe0] sm:$0xff]  }
 0x959   : > { %v6790_v12 = vpack.c.bf16 %v6773_v59, %v6772_v19  ;;  %8350 = vmatmul.mubr.msk.bf16.gmra.mrb[140].mxu1 %vm8348_vm7, %v16733_v49  ;;  %9064 = vmatmul.mubr.bf16.gmra.mrb[188].mxu0 %v14814_v52  ;;  %v15178_v24 = vsel %vm16734_vm4, %v7060_v56, %v7064_v1  ;;  %v6911_v52 = vor.u32 %v6909_v5, %v6907_v48  ;;  %v10042_v59 = vld [vmem:[%s15564_s9 + $0xe8] sm:$0xff]  }
 0x95a   : > { %8576 = vmatpush3.bf16.msra.mxu1 %v10037_v6  ;;  %9067 = vmatprep.mubr.bf16.mxu0 %v14853_v15 }
 0x95b   : > { %8577 = vmatprep.subr.bf16.mxu1 %v10038_v44  ;;  %v6913_v63 = vshll.u32 %v6790_v12, 16  ;;  %v6917_v25 = vshrl.u32 %v6790_v12, 16  ;;  %v7121_v33 = vrot.slane %v6790_v12, 2  ;;  %v6987_v2 = vrot.slane %v6790_v12, 1  ;;  %v10041_v44 = vld [vmem:[%s15564_s9 + $0xa0] sm:$0xff]  }
 0x95d   : > { %v10315_v45 = vpop.eup %10314  ;;  %v6915_v56 = vrot.slane %v6913_v63, 1  ;;  %v7122_v6 = vsel %vm16735_vm10, %v7119_v51, %v7121_v33  ;;  %v7066_v27 = vrot.slane %v6917_v25, 1  ;;  %v7067_v15 = vrot.slane %v6913_v63, 2  ;;  %v10043_v63 = vld [vmem:[%s15564_s9 + $0xa8] sm:$0xff]  }
 0x95e   : > { %v6774_v19 = vsel %vm12454_vm1, %v10315_v45, 0.0  ;;  %8578 = vmatpush3.bf16.msra.mxu1 %v10039_v23  ;;  %v15198_v5 = vsel %vm16737_vm14, %v6985_v57, %v6987_v2  ;;  %vm16739_vm1 = vmmov %vm16734_vm4  ;;  %v10045_v45 = vld [vmem:[%s15564_s9 + $0xb0] sm:$0xff]  }
 0x95f   : > { %v6791_v48 = vpack.c.bf16 %v6774_v19, %v6774_v19  ;;  %v6916_v51 = vsel %vm16738_vm12, %v6911_v52, %v6915_v56  ;;  %8579 = vmatprep.subr.bf16.mxu1 %v10040_v62  ;;  %v7068_v12 = vor.u32 %v7067_v15, %v7066_v27  ;;  %v6919_v23 = vor.u32 %v6917_v25, %v6915_v56  ;;  %vm16743_vm15 = vmmov %vm16739_vm1 }
 0x960   : > { %7611 = vmatprep.mubr.bf16.mxu1 %v6916_v51 }
 0x961   : > { %8353 = vmatmul.mubr.msk.bf16.gmra.mrb[144].mxu1 %vm8351_vm3, %v8352_v9  ;;  %9068 = vmatmul.mubr.bf16.gmra.mrb[192].mxu0 %v14884_v58  ;;  %v6921_v28 = vshll.u32 %v6791_v48, 16  ;;  %v7123_v54 = vrot.slane %v6791_v48, 2  ;;  %v15209_v57 = vsel %vm16739_vm1, %v7064_v1, %v7068_v12  ;;  %v7070_v49 = vshrl.u32 %v6791_v48, 16  ;;  %v10044_v58 = vld [vmem:[%s15564_s9 + $0xf0] sm:$0xff]  }
 0x962   : > { %8580 = vmatpush3.bf16.msra.mxu1 %v10041_v44  ;;  %9071 = vmatprep.mubr.bf16.mxu0 %v14915_v47  ;;  %v6989_v62 = vrot.slane %v6791_v48, 1 }
 0x963   : > { %8581 = vmatprep.subr.bf16.mxu1 %v10042_v59  ;;  %v6923_v18 = vrot.slane %v6921_v28, 1  ;;  %v7124_v40 = vsel %vm16740_vm6, %v7121_v33, %v7123_v54  ;;  %v7072_v9 = vrot.slane %v7070_v49, 1  ;;  %v7073_v1 = vrot.slane %v6921_v28, 2  ;;  %v10046_v33 = vld [vmem:[%s15564_s9 + $0xf8] sm:$0xff]  }
 0x964   : > { %v15220_v52 = vsel %vm16741_vm13, %v6987_v2, %v6989_v62 }
 0x965   : > { %v6924_v47 = vsel %vm16742_vm2, %v6919_v23, %v6923_v18  ;;  %v7074_v25 = vor.u32 %v7073_v1, %v7072_v9 }
 0x966   : > { %7619 = vmatprep.mubr.bf16.mxu1 %v6924_v47  ;;  %8582 = vmatpush3.bf16.msra.mxu1 %v10043_v63 }
 0x967   : > { %8583 = vmatprep.subr.bf16.mxu1 %v10044_v58  ;;  %v15234_v2 = vsel %vm16743_vm15, %v7068_v12, %v7074_v25 }
 0x969   : > { %8356 = vmatmul.mubr.msk.bf16.gmra.mrb[148].mxu1 %vm8354_vm8, %v8355_v14  ;;  %9072 = vmatmul.mubr.bf16.gmra.mrb[196].mxu0 %v14946_v29 }
 0x96a   : > { %8584 = vmatpush3.bf16.msra.mxu1 %v10045_v45  ;;  %7660 = vmatprep.mubr.bf16.mxu1 %v14706_v60  ;;  %v16745_v60 = vld [vmem:[#allocation34_spill] sm:$0xff] }
 0x96b   : > { %9075 = vmatprep.mubr.bf16.mxu0 %v14977_v30  ;;  %8585 = vmatprep.subr.bf16.mxu1 %v10046_v33 }
 0x96e   : > { %8586 = vmatpush3.bf16.msra.mxu1 %v10047_v41 }
 0x971   : > { %7661 = vmatmul.mubr.bf16.vlgmr.msra.gmra.mrb[152].mxu1 %v14686_v46  ;;  %9076 = vmatmul.mubr.bf16.gmra.mrb[200].mxu0 %v15008_v53  ;;  %v16744_v46 = vld [vmem:[#allocation43_spill] sm:$0xff] }
 0x972   : > { %7668 = vmatprep.mubr.bf16.mxu1 %v14755_v22  ;;  %9079 = vmatprep.mubr.bf16.mxu0 %v15039_v4 }
 0x979   : > { %7669 = vmatmul.mubr.bf16.gmra.mrb[156].mxu1 %v14727_v42  ;;  %9080 = vmatmul.mubr.bf16.gmra.mrb[204].mxu0 %v15070_v35 }
 0x97a   : > { %7676 = vmatprep.mubr.bf16.mxu1 %v14801_v43  ;;  %9083 = vmatprep.mubr.bf16.mxu0 %v15105_v10 }
 0x981   : > { %7677 = vmatmul.mubr.bf16.gmra.mrb[160].mxu1 %v14775_v34  ;;  %9084 = vmatmul.mubr.bf16.gmra.mrb[208].mxu0 %v15147_v32 }
 0x982   : > { %7684 = vmatprep.mubr.bf16.mxu1 %v14843_v26  ;;  %9087 = vmatprep.mubr.bf16.mxu0 %v7122_v6 }
 0x989   : > { %7685 = vmatmul.mubr.bf16.gmra.mrb[164].mxu1 %v14817_v0  ;;  %9088 = vmatmul.mubr.bf16.gmra.mrb[212].mxu0 %v7124_v40 }
 0x98a   : > { %7692 = vmatprep.mubr.bf16.mxu1 %v14874_v13 }
 0x991   : > { %7693 = vmatmul.mubr.bf16.gmra.mrb[168].mxu1 %v14856_v36  ;;  %v16746_v36 = vld [vmem:[#allocation2_spill] sm:$0xff] }
 0x992   : > { %7700 = vmatprep.mubr.bf16.mxu1 %v14905_v21 }
 0x999   : > { %7701 = vmatmul.mubr.bf16.gmra.mrb[172].mxu1 %v14887_v37 }
 0x99a   : > { %7708 = vmatprep.mubr.bf16.mxu1 %v14936_v16 }
 0x9a1   : > { %7709 = vmatmul.mubr.bf16.gmra.mrb[176].mxu1 %v14918_v7 }
 0x9a2   : > { %7716 = vmatprep.mubr.bf16.mxu1 %v14967_v31 }
 0x9a9   : > { %7717 = vmatmul.mubr.bf16.gmra.mrb[180].mxu1 %v14949_v20  ;;  %v16747_v20 = vld [vmem:[#allocation44_spill] sm:$0xff] }
 0x9aa   : > { %7724 = vmatprep.mubr.bf16.mxu1 %v14998_v61 }
 0x9b1   : > { %7725 = vmatmul.mubr.bf16.gmra.mrb[184].mxu1 %v14980_v50 }
 0x9b2   : > { %7732 = vmatprep.mubr.bf16.mxu1 %v15029_v3 }
 0x9b9   : > { %7733 = vmatmul.mubr.bf16.gmra.mrb[188].mxu1 %v15011_v11 }
 0x9ba   : > { %7740 = vmatprep.mubr.bf16.mxu1 %v15060_v55 }
 0x9c1   : > { %7741 = vmatmul.mubr.bf16.gmra.mrb[192].mxu1 %v16744_v46 }
 0x9c2   : > { %7748 = vmatprep.mubr.bf16.mxu1 %v16745_v60 }
 0x9c4   : > { %v8475_v42 = vpop.f32.mrb[136].mxu0 }
 0x9c5   : > { %v8476_v22 = vpop.f32.mrb[137].mxu0 }
 0x9c6   : > { %v15269_v34 = vadd.f32 %v8476_v22, %v8475_v42  ;;  %v8478_v43 = vpop.f32.mrb[138].mxu0 }
 0x9c7   : > { %v8479_v0 = vpop.f32.mrb[139].mxu0 }
 0x9c8   : > { %v15271_v26 = vadd.f32 %v8479_v0, %v8478_v43 }
 0x9c9   : > { %7749 = vmatmul.mubr.bf16.gmra.mrb[196].mxu1 %v16746_v36 }
 0x9ca   : > { %7756 = vmatprep.mubr.bf16.mxu1 %v15135_v39 }
 0x9cc   : > { %v8481_v13 = vpop.f32.mrb[140].mxu0 }
 0x9cd   : > { %v8482_v37 = vpop.f32.mrb[141].mxu0 }
 0x9ce   : > { %v15275_v21 = vadd.f32 %v8482_v37, %v8481_v13  ;;  %v8484_v7 = vpop.f32.mrb[142].mxu0 }
 0x9cf   : > { %v8485_v16 = vpop.f32.mrb[143].mxu0 }
 0x9d0   : > { %v15277_v29 = vadd.f32 %v8485_v16, %v8484_v7 }
 0x9d1   : > { %7757 = vmatmul.mubr.bf16.gmra.mrb[200].mxu1 %v16747_v20 }
 0x9d2   : > { %7764 = vmatprep.mubr.bf16.mxu1 %v15178_v24 }
 0x9d4   : > { %v8487_v31 = vpop.f32.mrb[144].mxu0 }
 0x9d5   : > { %v8488_v30 = vpop.f32.mrb[145].mxu0 }
 0x9d6   : > { %v15281_v50 = vadd.f32 %v8488_v30, %v8487_v31  ;;  %v8490_v61 = vpop.f32.mrb[146].mxu0 }
 0x9d7   : > { %v8491_v53 = vpop.f32.mrb[147].mxu0 }
 0x9d8   : > { %v15283_v11 = vadd.f32 %v8491_v53, %v8490_v61 }
 0x9d9   : > { %7765 = vmatmul.mubr.bf16.gmra.mrb[204].mxu1 %v15157_v17 }
 0x9da   : > { %7772 = vmatprep.mubr.bf16.mxu1 %v15209_v57 }
 0x9dc   : > { %v8493_v3 = vpop.f32.mrb[148].mxu0 }
 0x9dd   : > { %v8494_v4 = vpop.f32.mrb[149].mxu0 }
 0x9de   : > { %v15287_v55 = vadd.f32 %v8494_v4, %v8493_v3  ;;  %v8496_v35 = vpop.f32.mrb[150].mxu0 }
 0x9df   : > { %v8497_v10 = vpop.f32.mrb[151].mxu0 }
 0x9e0   : > { %v15289_v39 = vadd.f32 %v8497_v10, %v8496_v35 }
 0x9e1   : > { %7773 = vmatmul.mubr.bf16.gmra.mrb[208].mxu1 %v15198_v5 }
 0x9e2   : > { %7780 = vmatprep.mubr.bf16.mxu1 %v15234_v2 }
 0x9e4   : > { %v8499_v32 = vpop.f32.mrb[152].mxu0 }
 0x9e5   : > { %v8500_v8 = vpop.f32.mrb[153].mxu0 }
 0x9e6   : > { %v15293_v14 = vadd.f32 %v8500_v8, %v8499_v32  ;;  %v8502_v24 = vpop.f32.mrb[154].mxu0 }
 0x9e7   : > { %v8503_v17 = vpop.f32.mrb[155].mxu0 }
 0x9e8   : > { %v15295_v56 = vadd.f32 %v8503_v17, %v8502_v24 }
 0x9e9   : > { %7781 = vmatmul.mubr.bf16.gmra.mrb[212].mxu1 %v15220_v52 }
 0x9ec   : > { %v8505_v6 = vpop.f32.mrb[156].mxu0 }
 0x9ed   : > { %v8506_v27 = vpop.f32.mrb[157].mxu0 }
 0x9ee   : > { %v15298_v15 = vadd.f32 %v8506_v27, %v8505_v6  ;;  %v8508_v38 = vpop.f32.mrb[158].mxu0 }
 0x9ef   : > { %v8509_v19 = vpop.f32.mrb[159].mxu0 }
 0x9f0   : > { %v15300_v44 = vadd.f32 %v8509_v19, %v8508_v38 }
 0x9f4   : > { %v8511_v5 = vpop.f32.mrb[160].mxu0 }
 0x9f5   : > { %v8512_v48 = vpop.f32.mrb[161].mxu0 }
 0x9f6   : > { %v15302_v51 = vadd.f32 %v8512_v48, %v8511_v5  ;;  %v8514_v59 = vpop.f32.mrb[162].mxu0 }
 0x9f7   : > { %v8515_v12 = vpop.f32.mrb[163].mxu0 }
 0x9f8   : > { %v15304_v28 = vadd.f32 %v8515_v12, %v8514_v59 }
 0x9fc   : > { %v8517_v54 = vpop.f32.mrb[164].mxu0 }
 0x9fd   : > { %v8518_v57 = vpop.f32.mrb[165].mxu0 }
 0x9fe   : > { %v15306_v49 = vadd.f32 %v8518_v57, %v8517_v54  ;;  %v8520_v23 = vpop.f32.mrb[166].mxu0 }
 0x9ff   : > { %v8521_v63 = vpop.f32.mrb[167].mxu0 }
 0xa00   : > { %v15308_v62 = vadd.f32 %v8521_v63, %v8520_v23 }
 0xa04   : > { %v8523_v18 = vpop.f32.mrb[168].mxu0 }
 0xa05   : > { %v8524_v58 = vpop.f32.mrb[169].mxu0 }
 0xa06   : > { %v15310_v40 = vadd.f32 %v8524_v58, %v8523_v18  ;;  %v8526_v9 = vpop.f32.mrb[170].mxu0 }
 0xa07   : > { %v8527_v1 = vpop.f32.mrb[171].mxu0 }
 0xa08   : > { %v15312_v52 = vadd.f32 %v8527_v1, %v8526_v9 }
 0xa0c   : > { %v8529_v47 = vpop.f32.mrb[172].mxu0 }
 0xa0d   : > { %v8530_v25 = vpop.f32.mrb[173].mxu0 }
 0xa0e   : > { %v15314_v45 = vadd.f32 %v8530_v25, %v8529_v47  ;;  %v8532_v33 = vpop.f32.mrb[174].mxu0 }
 0xa0f   : > { %v8533_v2 = vpop.f32.mrb[175].mxu0 }
 0xa10   : > { %v15316_v41 = vadd.f32 %v8533_v2, %v8532_v33 }
 0xa14   : > { %v8535_v46 = vpop.f32.mrb[176].mxu0 }
 0xa15   : > { %v8536_v60 = vpop.f32.mrb[177].mxu0 }
 0xa16   : > { %v15318_v42 = vadd.f32 %v8536_v60, %v8535_v46  ;;  %v8538_v22 = vpop.f32.mrb[178].mxu0 }
 0xa17   : > { %v8539_v43 = vpop.f32.mrb[179].mxu0 }
 0xa18   : > { %v15320_v0 = vadd.f32 %v8539_v43, %v8538_v22 }
 0xa1c   : > { %v8541_v36 = vpop.f32.mrb[180].mxu0 }
 0xa1d   : > { %v8542_v13 = vpop.f32.mrb[181].mxu0 }
 0xa1e   : > { %v15322_v37 = vadd.f32 %v8542_v13, %v8541_v36  ;;  %v8544_v7 = vpop.f32.mrb[182].mxu0 }
 0xa1f   : > { %v8545_v16 = vpop.f32.mrb[183].mxu0 }
 0xa20   : > { %v15324_v20 = vadd.f32 %v8545_v16, %v8544_v7 }
 0xa24   : > { %v8547_v31 = vpop.f32.mrb[136].mxu1  ;;  %v15326_v30 = vpop.f32.mrb[184].mxu0 }
 0xa25   : > { %v8548_v61 = vpop.f32.mrb[137].mxu1  ;;  %v7823_v53 = vpop.f32.mrb[185].mxu0 }
 0xa26   : > { %v15328_v3 = vadd.f32 %v8548_v61, %v8547_v31  ;;  %v8550_v4 = vpop.f32.mrb[138].mxu1  ;;  %v15330_v35 = vpop.f32.mrb[186].mxu0  ;;  %v15375_v31 = vld [vmem:[%s15565_s10] ss:$0 sm:$0xff] }
 0xa27   : > { %v8551_v10 = vpop.f32.mrb[139].mxu1  ;;  %v7826_v32 = vpop.f32.mrb[187].mxu0 }
 0xa28   : > { %v15332_v8 = vadd.f32 %v8551_v10, %v8550_v4 }
 0xa2c   : > { %v8553_v24 = vpop.f32.mrb[140].mxu1  ;;  %v15334_v17 = vpop.f32.mrb[188].mxu0 }
 0xa2d   : > { %v8554_v6 = vpop.f32.mrb[141].mxu1  ;;  %v15336_v27 = vpop.f32.mrb[189].mxu0 }
 0xa2e   : > { %v15338_v38 = vadd.f32 %v8554_v6, %v8553_v24  ;;  %v8556_v19 = vpop.f32.mrb[142].mxu1  ;;  %v15340_v5 = vpop.f32.mrb[190].mxu0  ;;  %v7502_v6 = vadd.f32 %v15269_v34, %v15375_v31 }
 0xa2f   : > { %v8557_v48 = vpop.f32.mrb[143].mxu1  ;;  %v15342_v59 = vpop.f32.mrb[191].mxu0 }
 0xa30   : > { %v15344_v12 = vadd.f32 %v8557_v48, %v8556_v19 }
 0xa34   : > { %v8559_v54 = vpop.f32.mrb[144].mxu1  ;;  %v15346_v57 = vpop.f32.mrb[192].mxu0 }
 0xa35   : > { %v8560_v23 = vpop.f32.mrb[145].mxu1  ;;  %v15348_v63 = vpop.f32.mrb[193].mxu0 }
 0xa36   : > { %v15350_v18 = vadd.f32 %v8560_v23, %v8559_v54  ;;  %v8562_v58 = vpop.f32.mrb[146].mxu1  ;;  %v15352_v9 = vpop.f32.mrb[194].mxu0 }
 0xa37   : > { %v8563_v1 = vpop.f32.mrb[147].mxu1  ;;  %v15354_v47 = vpop.f32.mrb[195].mxu0 }
 0xa38   : > { %v15356_v25 = vadd.f32 %v8563_v1, %v8562_v58  ;;  %v7505_v1 = vadd.f32 %v15271_v26, %v15375_v31  ;;  %v7510_v26 = vadd.f32 %v15275_v21, %v15375_v31 }
 0xa3a   : > { %16748 = vst [vmem:[#allocation19_spill] sm:$0xff] %v15356_v25  ;;  %v7518_v25 = vadd.f32 %v15281_v50, %v15375_v31 }
 0xa3c   : > { %v8565_v33 = vpop.f32.mrb[148].mxu1  ;;  %v15359_v2 = vpop.f32.mrb[196].mxu0 }
 0xa3d   : > { %v8566_v46 = vpop.f32.mrb[149].mxu1  ;;  %v15361_v60 = vpop.f32.mrb[197].mxu0 }
 0xa3e   : > { %v15363_v22 = vadd.f32 %v8566_v46, %v8565_v33  ;;  %v8568_v43 = vpop.f32.mrb[150].mxu1  ;;  %v15365_v36 = vpop.f32.mrb[198].mxu0 }
 0xa3f   : > { %v8569_v13 = vpop.f32.mrb[151].mxu1  ;;  %v15367_v7 = vpop.f32.mrb[199].mxu0 }
 0xa40   : > { %16749 = vst [vmem:[#allocation22_spill] sm:$0xff] %v15363_v22  ;;  %v15369_v16 = vadd.f32 %v8569_v13, %v8568_v43 }
 0xa42   : > { %16750 = vst [vmem:[#allocation25_spill] sm:$0xff] %v15369_v16 }
 0xa44   : > { %v8587_v61 = vpop.f32.mrb[152].mxu1  ;;  %v15377_v4 = vpop.f32.mrb[200].mxu0 }
 0xa45   : > { %v8588_v10 = vpop.f32.mrb[153].mxu1  ;;  %v15379_v24 = vpop.f32.mrb[201].mxu0 }
 0xa46   : > { %v8589_v19 = vadd.f32 %v8588_v10, %v8587_v61  ;;  %v8590_v48 = vpop.f32.mrb[154].mxu1  ;;  %v15383_v54 = vpop.f32.mrb[202].mxu0 }
 0xa47   : > { %v8591_v23 = vpop.f32.mrb[155].mxu1  ;;  %v15385_v58 = vpop.f32.mrb[203].mxu0 }
 0xa48   : > { %v7663_v33 = vadd.f32 %v8589_v19, %v7502_v6  ;;  %v8592_v46 = vadd.f32 %v8591_v23, %v8590_v48 }
 0xa4a   : > { %v7824_v34 = vadd.f32 %v7823_v53, %v7663_v33  ;;  %v7666_v43 = vadd.f32 %v8592_v46, %v7505_v1 }
 0xa4c   : > { %7950 = vst [vmem:[%s15392_s30] sm:$0xff] %v7824_v34  ;;  %v7827_v13 = vadd.f32 %v7826_v32, %v7666_v43  ;;  %v8593_v61 = vpop.f32.mrb[156].mxu1  ;;  %v15395_v10 = vpop.f32.mrb[204].mxu0  ;;  %v7513_v32 = vadd.f32 %v15277_v29, %v15375_v31 }
 0xa4d   : > { %v8594_v16 = vpop.f32.mrb[157].mxu1  ;;  %v15397_v22 = vpop.f32.mrb[205].mxu0 }
 0xa4e   : > { %7951 = vst [vmem:[%s15392_s30 + $0x8] sm:$0xff] %v7827_v13  ;;  %v8595_v6 = vadd.f32 %v8594_v16, %v8593_v61  ;;  %v8596_v19 = vpop.f32.mrb[158].mxu1  ;;  %v15402_v48 = vpop.f32.mrb[206].mxu0 }
 0xa4f   : > { %v8597_v53 = vpop.f32.mrb[159].mxu1  ;;  %v15404_v23 = vpop.f32.mrb[207].mxu0 }
 0xa50   : > { %v7671_v1 = vadd.f32 %v8595_v6, %v7510_v26  ;;  %v8598_v33 = vadd.f32 %v8597_v53, %v8596_v19 }
 0xa52   : > { %v7832_v46 = vadd.f32 %v15326_v30, %v7671_v1  ;;  %v7674_v34 = vadd.f32 %v8598_v33, %v7513_v32 }
 0xa54   : > { %7952 = vst [vmem:[%s15392_s30 + $0x10] sm:$0xff] %v7832_v46  ;;  %v7835_v21 = vadd.f32 %v15330_v35, %v7674_v34  ;;  %v8599_v43 = vpop.f32.mrb[160].mxu1  ;;  %v15411_v16 = vpop.f32.mrb[208].mxu0  ;;  %v7521_v35 = vadd.f32 %v15283_v11, %v15375_v31 }
 0xa55   : > { %v8600_v13 = vpop.f32.mrb[161].mxu1  ;;  %v15413_v61 = vpop.f32.mrb[209].mxu0 }
 0xa56   : > { %7953 = vst [vmem:[%s15392_s30 + $0x18] sm:$0xff] %v7835_v21  ;;  %v8601_v29 = vadd.f32 %v8600_v13, %v8599_v43  ;;  %v8602_v26 = vpop.f32.mrb[162].mxu1  ;;  %v15418_v6 = vpop.f32.mrb[210].mxu0  ;;  %v7526_v13 = vadd.f32 %v15287_v55, %v15375_v31 }
 0xa57   : > { %v8603_v30 = vpop.f32.mrb[163].mxu1  ;;  %v15420_v19 = vpop.f32.mrb[211].mxu0 }
 0xa58   : > { %v7679_v53 = vadd.f32 %v8601_v29, %v7518_v25  ;;  %v8604_v32 = vadd.f32 %v8603_v30, %v8602_v26 }
 0xa5a   : > { %v7840_v1 = vadd.f32 %v15336_v27, %v7679_v53  ;;  %v7682_v33 = vadd.f32 %v8604_v32, %v7521_v35 }
 0xa5c   : > { %7954 = vst [vmem:[%s15392_s30 + $0x20] sm:$0xff] %v7840_v1  ;;  %v7843_v50 = vadd.f32 %v15342_v59, %v7682_v33  ;;  %v8605_v46 = vpop.f32.mrb[164].mxu1  ;;  %v15427_v34 = vpop.f32.mrb[212].mxu0  ;;  %v7529_v59 = vadd.f32 %v15289_v39, %v15375_v31  ;;  %v7537_v39 = vadd.f32 %v15295_v56, %v15375_v31  ;;  %v7545_v56 = vadd.f32 %v15300_v44, %v15375_v31 }
 0xa5d   : > { %v8606_v21 = vpop.f32.mrb[165].mxu1  ;;  %v15429_v43 = vpop.f32.mrb[213].mxu0  ;;  %v7553_v44 = vadd.f32 %v15304_v28, %v15375_v31  ;;  %v7561_v28 = vadd.f32 %v15308_v62, %v15375_v31  ;;  %v7569_v62 = vadd.f32 %v15312_v52, %v15375_v31  ;;  %v7577_v52 = vadd.f32 %v15316_v41, %v15375_v31 }
 0xa5e   : > { %7955 = vst [vmem:[%s15392_s30 + $0x28] sm:$0xff] %v7843_v50  ;;  %v8607_v11 = vadd.f32 %v8606_v21, %v8605_v46  ;;  %v8608_v25 = vpop.f32.mrb[166].mxu1  ;;  %v15434_v29 = vpop.f32.mrb[214].mxu0  ;;  %v7534_v50 = vadd.f32 %v15293_v14, %v15375_v31  ;;  %v7542_v14 = vadd.f32 %v15298_v15, %v15375_v31  ;;  %v7550_v15 = vadd.f32 %v15302_v51, %v15375_v31 }
 0xa5f   : > { %16751 = vst [vmem:[#allocation28_spill] sm:$0xff] %v15434_v29  ;;  %v8609_v27 = vpop.f32.mrb[167].mxu1  ;;  %v15436_v26 = vpop.f32.mrb[215].mxu0  ;;  %v7558_v51 = vadd.f32 %v15306_v49, %v15375_v31  ;;  %v7566_v49 = vadd.f32 %v15310_v40, %v15375_v31  ;;  %v7574_v40 = vadd.f32 %v15314_v45, %v15375_v31  ;;  %v7582_v45 = vadd.f32 %v15318_v42, %v15375_v31 }
 0xa60   : > { %v7687_v30 = vadd.f32 %v8607_v11, %v7526_v13  ;;  %v8610_v35 = vadd.f32 %v8609_v27, %v8608_v25  ;;  %v7585_v41 = vadd.f32 %v15320_v0, %v15375_v31  ;;  %v7590_v42 = vadd.f32 %v15322_v37, %v15375_v31 }
 0xa61   : > { %v7593_v0 = vadd.f32 %v15324_v20, %v15375_v31  ;;  %v7598_v37 = vadd.f32 %v15328_v3, %v15375_v31  ;;  %v7601_v20 = vadd.f32 %v15332_v8, %v15375_v31  ;;  %v7606_v3 = vadd.f32 %v15338_v38, %v15375_v31 }
 0xa62   : > { %v7848_v53 = vadd.f32 %v15334_v17, %v7687_v30  ;;  %v7690_v32 = vadd.f32 %v8610_v35, %v7529_v59  ;;  %v7609_v8 = vadd.f32 %v15344_v12, %v15375_v31  ;;  %v7614_v38 = vadd.f32 %v15350_v18, %v15375_v31  ;;  %v16752_v12 = vld [vmem:[#allocation19_spill] sm:$0xff]  ;;  %v16753_v18 = vld [vmem:[#allocation22_spill] sm:$0xff] }
 0xa64   : > { %7956 = vst [vmem:[%s15392_s30 + $0x30] sm:$0xff] %v7848_v53  ;;  %v7851_v55 = vadd.f32 %v15340_v5, %v7690_v32  ;;  %v8611_v1 = vpop.f32.mrb[168].mxu1 }
 0xa65   : > { %v8612_v33 = vpop.f32.mrb[169].mxu1 }
 0xa66   : > { %7957 = vst [vmem:[%s15392_s30 + $0x38] sm:$0xff] %v7851_v55  ;;  %v8613_v46 = vadd.f32 %v8612_v33, %v8611_v1  ;;  %v8614_v21 = vpop.f32.mrb[170].mxu1 }
 0xa67   : > { %v8615_v29 = vpop.f32.mrb[171].mxu1 }
 0xa68   : > { %v7695_v13 = vadd.f32 %v8613_v46, %v7534_v50  ;;  %v8616_v17 = vadd.f32 %v8615_v29, %v8614_v21 }
 0xa6a   : > { %v7856_v11 = vadd.f32 %v15348_v63, %v7695_v13  ;;  %v7698_v25 = vadd.f32 %v8616_v17, %v7537_v39 }
 0xa6c   : > { %7958 = vst [vmem:[%s15392_s30 + $0x40] sm:$0xff] %v7856_v11  ;;  %v7859_v5 = vadd.f32 %v15354_v47, %v7698_v25  ;;  %v8617_v27 = vpop.f32.mrb[172].mxu1 }
 0xa6d   : > { %v8618_v59 = vpop.f32.mrb[173].mxu1 }
 0xa6e   : > { %7959 = vst [vmem:[%s15392_s30 + $0x48] sm:$0xff] %v7859_v5  ;;  %v8619_v30 = vadd.f32 %v8618_v59, %v8617_v27  ;;  %v8620_v35 = vpop.f32.mrb[174].mxu1 }
 0xa6f   : > { %v8621_v53 = vpop.f32.mrb[175].mxu1 }
 0xa70   : > { %v7703_v29 = vadd.f32 %v8619_v30, %v7542_v14  ;;  %v8622_v63 = vadd.f32 %v8621_v53, %v8620_v35 }
 0xa72   : > { %v7864_v32 = vadd.f32 %v15346_v57, %v7703_v29  ;;  %v7706_v55 = vadd.f32 %v8622_v63, %v7545_v56 }
 0xa74   : > { %7960 = vst [vmem:[%s15392_s30 + $0x50] sm:$0xff] %v7864_v32  ;;  %v7867_v47 = vadd.f32 %v15352_v9, %v7706_v55  ;;  %v8623_v1 = vpop.f32.mrb[176].mxu1 }
 0xa75   : > { %v8624_v33 = vpop.f32.mrb[177].mxu1 }
 0xa76   : > { %7961 = vst [vmem:[%s15392_s30 + $0x58] sm:$0xff] %v7867_v47  ;;  %v8625_v50 = vadd.f32 %v8624_v33, %v8623_v1  ;;  %v8626_v46 = vpop.f32.mrb[178].mxu1 }
 0xa77   : > { %v8627_v21 = vpop.f32.mrb[179].mxu1 }
 0xa78   : > { %v7711_v39 = vadd.f32 %v8625_v50, %v7550_v15  ;;  %v8628_v57 = vadd.f32 %v8627_v21, %v8626_v46 }
 0xa7a   : > { %v7872_v13 = vadd.f32 %v15361_v60, %v7711_v39  ;;  %v7714_v17 = vadd.f32 %v8628_v57, %v7553_v44 }
 0xa7c   : > { %7962 = vst [vmem:[%s15392_s30 + $0x60] sm:$0xff] %v7872_v13  ;;  %v7875_v9 = vadd.f32 %v15367_v7, %v7714_v17  ;;  %v8629_v11 = vpop.f32.mrb[180].mxu1 }
 0xa7d   : > { %v8630_v25 = vpop.f32.mrb[181].mxu1 }
 0xa7e   : > { %7963 = vst [vmem:[%s15392_s30 + $0x68] sm:$0xff] %v7875_v9  ;;  %v8631_v5 = vadd.f32 %v8630_v25, %v8629_v11  ;;  %v8632_v27 = vpop.f32.mrb[182].mxu1 }
 0xa7f   : > { %v8633_v59 = vpop.f32.mrb[183].mxu1 }
 0xa80   : > { %v7719_v14 = vadd.f32 %v8631_v5, %v7558_v51  ;;  %v8634_v60 = vadd.f32 %v8633_v59, %v8632_v27 }
 0xa82   : > { %v7880_v30 = vadd.f32 %v15359_v2, %v7719_v14  ;;  %v7722_v35 = vadd.f32 %v8634_v60, %v7561_v28 }
 0xa84   : > { %7964 = vst [vmem:[%s15392_s30 + $0x70] sm:$0xff] %v7880_v30  ;;  %v7883_v7 = vadd.f32 %v15365_v36, %v7722_v35  ;;  %v8635_v53 = vpop.f32.mrb[184].mxu1 }
 0xa85   : > { %v8636_v56 = vpop.f32.mrb[185].mxu1 }
 0xa86   : > { %7965 = vst [vmem:[%s15392_s30 + $0x78] sm:$0xff] %v7883_v7  ;;  %v8637_v29 = vadd.f32 %v8636_v56, %v8635_v53  ;;  %v8638_v63 = vpop.f32.mrb[186].mxu1 }
 0xa87   : > { %v8639_v32 = vpop.f32.mrb[187].mxu1 }
 0xa88   : > { %v7727_v55 = vadd.f32 %v8637_v29, %v7566_v49  ;;  %v8640_v2 = vadd.f32 %v8639_v32, %v8638_v63 }
 0xa8a   : > { %v7888_v47 = vadd.f32 %v15379_v24, %v7727_v55  ;;  %v7730_v1 = vadd.f32 %v8640_v2, %v7569_v62 }
 0xa8c   : > { %7966 = vst [vmem:[%s15392_s30 + $0x80] sm:$0xff] %v7888_v47  ;;  %v7891_v36 = vadd.f32 %v15385_v58, %v7730_v1  ;;  %v8641_v33 = vpop.f32.mrb[188].mxu1 }
 0xa8d   : > { %v8642_v15 = vpop.f32.mrb[189].mxu1 }
 0xa8e   : > { %7967 = vst [vmem:[%s15392_s30 + $0x88] sm:$0xff] %v7891_v36  ;;  %v8643_v50 = vadd.f32 %v8642_v15, %v8641_v33  ;;  %v8644_v46 = vpop.f32.mrb[190].mxu1 }
 0xa8f   : > { %v8645_v21 = vpop.f32.mrb[191].mxu1 }
 0xa90   : > { %v7735_v44 = vadd.f32 %v8643_v50, %v7574_v40  ;;  %v8646_v24 = vadd.f32 %v8645_v21, %v8644_v46 }
 0xa92   : > { %v7896_v39 = vadd.f32 %v15377_v4, %v7735_v44  ;;  %v7738_v57 = vadd.f32 %v8646_v24, %v7577_v52 }
 0xa94   : > { %7968 = vst [vmem:[%s15392_s30 + $0x90] sm:$0xff] %v7896_v39  ;;  %v7899_v58 = vadd.f32 %v15383_v54, %v7738_v57  ;;  %v8647_v13 = vpop.f32.mrb[192].mxu1  ;;  %v7617_v57 = vadd.f32 %v16752_v12, %v15375_v31 }
 0xa95   : > { %v8648_v17 = vpop.f32.mrb[193].mxu1 }
 0xa96   : > { %7969 = vst [vmem:[%s15392_s30 + $0x98] sm:$0xff] %v7899_v58  ;;  %v8649_v9 = vadd.f32 %v8648_v17, %v8647_v13  ;;  %v8650_v11 = vpop.f32.mrb[194].mxu1 }
 0xa97   : > { %v8651_v25 = vpop.f32.mrb[195].mxu1 }
 0xa98   : > { %v7743_v51 = vadd.f32 %v8649_v9, %v7582_v45  ;;  %v8652_v4 = vadd.f32 %v8651_v25, %v8650_v11  ;;  %v7622_v11 = vadd.f32 %v16753_v18, %v15375_v31 }
 0xa9a   : > { %v7904_v5 = vadd.f32 %v15397_v22, %v7743_v51  ;;  %v7746_v27 = vadd.f32 %v8652_v4, %v7585_v41  ;;  %v16754_v4 = vld [vmem:[#allocation25_spill] sm:$0xff] }
 0xa9c   : > { %7970 = vst [vmem:[%s15392_s30 + $0xa0] sm:$0xff] %v7904_v5  ;;  %v7907_v54 = vadd.f32 %v15404_v23, %v7746_v27  ;;  %v8653_v59 = vpop.f32.mrb[196].mxu1  ;;  %v7625_v5 = vadd.f32 %v16754_v4, %v15375_v31 }
 0xa9d   : > { %v8654_v28 = vpop.f32.mrb[197].mxu1 }
 0xa9e   : > { %7971 = vst [vmem:[%s15392_s30 + $0xa8] sm:$0xff] %v7907_v54  ;;  %v8655_v14 = vadd.f32 %v8654_v28, %v8653_v59  ;;  %v8656_v60 = vpop.f32.mrb[198].mxu1  ;;  %v16755_v28 = vld [vmem:[#allocation28_spill] sm:$0xff] }
 0xa9f   : > { %v8657_v30 = vpop.f32.mrb[199].mxu1 }
 0xaa0   : > { %v7751_v35 = vadd.f32 %v8655_v14, %v7590_v42  ;;  %v8658_v22 = vadd.f32 %v8657_v30, %v8656_v60 }
 0xaa2   : > { %v7912_v7 = vadd.f32 %v15395_v10, %v7751_v35  ;;  %v7754_v53 = vadd.f32 %v8658_v22, %v7593_v0 }
 0xaa4   : > { %7972 = vst [vmem:[%s15392_s30 + $0xb0] sm:$0xff] %v7912_v7  ;;  %v7915_v23 = vadd.f32 %v15402_v48, %v7754_v53  ;;  %v8659_v56 = vpop.f32.mrb[200].mxu1 }
 0xaa5   : > { %v8660_v49 = vpop.f32.mrb[201].mxu1 }
 0xaa6   : > { %7973 = vst [vmem:[%s15392_s30 + $0xb8] sm:$0xff] %v7915_v23  ;;  %v8661_v29 = vadd.f32 %v8660_v49, %v8659_v56  ;;  %v8662_v63 = vpop.f32.mrb[202].mxu1 }
 0xaa7   : > { %v8663_v32 = vpop.f32.mrb[203].mxu1 }
 0xaa8   : > { %v7759_v62 = vadd.f32 %v8661_v29, %v7598_v37  ;;  %v8664_v10 = vadd.f32 %v8663_v32, %v8662_v63 }
 0xaaa   : > { %v7920_v55 = vadd.f32 %v15413_v61, %v7759_v62  ;;  %v7762_v2 = vadd.f32 %v8664_v10, %v7601_v20 }
 0xaac   : > { %7974 = vst [vmem:[%s15392_s30 + $0xc0] sm:$0xff] %v7920_v55  ;;  %v7923_v48 = vadd.f32 %v15420_v19, %v7762_v2  ;;  %v8665_v47 = vpop.f32.mrb[204].mxu1 }
 0xaad   : > { %v8666_v1 = vpop.f32.mrb[205].mxu1 }
 0xaae   : > { %7975 = vst [vmem:[%s15392_s30 + $0xc8] sm:$0xff] %v7923_v48  ;;  %v8667_v36 = vadd.f32 %v8666_v1, %v8665_v47  ;;  %v8668_v33 = vpop.f32.mrb[206].mxu1 }
 0xaaf   : > { %v8669_v15 = vpop.f32.mrb[207].mxu1 }
 0xab0   : > { %v7767_v40 = vadd.f32 %v8667_v36, %v7606_v3  ;;  %v8670_v61 = vadd.f32 %v8669_v15, %v8668_v33 }
 0xab2   : > { %v7928_v50 = vadd.f32 %v15411_v16, %v7767_v40  ;;  %v7770_v46 = vadd.f32 %v8670_v61, %v7609_v8 }
 0xab4   : > { %7976 = vst [vmem:[%s15392_s30 + $0xd0] sm:$0xff] %v7928_v50  ;;  %v7931_v19 = vadd.f32 %v15418_v6, %v7770_v46  ;;  %v8671_v21 = vpop.f32.mrb[208].mxu1 }
 0xab5   : > { %v8672_v52 = vpop.f32.mrb[209].mxu1 }
 0xab6   : > { %7977 = vst [vmem:[%s15392_s30 + $0xd8] sm:$0xff] %v7931_v19  ;;  %v8673_v44 = vadd.f32 %v8672_v52, %v8671_v21  ;;  %v8674_v24 = vpop.f32.mrb[210].mxu1 }
 0xab7   : > { %v8675_v39 = vpop.f32.mrb[211].mxu1 }
 0xab8   : > { %v7775_v58 = vadd.f32 %v8673_v44, %v7614_v38  ;;  %v8676_v16 = vadd.f32 %v8675_v39, %v8674_v24 }
 0xaba   : > { %v7936_v13 = vadd.f32 %v15429_v43, %v7775_v58  ;;  %v7778_v17 = vadd.f32 %v8676_v16, %v7617_v57 }
 0xabc   : > { %7978 = vst [vmem:[%s15392_s30 + $0xe0] sm:$0xff] %v7936_v13  ;;  %v7939_v6 = vadd.f32 %v15436_v26, %v7778_v17  ;;  %v8677_v45 = vpop.f32.mrb[212].mxu1 }
 0xabd   : > { %v8678_v9 = vpop.f32.mrb[213].mxu1 }
 0xabe   : > { %7979 = vst [vmem:[%s15392_s30 + $0xe8] sm:$0xff] %v7939_v6  ;;  %v8679_v25 = vadd.f32 %v8678_v9, %v8677_v45  ;;  %v8680_v41 = vpop.f32.mrb[214].mxu1 }
 0xabf   : > { %v8681_v51 = vpop.f32.mrb[215].mxu1 }
 0xac0   : > { %v7783_v27 = vadd.f32 %v8679_v25, %v7622_v11  ;;  %v8682_v43 = vadd.f32 %v8681_v51, %v8680_v41 }
 0xac2   : > { %v7944_v54 = vadd.f32 %v15427_v34, %v7783_v27  ;;  %v7786_v59 = vadd.f32 %v8682_v43, %v7625_v5 }
 0xac4   : > { %7980 = vst [vmem:[%s15392_s30 + $0xf0] sm:$0xff] %v7944_v54  ;;  %v7947_v26 = vadd.f32 %v16755_v28, %v7786_v59 }
 0xac6   : > { %7981 = vst [vmem:[%s15392_s30 + $0xf8] sm:$0xff] %v7947_v26 }
 0xac7 PF: > { %s21_s21 = sadd.s32 1, %s10367_s21   ;;  %s16756_s17 = smov %s10359_s19 }
 0xac8   : > { %p18_p8 = scmp.ge.s32.totalorder %s21_s21, 6   ;;  %s16757_s18 = smov %s10363_s20 }
 0xac9   : > { %s16758_s19 = smov %s16761_s22  ;;  %s16759_s20 = smov %s16765_s23 }
 0xaca   :  { %20 = sbr.rel (!%p18_p8) target bundleno = 3 (0x3), region = 94 }

</bundles_post_ra>
